<compile_context>
chip_gen: v5e
topology: v5e:2x2
jax: 0.10.0
libtpu: 0.0.40
codegen_flags: <defaults>
</compile_context>

<pallas_src>
import math
import functools

import jax
import jax.numpy as jnp
from jax.experimental import pallas as pl
from jax.experimental.pallas import tpu as pltpu


_SQRT1_2 = 1.0 / math.sqrt(2.0)


# ----------------------------- in-kernel helpers ------------------------------

def _mm(a, b):
    """MXU matmul: bf16 operands, f32 accumulation."""
    return jnp.dot(a.astype(jnp.bfloat16), b.astype(jnp.bfloat16),
                   preferred_element_type=jnp.float32)


def _layernorm(x, g, b, eps):
    mu = jnp.mean(x, axis=-1, keepdims=True)
    var = jnp.mean(jnp.square(x - mu), axis=-1, keepdims=True)   # biased, like torch
    return (x - mu) * jax.lax.rsqrt(var + eps) * g + b


def _gelu_exact(x):
    # nn.GELU default: 0.5*x*(1+erf(x/sqrt(2)))
    return 0.5 * x * (1.0 + jax.lax.erf(x * _SQRT1_2))


def _attention_block(x, cos, sin, swap, w, l, num_heads, eps):
    """One pre-LN transformer block, fully in VMEM. `w` is a tuple of stacked
    per-layer weight Refs, indexed by static layer index `l`."""
    (ln1g, ln1b, wqkv, bqkv, wproj, bproj,
     ln2g, ln2b, wfc1, bfc1, wfc2, bfc2) = w
    N, C = x.shape
    hd = C // num_heads
    scale = 1.0 / math.sqrt(hd)

    # ---- attention branch ----
    h = _layernorm(x, ln1g[l], ln1b[l], eps)
    qkv = _mm(h, wqkv[l]) + bqkv[l]                      # (N, 3C) f32
    q = qkv[:, :C]
    k = qkv[:, C:2 * C]
    v = qkv[:, 2 * C:]

    # axial rotary: out = t*cos + rotate_half(t)*sin ; rotate_half as +/-1 matmul (MXU).
    q = q * cos + _mm(q, swap) * sin
    k = k * cos + _mm(k, swap) * sin

    heads = []
    for hh in range(num_heads):
        sl = slice(hh * hd, (hh + 1) * hd)
        qh = q[:, sl].astype(jnp.bfloat16)
        kh = k[:, sl].astype(jnp.bfloat16)
        vh = v[:, sl].astype(jnp.bfloat16)
        s = jax.lax.dot_general(qh, kh, (((1,), (1,)), ((), ())),
                                preferred_element_type=jnp.float32) * scale
        m = jnp.max(s, axis=-1, keepdims=True)
        p = jnp.exp(s - m)
        p = p * pl.reciprocal(jnp.sum(p, axis=-1, keepdims=True), approx=True)
        heads.append(jnp.dot(p.astype(jnp.bfloat16), vh,
                             preferred_element_type=jnp.float32))
    attn = jnp.concatenate(heads, axis=-1)               # (N, C)
    x = x + _mm(attn, wproj[l]) + bproj[l]

    # ---- MLP branch ----
    h = _layernorm(x, ln2g[l], ln2b[l], eps)
    h = _gelu_exact(_mm(h, wfc1[l]) + bfc1[l])
    x = x + _mm(h, wfc2[l]) + bfc2[l]
    return x


# ----------------------------- the fused kernel ------------------------------

def _autoencoder_kernel(*refs, enc_depth, dec_depth, enc_heads, dec_heads,
                        lat, eps):
    rec_ref, mean_ref, logvar_ref, z_ref = refs[-4:]
    it = iter(refs[:-4])

    tokens_ref = next(it)
    noise_ref = next(it)
    e_cos = next(it)[...]
    e_sin = next(it)[...]
    e_swap = next(it)[...]
    d_cos = next(it)[...]
    d_sin = next(it)[...]
    d_swap = next(it)[...]
    pe_w = next(it)
    pe_b = next(it)
    enc_w = tuple(next(it) for _ in range(12))
    en_g = next(it)
    en_b = next(it)
    q_w = next(it)
    q_b = next(it)
    pq_w = next(it)
    pq_b = next(it)
    dec_w = tuple(next(it) for _ in range(12))
    dn_g = next(it)
    dn_b = next(it)
    pr_w = next(it)
    pr_b = next(it)

    # ---------------- encode ----------------
    x = _mm(tokens_ref[0], pe_w[...]) + pe_b[...]        # patch embed, (N, enc_dim)
    for l in range(enc_depth):
        x = _attention_block(x, e_cos, e_sin, e_swap, enc_w, l, enc_heads, eps)

    # -------------- bottleneck ---------------
    h = _layernorm(x, en_g[...], en_b[...], eps)
    moments = _mm(h, q_w[...]) + q_b[...]                # (N, 2*lat)
    mean = moments[:, :lat]
    logvar = jnp.clip(moments[:, lat:], -30.0, 20.0)
    std = jnp.exp(0.5 * logvar)
    z = mean + std * noise_ref[0].astype(jnp.float32)    # reparameterization
    d = _mm(z, pq_w[...]) + pq_b[...]                    # (N, dec_dim)

    # ---------------- decode ----------------
    for l in range(dec_depth):
        d = _attention_block(d, d_cos, d_sin, d_swap, dec_w, l, dec_heads, eps)
    h = _layernorm(d, dn_g[...], dn_b[...], eps)
    out = _mm(h, pr_w[...]) + pr_b[...]                  # (N, patch_dim)

    rec_ref[0] = out.astype(rec_ref.dtype)
    mean_ref[0] = mean.astype(mean_ref.dtype)
    logvar_ref[0] = logvar.astype(logvar_ref.dtype)
    z_ref[0] = z.astype(z_ref.dtype)


def autoencoder_forward_fused(params, tokens, noise, cfg, enc_rot, dec_rot):
    B, N, Dp = tokens.shape
    Ce, Cd, lat = cfg["enc_dim"], cfg["dec_dim"], cfg["latent_dim"]
    eps = 1e-6

    def w_bf16(w):
        return w.astype(jnp.bfloat16)

    def row(b):
        return b.reshape(1, -1).astype(jnp.float32)

    def stack_blocks(blocks):
        def srow(name, key):
            return jnp.stack([blk[name][key].reshape(1, -1) for blk in blocks])
        def smat(name):
            return jnp.stack([blk[name]["w"] for blk in blocks]).astype(jnp.bfloat16)
        return [
            srow("ln1", "g"), srow("ln1", "b"),
            smat("qkv"), srow("qkv", "b"),
            smat("proj"), srow("proj", "b"),
            srow("ln2", "g"), srow("ln2", "b"),
            smat("fc1"), srow("fc1", "b"),
            smat("fc2"), srow("fc2", "b"),
        ]

    enc_cos, enc_sin, enc_swap = enc_rot
    dec_cos, dec_sin, dec_swap = dec_rot

    batched_args = [tokens, noise]
    shared_args = (
        [enc_cos, enc_sin, enc_swap.astype(jnp.bfloat16),
         dec_cos, dec_sin, dec_swap.astype(jnp.bfloat16),
         w_bf16(params["patch_embed"]["w"]), row(params["patch_embed"]["b"])]
        + stack_blocks(params["encoder"])
        + [row(params["enc_norm"]["g"]), row(params["enc_norm"]["b"]),
           w_bf16(params["quant"]["w"]), row(params["quant"]["b"]),
           w_bf16(params["post_quant"]["w"]), row(params["post_quant"]["b"])]
        + stack_blocks(params["decoder"])
        + [row(params["dec_norm"]["g"]), row(params["dec_norm"]["b"]),
           w_bf16(params["predictor"]["w"]), row(params["predictor"]["b"])]
    )

    def batched_spec(a):
        nd = a.ndim
        return pl.BlockSpec((1,) + a.shape[1:],
                            lambda b, _nd=nd: (b,) + (0,) * (_nd - 1))

    def shared_spec(a):
        nd = a.ndim
        return pl.BlockSpec(a.shape, lambda b, _nd=nd: (0,) * _nd)

    in_specs = ([batched_spec(a) for a in batched_args]
                + [shared_spec(a) for a in shared_args])

    out_shape = (
        jax.ShapeDtypeStruct((B, N, Dp), tokens.dtype),   # reconstructed tokens
        jax.ShapeDtypeStruct((B, N, lat), jnp.float32),   # mean
        jax.ShapeDtypeStruct((B, N, lat), jnp.float32),   # logvar
        jax.ShapeDtypeStruct((B, N, lat), jnp.float32),   # z
    )
    out_specs = (
        pl.BlockSpec((1, N, Dp), lambda b: (b, 0, 0)),
        pl.BlockSpec((1, N, lat), lambda b: (b, 0, 0)),
        pl.BlockSpec((1, N, lat), lambda b: (b, 0, 0)),
        pl.BlockSpec((1, N, lat), lambda b: (b, 0, 0)),
    )

    # Advisory cost estimate for the XLA scheduler.
    he = int(Ce * cfg["mlp_ratio"])
    hd_d = int(Cd * cfg["mlp_ratio"])

    def blk_flops(C, hid, nh):
        hd = C // nh
        return 2 * N * C * (3 * C + 2 * C + C + 2 * hid) + nh * 4 * N * N * hd

    flops = int(B * (2 * N * Dp * Ce
                     + cfg["enc_depth"] * blk_flops(Ce, he, cfg["enc_heads"])
                     + 2 * N * Ce * 2 * lat + 2 * N * lat * Cd
                     + cfg["dec_depth"] * blk_flops(Cd, hd_d, cfg["dec_heads"])
                     + 2 * N * Cd * Dp))
    trans = int(B * (cfg["enc_depth"] * (cfg["enc_heads"] * N * N + N * he)
                     + cfg["dec_depth"] * (cfg["dec_heads"] * N * N + N * hd_d)
                     + N * lat))
    bytes_accessed = int(sum(int(a.size) * a.dtype.itemsize
                             for a in batched_args + shared_args)
                         + B * N * (Dp + 3 * lat) * 4)

    kernel = functools.partial(
        _autoencoder_kernel,
        enc_depth=cfg["enc_depth"], dec_depth=cfg["dec_depth"],
        enc_heads=cfg["enc_heads"], dec_heads=cfg["dec_heads"],
        lat=lat, eps=eps)

    return pl.pallas_call(
        kernel,
        out_shape=out_shape,
        grid=(B,),
        in_specs=in_specs,
        out_specs=out_specs,
        compiler_params=pltpu.CompilerParams(dimension_semantics=("parallel",)),
        cost_estimate=pl.CostEstimate(flops=flops, transcendentals=trans,
                                      bytes_accessed=bytes_accessed),
    )(*batched_args, *shared_args)


# ----------------------- rotary embedding tables (plain JAX glue) -----------------------

def axial_rotary_freqs(H, W, head_dim):
    """RotaryEmbedding(dim=head_dim//4, freqs_for='pixel', max_freq=H*W).get_axial_freqs(H, W)"""
    dim_r = head_dim // 4
    max_freq = H * W
    base = jnp.linspace(1.0, max_freq / 2.0, dim_r // 2) * jnp.pi   # (dim_r//2,)
    pos_h = jnp.linspace(-1.0, 1.0, H)
    pos_w = jnp.linspace(-1.0, 1.0, W)
    fh = jnp.repeat(pos_h[:, None] * base[None, :], 2, axis=-1)     # (H, dim_r)
    fw = jnp.repeat(pos_w[:, None] * base[None, :], 2, axis=-1)     # (W, dim_r)
    fh = jnp.broadcast_to(fh[:, None, :], (H, W, dim_r))
    fw = jnp.broadcast_to(fw[None, :, :], (H, W, dim_r))
    return jnp.concatenate([fh, fw], axis=-1)                       # (H, W, head_dim//2)


def rotary_tables(H, W, num_heads, head_dim):
    """Per-token cos/sin tables on the packed (N, C) layout plus the pair-swap
    (+/-1) matrix so `t*cos + (t@swap)*sin` reproduces apply_rotary_emb exactly."""
    freqs = axial_rotary_freqs(H, W, head_dim).reshape(H * W, -1)   # (N, head_dim//2)
    N, rot = freqs.shape
    cos_h = jnp.concatenate(
        [jnp.cos(freqs), jnp.ones((N, head_dim - rot), jnp.float32)], axis=-1)
    sin_h = jnp.concatenate(
        [jnp.sin(freqs), jnp.zeros((N, head_dim - rot), jnp.float32)], axis=-1)
    cos = jnp.tile(cos_h, (1, num_heads))                           # (N, C)
    sin = jnp.tile(sin_h, (1, num_heads))
    C = num_heads * head_dim
    even = jnp.arange(0, C, 2)
    odd = even + 1
    swap = jnp.zeros((C, C), jnp.float32)
    swap = swap.at[odd, even].set(-1.0)    # out[:, 2i]   = -t[:, 2i+1]
    swap = swap.at[even, odd].set(1.0)     # out[:, 2i+1] =  t[:, 2i]
    return cos, sin, swap


# ----------------------------- patchify / unpatchify -----------------------------

def patchify(x, p, sh, sw):
    """NCHW -> (B, N, 3*p*p) with patch-dim ordered (c, ph, pw), matching the module."""
    B = x.shape[0]
    x = x.reshape(B, 3, sh, p, sw, p)
    x = x.transpose(0, 2, 4, 1, 3, 5)      # B, sh, sw, c, ph, pw
    return x.reshape(B, sh * sw, 3 * p * p)


def unpatchify(x, p, sh, sw):
    """(B, N, 3*p*p) -> NCHW, inverse of the module's unpatchify."""
    B = x.shape[0]
    x = x.reshape(B, sh, sw, 3, p, p)
    x = x.transpose(0, 3, 1, 4, 2, 5)      # B, 3, sh, ph, sw, pw
    return x.reshape(B, 3, sh * p, sw * p)


# ----------------------------- parameters -----------------------------

def init_params(key, cfg):
    keys = iter(jax.random.split(key, 512))

    def lin(din, dout):
        limit = math.sqrt(6.0 / (din + dout))  # xavier_uniform, zero bias
        w = jax.random.uniform(next(keys), (din, dout), jnp.float32, -limit, limit)
        return {"w": w, "b": jnp.zeros((dout,), jnp.float32)}

    def ln(dim):
        return {"g": jnp.ones((dim,), jnp.float32), "b": jnp.zeros((dim,), jnp.float32)}

    def block(dim, mlp_ratio):
        hidden = int(dim * mlp_ratio)
        return {"ln1": ln(dim), "qkv": lin(dim, 3 * dim), "proj": lin(dim, dim),
                "ln2": ln(dim), "fc1": lin(dim, hidden), "fc2": lin(hidden, dim)}

    return {
        "patch_embed": lin(cfg["patch_dim"], cfg["enc_dim"]),
        "encoder": [block(cfg["enc_dim"], cfg["mlp_ratio"]) for _ in range(cfg["enc_depth"])],
        "enc_norm": ln(cfg["enc_dim"]),
        "quant": lin(cfg["enc_dim"], 2 * cfg["latent_dim"]),
        "post_quant": lin(cfg["latent_dim"], cfg["dec_dim"]),
        "decoder": [block(cfg["dec_dim"], cfg["mlp_ratio"]) for _ in range(cfg["dec_depth"])],
        "dec_norm": ln(cfg["dec_dim"]),
        "predictor": lin(cfg["dec_dim"], cfg["patch_dim"]),
    }


# ----------------------------- full forward (autoencode) -----------------------------

def autoencoder_forward(params, x, noise, enc_rot, dec_rot, cfg):
    sh, sw, p = cfg["seq_h"], cfg["seq_w"], cfg["patch_size"]
    tokens = patchify(x, p, sh, sw)
    # TODO(synk): torch.randn in DiagonalGaussianDistribution.sample replaced by a
    # fixed-key jax.random.normal `noise` input for determinism.
    rec_tok, mean, logvar, z = autoencoder_forward_fused(
        params, tokens, noise, cfg, enc_rot, dec_rot)
    rec = unpatchify(rec_tok, p, sh, sw)
    return rec, (mean, logvar), z


# ----------------------------------- main -----------------------------------

if __name__ == "__main__":
    cfg = dict(
        latent_dim=8,
        input_height=32, input_width=32, patch_size=8,
        enc_dim=64, enc_depth=2, enc_heads=4,
        dec_dim=64, dec_depth=2, dec_heads=4,
        mlp_ratio=4.0,
    )
    cfg["seq_h"] = cfg["input_height"] // cfg["patch_size"]
    cfg["seq_w"] = cfg["input_width"] // cfg["patch_size"]
    cfg["seq_len"] = cfg["seq_h"] * cfg["seq_w"]
    cfg["patch_dim"] = 3 * cfg["patch_size"] ** 2

    root = jax.random.PRNGKey(0)
    k_param, k_input, k_noise = jax.random.split(root, 3)

    params = init_params(k_param, cfg)

    B = 2
    x = jax.random.normal(k_input, (B, 3, cfg["input_height"], cfg["input_width"]), jnp.float32)
    noise = jax.random.normal(k_noise, (B, cfg["seq_len"], cfg["latent_dim"]), jnp.float32)

    enc_rot = rotary_tables(cfg["seq_h"], cfg["seq_w"], cfg["enc_heads"],
                            cfg["enc_dim"] // cfg["enc_heads"])
    dec_rot = rotary_tables(cfg["seq_h"], cfg["seq_w"], cfg["dec_heads"],
                            cfg["dec_dim"] // cfg["dec_heads"])

    fwd = jax.jit(functools.partial(autoencoder_forward, cfg=cfg))
    rec, (mean, logvar), z = fwd(params, x, noise, enc_rot, dec_rot)
    jax.block_until_ready((rec, mean, logvar, z))

    assert rec.shape == (B, 3, cfg["input_height"], cfg["input_width"])
    assert mean.shape == (B, cfg["seq_len"], cfg["latent_dim"])
    assert logvar.shape == (B, cfg["seq_len"], cfg["latent_dim"])
    assert z.shape == (B, cfg["seq_len"], cfg["latent_dim"])
    print("KERNEL_OK")
</pallas_src>

<mosaic_0001>
module attributes {stable_mosaic.version = 11 : i64} {
  func.func @_autoencoder_kernel(%arg0: i32, %arg1: memref<1x16x192xf32, #tpu.memory_space<vmem>>, %arg2: memref<1x16x8xf32, #tpu.memory_space<vmem>>, %arg3: memref<16x64xf32, #tpu.memory_space<vmem>>, %arg4: memref<16x64xf32, #tpu.memory_space<vmem>>, %arg5: memref<64x64xbf16, #tpu.memory_space<vmem>>, %arg6: memref<16x64xf32, #tpu.memory_space<vmem>>, %arg7: memref<16x64xf32, #tpu.memory_space<vmem>>, %arg8: memref<64x64xbf16, #tpu.memory_space<vmem>>, %arg9: memref<192x64xbf16, #tpu.memory_space<vmem>>, %arg10: memref<1x64xf32, #tpu.memory_space<vmem>>, %arg11: memref<2x1x64xf32, #tpu.memory_space<vmem>>, %arg12: memref<2x1x64xf32, #tpu.memory_space<vmem>>, %arg13: memref<2x64x192xbf16, #tpu.memory_space<vmem>>, %arg14: memref<2x1x192xf32, #tpu.memory_space<vmem>>, %arg15: memref<2x64x64xbf16, #tpu.memory_space<vmem>>, %arg16: memref<2x1x64xf32, #tpu.memory_space<vmem>>, %arg17: memref<2x1x64xf32, #tpu.memory_space<vmem>>, %arg18: memref<2x1x64xf32, #tpu.memory_space<vmem>>, %arg19: memref<2x64x256xbf16, #tpu.memory_space<vmem>>, %arg20: memref<2x1x256xf32, #tpu.memory_space<vmem>>, %arg21: memref<2x256x64xbf16, #tpu.memory_space<vmem>>, %arg22: memref<2x1x64xf32, #tpu.memory_space<vmem>>, %arg23: memref<1x64xf32, #tpu.memory_space<vmem>>, %arg24: memref<1x64xf32, #tpu.memory_space<vmem>>, %arg25: memref<64x16xbf16, #tpu.memory_space<vmem>>, %arg26: memref<1x16xf32, #tpu.memory_space<vmem>>, %arg27: memref<8x64xbf16, #tpu.memory_space<vmem>>, %arg28: memref<1x64xf32, #tpu.memory_space<vmem>>, %arg29: memref<2x1x64xf32, #tpu.memory_space<vmem>>, %arg30: memref<2x1x64xf32, #tpu.memory_space<vmem>>, %arg31: memref<2x64x192xbf16, #tpu.memory_space<vmem>>, %arg32: memref<2x1x192xf32, #tpu.memory_space<vmem>>, %arg33: memref<2x64x64xbf16, #tpu.memory_space<vmem>>, %arg34: memref<2x1x64xf32, #tpu.memory_space<vmem>>, %arg35: memref<2x1x64xf32, #tpu.memory_space<vmem>>, %arg36: memref<2x1x64xf32, #tpu.memory_space<vmem>>, %arg37: memref<2x64x256xbf16, #tpu.memory_space<vmem>>, %arg38: memref<2x1x256xf32, #tpu.memory_space<vmem>>, %arg39: memref<2x256x64xbf16, #tpu.memory_space<vmem>>, %arg40: memref<2x1x64xf32, #tpu.memory_space<vmem>>, %arg41: memref<1x64xf32, #tpu.memory_space<vmem>>, %arg42: memref<1x64xf32, #tpu.memory_space<vmem>>, %arg43: memref<64x192xbf16, #tpu.memory_space<vmem>>, %arg44: memref<1x192xf32, #tpu.memory_space<vmem>>, %arg45: memref<1x16x192xf32, #tpu.memory_space<vmem>>, %arg46: memref<1x16x8xf32, #tpu.memory_space<vmem>>, %arg47: memref<1x16x8xf32, #tpu.memory_space<vmem>>, %arg48: memref<1x16x8xf32, #tpu.memory_space<vmem>>) attributes {dimension_semantics = [#tpu.dimension_semantics<parallel>], iteration_bounds = array<i64: 2>, scalar_prefetch = 0 : i64, scratch_operands = 0 : i64, tpu.core_type = #tpu.core_type<tc>, window_params = [{transform_indices = @transform_0, window_bounds = array<i64: 1, 16, 192>}, {transform_indices = @transform_1, window_bounds = array<i64: 1, 16, 8>}, {pipeline_mode = #tpu.pipeline_mode<synchronous>, transform_indices = @transform_2, window_bounds = array<i64: 16, 64>}, {pipeline_mode = #tpu.pipeline_mode<synchronous>, transform_indices = @transform_3, window_bounds = array<i64: 16, 64>}, {pipeline_mode = #tpu.pipeline_mode<synchronous>, transform_indices = @transform_4, window_bounds = array<i64: 64, 64>}, {pipeline_mode = #tpu.pipeline_mode<synchronous>, transform_indices = @transform_5, window_bounds = array<i64: 16, 64>}, {pipeline_mode = #tpu.pipeline_mode<synchronous>, transform_indices = @transform_6, window_bounds = array<i64: 16, 64>}, {pipeline_mode = #tpu.pipeline_mode<synchronous>, transform_indices = @transform_7, window_bounds = array<i64: 64, 64>}, {pipeline_mode = #tpu.pipeline_mode<synchronous>, transform_indices = @transform_8, window_bounds = array<i64: 192, 64>}, {pipeline_mode = #tpu.pipeline_mode<synchronous>, transform_indices = @transform_9, window_bounds = array<i64: 1, 64>}, {pipeline_mode = #tpu.pipeline_mode<synchronous>, transform_indices = @transform_10, window_bounds = array<i64: 2, 1, 64>}, {pipeline_mode = #tpu.pipeline_mode<synchronous>, transform_indices = @transform_11, window_bounds = array<i64: 2, 1, 64>}, {pipeline_mode = #tpu.pipeline_mode<synchronous>, transform_indices = @transform_12, window_bounds = array<i64: 2, 64, 192>}, {pipeline_mode = #tpu.pipeline_mode<synchronous>, transform_indices = @transform_13, window_bounds = array<i64: 2, 1, 192>}, {pipeline_mode = #tpu.pipeline_mode<synchronous>, transform_indices = @transform_14, window_bounds = array<i64: 2, 64, 64>}, {pipeline_mode = #tpu.pipeline_mode<synchronous>, transform_indices = @transform_15, window_bounds = array<i64: 2, 1, 64>}, {pipeline_mode = #tpu.pipeline_mode<synchronous>, transform_indices = @transform_16, window_bounds = array<i64: 2, 1, 64>}, {pipeline_mode = #tpu.pipeline_mode<synchronous>, transform_indices = @transform_17, window_bounds = array<i64: 2, 1, 64>}, {pipeline_mode = #tpu.pipeline_mode<synchronous>, transform_indices = @transform_18, window_bounds = array<i64: 2, 64, 256>}, {pipeline_mode = #tpu.pipeline_mode<synchronous>, transform_indices = @transform_19, window_bounds = array<i64: 2, 1, 256>}, {pipeline_mode = #tpu.pipeline_mode<synchronous>, transform_indices = @transform_20, window_bounds = array<i64: 2, 256, 64>}, {pipeline_mode = #tpu.pipeline_mode<synchronous>, transform_indices = @transform_21, window_bounds = array<i64: 2, 1, 64>}, {pipeline_mode = #tpu.pipeline_mode<synchronous>, transform_indices = @transform_22, window_bounds = array<i64: 1, 64>}, {pipeline_mode = #tpu.pipeline_mode<synchronous>, transform_indices = @transform_23, window_bounds = array<i64: 1, 64>}, {pipeline_mode = #tpu.pipeline_mode<synchronous>, transform_indices = @transform_24, window_bounds = array<i64: 64, 16>}, {pipeline_mode = #tpu.pipeline_mode<synchronous>, transform_indices = @transform_25, window_bounds = array<i64: 1, 16>}, {pipeline_mode = #tpu.pipeline_mode<synchronous>, transform_indices = @transform_26, window_bounds = array<i64: 8, 64>}, {pipeline_mode = #tpu.pipeline_mode<synchronous>, transform_indices = @transform_27, window_bounds = array<i64: 1, 64>}, {pipeline_mode = #tpu.pipeline_mode<synchronous>, transform_indices = @transform_28, window_bounds = array<i64: 2, 1, 64>}, {pipeline_mode = #tpu.pipeline_mode<synchronous>, transform_indices = @transform_29, window_bounds = array<i64: 2, 1, 64>}, {pipeline_mode = #tpu.pipeline_mode<synchronous>, transform_indices = @transform_30, window_bounds = array<i64: 2, 64, 192>}, {pipeline_mode = #tpu.pipeline_mode<synchronous>, transform_indices = @transform_31, window_bounds = array<i64: 2, 1, 192>}, {pipeline_mode = #tpu.pipeline_mode<synchronous>, transform_indices = @transform_32, window_bounds = array<i64: 2, 64, 64>}, {pipeline_mode = #tpu.pipeline_mode<synchronous>, transform_indices = @transform_33, window_bounds = array<i64: 2, 1, 64>}, {pipeline_mode = #tpu.pipeline_mode<synchronous>, transform_indices = @transform_34, window_bounds = array<i64: 2, 1, 64>}, {pipeline_mode = #tpu.pipeline_mode<synchronous>, transform_indices = @transform_35, window_bounds = array<i64: 2, 1, 64>}, {pipeline_mode = #tpu.pipeline_mode<synchronous>, transform_indices = @transform_36, window_bounds = array<i64: 2, 64, 256>}, {pipeline_mode = #tpu.pipeline_mode<synchronous>, transform_indices = @transform_37, window_bounds = array<i64: 2, 1, 256>}, {pipeline_mode = #tpu.pipeline_mode<synchronous>, transform_indices = @transform_38, window_bounds = array<i64: 2, 256, 64>}, {pipeline_mode = #tpu.pipeline_mode<synchronous>, transform_indices = @transform_39, window_bounds = array<i64: 2, 1, 64>}, {pipeline_mode = #tpu.pipeline_mode<synchronous>, transform_indices = @transform_40, window_bounds = array<i64: 1, 64>}, {pipeline_mode = #tpu.pipeline_mode<synchronous>, transform_indices = @transform_41, window_bounds = array<i64: 1, 64>}, {pipeline_mode = #tpu.pipeline_mode<synchronous>, transform_indices = @transform_42, window_bounds = array<i64: 64, 192>}, {pipeline_mode = #tpu.pipeline_mode<synchronous>, transform_indices = @transform_43, window_bounds = array<i64: 1, 192>}, {transform_indices = @transform_44, window_bounds = array<i64: 1, 16, 192>}, {transform_indices = @transform_45, window_bounds = array<i64: 1, 16, 8>}, {transform_indices = @transform_46, window_bounds = array<i64: 1, 16, 8>}, {transform_indices = @transform_47, window_bounds = array<i64: 1, 16, 8>}]} {
    %c0 = arith.constant 0 : index
    %c0_0 = arith.constant 0 : index
    %0 = vector.load %arg3[%c0, %c0_0] : memref<16x64xf32, #tpu.memory_space<vmem>>, vector<16x64xf32>
    %c0_1 = arith.constant 0 : index
    %c0_2 = arith.constant 0 : index
    %1 = vector.load %arg4[%c0_1, %c0_2] : memref<16x64xf32, #tpu.memory_space<vmem>>, vector<16x64xf32>
    %c0_3 = arith.constant 0 : index
    %c0_4 = arith.constant 0 : index
    %2 = vector.load %arg5[%c0_3, %c0_4] : memref<64x64xbf16, #tpu.memory_space<vmem>>, vector<64x64xbf16>
    %c0_5 = arith.constant 0 : index
    %c0_6 = arith.constant 0 : index
    %3 = vector.load %arg6[%c0_5, %c0_6] : memref<16x64xf32, #tpu.memory_space<vmem>>, vector<16x64xf32>
    %c0_7 = arith.constant 0 : index
    %c0_8 = arith.constant 0 : index
    %4 = vector.load %arg7[%c0_7, %c0_8] : memref<16x64xf32, #tpu.memory_space<vmem>>, vector<16x64xf32>
    %c0_9 = arith.constant 0 : index
    %c0_10 = arith.constant 0 : index
    %5 = vector.load %arg8[%c0_9, %c0_10] : memref<64x64xbf16, #tpu.memory_space<vmem>>, vector<64x64xbf16>
    %c0_11 = arith.constant 0 : index
    %c0_12 = arith.constant 0 : index
    %c0_13 = arith.constant 0 : index
    %6 = vector.load %arg1[%c0_11, %c0_12, %c0_13] : memref<1x16x192xf32, #tpu.memory_space<vmem>>, vector<1x16x192xf32>
    %7 = vector.shape_cast %6 : vector<1x16x192xf32> to vector<16x192xf32>
    %c0_14 = arith.constant 0 : index
    %c0_15 = arith.constant 0 : index
    %8 = vector.load %arg9[%c0_14, %c0_15] : memref<192x64xbf16, #tpu.memory_space<vmem>>, vector<192x64xbf16>
    %9 = arith.truncf %7 : vector<16x192xf32> to vector<16x192xbf16>
    %cst = arith.constant dense<0.000000e+00> : vector<16x64xf32>
    %10 = tpu.matmul %9, %8, %cst {dimension_numbers = #tpu.dot_dimension_numbers<[1], [0], [0], [1], [0, 0, 1, 1], [], []>} : vector<16x192xbf16>, vector<192x64xbf16>, vector<16x64xf32> -> vector<16x64xf32>
    %c0_16 = arith.constant 0 : index
    %c0_17 = arith.constant 0 : index
    %11 = vector.load %arg10[%c0_16, %c0_17] : memref<1x64xf32, #tpu.memory_space<vmem>>, vector<1x64xf32>
    %12 = vector.broadcast %11 : vector<1x64xf32> to vector<16x64xf32>
    %13 = arith.addf %10, %12 : vector<16x64xf32>
    %c0_18 = arith.constant 0 : index
    %c0_19 = arith.constant 0 : index
    %c0_20 = arith.constant 0 : index
    %14 = vector.load %arg11[%c0_18, %c0_19, %c0_20] : memref<2x1x64xf32, #tpu.memory_space<vmem>>, vector<1x1x64xf32>
    %15 = vector.shape_cast %14 : vector<1x1x64xf32> to vector<1x64xf32>
    %c0_21 = arith.constant 0 : index
    %c0_22 = arith.constant 0 : index
    %c0_23 = arith.constant 0 : index
    %16 = vector.load %arg12[%c0_21, %c0_22, %c0_23] : memref<2x1x64xf32, #tpu.memory_space<vmem>>, vector<1x1x64xf32>
    %17 = vector.shape_cast %16 : vector<1x1x64xf32> to vector<1x64xf32>
    %cst_24 = arith.constant dense<0.000000e+00> : vector<16xf32>
    %18 = vector.multi_reduction <add>, %13, %cst_24 [1] : vector<16x64xf32> to vector<16xf32>
    %19 = vector.shape_cast %18 : vector<16xf32> to vector<16x1xf32>
    %cst_25 = arith.constant 6.400000e+01 : f32
    %20 = vector.broadcast %cst_25 : f32 to vector<16x1xf32>
    %21 = arith.divf %19, %20 : vector<16x1xf32>
    %22 = vector.broadcast %21 : vector<16x1xf32> to vector<16x64xf32>
    %23 = arith.subf %13, %22 : vector<16x64xf32>
    %24 = arith.mulf %23, %23 : vector<16x64xf32>
    %cst_26 = arith.constant dense<0.000000e+00> : vector<16xf32>
    %25 = vector.multi_reduction <add>, %24, %cst_26 [1] : vector<16x64xf32> to vector<16xf32>
    %26 = vector.shape_cast %25 : vector<16xf32> to vector<16x1xf32>
    %cst_27 = arith.constant 6.400000e+01 : f32
    %27 = vector.broadcast %cst_27 : f32 to vector<16x1xf32>
    %28 = arith.divf %26, %27 : vector<16x1xf32>
    %29 = vector.broadcast %21 : vector<16x1xf32> to vector<16x64xf32>
    %30 = arith.subf %13, %29 : vector<16x64xf32>
    %cst_28 = arith.constant 9.99999997E-7 : f32
    %31 = vector.broadcast %cst_28 : f32 to vector<16x1xf32>
    %32 = arith.addf %28, %31 : vector<16x1xf32>
    %33 = math.rsqrt %32 : vector<16x1xf32>
    %34 = vector.broadcast %33 : vector<16x1xf32> to vector<16x64xf32>
    %35 = arith.mulf %30, %34 : vector<16x64xf32>
    %36 = vector.broadcast %15 : vector<1x64xf32> to vector<16x64xf32>
    %37 = arith.mulf %35, %36 : vector<16x64xf32>
    %38 = vector.broadcast %17 : vector<1x64xf32> to vector<16x64xf32>
    %39 = arith.addf %37, %38 : vector<16x64xf32>
    %c0_29 = arith.constant 0 : index
    %c0_30 = arith.constant 0 : index
    %c0_31 = arith.constant 0 : index
    %40 = vector.load %arg13[%c0_29, %c0_30, %c0_31] : memref<2x64x192xbf16, #tpu.memory_space<vmem>>, vector<1x64x192xbf16>
    %41 = vector.shape_cast %40 : vector<1x64x192xbf16> to vector<64x192xbf16>
    %42 = arith.truncf %39 : vector<16x64xf32> to vector<16x64xbf16>
    %cst_32 = arith.constant dense<0.000000e+00> : vector<16x192xf32>
    %43 = tpu.matmul %42, %41, %cst_32 {dimension_numbers = #tpu.dot_dimension_numbers<[1], [0], [0], [1], [0, 0, 1, 1], [], []>} : vector<16x64xbf16>, vector<64x192xbf16>, vector<16x192xf32> -> vector<16x192xf32>
    %c0_33 = arith.constant 0 : index
    %c0_34 = arith.constant 0 : index
    %c0_35 = arith.constant 0 : index
    %44 = vector.load %arg14[%c0_33, %c0_34, %c0_35] : memref<2x1x192xf32, #tpu.memory_space<vmem>>, vector<1x1x192xf32>
    %45 = vector.shape_cast %44 : vector<1x1x192xf32> to vector<1x192xf32>
    %46 = vector.broadcast %45 : vector<1x192xf32> to vector<16x192xf32>
    %47 = arith.addf %43, %46 : vector<16x192xf32>
    %48 = vector.extract_strided_slice %47 {offsets = [0, 0], sizes = [16, 64], strides = [1, 1]} : vector<16x192xf32> to vector<16x64xf32>
    %49 = vector.extract_strided_slice %47 {offsets = [0, 64], sizes = [16, 64], strides = [1, 1]} : vector<16x192xf32> to vector<16x64xf32>
    %50 = vector.extract_strided_slice %47 {offsets = [0, 128], sizes = [16, 64], strides = [1, 1]} : vector<16x192xf32> to vector<16x64xf32>
    %51 = arith.mulf %48, %0 : vector<16x64xf32>
    %52 = arith.truncf %48 : vector<16x64xf32> to vector<16x64xbf16>
    %cst_36 = arith.constant dense<0.000000e+00> : vector<16x64xf32>
    %53 = tpu.matmul %52, %2, %cst_36 {dimension_numbers = #tpu.dot_dimension_numbers<[1], [0], [0], [1], [0, 0, 1, 1], [], []>} : vector<16x64xbf16>, vector<64x64xbf16>, vector<16x64xf32> -> vector<16x64xf32>
    %54 = arith.mulf %53, %1 : vector<16x64xf32>
    %55 = arith.addf %51, %54 : vector<16x64xf32>
    %56 = arith.mulf %49, %0 : vector<16x64xf32>
    %57 = arith.truncf %49 : vector<16x64xf32> to vector<16x64xbf16>
    %cst_37 = arith.constant dense<0.000000e+00> : vector<16x64xf32>
    %58 = tpu.matmul %57, %2, %cst_37 {dimension_numbers = #tpu.dot_dimension_numbers<[1], [0], [0], [1], [0, 0, 1, 1], [], []>} : vector<16x64xbf16>, vector<64x64xbf16>, vector<16x64xf32> -> vector<16x64xf32>
    %59 = arith.mulf %58, %1 : vector<16x64xf32>
    %60 = arith.addf %56, %59 : vector<16x64xf32>
    %61 = vector.extract_strided_slice %55 {offsets = [0, 0], sizes = [16, 16], strides = [1, 1]} : vector<16x64xf32> to vector<16x16xf32>
    %62 = arith.truncf %61 : vector<16x16xf32> to vector<16x16xbf16>
    %63 = vector.extract_strided_slice %60 {offsets = [0, 0], sizes = [16, 16], strides = [1, 1]} : vector<16x64xf32> to vector<16x16xf32>
    %64 = arith.truncf %63 : vector<16x16xf32> to vector<16x16xbf16>
    %65 = vector.extract_strided_slice %50 {offsets = [0, 0], sizes = [16, 16], strides = [1, 1]} : vector<16x64xf32> to vector<16x16xf32>
    %66 = arith.truncf %65 : vector<16x16xf32> to vector<16x16xbf16>
    %cst_38 = arith.constant dense<0.000000e+00> : vector<16x16xf32>
    %67 = tpu.matmul %62, %64, %cst_38 {dimension_numbers = #tpu.dot_dimension_numbers<[1], [1], [0], [0], [0, 0, 1, 0], [], []>} : vector<16x16xbf16>, vector<16x16xbf16>, vector<16x16xf32> -> vector<16x16xf32>
    %cst_39 = arith.constant 2.500000e-01 : f32
    %68 = vector.broadcast %cst_39 : f32 to vector<16x16xf32>
    %69 = arith.mulf %67, %68 : vector<16x16xf32>
    %cst_40 = arith.constant dense<0xFF800000> : vector<16xf32>
    %70 = vector.multi_reduction <maximumf>, %69, %cst_40 [1] : vector<16x16xf32> to vector<16xf32>
    %71 = vector.shape_cast %70 : vector<16xf32> to vector<16x1xf32>
    %72 = vector.broadcast %71 : vector<16x1xf32> to vector<16x16xf32>
    %73 = arith.subf %69, %72 : vector<16x16xf32>
    %74 = math.exp %73 : vector<16x16xf32>
    %cst_41 = arith.constant dense<0.000000e+00> : vector<16xf32>
    %75 = vector.multi_reduction <add>, %74, %cst_41 [1] : vector<16x16xf32> to vector<16xf32>
    %76 = vector.shape_cast %75 : vector<16xf32> to vector<16x1xf32>
    %77 = tpu.reciprocal %76 {approx = true} : vector<16x1xf32> -> vector<16x1xf32>
    %78 = vector.broadcast %77 : vector<16x1xf32> to vector<16x16xf32>
    %79 = arith.mulf %74, %78 : vector<16x16xf32>
    %80 = arith.truncf %79 : vector<16x16xf32> to vector<16x16xbf16>
    %cst_42 = arith.constant dense<0.000000e+00> : vector<16x16xf32>
    %81 = tpu.matmul %80, %66, %cst_42 {dimension_numbers = #tpu.dot_dimension_numbers<[1], [0], [0], [1], [0, 0, 1, 1], [], []>} : vector<16x16xbf16>, vector<16x16xbf16>, vector<16x16xf32> -> vector<16x16xf32>
    %82 = vector.extract_strided_slice %55 {offsets = [0, 16], sizes = [16, 16], strides = [1, 1]} : vector<16x64xf32> to vector<16x16xf32>
    %83 = arith.truncf %82 : vector<16x16xf32> to vector<16x16xbf16>
    %84 = vector.extract_strided_slice %60 {offsets = [0, 16], sizes = [16, 16], strides = [1, 1]} : vector<16x64xf32> to vector<16x16xf32>
    %85 = arith.truncf %84 : vector<16x16xf32> to vector<16x16xbf16>
    %86 = vector.extract_strided_slice %50 {offsets = [0, 16], sizes = [16, 16], strides = [1, 1]} : vector<16x64xf32> to vector<16x16xf32>
    %87 = arith.truncf %86 : vector<16x16xf32> to vector<16x16xbf16>
    %cst_43 = arith.constant dense<0.000000e+00> : vector<16x16xf32>
    %88 = tpu.matmul %83, %85, %cst_43 {dimension_numbers = #tpu.dot_dimension_numbers<[1], [1], [0], [0], [0, 0, 1, 0], [], []>} : vector<16x16xbf16>, vector<16x16xbf16>, vector<16x16xf32> -> vector<16x16xf32>
    %cst_44 = arith.constant 2.500000e-01 : f32
    %89 = vector.broadcast %cst_44 : f32 to vector<16x16xf32>
    %90 = arith.mulf %88, %89 : vector<16x16xf32>
    %cst_45 = arith.constant dense<0xFF800000> : vector<16xf32>
    %91 = vector.multi_reduction <maximumf>, %90, %cst_45 [1] : vector<16x16xf32> to vector<16xf32>
    %92 = vector.shape_cast %91 : vector<16xf32> to vector<16x1xf32>
    %93 = vector.broadcast %92 : vector<16x1xf32> to vector<16x16xf32>
    %94 = arith.subf %90, %93 : vector<16x16xf32>
    %95 = math.exp %94 : vector<16x16xf32>
    %cst_46 = arith.constant dense<0.000000e+00> : vector<16xf32>
    %96 = vector.multi_reduction <add>, %95, %cst_46 [1] : vector<16x16xf32> to vector<16xf32>
    %97 = vector.shape_cast %96 : vector<16xf32> to vector<16x1xf32>
    %98 = tpu.reciprocal %97 {approx = true} : vector<16x1xf32> -> vector<16x1xf32>
    %99 = vector.broadcast %98 : vector<16x1xf32> to vector<16x16xf32>
    %100 = arith.mulf %95, %99 : vector<16x16xf32>
    %101 = arith.truncf %100 : vector<16x16xf32> to vector<16x16xbf16>
    %cst_47 = arith.constant dense<0.000000e+00> : vector<16x16xf32>
    %102 = tpu.matmul %101, %87, %cst_47 {dimension_numbers = #tpu.dot_dimension_numbers<[1], [0], [0], [1], [0, 0, 1, 1], [], []>} : vector<16x16xbf16>, vector<16x16xbf16>, vector<16x16xf32> -> vector<16x16xf32>
    %103 = vector.extract_strided_slice %55 {offsets = [0, 32], sizes = [16, 16], strides = [1, 1]} : vector<16x64xf32> to vector<16x16xf32>
    %104 = arith.truncf %103 : vector<16x16xf32> to vector<16x16xbf16>
    %105 = vector.extract_strided_slice %60 {offsets = [0, 32], sizes = [16, 16], strides = [1, 1]} : vector<16x64xf32> to vector<16x16xf32>
    %106 = arith.truncf %105 : vector<16x16xf32> to vector<16x16xbf16>
    %107 = vector.extract_strided_slice %50 {offsets = [0, 32], sizes = [16, 16], strides = [1, 1]} : vector<16x64xf32> to vector<16x16xf32>
    %108 = arith.truncf %107 : vector<16x16xf32> to vector<16x16xbf16>
    %cst_48 = arith.constant dense<0.000000e+00> : vector<16x16xf32>
    %109 = tpu.matmul %104, %106, %cst_48 {dimension_numbers = #tpu.dot_dimension_numbers<[1], [1], [0], [0], [0, 0, 1, 0], [], []>} : vector<16x16xbf16>, vector<16x16xbf16>, vector<16x16xf32> -> vector<16x16xf32>
    %cst_49 = arith.constant 2.500000e-01 : f32
    %110 = vector.broadcast %cst_49 : f32 to vector<16x16xf32>
    %111 = arith.mulf %109, %110 : vector<16x16xf32>
    %cst_50 = arith.constant dense<0xFF800000> : vector<16xf32>
    %112 = vector.multi_reduction <maximumf>, %111, %cst_50 [1] : vector<16x16xf32> to vector<16xf32>
    %113 = vector.shape_cast %112 : vector<16xf32> to vector<16x1xf32>
    %114 = vector.broadcast %113 : vector<16x1xf32> to vector<16x16xf32>
    %115 = arith.subf %111, %114 : vector<16x16xf32>
    %116 = math.exp %115 : vector<16x16xf32>
    %cst_51 = arith.constant dense<0.000000e+00> : vector<16xf32>
    %117 = vector.multi_reduction <add>, %116, %cst_51 [1] : vector<16x16xf32> to vector<16xf32>
    %118 = vector.shape_cast %117 : vector<16xf32> to vector<16x1xf32>
    %119 = tpu.reciprocal %118 {approx = true} : vector<16x1xf32> -> vector<16x1xf32>
    %120 = vector.broadcast %119 : vector<16x1xf32> to vector<16x16xf32>
    %121 = arith.mulf %116, %120 : vector<16x16xf32>
    %122 = arith.truncf %121 : vector<16x16xf32> to vector<16x16xbf16>
    %cst_52 = arith.constant dense<0.000000e+00> : vector<16x16xf32>
    %123 = tpu.matmul %122, %108, %cst_52 {dimension_numbers = #tpu.dot_dimension_numbers<[1], [0], [0], [1], [0, 0, 1, 1], [], []>} : vector<16x16xbf16>, vector<16x16xbf16>, vector<16x16xf32> -> vector<16x16xf32>
    %124 = vector.extract_strided_slice %55 {offsets = [0, 48], sizes = [16, 16], strides = [1, 1]} : vector<16x64xf32> to vector<16x16xf32>
    %125 = arith.truncf %124 : vector<16x16xf32> to vector<16x16xbf16>
    %126 = vector.extract_strided_slice %60 {offsets = [0, 48], sizes = [16, 16], strides = [1, 1]} : vector<16x64xf32> to vector<16x16xf32>
    %127 = arith.truncf %126 : vector<16x16xf32> to vector<16x16xbf16>
    %128 = vector.extract_strided_slice %50 {offsets = [0, 48], sizes = [16, 16], strides = [1, 1]} : vector<16x64xf32> to vector<16x16xf32>
    %129 = arith.truncf %128 : vector<16x16xf32> to vector<16x16xbf16>
    %cst_53 = arith.constant dense<0.000000e+00> : vector<16x16xf32>
    %130 = tpu.matmul %125, %127, %cst_53 {dimension_numbers = #tpu.dot_dimension_numbers<[1], [1], [0], [0], [0, 0, 1, 0], [], []>} : vector<16x16xbf16>, vector<16x16xbf16>, vector<16x16xf32> -> vector<16x16xf32>
    %cst_54 = arith.constant 2.500000e-01 : f32
    %131 = vector.broadcast %cst_54 : f32 to vector<16x16xf32>
    %132 = arith.mulf %130, %131 : vector<16x16xf32>
    %cst_55 = arith.constant dense<0xFF800000> : vector<16xf32>
    %133 = vector.multi_reduction <maximumf>, %132, %cst_55 [1] : vector<16x16xf32> to vector<16xf32>
    %134 = vector.shape_cast %133 : vector<16xf32> to vector<16x1xf32>
    %135 = vector.broadcast %134 : vector<16x1xf32> to vector<16x16xf32>
    %136 = arith.subf %132, %135 : vector<16x16xf32>
    %137 = math.exp %136 : vector<16x16xf32>
    %cst_56 = arith.constant dense<0.000000e+00> : vector<16xf32>
    %138 = vector.multi_reduction <add>, %137, %cst_56 [1] : vector<16x16xf32> to vector<16xf32>
    %139 = vector.shape_cast %138 : vector<16xf32> to vector<16x1xf32>
    %140 = tpu.reciprocal %139 {approx = true} : vector<16x1xf32> -> vector<16x1xf32>
    %141 = vector.broadcast %140 : vector<16x1xf32> to vector<16x16xf32>
    %142 = arith.mulf %137, %141 : vector<16x16xf32>
    %143 = arith.truncf %142 : vector<16x16xf32> to vector<16x16xbf16>
    %cst_57 = arith.constant dense<0.000000e+00> : vector<16x16xf32>
    %144 = tpu.matmul %143, %129, %cst_57 {dimension_numbers = #tpu.dot_dimension_numbers<[1], [0], [0], [1], [0, 0, 1, 1], [], []>} : vector<16x16xbf16>, vector<16x16xbf16>, vector<16x16xf32> -> vector<16x16xf32>
    %145 = tpu.concatenate %81, %102, %123, %144 in 1 : vector<16x16xf32>, vector<16x16xf32>, vector<16x16xf32>, vector<16x16xf32> -> vector<16x64xf32>
    %c0_58 = arith.constant 0 : index
    %c0_59 = arith.constant 0 : index
    %c0_60 = arith.constant 0 : index
    %146 = vector.load %arg15[%c0_58, %c0_59, %c0_60] : memref<2x64x64xbf16, #tpu.memory_space<vmem>>, vector<1x64x64xbf16>
    %147 = vector.shape_cast %146 : vector<1x64x64xbf16> to vector<64x64xbf16>
    %148 = arith.truncf %145 : vector<16x64xf32> to vector<16x64xbf16>
    %cst_61 = arith.constant dense<0.000000e+00> : vector<16x64xf32>
    %149 = tpu.matmul %148, %147, %cst_61 {dimension_numbers = #tpu.dot_dimension_numbers<[1], [0], [0], [1], [0, 0, 1, 1], [], []>} : vector<16x64xbf16>, vector<64x64xbf16>, vector<16x64xf32> -> vector<16x64xf32>
    %150 = arith.addf %13, %149 : vector<16x64xf32>
    %c0_62 = arith.constant 0 : index
    %c0_63 = arith.constant 0 : index
    %c0_64 = arith.constant 0 : index
    %151 = vector.load %arg16[%c0_62, %c0_63, %c0_64] : memref<2x1x64xf32, #tpu.memory_space<vmem>>, vector<1x1x64xf32>
    %152 = vector.shape_cast %151 : vector<1x1x64xf32> to vector<1x64xf32>
    %153 = vector.broadcast %152 : vector<1x64xf32> to vector<16x64xf32>
    %154 = arith.addf %150, %153 : vector<16x64xf32>
    %c0_65 = arith.constant 0 : index
    %c0_66 = arith.constant 0 : index
    %c0_67 = arith.constant 0 : index
    %155 = vector.load %arg17[%c0_65, %c0_66, %c0_67] : memref<2x1x64xf32, #tpu.memory_space<vmem>>, vector<1x1x64xf32>
    %156 = vector.shape_cast %155 : vector<1x1x64xf32> to vector<1x64xf32>
    %c0_68 = arith.constant 0 : index
    %c0_69 = arith.constant 0 : index
    %c0_70 = arith.constant 0 : index
    %157 = vector.load %arg18[%c0_68, %c0_69, %c0_70] : memref<2x1x64xf32, #tpu.memory_space<vmem>>, vector<1x1x64xf32>
    %158 = vector.shape_cast %157 : vector<1x1x64xf32> to vector<1x64xf32>
    %cst_71 = arith.constant dense<0.000000e+00> : vector<16xf32>
    %159 = vector.multi_reduction <add>, %154, %cst_71 [1] : vector<16x64xf32> to vector<16xf32>
    %160 = vector.shape_cast %159 : vector<16xf32> to vector<16x1xf32>
    %cst_72 = arith.constant 6.400000e+01 : f32
    %161 = vector.broadcast %cst_72 : f32 to vector<16x1xf32>
    %162 = arith.divf %160, %161 : vector<16x1xf32>
    %163 = vector.broadcast %162 : vector<16x1xf32> to vector<16x64xf32>
    %164 = arith.subf %154, %163 : vector<16x64xf32>
    %165 = arith.mulf %164, %164 : vector<16x64xf32>
    %cst_73 = arith.constant dense<0.000000e+00> : vector<16xf32>
    %166 = vector.multi_reduction <add>, %165, %cst_73 [1] : vector<16x64xf32> to vector<16xf32>
    %167 = vector.shape_cast %166 : vector<16xf32> to vector<16x1xf32>
    %cst_74 = arith.constant 6.400000e+01 : f32
    %168 = vector.broadcast %cst_74 : f32 to vector<16x1xf32>
    %169 = arith.divf %167, %168 : vector<16x1xf32>
    %170 = vector.broadcast %162 : vector<16x1xf32> to vector<16x64xf32>
    %171 = arith.subf %154, %170 : vector<16x64xf32>
    %cst_75 = arith.constant 9.99999997E-7 : f32
    %172 = vector.broadcast %cst_75 : f32 to vector<16x1xf32>
    %173 = arith.addf %169, %172 : vector<16x1xf32>
    %174 = math.rsqrt %173 : vector<16x1xf32>
    %175 = vector.broadcast %174 : vector<16x1xf32> to vector<16x64xf32>
    %176 = arith.mulf %171, %175 : vector<16x64xf32>
    %177 = vector.broadcast %156 : vector<1x64xf32> to vector<16x64xf32>
    %178 = arith.mulf %176, %177 : vector<16x64xf32>
    %179 = vector.broadcast %158 : vector<1x64xf32> to vector<16x64xf32>
    %180 = arith.addf %178, %179 : vector<16x64xf32>
    %c0_76 = arith.constant 0 : index
    %c0_77 = arith.constant 0 : index
    %c0_78 = arith.constant 0 : index
    %181 = vector.load %arg19[%c0_76, %c0_77, %c0_78] : memref<2x64x256xbf16, #tpu.memory_space<vmem>>, vector<1x64x256xbf16>
    %182 = vector.shape_cast %181 : vector<1x64x256xbf16> to vector<64x256xbf16>
    %183 = arith.truncf %180 : vector<16x64xf32> to vector<16x64xbf16>
    %cst_79 = arith.constant dense<0.000000e+00> : vector<16x256xf32>
    %184 = tpu.matmul %183, %182, %cst_79 {dimension_numbers = #tpu.dot_dimension_numbers<[1], [0], [0], [1], [0, 0, 1, 1], [], []>} : vector<16x64xbf16>, vector<64x256xbf16>, vector<16x256xf32> -> vector<16x256xf32>
    %c0_80 = arith.constant 0 : index
    %c0_81 = arith.constant 0 : index
    %c0_82 = arith.constant 0 : index
    %185 = vector.load %arg20[%c0_80, %c0_81, %c0_82] : memref<2x1x256xf32, #tpu.memory_space<vmem>>, vector<1x1x256xf32>
    %186 = vector.shape_cast %185 : vector<1x1x256xf32> to vector<1x256xf32>
    %187 = vector.broadcast %186 : vector<1x256xf32> to vector<16x256xf32>
    %188 = arith.addf %184, %187 : vector<16x256xf32>
    %cst_83 = arith.constant 5.000000e-01 : f32
    %189 = vector.broadcast %cst_83 : f32 to vector<16x256xf32>
    %190 = arith.mulf %189, %188 : vector<16x256xf32>
    %cst_84 = arith.constant 0.707106769 : f32
    %191 = vector.broadcast %cst_84 : f32 to vector<16x256xf32>
    %192 = arith.mulf %188, %191 : vector<16x256xf32>
    %193 = math.erf %192 : vector<16x256xf32>
    %cst_85 = arith.constant 1.000000e+00 : f32
    %194 = vector.broadcast %cst_85 : f32 to vector<16x256xf32>
    %195 = arith.addf %194, %193 : vector<16x256xf32>
    %196 = arith.mulf %190, %195 : vector<16x256xf32>
    %c0_86 = arith.constant 0 : index
    %c0_87 = arith.constant 0 : index
    %c0_88 = arith.constant 0 : index
    %197 = vector.load %arg21[%c0_86, %c0_87, %c0_88] : memref<2x256x64xbf16, #tpu.memory_space<vmem>>, vector<1x256x64xbf16>
    %198 = vector.shape_cast %197 : vector<1x256x64xbf16> to vector<256x64xbf16>
    %199 = arith.truncf %196 : vector<16x256xf32> to vector<16x256xbf16>
    %cst_89 = arith.constant dense<0.000000e+00> : vector<16x64xf32>
    %200 = tpu.matmul %199, %198, %cst_89 {dimension_numbers = #tpu.dot_dimension_numbers<[1], [0], [0], [1], [0, 0, 1, 1], [], []>} : vector<16x256xbf16>, vector<256x64xbf16>, vector<16x64xf32> -> vector<16x64xf32>
    %201 = arith.addf %154, %200 : vector<16x64xf32>
    %c0_90 = arith.constant 0 : index
    %c0_91 = arith.constant 0 : index
    %c0_92 = arith.constant 0 : index
    %202 = vector.load %arg22[%c0_90, %c0_91, %c0_92] : memref<2x1x64xf32, #tpu.memory_space<vmem>>, vector<1x1x64xf32>
    %203 = vector.shape_cast %202 : vector<1x1x64xf32> to vector<1x64xf32>
    %204 = vector.broadcast %203 : vector<1x64xf32> to vector<16x64xf32>
    %205 = arith.addf %201, %204 : vector<16x64xf32>
    %c1 = arith.constant 1 : index
    %c0_93 = arith.constant 0 : index
    %c0_94 = arith.constant 0 : index
    %206 = vector.load %arg11[%c1, %c0_93, %c0_94] : memref<2x1x64xf32, #tpu.memory_space<vmem>>, vector<1x1x64xf32>
    %207 = vector.shape_cast %206 : vector<1x1x64xf32> to vector<1x64xf32>
    %c1_95 = arith.constant 1 : index
    %c0_96 = arith.constant 0 : index
    %c0_97 = arith.constant 0 : index
    %208 = vector.load %arg12[%c1_95, %c0_96, %c0_97] : memref<2x1x64xf32, #tpu.memory_space<vmem>>, vector<1x1x64xf32>
    %209 = vector.shape_cast %208 : vector<1x1x64xf32> to vector<1x64xf32>
    %cst_98 = arith.constant dense<0.000000e+00> : vector<16xf32>
    %210 = vector.multi_reduction <add>, %205, %cst_98 [1] : vector<16x64xf32> to vector<16xf32>
    %211 = vector.shape_cast %210 : vector<16xf32> to vector<16x1xf32>
    %cst_99 = arith.constant 6.400000e+01 : f32
    %212 = vector.broadcast %cst_99 : f32 to vector<16x1xf32>
    %213 = arith.divf %211, %212 : vector<16x1xf32>
    %214 = vector.broadcast %213 : vector<16x1xf32> to vector<16x64xf32>
    %215 = arith.subf %205, %214 : vector<16x64xf32>
    %216 = arith.mulf %215, %215 : vector<16x64xf32>
    %cst_100 = arith.constant dense<0.000000e+00> : vector<16xf32>
    %217 = vector.multi_reduction <add>, %216, %cst_100 [1] : vector<16x64xf32> to vector<16xf32>
    %218 = vector.shape_cast %217 : vector<16xf32> to vector<16x1xf32>
    %cst_101 = arith.constant 6.400000e+01 : f32
    %219 = vector.broadcast %cst_101 : f32 to vector<16x1xf32>
    %220 = arith.divf %218, %219 : vector<16x1xf32>
    %221 = vector.broadcast %213 : vector<16x1xf32> to vector<16x64xf32>
    %222 = arith.subf %205, %221 : vector<16x64xf32>
    %cst_102 = arith.constant 9.99999997E-7 : f32
    %223 = vector.broadcast %cst_102 : f32 to vector<16x1xf32>
    %224 = arith.addf %220, %223 : vector<16x1xf32>
    %225 = math.rsqrt %224 : vector<16x1xf32>
    %226 = vector.broadcast %225 : vector<16x1xf32> to vector<16x64xf32>
    %227 = arith.mulf %222, %226 : vector<16x64xf32>
    %228 = vector.broadcast %207 : vector<1x64xf32> to vector<16x64xf32>
    %229 = arith.mulf %227, %228 : vector<16x64xf32>
    %230 = vector.broadcast %209 : vector<1x64xf32> to vector<16x64xf32>
    %231 = arith.addf %229, %230 : vector<16x64xf32>
    %c1_103 = arith.constant 1 : index
    %c0_104 = arith.constant 0 : index
    %c0_105 = arith.constant 0 : index
    %232 = vector.load %arg13[%c1_103, %c0_104, %c0_105] : memref<2x64x192xbf16, #tpu.memory_space<vmem>>, vector<1x64x192xbf16>
    %233 = vector.shape_cast %232 : vector<1x64x192xbf16> to vector<64x192xbf16>
    %234 = arith.truncf %231 : vector<16x64xf32> to vector<16x64xbf16>
    %cst_106 = arith.constant dense<0.000000e+00> : vector<16x192xf32>
    %235 = tpu.matmul %234, %233, %cst_106 {dimension_numbers = #tpu.dot_dimension_numbers<[1], [0], [0], [1], [0, 0, 1, 1], [], []>} : vector<16x64xbf16>, vector<64x192xbf16>, vector<16x192xf32> -> vector<16x192xf32>
    %c1_107 = arith.constant 1 : index
    %c0_108 = arith.constant 0 : index
    %c0_109 = arith.constant 0 : index
    %236 = vector.load %arg14[%c1_107, %c0_108, %c0_109] : memref<2x1x192xf32, #tpu.memory_space<vmem>>, vector<1x1x192xf32>
    %237 = vector.shape_cast %236 : vector<1x1x192xf32> to vector<1x192xf32>
    %238 = vector.broadcast %237 : vector<1x192xf32> to vector<16x192xf32>
    %239 = arith.addf %235, %238 : vector<16x192xf32>
    %240 = vector.extract_strided_slice %239 {offsets = [0, 0], sizes = [16, 64], strides = [1, 1]} : vector<16x192xf32> to vector<16x64xf32>
    %241 = vector.extract_strided_slice %239 {offsets = [0, 64], sizes = [16, 64], strides = [1, 1]} : vector<16x192xf32> to vector<16x64xf32>
    %242 = vector.extract_strided_slice %239 {offsets = [0, 128], sizes = [16, 64], strides = [1, 1]} : vector<16x192xf32> to vector<16x64xf32>
    %243 = arith.mulf %240, %0 : vector<16x64xf32>
    %244 = arith.truncf %240 : vector<16x64xf32> to vector<16x64xbf16>
    %cst_110 = arith.constant dense<0.000000e+00> : vector<16x64xf32>
    %245 = tpu.matmul %244, %2, %cst_110 {dimension_numbers = #tpu.dot_dimension_numbers<[1], [0], [0], [1], [0, 0, 1, 1], [], []>} : vector<16x64xbf16>, vector<64x64xbf16>, vector<16x64xf32> -> vector<16x64xf32>
    %246 = arith.mulf %245, %1 : vector<16x64xf32>
    %247 = arith.addf %243, %246 : vector<16x64xf32>
    %248 = arith.mulf %241, %0 : vector<16x64xf32>
    %249 = arith.truncf %241 : vector<16x64xf32> to vector<16x64xbf16>
    %cst_111 = arith.constant dense<0.000000e+00> : vector<16x64xf32>
    %250 = tpu.matmul %249, %2, %cst_111 {dimension_numbers = #tpu.dot_dimension_numbers<[1], [0], [0], [1], [0, 0, 1, 1], [], []>} : vector<16x64xbf16>, vector<64x64xbf16>, vector<16x64xf32> -> vector<16x64xf32>
    %251 = arith.mulf %250, %1 : vector<16x64xf32>
    %252 = arith.addf %248, %251 : vector<16x64xf32>
    %253 = vector.extract_strided_slice %247 {offsets = [0, 0], sizes = [16, 16], strides = [1, 1]} : vector<16x64xf32> to vector<16x16xf32>
    %254 = arith.truncf %253 : vector<16x16xf32> to vector<16x16xbf16>
    %255 = vector.extract_strided_slice %252 {offsets = [0, 0], sizes = [16, 16], strides = [1, 1]} : vector<16x64xf32> to vector<16x16xf32>
    %256 = arith.truncf %255 : vector<16x16xf32> to vector<16x16xbf16>
    %257 = vector.extract_strided_slice %242 {offsets = [0, 0], sizes = [16, 16], strides = [1, 1]} : vector<16x64xf32> to vector<16x16xf32>
    %258 = arith.truncf %257 : vector<16x16xf32> to vector<16x16xbf16>
    %cst_112 = arith.constant dense<0.000000e+00> : vector<16x16xf32>
    %259 = tpu.matmul %254, %256, %cst_112 {dimension_numbers = #tpu.dot_dimension_numbers<[1], [1], [0], [0], [0, 0, 1, 0], [], []>} : vector<16x16xbf16>, vector<16x16xbf16>, vector<16x16xf32> -> vector<16x16xf32>
    %cst_113 = arith.constant 2.500000e-01 : f32
    %260 = vector.broadcast %cst_113 : f32 to vector<16x16xf32>
    %261 = arith.mulf %259, %260 : vector<16x16xf32>
    %cst_114 = arith.constant dense<0xFF800000> : vector<16xf32>
    %262 = vector.multi_reduction <maximumf>, %261, %cst_114 [1] : vector<16x16xf32> to vector<16xf32>
    %263 = vector.shape_cast %262 : vector<16xf32> to vector<16x1xf32>
    %264 = vector.broadcast %263 : vector<16x1xf32> to vector<16x16xf32>
    %265 = arith.subf %261, %264 : vector<16x16xf32>
    %266 = math.exp %265 : vector<16x16xf32>
    %cst_115 = arith.constant dense<0.000000e+00> : vector<16xf32>
    %267 = vector.multi_reduction <add>, %266, %cst_115 [1] : vector<16x16xf32> to vector<16xf32>
    %268 = vector.shape_cast %267 : vector<16xf32> to vector<16x1xf32>
    %269 = tpu.reciprocal %268 {approx = true} : vector<16x1xf32> -> vector<16x1xf32>
    %270 = vector.broadcast %269 : vector<16x1xf32> to vector<16x16xf32>
    %271 = arith.mulf %266, %270 : vector<16x16xf32>
    %272 = arith.truncf %271 : vector<16x16xf32> to vector<16x16xbf16>
    %cst_116 = arith.constant dense<0.000000e+00> : vector<16x16xf32>
    %273 = tpu.matmul %272, %258, %cst_116 {dimension_numbers = #tpu.dot_dimension_numbers<[1], [0], [0], [1], [0, 0, 1, 1], [], []>} : vector<16x16xbf16>, vector<16x16xbf16>, vector<16x16xf32> -> vector<16x16xf32>
    %274 = vector.extract_strided_slice %247 {offsets = [0, 16], sizes = [16, 16], strides = [1, 1]} : vector<16x64xf32> to vector<16x16xf32>
    %275 = arith.truncf %274 : vector<16x16xf32> to vector<16x16xbf16>
    %276 = vector.extract_strided_slice %252 {offsets = [0, 16], sizes = [16, 16], strides = [1, 1]} : vector<16x64xf32> to vector<16x16xf32>
    %277 = arith.truncf %276 : vector<16x16xf32> to vector<16x16xbf16>
    %278 = vector.extract_strided_slice %242 {offsets = [0, 16], sizes = [16, 16], strides = [1, 1]} : vector<16x64xf32> to vector<16x16xf32>
    %279 = arith.truncf %278 : vector<16x16xf32> to vector<16x16xbf16>
    %cst_117 = arith.constant dense<0.000000e+00> : vector<16x16xf32>
    %280 = tpu.matmul %275, %277, %cst_117 {dimension_numbers = #tpu.dot_dimension_numbers<[1], [1], [0], [0], [0, 0, 1, 0], [], []>} : vector<16x16xbf16>, vector<16x16xbf16>, vector<16x16xf32> -> vector<16x16xf32>
    %cst_118 = arith.constant 2.500000e-01 : f32
    %281 = vector.broadcast %cst_118 : f32 to vector<16x16xf32>
    %282 = arith.mulf %280, %281 : vector<16x16xf32>
    %cst_119 = arith.constant dense<0xFF800000> : vector<16xf32>
    %283 = vector.multi_reduction <maximumf>, %282, %cst_119 [1] : vector<16x16xf32> to vector<16xf32>
    %284 = vector.shape_cast %283 : vector<16xf32> to vector<16x1xf32>
    %285 = vector.broadcast %284 : vector<16x1xf32> to vector<16x16xf32>
    %286 = arith.subf %282, %285 : vector<16x16xf32>
    %287 = math.exp %286 : vector<16x16xf32>
    %cst_120 = arith.constant dense<0.000000e+00> : vector<16xf32>
    %288 = vector.multi_reduction <add>, %287, %cst_120 [1] : vector<16x16xf32> to vector<16xf32>
    %289 = vector.shape_cast %288 : vector<16xf32> to vector<16x1xf32>
    %290 = tpu.reciprocal %289 {approx = true} : vector<16x1xf32> -> vector<16x1xf32>
    %291 = vector.broadcast %290 : vector<16x1xf32> to vector<16x16xf32>
    %292 = arith.mulf %287, %291 : vector<16x16xf32>
    %293 = arith.truncf %292 : vector<16x16xf32> to vector<16x16xbf16>
    %cst_121 = arith.constant dense<0.000000e+00> : vector<16x16xf32>
    %294 = tpu.matmul %293, %279, %cst_121 {dimension_numbers = #tpu.dot_dimension_numbers<[1], [0], [0], [1], [0, 0, 1, 1], [], []>} : vector<16x16xbf16>, vector<16x16xbf16>, vector<16x16xf32> -> vector<16x16xf32>
    %295 = vector.extract_strided_slice %247 {offsets = [0, 32], sizes = [16, 16], strides = [1, 1]} : vector<16x64xf32> to vector<16x16xf32>
    %296 = arith.truncf %295 : vector<16x16xf32> to vector<16x16xbf16>
    %297 = vector.extract_strided_slice %252 {offsets = [0, 32], sizes = [16, 16], strides = [1, 1]} : vector<16x64xf32> to vector<16x16xf32>
    %298 = arith.truncf %297 : vector<16x16xf32> to vector<16x16xbf16>
    %299 = vector.extract_strided_slice %242 {offsets = [0, 32], sizes = [16, 16], strides = [1, 1]} : vector<16x64xf32> to vector<16x16xf32>
    %300 = arith.truncf %299 : vector<16x16xf32> to vector<16x16xbf16>
    %cst_122 = arith.constant dense<0.000000e+00> : vector<16x16xf32>
    %301 = tpu.matmul %296, %298, %cst_122 {dimension_numbers = #tpu.dot_dimension_numbers<[1], [1], [0], [0], [0, 0, 1, 0], [], []>} : vector<16x16xbf16>, vector<16x16xbf16>, vector<16x16xf32> -> vector<16x16xf32>
    %cst_123 = arith.constant 2.500000e-01 : f32
    %302 = vector.broadcast %cst_123 : f32 to vector<16x16xf32>
    %303 = arith.mulf %301, %302 : vector<16x16xf32>
    %cst_124 = arith.constant dense<0xFF800000> : vector<16xf32>
    %304 = vector.multi_reduction <maximumf>, %303, %cst_124 [1] : vector<16x16xf32> to vector<16xf32>
    %305 = vector.shape_cast %304 : vector<16xf32> to vector<16x1xf32>
    %306 = vector.broadcast %305 : vector<16x1xf32> to vector<16x16xf32>
    %307 = arith.subf %303, %306 : vector<16x16xf32>
    %308 = math.exp %307 : vector<16x16xf32>
    %cst_125 = arith.constant dense<0.000000e+00> : vector<16xf32>
    %309 = vector.multi_reduction <add>, %308, %cst_125 [1] : vector<16x16xf32> to vector<16xf32>
    %310 = vector.shape_cast %309 : vector<16xf32> to vector<16x1xf32>
    %311 = tpu.reciprocal %310 {approx = true} : vector<16x1xf32> -> vector<16x1xf32>
    %312 = vector.broadcast %311 : vector<16x1xf32> to vector<16x16xf32>
    %313 = arith.mulf %308, %312 : vector<16x16xf32>
    %314 = arith.truncf %313 : vector<16x16xf32> to vector<16x16xbf16>
    %cst_126 = arith.constant dense<0.000000e+00> : vector<16x16xf32>
    %315 = tpu.matmul %314, %300, %cst_126 {dimension_numbers = #tpu.dot_dimension_numbers<[1], [0], [0], [1], [0, 0, 1, 1], [], []>} : vector<16x16xbf16>, vector<16x16xbf16>, vector<16x16xf32> -> vector<16x16xf32>
    %316 = vector.extract_strided_slice %247 {offsets = [0, 48], sizes = [16, 16], strides = [1, 1]} : vector<16x64xf32> to vector<16x16xf32>
    %317 = arith.truncf %316 : vector<16x16xf32> to vector<16x16xbf16>
    %318 = vector.extract_strided_slice %252 {offsets = [0, 48], sizes = [16, 16], strides = [1, 1]} : vector<16x64xf32> to vector<16x16xf32>
    %319 = arith.truncf %318 : vector<16x16xf32> to vector<16x16xbf16>
    %320 = vector.extract_strided_slice %242 {offsets = [0, 48], sizes = [16, 16], strides = [1, 1]} : vector<16x64xf32> to vector<16x16xf32>
    %321 = arith.truncf %320 : vector<16x16xf32> to vector<16x16xbf16>
    %cst_127 = arith.constant dense<0.000000e+00> : vector<16x16xf32>
    %322 = tpu.matmul %317, %319, %cst_127 {dimension_numbers = #tpu.dot_dimension_numbers<[1], [1], [0], [0], [0, 0, 1, 0], [], []>} : vector<16x16xbf16>, vector<16x16xbf16>, vector<16x16xf32> -> vector<16x16xf32>
    %cst_128 = arith.constant 2.500000e-01 : f32
    %323 = vector.broadcast %cst_128 : f32 to vector<16x16xf32>
    %324 = arith.mulf %322, %323 : vector<16x16xf32>
    %cst_129 = arith.constant dense<0xFF800000> : vector<16xf32>
    %325 = vector.multi_reduction <maximumf>, %324, %cst_129 [1] : vector<16x16xf32> to vector<16xf32>
    %326 = vector.shape_cast %325 : vector<16xf32> to vector<16x1xf32>
    %327 = vector.broadcast %326 : vector<16x1xf32> to vector<16x16xf32>
    %328 = arith.subf %324, %327 : vector<16x16xf32>
    %329 = math.exp %328 : vector<16x16xf32>
    %cst_130 = arith.constant dense<0.000000e+00> : vector<16xf32>
    %330 = vector.multi_reduction <add>, %329, %cst_130 [1] : vector<16x16xf32> to vector<16xf32>
    %331 = vector.shape_cast %330 : vector<16xf32> to vector<16x1xf32>
    %332 = tpu.reciprocal %331 {approx = true} : vector<16x1xf32> -> vector<16x1xf32>
    %333 = vector.broadcast %332 : vector<16x1xf32> to vector<16x16xf32>
    %334 = arith.mulf %329, %333 : vector<16x16xf32>
    %335 = arith.truncf %334 : vector<16x16xf32> to vector<16x16xbf16>
    %cst_131 = arith.constant dense<0.000000e+00> : vector<16x16xf32>
    %336 = tpu.matmul %335, %321, %cst_131 {dimension_numbers = #tpu.dot_dimension_numbers<[1], [0], [0], [1], [0, 0, 1, 1], [], []>} : vector<16x16xbf16>, vector<16x16xbf16>, vector<16x16xf32> -> vector<16x16xf32>
    %337 = tpu.concatenate %273, %294, %315, %336 in 1 : vector<16x16xf32>, vector<16x16xf32>, vector<16x16xf32>, vector<16x16xf32> -> vector<16x64xf32>
    %c1_132 = arith.constant 1 : index
    %c0_133 = arith.constant 0 : index
    %c0_134 = arith.constant 0 : index
    %338 = vector.load %arg15[%c1_132, %c0_133, %c0_134] : memref<2x64x64xbf16, #tpu.memory_space<vmem>>, vector<1x64x64xbf16>
    %339 = vector.shape_cast %338 : vector<1x64x64xbf16> to vector<64x64xbf16>
    %340 = arith.truncf %337 : vector<16x64xf32> to vector<16x64xbf16>
    %cst_135 = arith.constant dense<0.000000e+00> : vector<16x64xf32>
    %341 = tpu.matmul %340, %339, %cst_135 {dimension_numbers = #tpu.dot_dimension_numbers<[1], [0], [0], [1], [0, 0, 1, 1], [], []>} : vector<16x64xbf16>, vector<64x64xbf16>, vector<16x64xf32> -> vector<16x64xf32>
    %342 = arith.addf %205, %341 : vector<16x64xf32>
    %c1_136 = arith.constant 1 : index
    %c0_137 = arith.constant 0 : index
    %c0_138 = arith.constant 0 : index
    %343 = vector.load %arg16[%c1_136, %c0_137, %c0_138] : memref<2x1x64xf32, #tpu.memory_space<vmem>>, vector<1x1x64xf32>
    %344 = vector.shape_cast %343 : vector<1x1x64xf32> to vector<1x64xf32>
    %345 = vector.broadcast %344 : vector<1x64xf32> to vector<16x64xf32>
    %346 = arith.addf %342, %345 : vector<16x64xf32>
    %c1_139 = arith.constant 1 : index
    %c0_140 = arith.constant 0 : index
    %c0_141 = arith.constant 0 : index
    %347 = vector.load %arg17[%c1_139, %c0_140, %c0_141] : memref<2x1x64xf32, #tpu.memory_space<vmem>>, vector<1x1x64xf32>
    %348 = vector.shape_cast %347 : vector<1x1x64xf32> to vector<1x64xf32>
    %c1_142 = arith.constant 1 : index
    %c0_143 = arith.constant 0 : index
    %c0_144 = arith.constant 0 : index
    %349 = vector.load %arg18[%c1_142, %c0_143, %c0_144] : memref<2x1x64xf32, #tpu.memory_space<vmem>>, vector<1x1x64xf32>
    %350 = vector.shape_cast %349 : vector<1x1x64xf32> to vector<1x64xf32>
    %cst_145 = arith.constant dense<0.000000e+00> : vector<16xf32>
    %351 = vector.multi_reduction <add>, %346, %cst_145 [1] : vector<16x64xf32> to vector<16xf32>
    %352 = vector.shape_cast %351 : vector<16xf32> to vector<16x1xf32>
    %cst_146 = arith.constant 6.400000e+01 : f32
    %353 = vector.broadcast %cst_146 : f32 to vector<16x1xf32>
    %354 = arith.divf %352, %353 : vector<16x1xf32>
    %355 = vector.broadcast %354 : vector<16x1xf32> to vector<16x64xf32>
    %356 = arith.subf %346, %355 : vector<16x64xf32>
    %357 = arith.mulf %356, %356 : vector<16x64xf32>
    %cst_147 = arith.constant dense<0.000000e+00> : vector<16xf32>
    %358 = vector.multi_reduction <add>, %357, %cst_147 [1] : vector<16x64xf32> to vector<16xf32>
    %359 = vector.shape_cast %358 : vector<16xf32> to vector<16x1xf32>
    %cst_148 = arith.constant 6.400000e+01 : f32
    %360 = vector.broadcast %cst_148 : f32 to vector<16x1xf32>
    %361 = arith.divf %359, %360 : vector<16x1xf32>
    %362 = vector.broadcast %354 : vector<16x1xf32> to vector<16x64xf32>
    %363 = arith.subf %346, %362 : vector<16x64xf32>
    %cst_149 = arith.constant 9.99999997E-7 : f32
    %364 = vector.broadcast %cst_149 : f32 to vector<16x1xf32>
    %365 = arith.addf %361, %364 : vector<16x1xf32>
    %366 = math.rsqrt %365 : vector<16x1xf32>
    %367 = vector.broadcast %366 : vector<16x1xf32> to vector<16x64xf32>
    %368 = arith.mulf %363, %367 : vector<16x64xf32>
    %369 = vector.broadcast %348 : vector<1x64xf32> to vector<16x64xf32>
    %370 = arith.mulf %368, %369 : vector<16x64xf32>
    %371 = vector.broadcast %350 : vector<1x64xf32> to vector<16x64xf32>
    %372 = arith.addf %370, %371 : vector<16x64xf32>
    %c1_150 = arith.constant 1 : index
    %c0_151 = arith.constant 0 : index
    %c0_152 = arith.constant 0 : index
    %373 = vector.load %arg19[%c1_150, %c0_151, %c0_152] : memref<2x64x256xbf16, #tpu.memory_space<vmem>>, vector<1x64x256xbf16>
    %374 = vector.shape_cast %373 : vector<1x64x256xbf16> to vector<64x256xbf16>
    %375 = arith.truncf %372 : vector<16x64xf32> to vector<16x64xbf16>
    %cst_153 = arith.constant dense<0.000000e+00> : vector<16x256xf32>
    %376 = tpu.matmul %375, %374, %cst_153 {dimension_numbers = #tpu.dot_dimension_numbers<[1], [0], [0], [1], [0, 0, 1, 1], [], []>} : vector<16x64xbf16>, vector<64x256xbf16>, vector<16x256xf32> -> vector<16x256xf32>
    %c1_154 = arith.constant 1 : index
    %c0_155 = arith.constant 0 : index
    %c0_156 = arith.constant 0 : index
    %377 = vector.load %arg20[%c1_154, %c0_155, %c0_156] : memref<2x1x256xf32, #tpu.memory_space<vmem>>, vector<1x1x256xf32>
    %378 = vector.shape_cast %377 : vector<1x1x256xf32> to vector<1x256xf32>
    %379 = vector.broadcast %378 : vector<1x256xf32> to vector<16x256xf32>
    %380 = arith.addf %376, %379 : vector<16x256xf32>
    %cst_157 = arith.constant 5.000000e-01 : f32
    %381 = vector.broadcast %cst_157 : f32 to vector<16x256xf32>
    %382 = arith.mulf %381, %380 : vector<16x256xf32>
    %cst_158 = arith.constant 0.707106769 : f32
    %383 = vector.broadcast %cst_158 : f32 to vector<16x256xf32>
    %384 = arith.mulf %380, %383 : vector<16x256xf32>
    %385 = math.erf %384 : vector<16x256xf32>
    %cst_159 = arith.constant 1.000000e+00 : f32
    %386 = vector.broadcast %cst_159 : f32 to vector<16x256xf32>
    %387 = arith.addf %386, %385 : vector<16x256xf32>
    %388 = arith.mulf %382, %387 : vector<16x256xf32>
    %c1_160 = arith.constant 1 : index
    %c0_161 = arith.constant 0 : index
    %c0_162 = arith.constant 0 : index
    %389 = vector.load %arg21[%c1_160, %c0_161, %c0_162] : memref<2x256x64xbf16, #tpu.memory_space<vmem>>, vector<1x256x64xbf16>
    %390 = vector.shape_cast %389 : vector<1x256x64xbf16> to vector<256x64xbf16>
    %391 = arith.truncf %388 : vector<16x256xf32> to vector<16x256xbf16>
    %cst_163 = arith.constant dense<0.000000e+00> : vector<16x64xf32>
    %392 = tpu.matmul %391, %390, %cst_163 {dimension_numbers = #tpu.dot_dimension_numbers<[1], [0], [0], [1], [0, 0, 1, 1], [], []>} : vector<16x256xbf16>, vector<256x64xbf16>, vector<16x64xf32> -> vector<16x64xf32>
    %393 = arith.addf %346, %392 : vector<16x64xf32>
    %c1_164 = arith.constant 1 : index
    %c0_165 = arith.constant 0 : index
    %c0_166 = arith.constant 0 : index
    %394 = vector.load %arg22[%c1_164, %c0_165, %c0_166] : memref<2x1x64xf32, #tpu.memory_space<vmem>>, vector<1x1x64xf32>
    %395 = vector.shape_cast %394 : vector<1x1x64xf32> to vector<1x64xf32>
    %396 = vector.broadcast %395 : vector<1x64xf32> to vector<16x64xf32>
    %397 = arith.addf %393, %396 : vector<16x64xf32>
    %c0_167 = arith.constant 0 : index
    %c0_168 = arith.constant 0 : index
    %398 = vector.load %arg23[%c0_167, %c0_168] : memref<1x64xf32, #tpu.memory_space<vmem>>, vector<1x64xf32>
    %c0_169 = arith.constant 0 : index
    %c0_170 = arith.constant 0 : index
    %399 = vector.load %arg24[%c0_169, %c0_170] : memref<1x64xf32, #tpu.memory_space<vmem>>, vector<1x64xf32>
    %cst_171 = arith.constant dense<0.000000e+00> : vector<16xf32>
    %400 = vector.multi_reduction <add>, %397, %cst_171 [1] : vector<16x64xf32> to vector<16xf32>
    %401 = vector.shape_cast %400 : vector<16xf32> to vector<16x1xf32>
    %cst_172 = arith.constant 6.400000e+01 : f32
    %402 = vector.broadcast %cst_172 : f32 to vector<16x1xf32>
    %403 = arith.divf %401, %402 : vector<16x1xf32>
    %404 = vector.broadcast %403 : vector<16x1xf32> to vector<16x64xf32>
    %405 = arith.subf %397, %404 : vector<16x64xf32>
    %406 = arith.mulf %405, %405 : vector<16x64xf32>
    %cst_173 = arith.constant dense<0.000000e+00> : vector<16xf32>
    %407 = vector.multi_reduction <add>, %406, %cst_173 [1] : vector<16x64xf32> to vector<16xf32>
    %408 = vector.shape_cast %407 : vector<16xf32> to vector<16x1xf32>
    %cst_174 = arith.constant 6.400000e+01 : f32
    %409 = vector.broadcast %cst_174 : f32 to vector<16x1xf32>
    %410 = arith.divf %408, %409 : vector<16x1xf32>
    %411 = vector.broadcast %403 : vector<16x1xf32> to vector<16x64xf32>
    %412 = arith.subf %397, %411 : vector<16x64xf32>
    %cst_175 = arith.constant 9.99999997E-7 : f32
    %413 = vector.broadcast %cst_175 : f32 to vector<16x1xf32>
    %414 = arith.addf %410, %413 : vector<16x1xf32>
    %415 = math.rsqrt %414 : vector<16x1xf32>
    %416 = vector.broadcast %415 : vector<16x1xf32> to vector<16x64xf32>
    %417 = arith.mulf %412, %416 : vector<16x64xf32>
    %418 = vector.broadcast %398 : vector<1x64xf32> to vector<16x64xf32>
    %419 = arith.mulf %417, %418 : vector<16x64xf32>
    %420 = vector.broadcast %399 : vector<1x64xf32> to vector<16x64xf32>
    %421 = arith.addf %419, %420 : vector<16x64xf32>
    %c0_176 = arith.constant 0 : index
    %c0_177 = arith.constant 0 : index
    %422 = vector.load %arg25[%c0_176, %c0_177] : memref<64x16xbf16, #tpu.memory_space<vmem>>, vector<64x16xbf16>
    %423 = arith.truncf %421 : vector<16x64xf32> to vector<16x64xbf16>
    %cst_178 = arith.constant dense<0.000000e+00> : vector<16x16xf32>
    %424 = tpu.matmul %423, %422, %cst_178 {dimension_numbers = #tpu.dot_dimension_numbers<[1], [0], [0], [1], [0, 0, 1, 1], [], []>} : vector<16x64xbf16>, vector<64x16xbf16>, vector<16x16xf32> -> vector<16x16xf32>
    %c0_179 = arith.constant 0 : index
    %c0_180 = arith.constant 0 : index
    %425 = vector.load %arg26[%c0_179, %c0_180] : memref<1x16xf32, #tpu.memory_space<vmem>>, vector<1x16xf32>
    %426 = vector.broadcast %425 : vector<1x16xf32> to vector<16x16xf32>
    %427 = arith.addf %424, %426 : vector<16x16xf32>
    %428 = vector.extract_strided_slice %427 {offsets = [0, 0], sizes = [16, 8], strides = [1, 1]} : vector<16x16xf32> to vector<16x8xf32>
    %429 = vector.extract_strided_slice %427 {offsets = [0, 8], sizes = [16, 8], strides = [1, 1]} : vector<16x16xf32> to vector<16x8xf32>
    %cst_181 = arith.constant -3.000000e+01 : f32
    %cst_182 = arith.constant 2.000000e+01 : f32
    %430 = vector.broadcast %cst_181 : f32 to vector<16x8xf32>
    %431 = arith.maximumf %430, %429 : vector<16x8xf32>
    %432 = vector.broadcast %cst_182 : f32 to vector<16x8xf32>
    %433 = arith.minimumf %432, %431 : vector<16x8xf32>
    %cst_183 = arith.constant 5.000000e-01 : f32
    %434 = vector.broadcast %cst_183 : f32 to vector<16x8xf32>
    %435 = arith.mulf %434, %433 : vector<16x8xf32>
    %436 = math.exp %435 : vector<16x8xf32>
    %c0_184 = arith.constant 0 : index
    %c0_185 = arith.constant 0 : index
    %c0_186 = arith.constant 0 : index
    %437 = vector.load %arg2[%c0_184, %c0_185, %c0_186] : memref<1x16x8xf32, #tpu.memory_space<vmem>>, vector<1x16x8xf32>
    %438 = vector.shape_cast %437 : vector<1x16x8xf32> to vector<16x8xf32>
    %439 = arith.mulf %436, %438 : vector<16x8xf32>
    %440 = arith.addf %428, %439 : vector<16x8xf32>
    %c0_187 = arith.constant 0 : index
    %c0_188 = arith.constant 0 : index
    %441 = vector.load %arg27[%c0_187, %c0_188] : memref<8x64xbf16, #tpu.memory_space<vmem>>, vector<8x64xbf16>
    %442 = arith.truncf %440 : vector<16x8xf32> to vector<16x8xbf16>
    %cst_189 = arith.constant dense<0.000000e+00> : vector<16x64xf32>
    %443 = tpu.matmul %442, %441, %cst_189 {dimension_numbers = #tpu.dot_dimension_numbers<[1], [0], [0], [1], [0, 0, 1, 1], [], []>} : vector<16x8xbf16>, vector<8x64xbf16>, vector<16x64xf32> -> vector<16x64xf32>
    %c0_190 = arith.constant 0 : index
    %c0_191 = arith.constant 0 : index
    %444 = vector.load %arg28[%c0_190, %c0_191] : memref<1x64xf32, #tpu.memory_space<vmem>>, vector<1x64xf32>
    %445 = vector.broadcast %444 : vector<1x64xf32> to vector<16x64xf32>
    %446 = arith.addf %443, %445 : vector<16x64xf32>
    %c0_192 = arith.constant 0 : index
    %c0_193 = arith.constant 0 : index
    %c0_194 = arith.constant 0 : index
    %447 = vector.load %arg29[%c0_192, %c0_193, %c0_194] : memref<2x1x64xf32, #tpu.memory_space<vmem>>, vector<1x1x64xf32>
    %448 = vector.shape_cast %447 : vector<1x1x64xf32> to vector<1x64xf32>
    %c0_195 = arith.constant 0 : index
    %c0_196 = arith.constant 0 : index
    %c0_197 = arith.constant 0 : index
    %449 = vector.load %arg30[%c0_195, %c0_196, %c0_197] : memref<2x1x64xf32, #tpu.memory_space<vmem>>, vector<1x1x64xf32>
    %450 = vector.shape_cast %449 : vector<1x1x64xf32> to vector<1x64xf32>
    %cst_198 = arith.constant dense<0.000000e+00> : vector<16xf32>
    %451 = vector.multi_reduction <add>, %446, %cst_198 [1] : vector<16x64xf32> to vector<16xf32>
    %452 = vector.shape_cast %451 : vector<16xf32> to vector<16x1xf32>
    %cst_199 = arith.constant 6.400000e+01 : f32
    %453 = vector.broadcast %cst_199 : f32 to vector<16x1xf32>
    %454 = arith.divf %452, %453 : vector<16x1xf32>
    %455 = vector.broadcast %454 : vector<16x1xf32> to vector<16x64xf32>
    %456 = arith.subf %446, %455 : vector<16x64xf32>
    %457 = arith.mulf %456, %456 : vector<16x64xf32>
    %cst_200 = arith.constant dense<0.000000e+00> : vector<16xf32>
    %458 = vector.multi_reduction <add>, %457, %cst_200 [1] : vector<16x64xf32> to vector<16xf32>
    %459 = vector.shape_cast %458 : vector<16xf32> to vector<16x1xf32>
    %cst_201 = arith.constant 6.400000e+01 : f32
    %460 = vector.broadcast %cst_201 : f32 to vector<16x1xf32>
    %461 = arith.divf %459, %460 : vector<16x1xf32>
    %462 = vector.broadcast %454 : vector<16x1xf32> to vector<16x64xf32>
    %463 = arith.subf %446, %462 : vector<16x64xf32>
    %cst_202 = arith.constant 9.99999997E-7 : f32
    %464 = vector.broadcast %cst_202 : f32 to vector<16x1xf32>
    %465 = arith.addf %461, %464 : vector<16x1xf32>
    %466 = math.rsqrt %465 : vector<16x1xf32>
    %467 = vector.broadcast %466 : vector<16x1xf32> to vector<16x64xf32>
    %468 = arith.mulf %463, %467 : vector<16x64xf32>
    %469 = vector.broadcast %448 : vector<1x64xf32> to vector<16x64xf32>
    %470 = arith.mulf %468, %469 : vector<16x64xf32>
    %471 = vector.broadcast %450 : vector<1x64xf32> to vector<16x64xf32>
    %472 = arith.addf %470, %471 : vector<16x64xf32>
    %c0_203 = arith.constant 0 : index
    %c0_204 = arith.constant 0 : index
    %c0_205 = arith.constant 0 : index
    %473 = vector.load %arg31[%c0_203, %c0_204, %c0_205] : memref<2x64x192xbf16, #tpu.memory_space<vmem>>, vector<1x64x192xbf16>
    %474 = vector.shape_cast %473 : vector<1x64x192xbf16> to vector<64x192xbf16>
    %475 = arith.truncf %472 : vector<16x64xf32> to vector<16x64xbf16>
    %cst_206 = arith.constant dense<0.000000e+00> : vector<16x192xf32>
    %476 = tpu.matmul %475, %474, %cst_206 {dimension_numbers = #tpu.dot_dimension_numbers<[1], [0], [0], [1], [0, 0, 1, 1], [], []>} : vector<16x64xbf16>, vector<64x192xbf16>, vector<16x192xf32> -> vector<16x192xf32>
    %c0_207 = arith.constant 0 : index
    %c0_208 = arith.constant 0 : index
    %c0_209 = arith.constant 0 : index
    %477 = vector.load %arg32[%c0_207, %c0_208, %c0_209] : memref<2x1x192xf32, #tpu.memory_space<vmem>>, vector<1x1x192xf32>
    %478 = vector.shape_cast %477 : vector<1x1x192xf32> to vector<1x192xf32>
    %479 = vector.broadcast %478 : vector<1x192xf32> to vector<16x192xf32>
    %480 = arith.addf %476, %479 : vector<16x192xf32>
    %481 = vector.extract_strided_slice %480 {offsets = [0, 0], sizes = [16, 64], strides = [1, 1]} : vector<16x192xf32> to vector<16x64xf32>
    %482 = vector.extract_strided_slice %480 {offsets = [0, 64], sizes = [16, 64], strides = [1, 1]} : vector<16x192xf32> to vector<16x64xf32>
    %483 = vector.extract_strided_slice %480 {offsets = [0, 128], sizes = [16, 64], strides = [1, 1]} : vector<16x192xf32> to vector<16x64xf32>
    %484 = arith.mulf %481, %3 : vector<16x64xf32>
    %485 = arith.truncf %481 : vector<16x64xf32> to vector<16x64xbf16>
    %cst_210 = arith.constant dense<0.000000e+00> : vector<16x64xf32>
    %486 = tpu.matmul %485, %5, %cst_210 {dimension_numbers = #tpu.dot_dimension_numbers<[1], [0], [0], [1], [0, 0, 1, 1], [], []>} : vector<16x64xbf16>, vector<64x64xbf16>, vector<16x64xf32> -> vector<16x64xf32>
    %487 = arith.mulf %486, %4 : vector<16x64xf32>
    %488 = arith.addf %484, %487 : vector<16x64xf32>
    %489 = arith.mulf %482, %3 : vector<16x64xf32>
    %490 = arith.truncf %482 : vector<16x64xf32> to vector<16x64xbf16>
    %cst_211 = arith.constant dense<0.000000e+00> : vector<16x64xf32>
    %491 = tpu.matmul %490, %5, %cst_211 {dimension_numbers = #tpu.dot_dimension_numbers<[1], [0], [0], [1], [0, 0, 1, 1], [], []>} : vector<16x64xbf16>, vector<64x64xbf16>, vector<16x64xf32> -> vector<16x64xf32>
    %492 = arith.mulf %491, %4 : vector<16x64xf32>
    %493 = arith.addf %489, %492 : vector<16x64xf32>
    %494 = vector.extract_strided_slice %488 {offsets = [0, 0], sizes = [16, 16], strides = [1, 1]} : vector<16x64xf32> to vector<16x16xf32>
    %495 = arith.truncf %494 : vector<16x16xf32> to vector<16x16xbf16>
    %496 = vector.extract_strided_slice %493 {offsets = [0, 0], sizes = [16, 16], strides = [1, 1]} : vector<16x64xf32> to vector<16x16xf32>
    %497 = arith.truncf %496 : vector<16x16xf32> to vector<16x16xbf16>
    %498 = vector.extract_strided_slice %483 {offsets = [0, 0], sizes = [16, 16], strides = [1, 1]} : vector<16x64xf32> to vector<16x16xf32>
    %499 = arith.truncf %498 : vector<16x16xf32> to vector<16x16xbf16>
    %cst_212 = arith.constant dense<0.000000e+00> : vector<16x16xf32>
    %500 = tpu.matmul %495, %497, %cst_212 {dimension_numbers = #tpu.dot_dimension_numbers<[1], [1], [0], [0], [0, 0, 1, 0], [], []>} : vector<16x16xbf16>, vector<16x16xbf16>, vector<16x16xf32> -> vector<16x16xf32>
    %cst_213 = arith.constant 2.500000e-01 : f32
    %501 = vector.broadcast %cst_213 : f32 to vector<16x16xf32>
    %502 = arith.mulf %500, %501 : vector<16x16xf32>
    %cst_214 = arith.constant dense<0xFF800000> : vector<16xf32>
    %503 = vector.multi_reduction <maximumf>, %502, %cst_214 [1] : vector<16x16xf32> to vector<16xf32>
    %504 = vector.shape_cast %503 : vector<16xf32> to vector<16x1xf32>
    %505 = vector.broadcast %504 : vector<16x1xf32> to vector<16x16xf32>
    %506 = arith.subf %502, %505 : vector<16x16xf32>
    %507 = math.exp %506 : vector<16x16xf32>
    %cst_215 = arith.constant dense<0.000000e+00> : vector<16xf32>
    %508 = vector.multi_reduction <add>, %507, %cst_215 [1] : vector<16x16xf32> to vector<16xf32>
    %509 = vector.shape_cast %508 : vector<16xf32> to vector<16x1xf32>
    %510 = tpu.reciprocal %509 {approx = true} : vector<16x1xf32> -> vector<16x1xf32>
    %511 = vector.broadcast %510 : vector<16x1xf32> to vector<16x16xf32>
    %512 = arith.mulf %507, %511 : vector<16x16xf32>
    %513 = arith.truncf %512 : vector<16x16xf32> to vector<16x16xbf16>
    %cst_216 = arith.constant dense<0.000000e+00> : vector<16x16xf32>
    %514 = tpu.matmul %513, %499, %cst_216 {dimension_numbers = #tpu.dot_dimension_numbers<[1], [0], [0], [1], [0, 0, 1, 1], [], []>} : vector<16x16xbf16>, vector<16x16xbf16>, vector<16x16xf32> -> vector<16x16xf32>
    %515 = vector.extract_strided_slice %488 {offsets = [0, 16], sizes = [16, 16], strides = [1, 1]} : vector<16x64xf32> to vector<16x16xf32>
    %516 = arith.truncf %515 : vector<16x16xf32> to vector<16x16xbf16>
    %517 = vector.extract_strided_slice %493 {offsets = [0, 16], sizes = [16, 16], strides = [1, 1]} : vector<16x64xf32> to vector<16x16xf32>
    %518 = arith.truncf %517 : vector<16x16xf32> to vector<16x16xbf16>
    %519 = vector.extract_strided_slice %483 {offsets = [0, 16], sizes = [16, 16], strides = [1, 1]} : vector<16x64xf32> to vector<16x16xf32>
    %520 = arith.truncf %519 : vector<16x16xf32> to vector<16x16xbf16>
    %cst_217 = arith.constant dense<0.000000e+00> : vector<16x16xf32>
    %521 = tpu.matmul %516, %518, %cst_217 {dimension_numbers = #tpu.dot_dimension_numbers<[1], [1], [0], [0], [0, 0, 1, 0], [], []>} : vector<16x16xbf16>, vector<16x16xbf16>, vector<16x16xf32> -> vector<16x16xf32>
    %cst_218 = arith.constant 2.500000e-01 : f32
    %522 = vector.broadcast %cst_218 : f32 to vector<16x16xf32>
    %523 = arith.mulf %521, %522 : vector<16x16xf32>
    %cst_219 = arith.constant dense<0xFF800000> : vector<16xf32>
    %524 = vector.multi_reduction <maximumf>, %523, %cst_219 [1] : vector<16x16xf32> to vector<16xf32>
    %525 = vector.shape_cast %524 : vector<16xf32> to vector<16x1xf32>
    %526 = vector.broadcast %525 : vector<16x1xf32> to vector<16x16xf32>
    %527 = arith.subf %523, %526 : vector<16x16xf32>
    %528 = math.exp %527 : vector<16x16xf32>
    %cst_220 = arith.constant dense<0.000000e+00> : vector<16xf32>
    %529 = vector.multi_reduction <add>, %528, %cst_220 [1] : vector<16x16xf32> to vector<16xf32>
    %530 = vector.shape_cast %529 : vector<16xf32> to vector<16x1xf32>
    %531 = tpu.reciprocal %530 {approx = true} : vector<16x1xf32> -> vector<16x1xf32>
    %532 = vector.broadcast %531 : vector<16x1xf32> to vector<16x16xf32>
    %533 = arith.mulf %528, %532 : vector<16x16xf32>
    %534 = arith.truncf %533 : vector<16x16xf32> to vector<16x16xbf16>
    %cst_221 = arith.constant dense<0.000000e+00> : vector<16x16xf32>
    %535 = tpu.matmul %534, %520, %cst_221 {dimension_numbers = #tpu.dot_dimension_numbers<[1], [0], [0], [1], [0, 0, 1, 1], [], []>} : vector<16x16xbf16>, vector<16x16xbf16>, vector<16x16xf32> -> vector<16x16xf32>
    %536 = vector.extract_strided_slice %488 {offsets = [0, 32], sizes = [16, 16], strides = [1, 1]} : vector<16x64xf32> to vector<16x16xf32>
    %537 = arith.truncf %536 : vector<16x16xf32> to vector<16x16xbf16>
    %538 = vector.extract_strided_slice %493 {offsets = [0, 32], sizes = [16, 16], strides = [1, 1]} : vector<16x64xf32> to vector<16x16xf32>
    %539 = arith.truncf %538 : vector<16x16xf32> to vector<16x16xbf16>
    %540 = vector.extract_strided_slice %483 {offsets = [0, 32], sizes = [16, 16], strides = [1, 1]} : vector<16x64xf32> to vector<16x16xf32>
    %541 = arith.truncf %540 : vector<16x16xf32> to vector<16x16xbf16>
    %cst_222 = arith.constant dense<0.000000e+00> : vector<16x16xf32>
    %542 = tpu.matmul %537, %539, %cst_222 {dimension_numbers = #tpu.dot_dimension_numbers<[1], [1], [0], [0], [0, 0, 1, 0], [], []>} : vector<16x16xbf16>, vector<16x16xbf16>, vector<16x16xf32> -> vector<16x16xf32>
    %cst_223 = arith.constant 2.500000e-01 : f32
    %543 = vector.broadcast %cst_223 : f32 to vector<16x16xf32>
    %544 = arith.mulf %542, %543 : vector<16x16xf32>
    %cst_224 = arith.constant dense<0xFF800000> : vector<16xf32>
    %545 = vector.multi_reduction <maximumf>, %544, %cst_224 [1] : vector<16x16xf32> to vector<16xf32>
    %546 = vector.shape_cast %545 : vector<16xf32> to vector<16x1xf32>
    %547 = vector.broadcast %546 : vector<16x1xf32> to vector<16x16xf32>
    %548 = arith.subf %544, %547 : vector<16x16xf32>
    %549 = math.exp %548 : vector<16x16xf32>
    %cst_225 = arith.constant dense<0.000000e+00> : vector<16xf32>
    %550 = vector.multi_reduction <add>, %549, %cst_225 [1] : vector<16x16xf32> to vector<16xf32>
    %551 = vector.shape_cast %550 : vector<16xf32> to vector<16x1xf32>
    %552 = tpu.reciprocal %551 {approx = true} : vector<16x1xf32> -> vector<16x1xf32>
    %553 = vector.broadcast %552 : vector<16x1xf32> to vector<16x16xf32>
    %554 = arith.mulf %549, %553 : vector<16x16xf32>
    %555 = arith.truncf %554 : vector<16x16xf32> to vector<16x16xbf16>
    %cst_226 = arith.constant dense<0.000000e+00> : vector<16x16xf32>
    %556 = tpu.matmul %555, %541, %cst_226 {dimension_numbers = #tpu.dot_dimension_numbers<[1], [0], [0], [1], [0, 0, 1, 1], [], []>} : vector<16x16xbf16>, vector<16x16xbf16>, vector<16x16xf32> -> vector<16x16xf32>
    %557 = vector.extract_strided_slice %488 {offsets = [0, 48], sizes = [16, 16], strides = [1, 1]} : vector<16x64xf32> to vector<16x16xf32>
    %558 = arith.truncf %557 : vector<16x16xf32> to vector<16x16xbf16>
    %559 = vector.extract_strided_slice %493 {offsets = [0, 48], sizes = [16, 16], strides = [1, 1]} : vector<16x64xf32> to vector<16x16xf32>
    %560 = arith.truncf %559 : vector<16x16xf32> to vector<16x16xbf16>
    %561 = vector.extract_strided_slice %483 {offsets = [0, 48], sizes = [16, 16], strides = [1, 1]} : vector<16x64xf32> to vector<16x16xf32>
    %562 = arith.truncf %561 : vector<16x16xf32> to vector<16x16xbf16>
    %cst_227 = arith.constant dense<0.000000e+00> : vector<16x16xf32>
    %563 = tpu.matmul %558, %560, %cst_227 {dimension_numbers = #tpu.dot_dimension_numbers<[1], [1], [0], [0], [0, 0, 1, 0], [], []>} : vector<16x16xbf16>, vector<16x16xbf16>, vector<16x16xf32> -> vector<16x16xf32>
    %cst_228 = arith.constant 2.500000e-01 : f32
    %564 = vector.broadcast %cst_228 : f32 to vector<16x16xf32>
    %565 = arith.mulf %563, %564 : vector<16x16xf32>
    %cst_229 = arith.constant dense<0xFF800000> : vector<16xf32>
    %566 = vector.multi_reduction <maximumf>, %565, %cst_229 [1] : vector<16x16xf32> to vector<16xf32>
    %567 = vector.shape_cast %566 : vector<16xf32> to vector<16x1xf32>
    %568 = vector.broadcast %567 : vector<16x1xf32> to vector<16x16xf32>
    %569 = arith.subf %565, %568 : vector<16x16xf32>
    %570 = math.exp %569 : vector<16x16xf32>
    %cst_230 = arith.constant dense<0.000000e+00> : vector<16xf32>
    %571 = vector.multi_reduction <add>, %570, %cst_230 [1] : vector<16x16xf32> to vector<16xf32>
    %572 = vector.shape_cast %571 : vector<16xf32> to vector<16x1xf32>
    %573 = tpu.reciprocal %572 {approx = true} : vector<16x1xf32> -> vector<16x1xf32>
    %574 = vector.broadcast %573 : vector<16x1xf32> to vector<16x16xf32>
    %575 = arith.mulf %570, %574 : vector<16x16xf32>
    %576 = arith.truncf %575 : vector<16x16xf32> to vector<16x16xbf16>
    %cst_231 = arith.constant dense<0.000000e+00> : vector<16x16xf32>
    %577 = tpu.matmul %576, %562, %cst_231 {dimension_numbers = #tpu.dot_dimension_numbers<[1], [0], [0], [1], [0, 0, 1, 1], [], []>} : vector<16x16xbf16>, vector<16x16xbf16>, vector<16x16xf32> -> vector<16x16xf32>
    %578 = tpu.concatenate %514, %535, %556, %577 in 1 : vector<16x16xf32>, vector<16x16xf32>, vector<16x16xf32>, vector<16x16xf32> -> vector<16x64xf32>
    %c0_232 = arith.constant 0 : index
    %c0_233 = arith.constant 0 : index
    %c0_234 = arith.constant 0 : index
    %579 = vector.load %arg33[%c0_232, %c0_233, %c0_234] : memref<2x64x64xbf16, #tpu.memory_space<vmem>>, vector<1x64x64xbf16>
    %580 = vector.shape_cast %579 : vector<1x64x64xbf16> to vector<64x64xbf16>
    %581 = arith.truncf %578 : vector<16x64xf32> to vector<16x64xbf16>
    %cst_235 = arith.constant dense<0.000000e+00> : vector<16x64xf32>
    %582 = tpu.matmul %581, %580, %cst_235 {dimension_numbers = #tpu.dot_dimension_numbers<[1], [0], [0], [1], [0, 0, 1, 1], [], []>} : vector<16x64xbf16>, vector<64x64xbf16>, vector<16x64xf32> -> vector<16x64xf32>
    %583 = arith.addf %446, %582 : vector<16x64xf32>
    %c0_236 = arith.constant 0 : index
    %c0_237 = arith.constant 0 : index
    %c0_238 = arith.constant 0 : index
    %584 = vector.load %arg34[%c0_236, %c0_237, %c0_238] : memref<2x1x64xf32, #tpu.memory_space<vmem>>, vector<1x1x64xf32>
    %585 = vector.shape_cast %584 : vector<1x1x64xf32> to vector<1x64xf32>
    %586 = vector.broadcast %585 : vector<1x64xf32> to vector<16x64xf32>
    %587 = arith.addf %583, %586 : vector<16x64xf32>
    %c0_239 = arith.constant 0 : index
    %c0_240 = arith.constant 0 : index
    %c0_241 = arith.constant 0 : index
    %588 = vector.load %arg35[%c0_239, %c0_240, %c0_241] : memref<2x1x64xf32, #tpu.memory_space<vmem>>, vector<1x1x64xf32>
    %589 = vector.shape_cast %588 : vector<1x1x64xf32> to vector<1x64xf32>
    %c0_242 = arith.constant 0 : index
    %c0_243 = arith.constant 0 : index
    %c0_244 = arith.constant 0 : index
    %590 = vector.load %arg36[%c0_242, %c0_243, %c0_244] : memref<2x1x64xf32, #tpu.memory_space<vmem>>, vector<1x1x64xf32>
    %591 = vector.shape_cast %590 : vector<1x1x64xf32> to vector<1x64xf32>
    %cst_245 = arith.constant dense<0.000000e+00> : vector<16xf32>
    %592 = vector.multi_reduction <add>, %587, %cst_245 [1] : vector<16x64xf32> to vector<16xf32>
    %593 = vector.shape_cast %592 : vector<16xf32> to vector<16x1xf32>
    %cst_246 = arith.constant 6.400000e+01 : f32
    %594 = vector.broadcast %cst_246 : f32 to vector<16x1xf32>
    %595 = arith.divf %593, %594 : vector<16x1xf32>
    %596 = vector.broadcast %595 : vector<16x1xf32> to vector<16x64xf32>
    %597 = arith.subf %587, %596 : vector<16x64xf32>
    %598 = arith.mulf %597, %597 : vector<16x64xf32>
    %cst_247 = arith.constant dense<0.000000e+00> : vector<16xf32>
    %599 = vector.multi_reduction <add>, %598, %cst_247 [1] : vector<16x64xf32> to vector<16xf32>
    %600 = vector.shape_cast %599 : vector<16xf32> to vector<16x1xf32>
    %cst_248 = arith.constant 6.400000e+01 : f32
    %601 = vector.broadcast %cst_248 : f32 to vector<16x1xf32>
    %602 = arith.divf %600, %601 : vector<16x1xf32>
    %603 = vector.broadcast %595 : vector<16x1xf32> to vector<16x64xf32>
    %604 = arith.subf %587, %603 : vector<16x64xf32>
    %cst_249 = arith.constant 9.99999997E-7 : f32
    %605 = vector.broadcast %cst_249 : f32 to vector<16x1xf32>
    %606 = arith.addf %602, %605 : vector<16x1xf32>
    %607 = math.rsqrt %606 : vector<16x1xf32>
    %608 = vector.broadcast %607 : vector<16x1xf32> to vector<16x64xf32>
    %609 = arith.mulf %604, %608 : vector<16x64xf32>
    %610 = vector.broadcast %589 : vector<1x64xf32> to vector<16x64xf32>
    %611 = arith.mulf %609, %610 : vector<16x64xf32>
    %612 = vector.broadcast %591 : vector<1x64xf32> to vector<16x64xf32>
    %613 = arith.addf %611, %612 : vector<16x64xf32>
    %c0_250 = arith.constant 0 : index
    %c0_251 = arith.constant 0 : index
    %c0_252 = arith.constant 0 : index
    %614 = vector.load %arg37[%c0_250, %c0_251, %c0_252] : memref<2x64x256xbf16, #tpu.memory_space<vmem>>, vector<1x64x256xbf16>
    %615 = vector.shape_cast %614 : vector<1x64x256xbf16> to vector<64x256xbf16>
    %616 = arith.truncf %613 : vector<16x64xf32> to vector<16x64xbf16>
    %cst_253 = arith.constant dense<0.000000e+00> : vector<16x256xf32>
    %617 = tpu.matmul %616, %615, %cst_253 {dimension_numbers = #tpu.dot_dimension_numbers<[1], [0], [0], [1], [0, 0, 1, 1], [], []>} : vector<16x64xbf16>, vector<64x256xbf16>, vector<16x256xf32> -> vector<16x256xf32>
    %c0_254 = arith.constant 0 : index
    %c0_255 = arith.constant 0 : index
    %c0_256 = arith.constant 0 : index
    %618 = vector.load %arg38[%c0_254, %c0_255, %c0_256] : memref<2x1x256xf32, #tpu.memory_space<vmem>>, vector<1x1x256xf32>
    %619 = vector.shape_cast %618 : vector<1x1x256xf32> to vector<1x256xf32>
    %620 = vector.broadcast %619 : vector<1x256xf32> to vector<16x256xf32>
    %621 = arith.addf %617, %620 : vector<16x256xf32>
    %cst_257 = arith.constant 5.000000e-01 : f32
    %622 = vector.broadcast %cst_257 : f32 to vector<16x256xf32>
    %623 = arith.mulf %622, %621 : vector<16x256xf32>
    %cst_258 = arith.constant 0.707106769 : f32
    %624 = vector.broadcast %cst_258 : f32 to vector<16x256xf32>
    %625 = arith.mulf %621, %624 : vector<16x256xf32>
    %626 = math.erf %625 : vector<16x256xf32>
    %cst_259 = arith.constant 1.000000e+00 : f32
    %627 = vector.broadcast %cst_259 : f32 to vector<16x256xf32>
    %628 = arith.addf %627, %626 : vector<16x256xf32>
    %629 = arith.mulf %623, %628 : vector<16x256xf32>
    %c0_260 = arith.constant 0 : index
    %c0_261 = arith.constant 0 : index
    %c0_262 = arith.constant 0 : index
    %630 = vector.load %arg39[%c0_260, %c0_261, %c0_262] : memref<2x256x64xbf16, #tpu.memory_space<vmem>>, vector<1x256x64xbf16>
    %631 = vector.shape_cast %630 : vector<1x256x64xbf16> to vector<256x64xbf16>
    %632 = arith.truncf %629 : vector<16x256xf32> to vector<16x256xbf16>
    %cst_263 = arith.constant dense<0.000000e+00> : vector<16x64xf32>
    %633 = tpu.matmul %632, %631, %cst_263 {dimension_numbers = #tpu.dot_dimension_numbers<[1], [0], [0], [1], [0, 0, 1, 1], [], []>} : vector<16x256xbf16>, vector<256x64xbf16>, vector<16x64xf32> -> vector<16x64xf32>
    %634 = arith.addf %587, %633 : vector<16x64xf32>
    %c0_264 = arith.constant 0 : index
    %c0_265 = arith.constant 0 : index
    %c0_266 = arith.constant 0 : index
    %635 = vector.load %arg40[%c0_264, %c0_265, %c0_266] : memref<2x1x64xf32, #tpu.memory_space<vmem>>, vector<1x1x64xf32>
    %636 = vector.shape_cast %635 : vector<1x1x64xf32> to vector<1x64xf32>
    %637 = vector.broadcast %636 : vector<1x64xf32> to vector<16x64xf32>
    %638 = arith.addf %634, %637 : vector<16x64xf32>
    %c1_267 = arith.constant 1 : index
    %c0_268 = arith.constant 0 : index
    %c0_269 = arith.constant 0 : index
    %639 = vector.load %arg29[%c1_267, %c0_268, %c0_269] : memref<2x1x64xf32, #tpu.memory_space<vmem>>, vector<1x1x64xf32>
    %640 = vector.shape_cast %639 : vector<1x1x64xf32> to vector<1x64xf32>
    %c1_270 = arith.constant 1 : index
    %c0_271 = arith.constant 0 : index
    %c0_272 = arith.constant 0 : index
    %641 = vector.load %arg30[%c1_270, %c0_271, %c0_272] : memref<2x1x64xf32, #tpu.memory_space<vmem>>, vector<1x1x64xf32>
    %642 = vector.shape_cast %641 : vector<1x1x64xf32> to vector<1x64xf32>
    %cst_273 = arith.constant dense<0.000000e+00> : vector<16xf32>
    %643 = vector.multi_reduction <add>, %638, %cst_273 [1] : vector<16x64xf32> to vector<16xf32>
    %644 = vector.shape_cast %643 : vector<16xf32> to vector<16x1xf32>
    %cst_274 = arith.constant 6.400000e+01 : f32
    %645 = vector.broadcast %cst_274 : f32 to vector<16x1xf32>
    %646 = arith.divf %644, %645 : vector<16x1xf32>
    %647 = vector.broadcast %646 : vector<16x1xf32> to vector<16x64xf32>
    %648 = arith.subf %638, %647 : vector<16x64xf32>
    %649 = arith.mulf %648, %648 : vector<16x64xf32>
    %cst_275 = arith.constant dense<0.000000e+00> : vector<16xf32>
    %650 = vector.multi_reduction <add>, %649, %cst_275 [1] : vector<16x64xf32> to vector<16xf32>
    %651 = vector.shape_cast %650 : vector<16xf32> to vector<16x1xf32>
    %cst_276 = arith.constant 6.400000e+01 : f32
    %652 = vector.broadcast %cst_276 : f32 to vector<16x1xf32>
    %653 = arith.divf %651, %652 : vector<16x1xf32>
    %654 = vector.broadcast %646 : vector<16x1xf32> to vector<16x64xf32>
    %655 = arith.subf %638, %654 : vector<16x64xf32>
    %cst_277 = arith.constant 9.99999997E-7 : f32
    %656 = vector.broadcast %cst_277 : f32 to vector<16x1xf32>
    %657 = arith.addf %653, %656 : vector<16x1xf32>
    %658 = math.rsqrt %657 : vector<16x1xf32>
    %659 = vector.broadcast %658 : vector<16x1xf32> to vector<16x64xf32>
    %660 = arith.mulf %655, %659 : vector<16x64xf32>
    %661 = vector.broadcast %640 : vector<1x64xf32> to vector<16x64xf32>
    %662 = arith.mulf %660, %661 : vector<16x64xf32>
    %663 = vector.broadcast %642 : vector<1x64xf32> to vector<16x64xf32>
    %664 = arith.addf %662, %663 : vector<16x64xf32>
    %c1_278 = arith.constant 1 : index
    %c0_279 = arith.constant 0 : index
    %c0_280 = arith.constant 0 : index
    %665 = vector.load %arg31[%c1_278, %c0_279, %c0_280] : memref<2x64x192xbf16, #tpu.memory_space<vmem>>, vector<1x64x192xbf16>
    %666 = vector.shape_cast %665 : vector<1x64x192xbf16> to vector<64x192xbf16>
    %667 = arith.truncf %664 : vector<16x64xf32> to vector<16x64xbf16>
    %cst_281 = arith.constant dense<0.000000e+00> : vector<16x192xf32>
    %668 = tpu.matmul %667, %666, %cst_281 {dimension_numbers = #tpu.dot_dimension_numbers<[1], [0], [0], [1], [0, 0, 1, 1], [], []>} : vector<16x64xbf16>, vector<64x192xbf16>, vector<16x192xf32> -> vector<16x192xf32>
    %c1_282 = arith.constant 1 : index
    %c0_283 = arith.constant 0 : index
    %c0_284 = arith.constant 0 : index
    %669 = vector.load %arg32[%c1_282, %c0_283, %c0_284] : memref<2x1x192xf32, #tpu.memory_space<vmem>>, vector<1x1x192xf32>
    %670 = vector.shape_cast %669 : vector<1x1x192xf32> to vector<1x192xf32>
    %671 = vector.broadcast %670 : vector<1x192xf32> to vector<16x192xf32>
    %672 = arith.addf %668, %671 : vector<16x192xf32>
    %673 = vector.extract_strided_slice %672 {offsets = [0, 0], sizes = [16, 64], strides = [1, 1]} : vector<16x192xf32> to vector<16x64xf32>
    %674 = vector.extract_strided_slice %672 {offsets = [0, 64], sizes = [16, 64], strides = [1, 1]} : vector<16x192xf32> to vector<16x64xf32>
    %675 = vector.extract_strided_slice %672 {offsets = [0, 128], sizes = [16, 64], strides = [1, 1]} : vector<16x192xf32> to vector<16x64xf32>
    %676 = arith.mulf %673, %3 : vector<16x64xf32>
    %677 = arith.truncf %673 : vector<16x64xf32> to vector<16x64xbf16>
    %cst_285 = arith.constant dense<0.000000e+00> : vector<16x64xf32>
    %678 = tpu.matmul %677, %5, %cst_285 {dimension_numbers = #tpu.dot_dimension_numbers<[1], [0], [0], [1], [0, 0, 1, 1], [], []>} : vector<16x64xbf16>, vector<64x64xbf16>, vector<16x64xf32> -> vector<16x64xf32>
    %679 = arith.mulf %678, %4 : vector<16x64xf32>
    %680 = arith.addf %676, %679 : vector<16x64xf32>
    %681 = arith.mulf %674, %3 : vector<16x64xf32>
    %682 = arith.truncf %674 : vector<16x64xf32> to vector<16x64xbf16>
    %cst_286 = arith.constant dense<0.000000e+00> : vector<16x64xf32>
    %683 = tpu.matmul %682, %5, %cst_286 {dimension_numbers = #tpu.dot_dimension_numbers<[1], [0], [0], [1], [0, 0, 1, 1], [], []>} : vector<16x64xbf16>, vector<64x64xbf16>, vector<16x64xf32> -> vector<16x64xf32>
    %684 = arith.mulf %683, %4 : vector<16x64xf32>
    %685 = arith.addf %681, %684 : vector<16x64xf32>
    %686 = vector.extract_strided_slice %680 {offsets = [0, 0], sizes = [16, 16], strides = [1, 1]} : vector<16x64xf32> to vector<16x16xf32>
    %687 = arith.truncf %686 : vector<16x16xf32> to vector<16x16xbf16>
    %688 = vector.extract_strided_slice %685 {offsets = [0, 0], sizes = [16, 16], strides = [1, 1]} : vector<16x64xf32> to vector<16x16xf32>
    %689 = arith.truncf %688 : vector<16x16xf32> to vector<16x16xbf16>
    %690 = vector.extract_strided_slice %675 {offsets = [0, 0], sizes = [16, 16], strides = [1, 1]} : vector<16x64xf32> to vector<16x16xf32>
    %691 = arith.truncf %690 : vector<16x16xf32> to vector<16x16xbf16>
    %cst_287 = arith.constant dense<0.000000e+00> : vector<16x16xf32>
    %692 = tpu.matmul %687, %689, %cst_287 {dimension_numbers = #tpu.dot_dimension_numbers<[1], [1], [0], [0], [0, 0, 1, 0], [], []>} : vector<16x16xbf16>, vector<16x16xbf16>, vector<16x16xf32> -> vector<16x16xf32>
    %cst_288 = arith.constant 2.500000e-01 : f32
    %693 = vector.broadcast %cst_288 : f32 to vector<16x16xf32>
    %694 = arith.mulf %692, %693 : vector<16x16xf32>
    %cst_289 = arith.constant dense<0xFF800000> : vector<16xf32>
    %695 = vector.multi_reduction <maximumf>, %694, %cst_289 [1] : vector<16x16xf32> to vector<16xf32>
    %696 = vector.shape_cast %695 : vector<16xf32> to vector<16x1xf32>
    %697 = vector.broadcast %696 : vector<16x1xf32> to vector<16x16xf32>
    %698 = arith.subf %694, %697 : vector<16x16xf32>
    %699 = math.exp %698 : vector<16x16xf32>
    %cst_290 = arith.constant dense<0.000000e+00> : vector<16xf32>
    %700 = vector.multi_reduction <add>, %699, %cst_290 [1] : vector<16x16xf32> to vector<16xf32>
    %701 = vector.shape_cast %700 : vector<16xf32> to vector<16x1xf32>
    %702 = tpu.reciprocal %701 {approx = true} : vector<16x1xf32> -> vector<16x1xf32>
    %703 = vector.broadcast %702 : vector<16x1xf32> to vector<16x16xf32>
    %704 = arith.mulf %699, %703 : vector<16x16xf32>
    %705 = arith.truncf %704 : vector<16x16xf32> to vector<16x16xbf16>
    %cst_291 = arith.constant dense<0.000000e+00> : vector<16x16xf32>
    %706 = tpu.matmul %705, %691, %cst_291 {dimension_numbers = #tpu.dot_dimension_numbers<[1], [0], [0], [1], [0, 0, 1, 1], [], []>} : vector<16x16xbf16>, vector<16x16xbf16>, vector<16x16xf32> -> vector<16x16xf32>
    %707 = vector.extract_strided_slice %680 {offsets = [0, 16], sizes = [16, 16], strides = [1, 1]} : vector<16x64xf32> to vector<16x16xf32>
    %708 = arith.truncf %707 : vector<16x16xf32> to vector<16x16xbf16>
    %709 = vector.extract_strided_slice %685 {offsets = [0, 16], sizes = [16, 16], strides = [1, 1]} : vector<16x64xf32> to vector<16x16xf32>
    %710 = arith.truncf %709 : vector<16x16xf32> to vector<16x16xbf16>
    %711 = vector.extract_strided_slice %675 {offsets = [0, 16], sizes = [16, 16], strides = [1, 1]} : vector<16x64xf32> to vector<16x16xf32>
    %712 = arith.truncf %711 : vector<16x16xf32> to vector<16x16xbf16>
    %cst_292 = arith.constant dense<0.000000e+00> : vector<16x16xf32>
    %713 = tpu.matmul %708, %710, %cst_292 {dimension_numbers = #tpu.dot_dimension_numbers<[1], [1], [0], [0], [0, 0, 1, 0], [], []>} : vector<16x16xbf16>, vector<16x16xbf16>, vector<16x16xf32> -> vector<16x16xf32>
    %cst_293 = arith.constant 2.500000e-01 : f32
    %714 = vector.broadcast %cst_293 : f32 to vector<16x16xf32>
    %715 = arith.mulf %713, %714 : vector<16x16xf32>
    %cst_294 = arith.constant dense<0xFF800000> : vector<16xf32>
    %716 = vector.multi_reduction <maximumf>, %715, %cst_294 [1] : vector<16x16xf32> to vector<16xf32>
    %717 = vector.shape_cast %716 : vector<16xf32> to vector<16x1xf32>
    %718 = vector.broadcast %717 : vector<16x1xf32> to vector<16x16xf32>
    %719 = arith.subf %715, %718 : vector<16x16xf32>
    %720 = math.exp %719 : vector<16x16xf32>
    %cst_295 = arith.constant dense<0.000000e+00> : vector<16xf32>
    %721 = vector.multi_reduction <add>, %720, %cst_295 [1] : vector<16x16xf32> to vector<16xf32>
    %722 = vector.shape_cast %721 : vector<16xf32> to vector<16x1xf32>
    %723 = tpu.reciprocal %722 {approx = true} : vector<16x1xf32> -> vector<16x1xf32>
    %724 = vector.broadcast %723 : vector<16x1xf32> to vector<16x16xf32>
    %725 = arith.mulf %720, %724 : vector<16x16xf32>
    %726 = arith.truncf %725 : vector<16x16xf32> to vector<16x16xbf16>
    %cst_296 = arith.constant dense<0.000000e+00> : vector<16x16xf32>
    %727 = tpu.matmul %726, %712, %cst_296 {dimension_numbers = #tpu.dot_dimension_numbers<[1], [0], [0], [1], [0, 0, 1, 1], [], []>} : vector<16x16xbf16>, vector<16x16xbf16>, vector<16x16xf32> -> vector<16x16xf32>
    %728 = vector.extract_strided_slice %680 {offsets = [0, 32], sizes = [16, 16], strides = [1, 1]} : vector<16x64xf32> to vector<16x16xf32>
    %729 = arith.truncf %728 : vector<16x16xf32> to vector<16x16xbf16>
    %730 = vector.extract_strided_slice %685 {offsets = [0, 32], sizes = [16, 16], strides = [1, 1]} : vector<16x64xf32> to vector<16x16xf32>
    %731 = arith.truncf %730 : vector<16x16xf32> to vector<16x16xbf16>
    %732 = vector.extract_strided_slice %675 {offsets = [0, 32], sizes = [16, 16], strides = [1, 1]} : vector<16x64xf32> to vector<16x16xf32>
    %733 = arith.truncf %732 : vector<16x16xf32> to vector<16x16xbf16>
    %cst_297 = arith.constant dense<0.000000e+00> : vector<16x16xf32>
    %734 = tpu.matmul %729, %731, %cst_297 {dimension_numbers = #tpu.dot_dimension_numbers<[1], [1], [0], [0], [0, 0, 1, 0], [], []>} : vector<16x16xbf16>, vector<16x16xbf16>, vector<16x16xf32> -> vector<16x16xf32>
    %cst_298 = arith.constant 2.500000e-01 : f32
    %735 = vector.broadcast %cst_298 : f32 to vector<16x16xf32>
    %736 = arith.mulf %734, %735 : vector<16x16xf32>
    %cst_299 = arith.constant dense<0xFF800000> : vector<16xf32>
    %737 = vector.multi_reduction <maximumf>, %736, %cst_299 [1] : vector<16x16xf32> to vector<16xf32>
    %738 = vector.shape_cast %737 : vector<16xf32> to vector<16x1xf32>
    %739 = vector.broadcast %738 : vector<16x1xf32> to vector<16x16xf32>
    %740 = arith.subf %736, %739 : vector<16x16xf32>
    %741 = math.exp %740 : vector<16x16xf32>
    %cst_300 = arith.constant dense<0.000000e+00> : vector<16xf32>
    %742 = vector.multi_reduction <add>, %741, %cst_300 [1] : vector<16x16xf32> to vector<16xf32>
    %743 = vector.shape_cast %742 : vector<16xf32> to vector<16x1xf32>
    %744 = tpu.reciprocal %743 {approx = true} : vector<16x1xf32> -> vector<16x1xf32>
    %745 = vector.broadcast %744 : vector<16x1xf32> to vector<16x16xf32>
    %746 = arith.mulf %741, %745 : vector<16x16xf32>
    %747 = arith.truncf %746 : vector<16x16xf32> to vector<16x16xbf16>
    %cst_301 = arith.constant dense<0.000000e+00> : vector<16x16xf32>
    %748 = tpu.matmul %747, %733, %cst_301 {dimension_numbers = #tpu.dot_dimension_numbers<[1], [0], [0], [1], [0, 0, 1, 1], [], []>} : vector<16x16xbf16>, vector<16x16xbf16>, vector<16x16xf32> -> vector<16x16xf32>
    %749 = vector.extract_strided_slice %680 {offsets = [0, 48], sizes = [16, 16], strides = [1, 1]} : vector<16x64xf32> to vector<16x16xf32>
    %750 = arith.truncf %749 : vector<16x16xf32> to vector<16x16xbf16>
    %751 = vector.extract_strided_slice %685 {offsets = [0, 48], sizes = [16, 16], strides = [1, 1]} : vector<16x64xf32> to vector<16x16xf32>
    %752 = arith.truncf %751 : vector<16x16xf32> to vector<16x16xbf16>
    %753 = vector.extract_strided_slice %675 {offsets = [0, 48], sizes = [16, 16], strides = [1, 1]} : vector<16x64xf32> to vector<16x16xf32>
    %754 = arith.truncf %753 : vector<16x16xf32> to vector<16x16xbf16>
    %cst_302 = arith.constant dense<0.000000e+00> : vector<16x16xf32>
    %755 = tpu.matmul %750, %752, %cst_302 {dimension_numbers = #tpu.dot_dimension_numbers<[1], [1], [0], [0], [0, 0, 1, 0], [], []>} : vector<16x16xbf16>, vector<16x16xbf16>, vector<16x16xf32> -> vector<16x16xf32>
    %cst_303 = arith.constant 2.500000e-01 : f32
    %756 = vector.broadcast %cst_303 : f32 to vector<16x16xf32>
    %757 = arith.mulf %755, %756 : vector<16x16xf32>
    %cst_304 = arith.constant dense<0xFF800000> : vector<16xf32>
    %758 = vector.multi_reduction <maximumf>, %757, %cst_304 [1] : vector<16x16xf32> to vector<16xf32>
    %759 = vector.shape_cast %758 : vector<16xf32> to vector<16x1xf32>
    %760 = vector.broadcast %759 : vector<16x1xf32> to vector<16x16xf32>
    %761 = arith.subf %757, %760 : vector<16x16xf32>
    %762 = math.exp %761 : vector<16x16xf32>
    %cst_305 = arith.constant dense<0.000000e+00> : vector<16xf32>
    %763 = vector.multi_reduction <add>, %762, %cst_305 [1] : vector<16x16xf32> to vector<16xf32>
    %764 = vector.shape_cast %763 : vector<16xf32> to vector<16x1xf32>
    %765 = tpu.reciprocal %764 {approx = true} : vector<16x1xf32> -> vector<16x1xf32>
    %766 = vector.broadcast %765 : vector<16x1xf32> to vector<16x16xf32>
    %767 = arith.mulf %762, %766 : vector<16x16xf32>
    %768 = arith.truncf %767 : vector<16x16xf32> to vector<16x16xbf16>
    %cst_306 = arith.constant dense<0.000000e+00> : vector<16x16xf32>
    %769 = tpu.matmul %768, %754, %cst_306 {dimension_numbers = #tpu.dot_dimension_numbers<[1], [0], [0], [1], [0, 0, 1, 1], [], []>} : vector<16x16xbf16>, vector<16x16xbf16>, vector<16x16xf32> -> vector<16x16xf32>
    %770 = tpu.concatenate %706, %727, %748, %769 in 1 : vector<16x16xf32>, vector<16x16xf32>, vector<16x16xf32>, vector<16x16xf32> -> vector<16x64xf32>
    %c1_307 = arith.constant 1 : index
    %c0_308 = arith.constant 0 : index
    %c0_309 = arith.constant 0 : index
    %771 = vector.load %arg33[%c1_307, %c0_308, %c0_309] : memref<2x64x64xbf16, #tpu.memory_space<vmem>>, vector<1x64x64xbf16>
    %772 = vector.shape_cast %771 : vector<1x64x64xbf16> to vector<64x64xbf16>
    %773 = arith.truncf %770 : vector<16x64xf32> to vector<16x64xbf16>
    %cst_310 = arith.constant dense<0.000000e+00> : vector<16x64xf32>
    %774 = tpu.matmul %773, %772, %cst_310 {dimension_numbers = #tpu.dot_dimension_numbers<[1], [0], [0], [1], [0, 0, 1, 1], [], []>} : vector<16x64xbf16>, vector<64x64xbf16>, vector<16x64xf32> -> vector<16x64xf32>
    %775 = arith.addf %638, %774 : vector<16x64xf32>
    %c1_311 = arith.constant 1 : index
    %c0_312 = arith.constant 0 : index
    %c0_313 = arith.constant 0 : index
    %776 = vector.load %arg34[%c1_311, %c0_312, %c0_313] : memref<2x1x64xf32, #tpu.memory_space<vmem>>, vector<1x1x64xf32>
    %777 = vector.shape_cast %776 : vector<1x1x64xf32> to vector<1x64xf32>
    %778 = vector.broadcast %777 : vector<1x64xf32> to vector<16x64xf32>
    %779 = arith.addf %775, %778 : vector<16x64xf32>
    %c1_314 = arith.constant 1 : index
    %c0_315 = arith.constant 0 : index
    %c0_316 = arith.constant 0 : index
    %780 = vector.load %arg35[%c1_314, %c0_315, %c0_316] : memref<2x1x64xf32, #tpu.memory_space<vmem>>, vector<1x1x64xf32>
    %781 = vector.shape_cast %780 : vector<1x1x64xf32> to vector<1x64xf32>
    %c1_317 = arith.constant 1 : index
    %c0_318 = arith.constant 0 : index
    %c0_319 = arith.constant 0 : index
    %782 = vector.load %arg36[%c1_317, %c0_318, %c0_319] : memref<2x1x64xf32, #tpu.memory_space<vmem>>, vector<1x1x64xf32>
    %783 = vector.shape_cast %782 : vector<1x1x64xf32> to vector<1x64xf32>
    %cst_320 = arith.constant dense<0.000000e+00> : vector<16xf32>
    %784 = vector.multi_reduction <add>, %779, %cst_320 [1] : vector<16x64xf32> to vector<16xf32>
    %785 = vector.shape_cast %784 : vector<16xf32> to vector<16x1xf32>
    %cst_321 = arith.constant 6.400000e+01 : f32
    %786 = vector.broadcast %cst_321 : f32 to vector<16x1xf32>
    %787 = arith.divf %785, %786 : vector<16x1xf32>
    %788 = vector.broadcast %787 : vector<16x1xf32> to vector<16x64xf32>
    %789 = arith.subf %779, %788 : vector<16x64xf32>
    %790 = arith.mulf %789, %789 : vector<16x64xf32>
    %cst_322 = arith.constant dense<0.000000e+00> : vector<16xf32>
    %791 = vector.multi_reduction <add>, %790, %cst_322 [1] : vector<16x64xf32> to vector<16xf32>
    %792 = vector.shape_cast %791 : vector<16xf32> to vector<16x1xf32>
    %cst_323 = arith.constant 6.400000e+01 : f32
    %793 = vector.broadcast %cst_323 : f32 to vector<16x1xf32>
    %794 = arith.divf %792, %793 : vector<16x1xf32>
    %795 = vector.broadcast %787 : vector<16x1xf32> to vector<16x64xf32>
    %796 = arith.subf %779, %795 : vector<16x64xf32>
    %cst_324 = arith.constant 9.99999997E-7 : f32
    %797 = vector.broadcast %cst_324 : f32 to vector<16x1xf32>
    %798 = arith.addf %794, %797 : vector<16x1xf32>
    %799 = math.rsqrt %798 : vector<16x1xf32>
    %800 = vector.broadcast %799 : vector<16x1xf32> to vector<16x64xf32>
    %801 = arith.mulf %796, %800 : vector<16x64xf32>
    %802 = vector.broadcast %781 : vector<1x64xf32> to vector<16x64xf32>
    %803 = arith.mulf %801, %802 : vector<16x64xf32>
    %804 = vector.broadcast %783 : vector<1x64xf32> to vector<16x64xf32>
    %805 = arith.addf %803, %804 : vector<16x64xf32>
    %c1_325 = arith.constant 1 : index
    %c0_326 = arith.constant 0 : index
    %c0_327 = arith.constant 0 : index
    %806 = vector.load %arg37[%c1_325, %c0_326, %c0_327] : memref<2x64x256xbf16, #tpu.memory_space<vmem>>, vector<1x64x256xbf16>
    %807 = vector.shape_cast %806 : vector<1x64x256xbf16> to vector<64x256xbf16>
    %808 = arith.truncf %805 : vector<16x64xf32> to vector<16x64xbf16>
    %cst_328 = arith.constant dense<0.000000e+00> : vector<16x256xf32>
    %809 = tpu.matmul %808, %807, %cst_328 {dimension_numbers = #tpu.dot_dimension_numbers<[1], [0], [0], [1], [0, 0, 1, 1], [], []>} : vector<16x64xbf16>, vector<64x256xbf16>, vector<16x256xf32> -> vector<16x256xf32>
    %c1_329 = arith.constant 1 : index
    %c0_330 = arith.constant 0 : index
    %c0_331 = arith.constant 0 : index
    %810 = vector.load %arg38[%c1_329, %c0_330, %c0_331] : memref<2x1x256xf32, #tpu.memory_space<vmem>>, vector<1x1x256xf32>
    %811 = vector.shape_cast %810 : vector<1x1x256xf32> to vector<1x256xf32>
    %812 = vector.broadcast %811 : vector<1x256xf32> to vector<16x256xf32>
    %813 = arith.addf %809, %812 : vector<16x256xf32>
    %cst_332 = arith.constant 5.000000e-01 : f32
    %814 = vector.broadcast %cst_332 : f32 to vector<16x256xf32>
    %815 = arith.mulf %814, %813 : vector<16x256xf32>
    %cst_333 = arith.constant 0.707106769 : f32
    %816 = vector.broadcast %cst_333 : f32 to vector<16x256xf32>
    %817 = arith.mulf %813, %816 : vector<16x256xf32>
    %818 = math.erf %817 : vector<16x256xf32>
    %cst_334 = arith.constant 1.000000e+00 : f32
    %819 = vector.broadcast %cst_334 : f32 to vector<16x256xf32>
    %820 = arith.addf %819, %818 : vector<16x256xf32>
    %821 = arith.mulf %815, %820 : vector<16x256xf32>
    %c1_335 = arith.constant 1 : index
    %c0_336 = arith.constant 0 : index
    %c0_337 = arith.constant 0 : index
    %822 = vector.load %arg39[%c1_335, %c0_336, %c0_337] : memref<2x256x64xbf16, #tpu.memory_space<vmem>>, vector<1x256x64xbf16>
    %823 = vector.shape_cast %822 : vector<1x256x64xbf16> to vector<256x64xbf16>
    %824 = arith.truncf %821 : vector<16x256xf32> to vector<16x256xbf16>
    %cst_338 = arith.constant dense<0.000000e+00> : vector<16x64xf32>
    %825 = tpu.matmul %824, %823, %cst_338 {dimension_numbers = #tpu.dot_dimension_numbers<[1], [0], [0], [1], [0, 0, 1, 1], [], []>} : vector<16x256xbf16>, vector<256x64xbf16>, vector<16x64xf32> -> vector<16x64xf32>
    %826 = arith.addf %779, %825 : vector<16x64xf32>
    %c1_339 = arith.constant 1 : index
    %c0_340 = arith.constant 0 : index
    %c0_341 = arith.constant 0 : index
    %827 = vector.load %arg40[%c1_339, %c0_340, %c0_341] : memref<2x1x64xf32, #tpu.memory_space<vmem>>, vector<1x1x64xf32>
    %828 = vector.shape_cast %827 : vector<1x1x64xf32> to vector<1x64xf32>
    %829 = vector.broadcast %828 : vector<1x64xf32> to vector<16x64xf32>
    %830 = arith.addf %826, %829 : vector<16x64xf32>
    %c0_342 = arith.constant 0 : index
    %c0_343 = arith.constant 0 : index
    %831 = vector.load %arg41[%c0_342, %c0_343] : memref<1x64xf32, #tpu.memory_space<vmem>>, vector<1x64xf32>
    %c0_344 = arith.constant 0 : index
    %c0_345 = arith.constant 0 : index
    %832 = vector.load %arg42[%c0_344, %c0_345] : memref<1x64xf32, #tpu.memory_space<vmem>>, vector<1x64xf32>
    %cst_346 = arith.constant dense<0.000000e+00> : vector<16xf32>
    %833 = vector.multi_reduction <add>, %830, %cst_346 [1] : vector<16x64xf32> to vector<16xf32>
    %834 = vector.shape_cast %833 : vector<16xf32> to vector<16x1xf32>
    %cst_347 = arith.constant 6.400000e+01 : f32
    %835 = vector.broadcast %cst_347 : f32 to vector<16x1xf32>
    %836 = arith.divf %834, %835 : vector<16x1xf32>
    %837 = vector.broadcast %836 : vector<16x1xf32> to vector<16x64xf32>
    %838 = arith.subf %830, %837 : vector<16x64xf32>
    %839 = arith.mulf %838, %838 : vector<16x64xf32>
    %cst_348 = arith.constant dense<0.000000e+00> : vector<16xf32>
    %840 = vector.multi_reduction <add>, %839, %cst_348 [1] : vector<16x64xf32> to vector<16xf32>
    %841 = vector.shape_cast %840 : vector<16xf32> to vector<16x1xf32>
    %cst_349 = arith.constant 6.400000e+01 : f32
    %842 = vector.broadcast %cst_349 : f32 to vector<16x1xf32>
    %843 = arith.divf %841, %842 : vector<16x1xf32>
    %844 = vector.broadcast %836 : vector<16x1xf32> to vector<16x64xf32>
    %845 = arith.subf %830, %844 : vector<16x64xf32>
    %cst_350 = arith.constant 9.99999997E-7 : f32
    %846 = vector.broadcast %cst_350 : f32 to vector<16x1xf32>
    %847 = arith.addf %843, %846 : vector<16x1xf32>
    %848 = math.rsqrt %847 : vector<16x1xf32>
    %849 = vector.broadcast %848 : vector<16x1xf32> to vector<16x64xf32>
    %850 = arith.mulf %845, %849 : vector<16x64xf32>
    %851 = vector.broadcast %831 : vector<1x64xf32> to vector<16x64xf32>
    %852 = arith.mulf %850, %851 : vector<16x64xf32>
    %853 = vector.broadcast %832 : vector<1x64xf32> to vector<16x64xf32>
    %854 = arith.addf %852, %853 : vector<16x64xf32>
    %c0_351 = arith.constant 0 : index
    %c0_352 = arith.constant 0 : index
    %855 = vector.load %arg43[%c0_351, %c0_352] : memref<64x192xbf16, #tpu.memory_space<vmem>>, vector<64x192xbf16>
    %856 = arith.truncf %854 : vector<16x64xf32> to vector<16x64xbf16>
    %cst_353 = arith.constant dense<0.000000e+00> : vector<16x192xf32>
    %857 = tpu.matmul %856, %855, %cst_353 {dimension_numbers = #tpu.dot_dimension_numbers<[1], [0], [0], [1], [0, 0, 1, 1], [], []>} : vector<16x64xbf16>, vector<64x192xbf16>, vector<16x192xf32> -> vector<16x192xf32>
    %c0_354 = arith.constant 0 : index
    %c0_355 = arith.constant 0 : index
    %858 = vector.load %arg44[%c0_354, %c0_355] : memref<1x192xf32, #tpu.memory_space<vmem>>, vector<1x192xf32>
    %859 = vector.broadcast %858 : vector<1x192xf32> to vector<16x192xf32>
    %860 = arith.addf %857, %859 : vector<16x192xf32>
    %c0_356 = arith.constant 0 : index
    %c0_357 = arith.constant 0 : index
    %c0_358 = arith.constant 0 : index
    %861 = vector.load %arg45[%c0_356, %c0_357, %c0_358] : memref<1x16x192xf32, #tpu.memory_space<vmem>>, vector<1x16x192xf32>
    %862 = vector.shape_cast %861 : vector<1x16x192xf32> to vector<16x192xf32>
    %863 = vector.shape_cast %860 : vector<16x192xf32> to vector<1x16x192xf32>
    tpu.vector_store %arg45[%c0_356, %c0_357, %c0_358], %863 {strides = array<i32>} : memref<1x16x192xf32, #tpu.memory_space<vmem>>, vector<1x16x192xf32>,
    %c0_359 = arith.constant 0 : index
    %c0_360 = arith.constant 0 : index
    %c0_361 = arith.constant 0 : index
    %864 = vector.load %arg46[%c0_359, %c0_360, %c0_361] : memref<1x16x8xf32, #tpu.memory_space<vmem>>, vector<1x16x8xf32>
    %865 = vector.shape_cast %864 : vector<1x16x8xf32> to vector<16x8xf32>
    %866 = vector.shape_cast %428 : vector<16x8xf32> to vector<1x16x8xf32>
    tpu.vector_store %arg46[%c0_359, %c0_360, %c0_361], %866 {strides = array<i32>} : memref<1x16x8xf32, #tpu.memory_space<vmem>>, vector<1x16x8xf32>,
    %c0_362 = arith.constant 0 : index
    %c0_363 = arith.constant 0 : index
    %c0_364 = arith.constant 0 : index
    %867 = vector.load %arg47[%c0_362, %c0_363, %c0_364] : memref<1x16x8xf32, #tpu.memory_space<vmem>>, vector<1x16x8xf32>
    %868 = vector.shape_cast %867 : vector<1x16x8xf32> to vector<16x8xf32>
    %869 = vector.shape_cast %433 : vector<16x8xf32> to vector<1x16x8xf32>
    tpu.vector_store %arg47[%c0_362, %c0_363, %c0_364], %869 {strides = array<i32>} : memref<1x16x8xf32, #tpu.memory_space<vmem>>, vector<1x16x8xf32>,
    %c0_365 = arith.constant 0 : index
    %c0_366 = arith.constant 0 : index
    %c0_367 = arith.constant 0 : index
    %870 = vector.load %arg48[%c0_365, %c0_366, %c0_367] : memref<1x16x8xf32, #tpu.memory_space<vmem>>, vector<1x16x8xf32>
    %871 = vector.shape_cast %870 : vector<1x16x8xf32> to vector<16x8xf32>
    %872 = vector.shape_cast %440 : vector<16x8xf32> to vector<1x16x8xf32>
    tpu.vector_store %arg48[%c0_365, %c0_366, %c0_367], %872 {strides = array<i32>} : memref<1x16x8xf32, #tpu.memory_space<vmem>>, vector<1x16x8xf32>,
    return
  }
  func.func @transform_0(%arg0: i32) -> (i32, i32, i32) {
    %c0_i32 = arith.constant 0 : i32
    %c0_i32_0 = arith.constant 0 : i32
    %c0_i32_1 = arith.constant 0 : i32
    return %arg0, %c0_i32, %c0_i32_0 : i32, i32, i32
  }
  func.func @transform_1(%arg0: i32) -> (i32, i32, i32) {
    %c0_i32 = arith.constant 0 : i32
    %c0_i32_0 = arith.constant 0 : i32
    %c0_i32_1 = arith.constant 0 : i32
    return %arg0, %c0_i32, %c0_i32_0 : i32, i32, i32
  }
  func.func @transform_2(%arg0: i32) -> (i32, i32) {
    %c0_i32 = arith.constant 0 : i32
    %c0_i32_0 = arith.constant 0 : i32
    %c0_i32_1 = arith.constant 0 : i32
    return %c0_i32, %c0_i32_0 : i32, i32
  }
  func.func @transform_3(%arg0: i32) -> (i32, i32) {
    %c0_i32 = arith.constant 0 : i32
    %c0_i32_0 = arith.constant 0 : i32
    %c0_i32_1 = arith.constant 0 : i32
    return %c0_i32, %c0_i32_0 : i32, i32
  }
  func.func @transform_4(%arg0: i32) -> (i32, i32) {
    %c0_i32 = arith.constant 0 : i32
    %c0_i32_0 = arith.constant 0 : i32
    %c0_i32_1 = arith.constant 0 : i32
    return %c0_i32, %c0_i32_0 : i32, i32
  }
  func.func @transform_5(%arg0: i32) -> (i32, i32) {
    %c0_i32 = arith.constant 0 : i32
    %c0_i32_0 = arith.constant 0 : i32
    %c0_i32_1 = arith.constant 0 : i32
    return %c0_i32, %c0_i32_0 : i32, i32
  }
  func.func @transform_6(%arg0: i32) -> (i32, i32) {
    %c0_i32 = arith.constant 0 : i32
    %c0_i32_0 = arith.constant 0 : i32
    %c0_i32_1 = arith.constant 0 : i32
    return %c0_i32, %c0_i32_0 : i32, i32
  }
  func.func @transform_7(%arg0: i32) -> (i32, i32) {
    %c0_i32 = arith.constant 0 : i32
    %c0_i32_0 = arith.constant 0 : i32
    %c0_i32_1 = arith.constant 0 : i32
    return %c0_i32, %c0_i32_0 : i32, i32
  }
  func.func @transform_8(%arg0: i32) -> (i32, i32) {
    %c0_i32 = arith.constant 0 : i32
    %c0_i32_0 = arith.constant 0 : i32
    %c0_i32_1 = arith.constant 0 : i32
    return %c0_i32, %c0_i32_0 : i32, i32
  }
  func.func @transform_9(%arg0: i32) -> (i32, i32) {
    %c0_i32 = arith.constant 0 : i32
    %c0_i32_0 = arith.constant 0 : i32
    %c0_i32_1 = arith.constant 0 : i32
    return %c0_i32, %c0_i32_0 : i32, i32
  }
  func.func @transform_10(%arg0: i32) -> (i32, i32, i32) {
    %c0_i32 = arith.constant 0 : i32
    %c0_i32_0 = arith.constant 0 : i32
    %c0_i32_1 = arith.constant 0 : i32
    %c0_i32_2 = arith.constant 0 : i32
    return %c0_i32, %c0_i32_0, %c0_i32_1 : i32, i32, i32
  }
  func.func @transform_11(%arg0: i32) -> (i32, i32, i32) {
    %c0_i32 = arith.constant 0 : i32
    %c0_i32_0 = arith.constant 0 : i32
    %c0_i32_1 = arith.constant 0 : i32
    %c0_i32_2 = arith.constant 0 : i32
    return %c0_i32, %c0_i32_0, %c0_i32_1 : i32, i32, i32
  }
  func.func @transform_12(%arg0: i32) -> (i32, i32, i32) {
    %c0_i32 = arith.constant 0 : i32
    %c0_i32_0 = arith.constant 0 : i32
    %c0_i32_1 = arith.constant 0 : i32
    %c0_i32_2 = arith.constant 0 : i32
    return %c0_i32, %c0_i32_0, %c0_i32_1 : i32, i32, i32
  }
  func.func @transform_13(%arg0: i32) -> (i32, i32, i32) {
    %c0_i32 = arith.constant 0 : i32
    %c0_i32_0 = arith.constant 0 : i32
    %c0_i32_1 = arith.constant 0 : i32
    %c0_i32_2 = arith.constant 0 : i32
    return %c0_i32, %c0_i32_0, %c0_i32_1 : i32, i32, i32
  }
  func.func @transform_14(%arg0: i32) -> (i32, i32, i32) {
    %c0_i32 = arith.constant 0 : i32
    %c0_i32_0 = arith.constant 0 : i32
    %c0_i32_1 = arith.constant 0 : i32
    %c0_i32_2 = arith.constant 0 : i32
    return %c0_i32, %c0_i32_0, %c0_i32_1 : i32, i32, i32
  }
  func.func @transform_15(%arg0: i32) -> (i32, i32, i32) {
    %c0_i32 = arith.constant 0 : i32
    %c0_i32_0 = arith.constant 0 : i32
    %c0_i32_1 = arith.constant 0 : i32
    %c0_i32_2 = arith.constant 0 : i32
    return %c0_i32, %c0_i32_0, %c0_i32_1 : i32, i32, i32
  }
  func.func @transform_16(%arg0: i32) -> (i32, i32, i32) {
    %c0_i32 = arith.constant 0 : i32
    %c0_i32_0 = arith.constant 0 : i32
    %c0_i32_1 = arith.constant 0 : i32
    %c0_i32_2 = arith.constant 0 : i32
    return %c0_i32, %c0_i32_0, %c0_i32_1 : i32, i32, i32
  }
  func.func @transform_17(%arg0: i32) -> (i32, i32, i32) {
    %c0_i32 = arith.constant 0 : i32
    %c0_i32_0 = arith.constant 0 : i32
    %c0_i32_1 = arith.constant 0 : i32
    %c0_i32_2 = arith.constant 0 : i32
    return %c0_i32, %c0_i32_0, %c0_i32_1 : i32, i32, i32
  }
  func.func @transform_18(%arg0: i32) -> (i32, i32, i32) {
    %c0_i32 = arith.constant 0 : i32
    %c0_i32_0 = arith.constant 0 : i32
    %c0_i32_1 = arith.constant 0 : i32
    %c0_i32_2 = arith.constant 0 : i32
    return %c0_i32, %c0_i32_0, %c0_i32_1 : i32, i32, i32
  }
  func.func @transform_19(%arg0: i32) -> (i32, i32, i32) {
    %c0_i32 = arith.constant 0 : i32
    %c0_i32_0 = arith.constant 0 : i32
    %c0_i32_1 = arith.constant 0 : i32
    %c0_i32_2 = arith.constant 0 : i32
    return %c0_i32, %c0_i32_0, %c0_i32_1 : i32, i32, i32
  }
  func.func @transform_20(%arg0: i32) -> (i32, i32, i32) {
    %c0_i32 = arith.constant 0 : i32
    %c0_i32_0 = arith.constant 0 : i32
    %c0_i32_1 = arith.constant 0 : i32
    %c0_i32_2 = arith.constant 0 : i32
    return %c0_i32, %c0_i32_0, %c0_i32_1 : i32, i32, i32
  }
  func.func @transform_21(%arg0: i32) -> (i32, i32, i32) {
    %c0_i32 = arith.constant 0 : i32
    %c0_i32_0 = arith.constant 0 : i32
    %c0_i32_1 = arith.constant 0 : i32
    %c0_i32_2 = arith.constant 0 : i32
    return %c0_i32, %c0_i32_0, %c0_i32_1 : i32, i32, i32
  }
  func.func @transform_22(%arg0: i32) -> (i32, i32) {
    %c0_i32 = arith.constant 0 : i32
    %c0_i32_0 = arith.constant 0 : i32
    %c0_i32_1 = arith.constant 0 : i32
    return %c0_i32, %c0_i32_0 : i32, i32
  }
  func.func @transform_23(%arg0: i32) -> (i32, i32) {
    %c0_i32 = arith.constant 0 : i32
    %c0_i32_0 = arith.constant 0 : i32
    %c0_i32_1 = arith.constant 0 : i32
    return %c0_i32, %c0_i32_0 : i32, i32
  }
  func.func @transform_24(%arg0: i32) -> (i32, i32) {
    %c0_i32 = arith.constant 0 : i32
    %c0_i32_0 = arith.constant 0 : i32
    %c0_i32_1 = arith.constant 0 : i32
    return %c0_i32, %c0_i32_0 : i32, i32
  }
  func.func @transform_25(%arg0: i32) -> (i32, i32) {
    %c0_i32 = arith.constant 0 : i32
    %c0_i32_0 = arith.constant 0 : i32
    %c0_i32_1 = arith.constant 0 : i32
    return %c0_i32, %c0_i32_0 : i32, i32
  }
  func.func @transform_26(%arg0: i32) -> (i32, i32) {
    %c0_i32 = arith.constant 0 : i32
    %c0_i32_0 = arith.constant 0 : i32
    %c0_i32_1 = arith.constant 0 : i32
    return %c0_i32, %c0_i32_0 : i32, i32
  }
  func.func @transform_27(%arg0: i32) -> (i32, i32) {
    %c0_i32 = arith.constant 0 : i32
    %c0_i32_0 = arith.constant 0 : i32
    %c0_i32_1 = arith.constant 0 : i32
    return %c0_i32, %c0_i32_0 : i32, i32
  }
  func.func @transform_28(%arg0: i32) -> (i32, i32, i32) {
    %c0_i32 = arith.constant 0 : i32
    %c0_i32_0 = arith.constant 0 : i32
    %c0_i32_1 = arith.constant 0 : i32
    %c0_i32_2 = arith.constant 0 : i32
    return %c0_i32, %c0_i32_0, %c0_i32_1 : i32, i32, i32
  }
  func.func @transform_29(%arg0: i32) -> (i32, i32, i32) {
    %c0_i32 = arith.constant 0 : i32
    %c0_i32_0 = arith.constant 0 : i32
    %c0_i32_1 = arith.constant 0 : i32
    %c0_i32_2 = arith.constant 0 : i32
    return %c0_i32, %c0_i32_0, %c0_i32_1 : i32, i32, i32
  }
  func.func @transform_30(%arg0: i32) -> (i32, i32, i32) {
    %c0_i32 = arith.constant 0 : i32
    %c0_i32_0 = arith.constant 0 : i32
    %c0_i32_1 = arith.constant 0 : i32
    %c0_i32_2 = arith.constant 0 : i32
    return %c0_i32, %c0_i32_0, %c0_i32_1 : i32, i32, i32
  }
  func.func @transform_31(%arg0: i32) -> (i32, i32, i32) {
    %c0_i32 = arith.constant 0 : i32
    %c0_i32_0 = arith.constant 0 : i32
    %c0_i32_1 = arith.constant 0 : i32
    %c0_i32_2 = arith.constant 0 : i32
    return %c0_i32, %c0_i32_0, %c0_i32_1 : i32, i32, i32
  }
  func.func @transform_32(%arg0: i32) -> (i32, i32, i32) {
    %c0_i32 = arith.constant 0 : i32
    %c0_i32_0 = arith.constant 0 : i32
    %c0_i32_1 = arith.constant 0 : i32
    %c0_i32_2 = arith.constant 0 : i32
    return %c0_i32, %c0_i32_0, %c0_i32_1 : i32, i32, i32
  }
  func.func @transform_33(%arg0: i32) -> (i32, i32, i32) {
    %c0_i32 = arith.constant 0 : i32
    %c0_i32_0 = arith.constant 0 : i32
    %c0_i32_1 = arith.constant 0 : i32
    %c0_i32_2 = arith.constant 0 : i32
    return %c0_i32, %c0_i32_0, %c0_i32_1 : i32, i32, i32
  }
  func.func @transform_34(%arg0: i32) -> (i32, i32, i32) {
    %c0_i32 = arith.constant 0 : i32
    %c0_i32_0 = arith.constant 0 : i32
    %c0_i32_1 = arith.constant 0 : i32
    %c0_i32_2 = arith.constant 0 : i32
    return %c0_i32, %c0_i32_0, %c0_i32_1 : i32, i32, i32
  }
  func.func @transform_35(%arg0: i32) -> (i32, i32, i32) {
    %c0_i32 = arith.constant 0 : i32
    %c0_i32_0 = arith.constant 0 : i32
    %c0_i32_1 = arith.constant 0 : i32
    %c0_i32_2 = arith.constant 0 : i32
    return %c0_i32, %c0_i32_0, %c0_i32_1 : i32, i32, i32
  }
  func.func @transform_36(%arg0: i32) -> (i32, i32, i32) {
    %c0_i32 = arith.constant 0 : i32
    %c0_i32_0 = arith.constant 0 : i32
    %c0_i32_1 = arith.constant 0 : i32
    %c0_i32_2 = arith.constant 0 : i32
    return %c0_i32, %c0_i32_0, %c0_i32_1 : i32, i32, i32
  }
  func.func @transform_37(%arg0: i32) -> (i32, i32, i32) {
    %c0_i32 = arith.constant 0 : i32
    %c0_i32_0 = arith.constant 0 : i32
    %c0_i32_1 = arith.constant 0 : i32
    %c0_i32_2 = arith.constant 0 : i32
    return %c0_i32, %c0_i32_0, %c0_i32_1 : i32, i32, i32
  }
  func.func @transform_38(%arg0: i32) -> (i32, i32, i32) {
    %c0_i32 = arith.constant 0 : i32
    %c0_i32_0 = arith.constant 0 : i32
    %c0_i32_1 = arith.constant 0 : i32
    %c0_i32_2 = arith.constant 0 : i32
    return %c0_i32, %c0_i32_0, %c0_i32_1 : i32, i32, i32
  }
  func.func @transform_39(%arg0: i32) -> (i32, i32, i32) {
    %c0_i32 = arith.constant 0 : i32
    %c0_i32_0 = arith.constant 0 : i32
    %c0_i32_1 = arith.constant 0 : i32
    %c0_i32_2 = arith.constant 0 : i32
    return %c0_i32, %c0_i32_0, %c0_i32_1 : i32, i32, i32
  }
  func.func @transform_40(%arg0: i32) -> (i32, i32) {
    %c0_i32 = arith.constant 0 : i32
    %c0_i32_0 = arith.constant 0 : i32
    %c0_i32_1 = arith.constant 0 : i32
    return %c0_i32, %c0_i32_0 : i32, i32
  }
  func.func @transform_41(%arg0: i32) -> (i32, i32) {
    %c0_i32 = arith.constant 0 : i32
    %c0_i32_0 = arith.constant 0 : i32
    %c0_i32_1 = arith.constant 0 : i32
    return %c0_i32, %c0_i32_0 : i32, i32
  }
  func.func @transform_42(%arg0: i32) -> (i32, i32) {
    %c0_i32 = arith.constant 0 : i32
    %c0_i32_0 = arith.constant 0 : i32
    %c0_i32_1 = arith.constant 0 : i32
    return %c0_i32, %c0_i32_0 : i32, i32
  }
  func.func @transform_43(%arg0: i32) -> (i32, i32) {
    %c0_i32 = arith.constant 0 : i32
    %c0_i32_0 = arith.constant 0 : i32
    %c0_i32_1 = arith.constant 0 : i32
    return %c0_i32, %c0_i32_0 : i32, i32
  }
  func.func @transform_44(%arg0: i32) -> (i32, i32, i32) {
    %c0_i32 = arith.constant 0 : i32
    %c0_i32_0 = arith.constant 0 : i32
    %c0_i32_1 = arith.constant 0 : i32
    return %arg0, %c0_i32, %c0_i32_0 : i32, i32, i32
  }
  func.func @transform_45(%arg0: i32) -> (i32, i32, i32) {
    %c0_i32 = arith.constant 0 : i32
    %c0_i32_0 = arith.constant 0 : i32
    %c0_i32_1 = arith.constant 0 : i32
    return %arg0, %c0_i32, %c0_i32_0 : i32, i32, i32
  }
  func.func @transform_46(%arg0: i32) -> (i32, i32, i32) {
    %c0_i32 = arith.constant 0 : i32
    %c0_i32_0 = arith.constant 0 : i32
    %c0_i32_1 = arith.constant 0 : i32
    return %arg0, %c0_i32, %c0_i32_0 : i32, i32, i32
  }
  func.func @transform_47(%arg0: i32) -> (i32, i32, i32) {
    %c0_i32 = arith.constant 0 : i32
    %c0_i32_0 = arith.constant 0 : i32
    %c0_i32_1 = arith.constant 0 : i32
    return %arg0, %c0_i32, %c0_i32_0 : i32, i32, i32
  }
}

</mosaic_0001>

<bundles_post_ra>
// kernel: autoencoder_forward.1
= control target key start
LH: loop header
LB: loop body
LE: loop exit
PB: predicated region body
PF: predicated region fallthrough
CT: control target
= control target key end

     0   :  { %s8109_s6 = smov 1   ;;  %s8110_s10 = smov 2   ;;  %s9850_s0 = inlined_call_operand.smem [shape: u32[48], index: -1, kind: input, shape index: {}] }
   0x1   :  { %s8176_s5 = sld [smem:[%s9850_s0]]   ;;  %s8111_s14 = smov 3  }
   0x2   :  { %s8181_s9 = sld [smem:[%s9850_s0 + %s8109_s6]]   ;;  %s8112_s18 = smov 4  }
   0x3   :  { %s8186_s13 = sld [smem:[%s9850_s0 + %s8110_s10]]   ;;  %s8113_s22 = smov 5  }
   0x4   :  { %s8191_s17 = sld [smem:[%s9850_s0 + %s8111_s14]]   ;;  %s8114_s26 = smov 6  }
   0x5   :  { %s8196_s21 = sld [smem:[%s9850_s0 + %s8112_s18]]   ;;  %s8115_s30 = smov 7  }
   0x6   :  { %s8201_s25 = sld [smem:[%s9850_s0 + %s8113_s22]]   ;;  %s8116_s4 = smov 8  }
   0x7   :  { %9907 = sst [smem:[#allocation8_spill]] %s8176_s5  ;;  %s8117_s10 = smov 9  }
   0x8   :  { %9908 = sst [smem:[#allocation9_spill]] %s8181_s9  ;;  %s8118_s15 = smov 10  }
   0x9   :  { %9909 = sst [smem:[#allocation10_spill]] %s8186_s13  ;;  %s8119_s20 = smov 11  }
   0xa   :  { %9910 = sst [smem:[#allocation11_spill]] %s8191_s17  ;;  %s8121_s1 = smov 13  }
   0xb   :  { %9911 = sst [smem:[#allocation12_spill]] %s8196_s21  ;;  %s8122_s7 = smov 14  }
   0xc   :  { %9912 = sst [smem:[#allocation13_spill]] %s8201_s25  ;;  %s8124_s22 = smov 16  }
   0xd   :  { %s8206_s29 = sld [smem:[%s9850_s0 + %s8114_s26]]   ;;  %s8120_s26 = smov 12  }
   0xe   :  { %s8211_s3 = sld [smem:[%s9850_s0 + %s8115_s30]]   ;;  %s8125_s28 = smov 17  }
   0xf   :  { %s8216_s8 = sld [smem:[%s9850_s0 + %s8116_s4]]  }
  0x10   :  { %s8221_s14 = sld [smem:[%s9850_s0 + %s8117_s10]]  }
  0x11   :  { %s8226_s19 = sld [smem:[%s9850_s0 + %s8118_s15]]   ;;  %s8123_s15 = smov 15  }
  0x12   :  { %s8231_s24 = sld [smem:[%s9850_s0 + %s8119_s20]]  }
  0x13   :  { %9913 = sst [smem:[#allocation14_spill]] %s8206_s29 }
  0x14   :  { %9914 = sst [smem:[#allocation15_spill]] %s8211_s3 }
  0x15   :  { %9915 = sst [smem:[#allocation16_spill]] %s8216_s8 }
  0x16   :  { %9916 = sst [smem:[#allocation17_spill]] %s8221_s14 }
  0x17   :  { %9917 = sst [smem:[#allocation18_spill]] %s8226_s19 }
  0x18   :  { %s8236_s30 = sld [smem:[%s9850_s0 + %s8120_s26]]  }
  0x19   :  { %s8241_s6 = sld [smem:[%s9850_s0 + %s8121_s1]]  }
  0x1a   :  { %s8246_s12 = sld [smem:[%s9850_s0 + %s8122_s7]]   ;;  %s8126_s7 = smov 18  }
  0x1b   :  { %s8251_s20 = sld [smem:[%s9850_s0 + %s8123_s15]]   ;;  %s8127_s15 = smov 19  }
  0x1c   :  { %s8256_s27 = sld [smem:[%s9850_s0 + %s8124_s22]]   ;;  %s8128_s22 = smov 20  }
  0x1d   :  { %s8261_s4 = sld [smem:[%s9850_s0 + %s8125_s28]]   ;;  %s8129_s28 = smov 21  }
  0x1e   :  { %s8266_s29 = sld [smem:[%s9850_s0 + %s8126_s7]]   ;;  %s8130_s7 = smov 22  }
  0x1f   :  { %9918 = sst [smem:[#allocation19_spill]] %s8241_s6 }
  0x20   :  { %9919 = sst [smem:[#allocation20_spill]] %s8246_s12 }
  0x21   :  { %9920 = sst [smem:[#allocation21_spill]] %s8251_s20 }
  0x22   :  { %9921 = sst [smem:[#allocation22_spill]] %s8256_s27 }
  0x23   :  { %9922 = sst [smem:[#allocation23_spill]] %s8261_s4 }
  0x24   :  { %9923 = sst [smem:[#allocation24_spill]] %s8266_s29 }
  0x25   :  { %s8271_s3 = sld [smem:[%s9850_s0 + %s8127_s15]]   ;;  %s8131_s15 = smov 23  }
  0x26   :  { %s8276_s25 = sld [smem:[%s9850_s0 + %s8128_s22]]   ;;  %s8132_s22 = smov 24  }
  0x27   :  { %s8281_s9 = sld [smem:[%s9850_s0 + %s8129_s28]]   ;;  %s8133_s28 = smov 25  }
  0x28   :  { %s8286_s4 = sld [smem:[%s9850_s0 + %s8130_s7]]   ;;  %s8134_s7 = smov 26  }
  0x2b   :  { %9924 = sst [smem:[#allocation25_spill]] %s8271_s3 }
  0x2c   :  { %9925 = sst [smem:[#allocation26_spill]] %s8276_s25 }
  0x2d   :  { %9926 = sst [smem:[#allocation27_spill]] %s8281_s9 }
  0x2e   :  { %9927 = sst [smem:[#allocation28_spill]] %s8286_s4 }
  0x2f   :  { %s8291_s3 = sld [smem:[%s9850_s0 + %s8131_s15]]   ;;  %s8135_s15 = smov 27  }
  0x30   :  { %s8296_s25 = sld [smem:[%s9850_s0 + %s8132_s22]]   ;;  %s8136_s22 = smov 28  }
  0x31   :  { %s8301_s9 = sld [smem:[%s9850_s0 + %s8133_s28]]   ;;  %s8137_s28 = smov 29  }
  0x32   :  { %s8306_s4 = sld [smem:[%s9850_s0 + %s8134_s7]]   ;;  %s8138_s7 = smov 30  }
  0x35   :  { %9928 = sst [smem:[#allocation29_spill]] %s8291_s3 }
  0x36   :  { %9929 = sst [smem:[#allocation30_spill]] %s8296_s25 }
  0x37   :  { %9930 = sst [smem:[#allocation31_spill]] %s8301_s9 }
  0x38   :  { %9931 = sst [smem:[#allocation32_spill]] %s8306_s4 }
  0x39   :  { %s8311_s3 = sld [smem:[%s9850_s0 + %s8135_s15]]   ;;  %s8139_s15 = smov 31  }
  0x3a   :  { %s8316_s25 = sld [smem:[%s9850_s0 + %s8136_s22]]   ;;  %s8140_s22 = smov 32  }
  0x3b   :  { %s8321_s9 = sld [smem:[%s9850_s0 + %s8137_s28]]   ;;  %s8141_s28 = smov 33  }
  0x3c   :  { %s8326_s4 = sld [smem:[%s9850_s0 + %s8138_s7]]   ;;  %s8142_s7 = smov 34  }
  0x3f   :  { %9932 = sst [smem:[#allocation33_spill]] %s8311_s3 }
  0x40   :  { %9933 = sst [smem:[#allocation34_spill]] %s8316_s25 }
  0x41   :  { %9934 = sst [smem:[#allocation35_spill]] %s8321_s9 }
  0x42   :  { %9935 = sst [smem:[#allocation36_spill]] %s8326_s4 }
  0x43   :  { %s8331_s3 = sld [smem:[%s9850_s0 + %s8139_s15]]   ;;  %s8143_s15 = smov 35  }
  0x44   :  { %s8336_s25 = sld [smem:[%s9850_s0 + %s8140_s22]]   ;;  %s8144_s22 = smov 36  }
  0x45   :  { %s8341_s9 = sld [smem:[%s9850_s0 + %s8141_s28]]   ;;  %s8145_s28 = smov 37  }
  0x46   :  { %s8346_s4 = sld [smem:[%s9850_s0 + %s8142_s7]]   ;;  %s8146_s7 = smov 38  }
  0x49   :  { %9936 = sst [smem:[#allocation37_spill]] %s8331_s3 }
  0x4a   :  { %9937 = sst [smem:[#allocation38_spill]] %s8336_s25 }
  0x4b   :  { %9938 = sst [smem:[#allocation39_spill]] %s8341_s9 }
  0x4c   :  { %9939 = sst [smem:[#allocation40_spill]] %s8346_s4 }
  0x4d   :  { %s8351_s3 = sld [smem:[%s9850_s0 + %s8143_s15]]   ;;  %s8147_s15 = smov 39  }
  0x4e   :  { %s8356_s25 = sld [smem:[%s9850_s0 + %s8144_s22]]   ;;  %s8148_s22 = smov 40  }
  0x4f   :  { %s8361_s9 = sld [smem:[%s9850_s0 + %s8145_s28]]   ;;  %s8149_s28 = smov 41  }
  0x50   :  { %s8366_s4 = sld [smem:[%s9850_s0 + %s8146_s7]]   ;;  %s8150_s7 = smov 42  }
  0x53   :  { %9940 = sst [smem:[#allocation41_spill]] %s8351_s3 }
  0x54   :  { %9941 = sst [smem:[#allocation42_spill]] %s8356_s25 }
  0x55   :  { %9942 = sst [smem:[#allocation43_spill]] %s8361_s9 }
  0x56   :  { %9943 = sst [smem:[#allocation44_spill]] %s8366_s4 }
  0x57   :  { %s8371_s3 = sld [smem:[%s9850_s0 + %s8147_s15]]   ;;  %s8151_s15 = smov 43  }
  0x58   :  { %s8376_s25 = sld [smem:[%s9850_s0 + %s8148_s22]]   ;;  %s8152_s22 = smov 44  }
  0x59   :  { %s8381_s9 = sld [smem:[%s9850_s0 + %s8149_s28]]   ;;  %s8153_s28 = smov 45  }
  0x5a   :  { %s8386_s4 = sld [smem:[%s9850_s0 + %s8150_s7]]   ;;  %s8154_s7 = smov 46  }
  0x5b   :  { %s8396_s27 = sld [smem:[%s9850_s0 + %s8152_s22]]  }
  0x5c   :  { %s8401_s29 = sld [smem:[%s9850_s0 + %s8153_s28]]  }
  0x5d   :  { %9944 = sst [smem:[#allocation45_spill]] %s8371_s3 }
  0x5e   :  { %s8391_s3 = sld [smem:[%s9850_s0 + %s8151_s15]]   ;;  %s8155_s15 = smov 47  }
  0x5f   :  { %9945 = sst [smem:[#allocation46_spill]] %s8381_s9 }
  0x60   :  { %9946 = sst [smem:[#allocation47_spill]] %s8386_s4 }
  0x61   :  { %s8406_s4 = sld [smem:[%s9850_s0 + %s8154_s7]]  }
  0x64   :  { %9947 = sst [smem:[#allocation48_spill]] %s8391_s3 }
  0x65   :  { %s8411_s3 = sld [smem:[%s9850_s0 + %s8155_s15]]  }
  0x6b   :  { %9948 = sst [smem:[#allocation49_spill]] %s8411_s3 }
  0x6c   :  { %101 = vsyncpa [#allocation3], 0 }
  0x6d   :  { %102 = vsyncpa [#allocation5], 0  ;;  %s8413_s22 = smov 0  }
  0x6e LB: > { %s9949_s21 = sld [smem:[#allocation12_spill]]  ;;  %s1277_s23 = sshll.u32 %s8376_s25, 4  ;;  %s8107_s22 = sphi %s8413_s22, %s108_s22   ;;  %s1278_s23 = int_to_ptr.hbm [resolvable:$true] %s1277_s23 }
  0x6f   : > { %s9950_s20 = sld [smem:[#allocation21_spill]]  ;;  %s8420_s26 = sadd.s32 4294967295, %s8107_s22  }
  0x70   : > { %s9951_s19 = sld [smem:[#allocation18_spill]]  ;;  %p6518_p0 = scmp.ge.s32.totalorder %s8107_s22, 1 }
  0x71   : > { %s9952_s17 = sld [smem:[#allocation11_spill]]  ;;  %p1151_p1 = scmp.lt.s32.totalorder %s8107_s22, 3 }
  0x72   : > { %s9953_s13 = sld [smem:[#allocation10_spill]]  ;;  %p7649_p2 = scmp.eq.s32.totalorder %s8420_s26, 0 }
  0x73   : > { %s9954_s12 = sld [smem:[#allocation20_spill]]  ;;  %p8425_p3 = pnand %p6518_p0, %p1151_p1 }
  0x74   : > { %s9955_s9 = sld [smem:[#allocation46_spill]]  ;;  %s8156_s28 = smov [#allocation2]  }
  0x75   : > { %s9956_s8 = sld [smem:[#allocation16_spill]]  ;;  %s1279_s1 = sshll.u32 %s8156_s28, 4  ;;  %s1280_s1 = int_to_ptr.vmem [resolvable:$true] %s1279_s1 }
  0x76   : > { %s9957_s6 = sld [smem:[#allocation19_spill]]  ;;  %p7642_p4 = pneg %p8425_p3 }
  0x77   : > { %9958 = sst [smem:[#allocation50_spill]] %s8107_s22  ;;  %s8157_s10 = smov [#allocation4]  }
  0x78   : > { %p8434_p5 = pnand %p7649_p2, %p7642_p4  ;;  %s8438_s11 = sshll.u32 %s8157_s10, 4  ;;  %s1292_s11 = int_to_ptr.vmem [resolvable:$true] %s8438_s11 }
  0x79   : > { %s8033_s15 = sshra.s32 %s1278_s23, 4  ;;  %s8040_s18 = scalar_lea.hbm %s8376_s25, 1  ;;  %s8034_s15 = int_to_ptr.hbm [resolvable:$true] %s8033_s15 }
  0x7a   : > { %s1289_s2 = sshll.u32 %s9955_s9, 4  ;;  %s8035_s16 = scalar_lea.hbm %s8034_s15, 1  ;;  %s1290_s2 = int_to_ptr.hbm [resolvable:$true] %s1289_s2 }
  0x7b   : > { %p8036_p6 = scmp.ne.s32.totalorder %s8034_s15, %s8035_s16  ;;  %p8037_p7 = pneg %p8434_p5 }
  0x7c   : > { %p8041_p10 = scmp.lt.s32.totalorder %s8034_s15, %s8376_s25  ;;  %p8042_p11 = scmp.lt.s32.totalorder %s8040_s18, %s8035_s16 }
  0x7d   : > { %p8038_p8 = pnand %p8037_p7, %p8036_p6 }
  0x7e   : > { %p8043_p12 = por %p8042_p11, %p8041_p10 }
  0x7f   : > { %p8039_p9 = pneg %p8038_p8 }
  0x81   : > { %p8044_p13 = pnand %p8043_p12, %p8039_p9 }
  0x83   : > { %8047 = shalt.err (!%p8044_p13)
}
  0x84   : > { %7645 = dma.hbm_to_vmem [thread:$0]  (!%p8434_p5), %s1278_s23, 16, %s1280_s1, [#allocation3]  }
  0x85   : > { %s8063_s28 = sshra.s32 %s1290_s2, 4  ;;  %s8070_s22 = scalar_lea.hbm %s9955_s9, 1  ;;  %s8064_s28 = int_to_ptr.hbm [resolvable:$true] %s8063_s28 }
  0x86   : > { %s8065_s10 = scalar_lea.hbm %s8064_s28, 1  ;;  %p8071_p6 = scmp.lt.s32.totalorder %s8064_s28, %s9955_s9 }
  0x87   : > { %p8066_p0 = scmp.ne.s32.totalorder %s8064_s28, %s8065_s10  ;;  %p8072_p8 = scmp.lt.s32.totalorder %s8070_s22, %s8065_s10 }
  0x89   : > { %p8068_p1 = pnand %p8066_p0, %p8037_p7  ;;  %p8073_p10 = por %p8072_p8, %p8071_p6 }
  0x8b   : > { %p8069_p4 = pneg %p8068_p1 }
  0x8d   : > { %p8074_p9 = pnand %p8073_p10, %p8069_p4 }
  0x8f   : > { %8077 = shalt.err (!%p8074_p9)
}
  0x90   : > { %7648 = dma.hbm_to_vmem [thread:$0]  (!%p8434_p5), %s1290_s2, 16, %s1292_s11, [#allocation5]  }
  0x91   : > { %1326 = sbr.rel (%p8425_p3) target bundleno = 10680 (0x29b8), region = 196 }
  0x96   : > { %8098 = dma.done.wait (%p7649_p2), [#allocation3], 16  }
  0x97   : > { %8100 = vsyncadd (%p7649_p2), [#allocation3], 4294967280 }
  0x98   : > { %8102 = dma.done.wait (%p7649_p2), [#allocation5], 16  }
  0x99   : > { %8104 = vsyncadd (%p7649_p2), [#allocation5], 4294967280  ;;  %s9961_s5 = sld [smem:[#allocation8_spill]]  ;;  %p1464_p3 = scmp.lt.s32.totalorder %s8420_s26, 1  ;;  %v7473_v0 = vld [vmem:[%s9956_s8 + $0x38] sm:$0xff]  ;;  %v7472_v2 = vld [vmem:[%s9956_s8 + $0x30] sm:$0xff] }
  0x9a   : > { %v7477_v1 = vld [vmem:[%s9956_s8 + $0x58] sm:$0xff]  ;;  %1629 = vmatpush.bf16.msra.mxu0 %v7473_v0  ;;  %v7476_v3 = vld [vmem:[%s9956_s8 + $0x50] sm:$0xff]  ;;  %v7471_v4 = vld [vmem:[%s9956_s8 + $0x28] sm:$0xff]  ;;  %s9962_s14 = sld [smem:[#allocation17_spill]]  ;;  %vm1625_vm0 = vcmask 523264   ;;  %v8158_v29 = vmov 64.0  }
  0x9b   : > { %s10015_s26 = smov (!%p1464_p3, %s8420_s26), 1  ;;  %1647 = vmatpush.bf16.msra.mxu1 %v7477_v1  ;;  %v7475_v5 = vld [vmem:[%s9956_s8 + $0x48] sm:$0xff]  ;;  %v7470_v6 = vld [vmem:[%s9956_s8 + $0x20] sm:$0xff]  ;;  %v7469_v10 = vld [vmem:[%s9956_s8 + $0x18] sm:$0xff]  ;;  %7811 = vrcp.f32 %v8158_v29  ;;  %s9882_s0 = smov 64   ;;  %vm1902_vm8 = vcmask 130048  }
  0x9c   : > { %s9875_s22 = sshll.u32 %s10015_s26, 5  ;;  %v7474_v7 = vld [vmem:[%s9956_s8 + $0x40] sm:$0xff]  ;;  %v7468_v12 = vld [vmem:[%s9956_s8 + $0x10] sm:$0xff]  ;;  %v7467_v13 = vld [vmem:[%s9956_s8 + $0x8] sm:$0xff]  ;;  %s9880_s1 = smov 112   ;;  %vm2200_vm9 = vcmask 261120  }
  0x9d   : > { %v7466_v14 = vld [vmem:[%s9956_s8] sm:$0xff]  ;;  %v6612_v46 = vld [vmem:[%s8236_s30 + $0x30] sm:$0xf]  ;;  %v7485_v47 = vld [vmem:[%s8236_s30 + $0x34] sm:$0xf0]  ;;  %s9878_s2 = smov 96  }
  0x9e   : > { %1630 = vmatpush.bf16.msra.mxu0 %v7472_v2  ;;  %v7484_v48 = vld [vmem:[%s8236_s30 + $0x34] sm:$0xf]  ;;  %v6613_v49 = vor.u32 %v7485_v47, %v6612_v46  ;;  %v6614_v50 = vld [vmem:[%s8236_s30 + $0x38] sm:$0xf0]  ;;  %v6604_v52 = vld [vmem:[%s8236_s30 + $0x20] sm:$0xf] }
  0x9f   : > { %s1468_s23 = scalar_lea.vmem %s9961_s5, %s9875_s22  ;;  %1648 = vmatpush.bf16.msra.mxu1 %v7476_v3  ;;  %v6617_v51 = vor.u32 %v7484_v48, %v6614_v50  ;;  %v7483_v53 = vld [vmem:[%s8236_s30 + $0x24] sm:$0xf0]  ;;  %v7482_v54 = vld [vmem:[%s8236_s30 + $0x24] sm:$0xf]  ;;  %v6606_v56 = vld [vmem:[%s8236_s30 + $0x28] sm:$0xf0] }
  0xa0   : > { %v1520_v8 = vld [vmem:[%s1468_s23 + $0x8] sm:$0xff]  ;;  %v1522_v9 = vld [vmem:[%s1468_s23 + $0x18] sm:$0xff]  ;;  %v1519_v15 = vld [vmem:[%s1468_s23] sm:$0xff]  ;;  %1782 = vmatpush.bf16.msra.mxu2 %v6613_v49  ;;  %v6605_v55 = vor.u32 %v7483_v53, %v6604_v52  ;;  %v6609_v57 = vor.u32 %v7482_v54, %v6606_v56  ;;  %s9876_s7 = smov 16   ;;  %s9888_s11 = smov 48   ;;  %vm2203_vm10 = vcmask 392192  }
  0xa1   : > { %v1548_v11 = vpack.c.bf16 %v1522_v9, %v1520_v8  ;;  %v1521_v16 = vld [vmem:[%s1468_s23 + $0x10] sm:$0xff]  ;;  %v7780_v18 = vld [vmem:[%s9962_s14] ss:$0 sm:$0xff]  ;;  %v7812_v30 = vpop.eup %7811  ;;  %1796 = vmatpush.bf16.msra.mxu3 %v6617_v51  ;;  %v7481_v59 = vld [vmem:[%s8236_s30 + $0x14] sm:$0xf0]  ;;  %s9886_s15 = smov 32  }
  0xa2   : > { %1631 = vmatpush.bf16.msra.mxu0 %v7471_v4  ;;  %v1547_v17 = vpack.c.bf16 %v1521_v16, %v1519_v15  ;;  %v1666_v31 = vmul.f32 64.0, %v7812_v30  ;;  %vm1670_vm1 = vweird.f32 %v7812_v30  ;;  %v6596_v58 = vld [vmem:[%s8236_s30 + $0x10] sm:$0xf]  ;;  %v7480_v60 = vld [vmem:[%s8236_s30 + $0x14] sm:$0xf]  ;;  %v8531_v9 = vld [vmem:[%s9953_s13 + $0x8] sm:$0xff] }
  0xa3   : > { %1649 = vmatpush.bf16.msra.mxu1 %v7475_v5  ;;  %v6597_v61 = vor.u32 %v7481_v59, %v6596_v58  ;;  %v6598_v62 = vld [vmem:[%s8236_s30 + $0x18] sm:$0xf0]  ;;  %v6588_v63 = vld [vmem:[%s8236_s30] sm:$0xf]  ;;  %v7479_v0 = vld [vmem:[%s8236_s30 + $0x4] sm:$0xf0] }
  0xa4   : > { %v1667_v32 = vsub.f32 1.0, %v1666_v31  ;;  %1783 = vmatpush.bf16.msra.mxu2 %v6605_v55  ;;  %v6601_v1 = vor.u32 %v7480_v60, %v6598_v62  ;;  %v7478_v2 = vld [vmem:[%s8236_s30 + $0x4] sm:$0xf]  ;;  %v6590_v3 = vld [vmem:[%s8236_s30 + $0x8] sm:$0xf0]  ;;  %v6589_v5 = vor.u32 %v7479_v0, %v6588_v63  ;;  %s9884_s16 = smov 80  }
  0xa5   : > { %1797 = vmatpush.bf16.msra.mxu3 %v6609_v57  ;;  %v7781_v29 = vld [vmem:[%s9951_s19] ss:$0 sm:$0xff]  ;;  %v1498_v60 = vld [vmem:[%s9952_s17 + $0x8] sm:$0xff]  ;;  %s9963_s18 = sld [smem:[#allocation24_spill]]  ;;  %s8166_s5 = smov 8  }
  0xa6   : > { %1632 = vmatpush.bf16.msra.mxu0 %v7470_v6  ;;  %v1668_v33 = vmul.f32 %v7812_v30, %v1667_v32  ;;  %v1495_v56 = vld [vmem:[%s9953_s13] sm:$0xff]  ;;  %s9964_s28 = sld [smem:[#allocation22_spill]] }
  0xa7   : > { %1650 = vmatpush.bf16.msra.mxu1 %v7474_v7  ;;  %v6593_v7 = vor.u32 %v7478_v2, %v6590_v3  ;;  %v1497_v59 = vld [vmem:[%s9952_s17] sm:$0xff]  ;;  %s9965_s10 = sld [smem:[#allocation23_spill]] }
  0xa8   : > { %v1669_v34 = vadd.f32 %v7812_v30, %v1668_v33  ;;  %1784 = vmatpush.bf16.msra.mxu2 %v6597_v61  ;;  %s9966_s23 = sld [smem:[#allocation25_spill]] }
  0xa9   : > { %1798 = vmatpush.bf16.msra.mxu3 %v6601_v1  ;;  %s9967_s22 = sld [smem:[#allocation26_spill]] }
  0xaa   : > { %1633 = vmatpush.bf16.msra.mxu0 %v7469_v10  ;;  %6585 = vmatmul.msk.bf16.vlgmr.msra.gmra.mxu1 %vm1625_vm0, %v1548_v11  ;;  %v8497_v35 = vsel %vm1670_vm1, %v7812_v30, %v1669_v34  ;;  %v7461_v10 = vld [vmem:[%s9949_s21 + $0x18] sm:$0xff]  ;;  %v7782_v34 = vld [vmem:[%s8231_s24] ss:$0 sm:$0xff]  ;;  %s9983_s3 = sld [smem:[#allocation49_spill]] }
  0xab   : > { %1840 = vmatpush.bf16.msrb.mxu1 %v7461_v10  ;;  %s9992_s8 = sld [smem:[#allocation37_spill]] }
  0xac   : > { %1785 = vmatpush.bf16.msra.mxu2 %v6589_v5  ;;  %s9993_s9 = sld [smem:[#allocation14_spill]] }
  0xad   : > { %1799 = vmatpush.bf16.msra.mxu3 %v6593_v7  ;;  %s9997_s14 = sld [smem:[#allocation38_spill]] }
  0xae   : > { %1634 = vmatpush.bf16.msra.mxu0 %v7468_v12 }
  0xb0   : > { %1874 = vmatpush.bf16.msrb.mxu2 %v7461_v10 }
  0xb2   : > { %1635 = vmatpush.bf16.msra.mxu0 %v7467_v13 }
  0xb6   : > { %1636 = vmatpush.bf16.msra.mxu0 %v7466_v14 }
  0xb9   : > { %1637 = vmatmul.bf16.vlgmr.msra.gmra.mxu0 %v1547_v17 }
 0x127   : > { %v1652_v19 = vpop.f32.mrf.mxu1 }
 0x12f   : > { %v1654_v26 = vpop.f32.mrf.mxu1 }
 0x136   : > { %v1638_v20 = vpop.f32.mrf.mxu0 }
 0x137   : > { %v1639_v21 = vadd.f32 %v7780_v18, %v1638_v20 }
 0x139   : > { %v8489_v22 = vadd.f32 %v1652_v19, %v1639_v21 }
 0x13b   : > { %v1659_v23 = vsel %vm1625_vm0, %v8489_v22, 0.0 }
 0x13c   : > { %1660 = vadd.xlane.f32.xlu0 %v1659_v23 }
 0x13e   : > { %v1640_v24 = vpop.f32.mrf.mxu0 }
 0x13f   : > { %v1641_v25 = vadd.f32 %v7780_v18, %v1640_v24 }
 0x141   : > { %v8493_v27 = vadd.f32 %v1654_v26, %v1641_v25 }
 0x143   : > { %v1662_v28 = vsel %vm1625_vm0, %v8493_v27, 0.0 }
 0x144   : > { %1663 = vadd.xlane.f32.xlu0 %v1662_v28 }
 0x158   : > { %1858 = vrot.lane.b32.xlu0 %v8531_v9, %s9882_s0 }
 0x1af   : > { %v1661_v36 = vpop.xlane.xlu0 %1660 }
 0x1b0   : > { %v1672_v37 = vmul.f32 %v8497_v35, %v1661_v36 }
 0x1b2   : > { %v8501_v38 = vsub.f32 %v8489_v22, %v1672_v37 }
 0x1b4   : > { %v1676_v39 = vmul.f32 %v8501_v38, %v8501_v38 }
 0x1b6   : > { %v1678_v40 = vsel %vm1625_vm0, %v1676_v39, 0.0 }
 0x1b7   : > { %1679 = vadd.xlane.f32.xlu1 %v1678_v40  ;;  %v1664_v41 = vpop.xlane.xlu0 %1663 }
 0x1b8   : > { %v1673_v42 = vmul.f32 %v8497_v35, %v1664_v41  ;;  %v7459_v41 = vld [vmem:[%s9949_s21 + $0x8] sm:$0xff] }
 0x1ba   : > { %v8508_v43 = vsub.f32 %v8493_v27, %v1673_v42  ;;  %v7458_v42 = vld [vmem:[%s9949_s21] sm:$0xff] }
 0x1bc   : > { %v1677_v44 = vmul.f32 %v8508_v43, %v8508_v43 }
 0x1be   : > { %v1681_v45 = vsel %vm1625_vm0, %v1677_v44, 0.0 }
 0x1bf   : > { %1682 = vadd.xlane.f32.xlu1 %v1681_v45  ;;  %v1729_v45 = vld [vmem:[%s9957_s6] sm:$0x3] }
 0x1c0   : > { %v1731_v46 = vperm.slane %v1729_v45, 0  ;;  %v1732_v47 = vperm.slane %v1729_v45, 1 }
 0x22a   : > { %v1680_v4 = vpop.xlane.xlu1 %1679 }
 0x22b   : > { %v1684_v6 = vmul.f32 %v1680_v4, %v8497_v35 }
 0x22d   : > { %v1686_v8 = vadd.f32 1e-06, %v1684_v6 }
 0x22f   : > { %7813 = vrsqrt.f32 %v1686_v8  ;;  %vm1694_vm3 = vweird.f32 %v1686_v8 }
 0x232   : > { %v1683_v11 = vpop.xlane.xlu1 %1682 }
 0x233   : > { %v1685_v12 = vmul.f32 %v1683_v11, %v8497_v35 }
 0x235   : > { %v7814_v13 = vpop.eup %7813  ;;  %v1687_v14 = vadd.f32 1e-06, %v1685_v12 }
 0x236   : > { %v1689_v15 = vmul.f32 %v7814_v13, %v1686_v8  ;;  %vm1695_vm2 = vweird.f32 %v7814_v13 }
 0x237   : > { %7815 = vrsqrt.f32 %v1687_v14  ;;  %vm1696_vm4 = vmor %vm1694_vm3, %vm1695_vm2  ;;  %vm1704_vm6 = vweird.f32 %v1687_v14 }
 0x238   : > { %v1690_v16 = vmul.f32 %v7814_v13, %v1689_v15 }
 0x23a   : > { %v1691_v17 = vmul.f32 0.5, %v1690_v16 }
 0x23c   : > { %v1692_v18 = vsub.f32 1.5, %v1691_v17 }
 0x23d   : > { %v7816_v19 = vpop.eup %7815 }
 0x23e   : > { %v1693_v20 = vmul.f32 %v7814_v13, %v1692_v18  ;;  %v1699_v21 = vmul.f32 %v7816_v19, %v1687_v14  ;;  %vm1705_vm5 = vweird.f32 %v7816_v19 }
 0x23f   : > { %vm1706_vm7 = vmor %vm1704_vm6, %vm1705_vm5 }
 0x240   : > { %v1700_v23 = vmul.f32 %v7816_v19, %v1699_v21  ;;  %v1697_v24 = vsel %vm1696_vm4, %v7814_v13, %v1693_v20 }
 0x241   : > { %v1708_v28 = vmul.f32 %v1697_v24, %v8501_v38  ;;  %v7460_v38 = vld [vmem:[%s9949_s21 + $0x10] sm:$0xff] }
 0x242   : > { %v1701_v25 = vmul.f32 0.5, %v1700_v23  ;;  %1841 = vmatpush.bf16.msrb.mxu1 %v7460_v38  ;;  %1875 = vmatpush.bf16.msrb.mxu2 %v7460_v38 }
 0x243   : > { %v1713_v33 = vmul.f32 %v7781_v29, %v1708_v28 }
 0x244   : > { %v1702_v26 = vsub.f32 1.5, %v1701_v25 }
 0x245   : > { %v1718_v37 = vadd.f32 %v7782_v34, %v1713_v33 }
 0x246   : > { %v1703_v30 = vmul.f32 %v7816_v19, %v1702_v26  ;;  %1842 = vmatpush.bf16.msrb.mxu1 %v7459_v41  ;;  %1876 = vmatpush.bf16.msrb.mxu2 %v7459_v41 }
 0x248   : > { %v1707_v31 = vsel %vm1706_vm7, %v7816_v19, %v1703_v30 }
 0x249   : > { %v1709_v32 = vmul.f32 %v1707_v31, %v8508_v43 }
 0x24a   : > { %1843 = vmatpush.bf16.msrb.mxu1 %v7458_v42  ;;  %1877 = vmatpush.bf16.msrb.mxu2 %v7458_v42 }
 0x24b   : > { %v1714_v36 = vmul.f32 %v7781_v29, %v1709_v32 }
 0x24d   : > { %v1719_v39 = vadd.f32 %v7782_v34, %v1714_v36 }
 0x24f   : > { %v1728_v40 = vpack.c.bf16 %v1719_v39, %v1718_v37 }
 0x251   : > { %6618 = vmatmul.msk.bf16.vlgmr.msra.gmra.mxu2 %vm1625_vm0, %v1728_v40  ;;  %6619 = vmatmul.msk.bf16.vlgmr.msra.gmra.mxu3 %vm1625_vm0, %v1728_v40 }
 0x2d4   : > { %v1787_v43 = vpop.f32.mrf.mxu2  ;;  %v1801_v44 = vpop.f32.mrf.mxu3 }
 0x2d5   : > { %v1788_v50 = vadd.f32 %v1787_v43, %v1731_v46  ;;  %v1802_v51 = vadd.f32 %v1801_v44, %v1732_v47 }
 0x2d7   : > { %v1806_v63 = vmul.f32 %v1788_v50, %v1495_v56 }
 0x2dc   : > { %v1789_v48 = vpop.f32.mrf.mxu2  ;;  %v1803_v49 = vpop.f32.mrf.mxu3 }
 0x2dd   : > { %v1790_v52 = vadd.f32 %v1789_v48, %v1731_v46  ;;  %v1804_v53 = vadd.f32 %v1803_v49, %v1732_v47 }
 0x2df   : > { %v8547_v54 = vpack.c.bf16 %v1804_v53, %v1802_v51  ;;  %v1808_v55 = vpack.c.bf16 %v1790_v52, %v1788_v50  ;;  %v1807_v0 = vmul.f32 %v1790_v52, %v8531_v9  ;;  %v8564_v9 = vpop.permute.xlu0 %1858 }
 0x2e0   : > { %v1863_v12 = vmul.f32 %v8564_v9, %v1790_v52 }
 0x2e1   : > { %1958 = vmatpush.bf16.msrb.mxu0 %v8547_v54  ;;  %1865 = vrot.lane.b32.xlu2 %v1808_v55, %s9882_s0 }
 0x2e2   : > { %6636 = vmatmul.msk.bf16.vlgmr.msrb.gmra.mxu1 %vm1625_vm0, %v1808_v55 }
 0x2e9   : > { %1856 = vrot.lane.b32.xlu2 %v1495_v56, %s9882_s0 }
 0x33b   : > { %v1866_v57 = vpop.permute.xlu2 %1865 }
 0x33c   : > { %6637 = vmatmul.msk.bf16.vlgmr.msrb.gmra.mxu2 %vm1625_vm0, %v1866_v57 }
 0x343   : > { %v8562_v10 = vpop.permute.xlu2 %1856 }
 0x344   : > { %v1862_v13 = vmul.f32 %v8562_v10, %v1788_v50 }
 0x35f   : > { %v1845_v58 = vpop.f32.mrf.mxu1 }
 0x360   : > { %v1850_v61 = vmul.f32 %v1845_v58, %v1497_v59 }
 0x362   : > { %v1852_v2 = vadd.f32 %v1850_v61, %v1806_v63 }
 0x367   : > { %v1847_v62 = vpop.f32.mrf.mxu1 }
 0x368   : > { %v1851_v1 = vmul.f32 %v1847_v62, %v1498_v60 }
 0x36a   : > { %v1853_v3 = vadd.f32 %v1851_v1, %v1807_v0 }
 0x36c   : > { %v1896_v4 = vpack.c.bf16 %v1853_v3, %v1852_v2 }
 0x36e   : > { %1966 = vrot.lane.b32.xlu0 %v1896_v4, %s9880_s1 }
 0x376   : > { %2036 = vrot.lane.b32.xlu0 %v1896_v4, %s9878_s2 }
 0x3bf   : > { %v1879_v5 = vpop.f32.mrf.mxu2 }
 0x3c0   : > { %v1884_v6 = vmul.f32 %v1879_v5, %v1497_v59 }
 0x3c2   : > { %1888 = vrot.lane.b32.xlu1 %v1884_v6, %s9882_s0 }
 0x3c7   : > { %v1881_v7 = vpop.f32.mrf.mxu2 }
 0x3c8   : > { %v1885_v8 = vmul.f32 %v1881_v7, %v1498_v60 }
 0x3ca   : > { %1890 = vrot.lane.b32.xlu2 %v1885_v8, %s9882_s0 }
 0x3e0   : > { %v1967_v23 = vpop.permute.xlu0 %1966 }
 0x3e8   : > { %v2037_v26 = vpop.permute.xlu0 %2036 }
 0x424   : > { %v1891_v11 = vpop.permute.xlu2 %1890 }
 0x425   : > { %v1895_v15 = vadd.f32 %v1891_v11, %v1863_v12 }
 0x434   : > { %v1889_v14 = vpop.permute.xlu1 %1888 }
 0x435   : > { %v1894_v16 = vadd.f32 %v1889_v14, %v1862_v13 }
 0x437   : > { %v1897_v17 = vpack.c.bf16 %v1895_v15, %v1894_v16 }
 0x439   : > { %2107 = vrot.lane.b32.xlu1 %v1897_v17, %s9876_s7  ;;  %1900 = vrot.lane.b32.xlu2 %v1897_v17, %s9882_s0 }
 0x441   : > { %1968 = vrot.lane.b32.xlu2 %v1897_v17, %s9888_s11 }
 0x449   : > { %2038 = vrot.lane.b32.xlu2 %v1897_v17, %s9886_s15 }
 0x451   : > { %2105 = vrot.lane.b32.xlu2 %v1896_v4, %s9884_s16 }
 0x493   : > { %v1901_v18 = vpop.permute.xlu2 %1900 }
 0x494   : > { %v1907_v19 = vsel %vm1902_vm8, %v1901_v18, 0 }
 0x495   : > { %1916 = vmatpush.bf16.xpose.msrb.mxu3 %v1907_v19 }
 0x49b   : > { %v1969_v20 = vpop.permute.xlu2 %1968 }
 0x49c   : > { %v1974_v21 = vsel %vm1902_vm8, %v1969_v20, 0  ;;  %6638 = vmatmul.msk.bf16.vlgmr.msrb.gmra.mxu3 %vm1902_vm8, %v1896_v4 }
 0x49d   : > { %1983 = vmatpush.bf16.xpose.msra.mxu1 %v1974_v21 }
 0x4a3   : > { %v2039_v24 = vpop.permute.xlu2 %2038 }
 0x4a4   : > { %v2044_v25 = vsel %vm1902_vm8, %v2039_v24, 0  ;;  %6640 = vmatmul.msk.bf16.vlgmr.msra.gmra.mxu1 %vm1902_vm8, %v1967_v23 }
 0x4a5   : > { %2053 = vmatpush.bf16.xpose.msra.mxu3 %v2044_v25 }
 0x4ab   : > { %v2108_v28 = vpop.permute.xlu1 %2107  ;;  %v2106_v30 = vpop.permute.xlu2 %2105 }
 0x4ac   : > { %v2113_v29 = vsel %vm1902_vm8, %v2108_v28, 0  ;;  %6642 = vmatmul.msk.bf16.vlgmr.msra.gmra.mxu3 %vm1902_vm8, %v2037_v26 }
 0x4ad   : > { %2122 = vmatpush.bf16.xpose.msrb.mxu1 %v2113_v29 }
 0x4b4   : > { %6644 = vmatmul.msk.bf16.vlgmr.msrb.gmra.mxu1 %vm1902_vm8, %v2106_v30 }
 0x51f   : > { %v1918_v31 = vpop.f32.mrf.mxu3 }
 0x520   : > { %v1923_v32 = vmul.f32 0.25, %v1918_v31 }
 0x521   : > { %v1985_v33 = vpop.f32.mrf.mxu1 }
 0x522   : > { %v1990_v34 = vmul.f32 0.25, %v1985_v33  ;;  %v1925_v36 = vsel %vm1902_vm8, %v1923_v32, -inf }
 0x523   : > { %1926 = vmax.xlane.f32.xlu2 %v1925_v36 }
 0x524   : > { %v1992_v37 = vsel %vm1902_vm8, %v1990_v34, -inf }
 0x525   : > { %1993 = vmax.xlane.f32.xlu1 %v1992_v37 }
 0x527   : > { %v1920_v39 = vpop.f32.mrf.mxu3 }
 0x528   : > { %v1924_v40 = vmul.f32 0.25, %v1920_v39 }
 0x529   : > { %v1987_v38 = vpop.f32.mrf.mxu1 }
 0x52a   : > { %v1991_v41 = vmul.f32 0.25, %v1987_v38  ;;  %v1928_v43 = vsel %vm1902_vm8, %v1924_v40, -inf }
 0x52c   : > { %v1995_v42 = vsel %vm1902_vm8, %v1991_v41, -inf }
 0x52d   : > { %1996 = vmax.xlane.f32.xlu0 %v1995_v42  ;;  %1929 = vmax.xlane.f32.xlu1 %v1928_v43 }
 0x52f   : > { %v2055_v44 = vpop.f32.mrf.mxu3 }
 0x530   : > { %v2060_v45 = vmul.f32 0.25, %v2055_v44 }
 0x531   : > { %v2124_v46 = vpop.f32.mrf.mxu1 }
 0x532   : > { %v2129_v47 = vmul.f32 0.25, %v2124_v46  ;;  %v2062_v49 = vsel %vm1902_vm8, %v2060_v45, -inf }
 0x534   : > { %v2131_v48 = vsel %vm1902_vm8, %v2129_v47, -inf }
 0x535   : > { %2132 = vmax.xlane.f32.xlu0 %v2131_v48  ;;  %2063 = vmax.xlane.f32.xlu1 %v2062_v49 }
 0x537   : > { %v2057_v50 = vpop.f32.mrf.mxu3 }
 0x538   : > { %v2061_v51 = vmul.f32 0.25, %v2057_v50 }
 0x539   : > { %v2126_v52 = vpop.f32.mrf.mxu1 }
 0x53a   : > { %v2130_v53 = vmul.f32 0.25, %v2126_v52  ;;  %v2065_v56 = vsel %vm1902_vm8, %v2061_v51, -inf }
 0x53c   : > { %v2134_v55 = vsel %vm1902_vm8, %v2130_v53, -inf }
 0x53d   : > { %2135 = vmax.xlane.f32.xlu2 %v2134_v55  ;;  %2066 = vmax.xlane.f32.xlu0 %v2065_v56 }
 0x596   : > { %v1927_v57 = vpop.xlane.xlu2 %1926 }
 0x597   : > { %v1931_v58 = vsub.f32 %v1923_v32, %v1927_v57 }
 0x598   : > { %v1994_v59 = vpop.xlane.xlu1 %1993 }
 0x599   : > { %v1933_v60 = vmul.f32 1.442695, %v1931_v58  ;;  %v1998_v61 = vsub.f32 %v1990_v34, %v1994_v59 }
 0x59b   : > { %7817 = vpow2.f32 %v1933_v60  ;;  %v2000_v62 = vmul.f32 1.442695, %v1998_v61 }
 0x59d   : > { %7819 = vpow2.f32 %v2000_v62 }
 0x5a0   : > { %v1997_v63 = vpop.xlane.xlu0 %1996  ;;  %v1930_v0 = vpop.xlane.xlu1 %1929 }
 0x5a1   : > { %v7818_v1 = vpop.eup %7817  ;;  %v1999_v2 = vsub.f32 %v1991_v41, %v1997_v63  ;;  %v1932_v3 = vsub.f32 %v1924_v40, %v1930_v0 }
 0x5a2   : > { %v1937_v4 = vsel %vm1902_vm8, %v7818_v1, 0.0 }
 0x5a3   : > { %v8590_v5 = vpop.eup %7819  ;;  %v2002_v6 = vmul.f32 1.442695, %v1999_v2  ;;  %v1935_v7 = vmul.f32 1.442695, %v1932_v3  ;;  %1938 = vadd.xlane.f32.xlu0 %v1937_v4 }
 0x5a4   : > { %v2004_v8 = vsel %vm1902_vm8, %v8590_v5, 0.0 }
 0x5a5   : > { %7821 = vpow2.f32 %v2002_v6  ;;  %2005 = vadd.xlane.f32.xlu2 %v2004_v8 }
 0x5a6   : > { %7823 = vpow2.f32 %v1935_v7 }
 0x5a8   : > { %v2133_v11 = vpop.xlane.xlu0 %2132  ;;  %v2064_v12 = vpop.xlane.xlu1 %2063 }
 0x5a9   : > { %v2137_v13 = vsub.f32 %v2129_v47, %v2133_v11  ;;  %v2068_v16 = vsub.f32 %v2060_v45, %v2064_v12 }
 0x5ab   : > { %v7822_v14 = vpop.eup %7821  ;;  %v2139_v15 = vmul.f32 1.442695, %v2137_v13  ;;  %v2070_v20 = vmul.f32 1.442695, %v2068_v16 }
 0x5ac   : > { %v7824_v17 = vpop.eup %7823  ;;  %v2007_v18 = vsel %vm1902_vm8, %v7822_v14, 0.0 }
 0x5ad   : > { %7825 = vpow2.f32 %v2139_v15  ;;  %2008 = vadd.xlane.f32.xlu1 %v2007_v18  ;;  %v1940_v19 = vsel %vm1902_vm8, %v7824_v17, 0.0  ;;  %v7489_v18 = vld [vmem:[%s9954_s12 + $0x18] sm:$0xff] }
 0x5ae   : > { %1941 = vadd.xlane.f32.xlu2 %v1940_v19  ;;  %7827 = vpow2.f32 %v2070_v20  ;;  %2246 = vmatpush.bf16.msrb.mxu3 %v7489_v18  ;;  %v7488_v19 = vld [vmem:[%s9954_s12 + $0x10] sm:$0xff]  ;;  %v7487_v20 = vld [vmem:[%s9954_s12 + $0x8] sm:$0xff]  ;;  %v7490_v18 = vld [vmem:[%s9963_s18 + $0x4] sm:$0xf] }
 0x5b0   : > { %v2136_v21 = vpop.xlane.xlu2 %2135  ;;  %v2067_v23 = vpop.xlane.xlu0 %2066 }
 0x5b1   : > { %v2138_v24 = vsub.f32 %v2130_v53, %v2136_v21  ;;  %v2069_v28 = vsub.f32 %v2061_v51, %v2067_v23  ;;  %v7486_v21 = vld [vmem:[%s9954_s12] sm:$0xff] }
 0x5b2   : > { %2247 = vmatpush.bf16.msrb.mxu3 %v7488_v19 }
 0x5b3   : > { %v8596_v25 = vpop.eup %7825  ;;  %v2141_v26 = vmul.f32 1.442695, %v2138_v24  ;;  %v2072_v30 = vmul.f32 1.442695, %v2069_v28 }
 0x5b4   : > { %v2143_v29 = vsel %vm1902_vm8, %v8596_v25, 0.0  ;;  %v7828_v31 = vpop.eup %7827 }
 0x5b5   : > { %7829 = vpow2.f32 %v2141_v26  ;;  %2144 = vadd.xlane.f32.xlu0 %v2143_v29  ;;  %v2074_v34 = vsel %vm1902_vm8, %v7828_v31, 0.0 }
 0x5b6   : > { %7831 = vpow2.f32 %v2072_v30  ;;  %2248 = vmatpush.bf16.msrb.mxu3 %v7487_v20 }
 0x5ba   : > { %2249 = vmatpush.bf16.msrb.mxu3 %v7486_v21  ;;  %v6667_v21 = vld [vmem:[%s9963_s18 + $0x8] sm:$0xf0] }
 0x5bb   : > { %v7830_v32 = vpop.eup %7829 }
 0x5bc   : > { %v2146_v33 = vsel %vm1902_vm8, %v7830_v32, 0.0  ;;  %v7832_v36 = vpop.eup %7831 }
 0x5bd   : > { %2147 = vadd.xlane.f32.xlu2 %v2146_v33  ;;  %2075 = vadd.xlane.f32.xlu0 %v2074_v34  ;;  %v2077_v37 = vsel %vm1902_vm8, %v7832_v36, 0.0 }
 0x5c5   : > { %2078 = vadd.xlane.f32.xlu2 %v2077_v37 }
 0x5c6   : > { %2016 = vrot.lane.b32.xlu1 %v8547_v54, %s9880_s1 }
 0x5d1   : > { %2154 = vrot.lane.b32.xlu0 %v8547_v54, %s9884_s16 }
 0x5dd   : > { %2085 = vrot.lane.b32.xlu2 %v8547_v54, %s9878_s2 }
 0x616   : > { %v1939_v40 = vpop.xlane.xlu0 %1938 }
 0x617   : > { %7833 = vrcp.f32 %v1939_v40 }
 0x618   : > { %v2006_v39 = vpop.xlane.xlu2 %2005 }
 0x61d   : > { %v7834_v41 = vpop.eup %7833 }
 0x61e   : > { %v1945_v43 = vmul.f32 %v7834_v41, %v7818_v1  ;;  %v7783_v41 = vld [vmem:[%s9950_s20] ss:$0 sm:$0xff] }
 0x620   : > { %v2009_v45 = vpop.xlane.xlu1 %2008 }
 0x621   : > { %v1942_v38 = vpop.xlane.xlu2 %1941 }
 0x622   : > { %7835 = vrcp.f32 %v1942_v38 }
 0x623   : > { %7837 = vrcp.f32 %v2009_v45 }
 0x624   : > { %7839 = vrcp.f32 %v2006_v39 }
 0x628   : > { %v7836_v42 = vpop.eup %7835  ;;  %v2145_v46 = vpop.xlane.xlu0 %2144 }
 0x629   : > { %v1946_v44 = vmul.f32 %v7836_v42, %v7824_v17  ;;  %v7838_v49 = vpop.eup %7837 }
 0x62a   : > { %v7840_v54 = vpop.eup %7839  ;;  %v2013_v51 = vmul.f32 %v7838_v49, %v7822_v14 }
 0x62b   : > { %v1947_v47 = vpack.c.bf16 %v1946_v44, %v1945_v43  ;;  %v2012_v52 = vmul.f32 %v7840_v54, %v8590_v5 }
 0x62d   : > { %6639 = vmatmul.msk.bf16.vlgmr.msrb.gmra.mxu0 %vm1902_vm8, %v1947_v47  ;;  %v2014_v56 = vpack.c.bf16 %v2013_v51, %v2012_v52 }
 0x630   : > { %v2148_v48 = vpop.xlane.xlu2 %2147  ;;  %v2076_v50 = vpop.xlane.xlu0 %2075 }
 0x631   : > { %7841 = vrcp.f32 %v2076_v50 }
 0x637   : > { %v7842_v57 = vpop.eup %7841 }
 0x638   : > { %v2079_v53 = vpop.xlane.xlu2 %2078  ;;  %v2017_v55 = vpop.permute.xlu1 %2016  ;;  %v2082_v59 = vmul.f32 %v7842_v57, %v7828_v31 }
 0x639   : > { %7843 = vrcp.f32 %v2079_v53  ;;  %2029 = vmatpush.bf16.msra.mxu2 %v2017_v55 }
 0x63a   : > { %7845 = vrcp.f32 %v2148_v48 }
 0x63b   : > { %7847 = vrcp.f32 %v2145_v46 }
 0x63c   : > { %6641 = vmatmul.msk.bf16.vlgmr.msra.gmra.mxu2 %vm1902_vm8, %v2014_v56 }
 0x63f   : > { %v7844_v58 = vpop.eup %7843 }
 0x640   : > { %v2083_v60 = vmul.f32 %v7844_v58, %v7832_v36  ;;  %v2086_v61 = vpop.permute.xlu2 %2085  ;;  %v7846_v63 = vpop.eup %7845  ;;  %v6689_v58 = vld [vmem:[%s9963_s18 + $0x30] sm:$0xf] }
 0x641   : > { %2098 = vmatpush.bf16.msra.mxu0 %v2086_v61  ;;  %v7848_v1 = vpop.eup %7847  ;;  %v2152_v2 = vmul.f32 %v7846_v63, %v7830_v32 }
 0x642   : > { %v2084_v62 = vpack.c.bf16 %v2083_v60, %v2082_v59  ;;  %v2151_v3 = vmul.f32 %v7848_v1, %v8596_v25  ;;  %v7497_v59 = vld [vmem:[%s9963_s18 + $0x34] sm:$0xf0]  ;;  %v7496_v60 = vld [vmem:[%s9963_s18 + $0x34] sm:$0xf]  ;;  %v7495_v1 = vld [vmem:[%s9963_s18 + $0x24] sm:$0xf0] }
 0x643   : > { %v2155_v0 = vpop.permute.xlu0 %2154  ;;  %v6690_v61 = vor.u32 %v7497_v59, %v6689_v58 }
 0x644   : > { %6643 = vmatmul.msk.bf16.vlgmr.msra.gmra.mxu0 %vm1902_vm8, %v2084_v62  ;;  %2167 = vmatpush.bf16.msrb.mxu2 %v2155_v0  ;;  %v2153_v4 = vpack.c.bf16 %v2152_v2, %v2151_v3  ;;  %v6691_v62 = vld [vmem:[%s9963_s18 + $0x38] sm:$0xf0]  ;;  %v6681_v0 = vld [vmem:[%s9963_s18 + $0x20] sm:$0xf]  ;;  %v7494_v2 = vld [vmem:[%s9963_s18 + $0x24] sm:$0xf] }
 0x645   : > { %v6694_v63 = vor.u32 %v7496_v60, %v6691_v62  ;;  %2382 = vmatpush.bf16.msrb.mxu0 %v6690_v61  ;;  %v6682_v3 = vor.u32 %v7495_v1, %v6681_v0 }
 0x647   : > { %2396 = vmatpush.bf16.msra.mxu1 %v6694_v63 }
 0x649   : > { %2383 = vmatpush.bf16.msrb.mxu0 %v6682_v3 }
 0x64c   : > { %6645 = vmatmul.msk.bf16.vlgmr.msrb.gmra.mxu2 %vm1902_vm8, %v2153_v4  ;;  %v6683_v4 = vld [vmem:[%s9963_s18 + $0x28] sm:$0xf0] }
 0x6aa   : > { %v1960_v5 = vpop.f32.mrf.mxu0 }
 0x6b2   : > { %v1962_v6 = vpop.f32.mrf.mxu0 }
 0x6bf   : > { %v2031_v7 = vpop.f32.mrf.mxu2 }
 0x6c1   : > { %v2100_v8 = vpop.f32.mrf.mxu0 }
 0x6c7   : > { %v2033_v11 = vpop.f32.mrf.mxu2 }
 0x6c8   : > { %v7720_v12 = vpack.i.bf16 %v2033_v11, %v2031_v7  ;;  %v7493_v7 = vld [vmem:[%s9963_s18 + $0x14] sm:$0xf0] }
 0x6c9   : > { %v2102_v13 = vpop.f32.mrf.mxu0 }
 0x6ca   : > { %7721 = vrot.lane.b32.xlu1 %v7720_v12, %s9876_s7  ;;  %v7725_v15 = vpack.i.bf16 %v2102_v13, %v2100_v8  ;;  %v7492_v8 = vld [vmem:[%s9963_s18 + $0x14] sm:$0xf]  ;;  %v6675_v12 = vld [vmem:[%s9963_s18 + $0x18] sm:$0xf0]  ;;  %s9968_s7 = smov %s9967_s22 }
 0x6cf   : > { %v2169_v14 = vpop.f32.mrf.mxu2 }
 0x6d2   : > { %7726 = vrot.lane.b32.xlu1 %v7725_v15, %s9886_s15 }
 0x6d7   : > { %v2171_v16 = vpop.f32.mrf.mxu2 }
 0x6d8   : > { %v7730_v17 = vpack.i.bf16 %v2171_v16, %v2169_v14  ;;  %v6678_v14 = vor.u32 %v7492_v8, %v6675_v12  ;;  %v6665_v16 = vld [vmem:[%s9963_s18] sm:$0xf] }
 0x6da   : > { %7731 = vrot.lane.b32.xlu0 %v7730_v17, %s9888_s11  ;;  %v7491_v17 = vld [vmem:[%s9963_s18 + $0x4] sm:$0xf0] }
 0x6db   : > { %v6666_v20 = vor.u32 %v7491_v17, %v6665_v16  ;;  %v7505_v17 = vld [vmem:[%s9967_s22 + $0x38] sm:$0xff]  ;;  %s9971_s22 = sld [smem:[#allocation27_spill]] }
 0x6dc   : > { %2712 = vmatpush.bf16.msra.mxu2 %v7505_v17 }
 0x6e1   : > { %s9972_s2 = smov %s9971_s22 }
 0x73c   : > { %v7722_v23 = vpop.permute.xlu1 %7721 }
 0x73d   : > { %v7724_v25 = vunpack.i.h.bf16 %v7722_v23  ;;  %v7723_v26 = vunpack.i.l.bf16 %v7722_v23  ;;  %v6670_v23 = vor.u32 %v7490_v18, %v6667_v21  ;;  %v7513_v18 = vld [vmem:[%s9968_s7 + $0x78] sm:$0xff] }
 0x73e   : > { %2726 = vmatpush.bf16.msra.mxu3 %v7513_v18  ;;  %v7509_v18 = vld [vmem:[%s9968_s7 + $0x58] sm:$0xff] }
 0x73f   : > { %v2199_v31 = vsel %vm1902_vm8, %v1962_v6, %v7724_v25  ;;  %v2198_v32 = vsel %vm1902_vm8, %v1960_v5, %v7723_v26  ;;  %v6686_v5 = vor.u32 %v7494_v2, %v6683_v4  ;;  %v6673_v6 = vld [vmem:[%s9963_s18 + $0x10] sm:$0xf] }
 0x740   : > { %v6674_v11 = vor.u32 %v7493_v7, %v6673_v6 }
 0x741   : > { %2397 = vmatpush.bf16.msra.mxu1 %v6686_v5 }
 0x742   : > { %2384 = vmatpush.bf16.msrb.mxu0 %v6674_v11 }
 0x744   : > { %v7727_v24 = vpop.permute.xlu1 %7726 }
 0x745   : > { %v7729_v28 = vunpack.i.h.bf16 %v7727_v24  ;;  %v7728_v29 = vunpack.i.l.bf16 %v7727_v24  ;;  %2398 = vmatpush.bf16.msra.mxu1 %v6678_v14 }
 0x746   : > { %2385 = vmatpush.bf16.msrb.mxu0 %v6666_v20 }
 0x747   : > { %v2201_v36 = vsel %vm2200_vm9, %v2198_v32, %v7728_v29  ;;  %v2202_v37 = vsel %vm2200_vm9, %v2199_v31, %v7729_v28 }
 0x749   : > { %2399 = vmatpush.bf16.msra.mxu1 %v6670_v23 }
 0x74c   : > { %v7732_v30 = vpop.permute.xlu0 %7731 }
 0x74d   : > { %v7734_v33 = vunpack.i.h.bf16 %v7732_v30  ;;  %v7733_v34 = vunpack.i.l.bf16 %v7732_v30 }
 0x74f   : > { %v2205_v39 = vsel %vm2203_vm10, %v2202_v37, %v7734_v33  ;;  %v2204_v40 = vsel %vm2203_vm10, %v2201_v36, %v7733_v34 }
 0x750   : > { %v2214_v38 = vpack.c.bf16 %v2205_v39, %v2204_v40 }
 0x752   : > { %6662 = vmatmul.msk.bf16.vlgmr.msrb.gmra.mxu3 %vm1625_vm0, %v2214_v38 }
 0x7d5   : > { %v2251_v42 = vpop.f32.mrf.mxu3 }
 0x7d6   : > { %v2256_v43 = vadd.f32 %v2251_v42, %v8489_v22 }
 0x7d8   : > { %v8631_v44 = vadd.f32 %v7783_v41, %v2256_v43 }
 0x7da   : > { %v2266_v45 = vsel %vm1625_vm0, %v8631_v44, 0.0 }
 0x7db   : > { %2267 = vadd.xlane.f32.xlu1 %v2266_v45 }
 0x7dd   : > { %v2253_v46 = vpop.f32.mrf.mxu3 }
 0x7de   : > { %v2257_v47 = vadd.f32 %v2253_v46, %v8493_v27  ;;  %v7785_v46 = vld [vmem:[%s9965_s10] ss:$0 sm:$0xff] }
 0x7e0   : > { %v8636_v48 = vadd.f32 %v7783_v41, %v2257_v47  ;;  %v7784_v41 = vld [vmem:[%s9964_s28] ss:$0 sm:$0xff] }
 0x7e2   : > { %v2269_v49 = vsel %vm1625_vm0, %v8636_v48, 0.0 }
 0x7e3   : > { %2270 = vadd.xlane.f32.xlu2 %v2269_v49 }
 0x84e   : > { %v2268_v50 = vpop.xlane.xlu1 %2267 }
 0x84f   : > { %v2272_v22 = vmul.f32 %v2268_v50, %v8497_v35 }
 0x851   : > { %v8642_v54 = vsub.f32 %v8631_v44, %v2272_v22 }
 0x853   : > { %v2276_v51 = vmul.f32 %v8642_v54, %v8642_v54 }
 0x855   : > { %v2278_v27 = vsel %vm1625_vm0, %v2276_v51, 0.0 }
 0x856   : > { %2279 = vadd.xlane.f32.xlu0 %v2278_v27  ;;  %v2271_v52 = vpop.xlane.xlu2 %2270 }
 0x857   : > { %v2273_v53 = vmul.f32 %v2271_v52, %v8497_v35  ;;  %v2329_v52 = vld [vmem:[%s9966_s23] sm:$0x3] }
 0x859   : > { %v8649_v55 = vsub.f32 %v8636_v48, %v2273_v53  ;;  %v2331_v53 = vperm.slane %v2329_v52, 0 }
 0x85b   : > { %v2277_v56 = vmul.f32 %v8649_v55, %v8649_v55 }
 0x85d   : > { %v2281_v57 = vsel %vm1625_vm0, %v2277_v56, 0.0  ;;  %v2332_v56 = vperm.slane %v2329_v52, 1 }
 0x85e   : > { %2282 = vadd.xlane.f32.xlu1 %v2281_v57 }
 0x8c9   : > { %v2280_v13 = vpop.xlane.xlu0 %2279 }
 0x8ca   : > { %v2284_v15 = vmul.f32 %v2280_v13, %v8497_v35 }
 0x8cc   : > { %v2286_v19 = vadd.f32 1e-06, %v2284_v15 }
 0x8ce   : > { %7849 = vrsqrt.f32 %v2286_v19  ;;  %vm2294_vm12 = vweird.f32 %v2286_v19 }
 0x8d1   : > { %v2283_v24 = vpop.xlane.xlu1 %2282 }
 0x8d2   : > { %v2285_v25 = vmul.f32 %v2283_v24, %v8497_v35 }
 0x8d4   : > { %v7850_v26 = vpop.eup %7849  ;;  %v2287_v28 = vadd.f32 1e-06, %v2285_v25 }
 0x8d5   : > { %v2289_v29 = vmul.f32 %v7850_v26, %v2286_v19  ;;  %vm2295_vm11 = vweird.f32 %v7850_v26 }
 0x8d6   : > { %7851 = vrsqrt.f32 %v2287_v28  ;;  %vm2296_vm13 = vmor %vm2294_vm12, %vm2295_vm11  ;;  %vm2304_vm15 = vweird.f32 %v2287_v28 }
 0x8d7   : > { %v2290_v30 = vmul.f32 %v7850_v26, %v2289_v29  ;;  %v7512_v29 = vld [vmem:[%s9968_s7 + $0x70] sm:$0xff] }
 0x8d8   : > { %2727 = vmatpush.bf16.msra.mxu3 %v7512_v29 }
 0x8d9   : > { %v2291_v31 = vmul.f32 0.5, %v2290_v30 }
 0x8db   : > { %v2292_v32 = vsub.f32 1.5, %v2291_v31 }
 0x8dc   : > { %v7852_v33 = vpop.eup %7851 }
 0x8dd   : > { %v2293_v34 = vmul.f32 %v7850_v26, %v2292_v32  ;;  %v2299_v36 = vmul.f32 %v7852_v33, %v2287_v28  ;;  %vm2305_vm14 = vweird.f32 %v7852_v33  ;;  %v7504_v28 = vld [vmem:[%s9968_s7 + $0x30] sm:$0xff] }
 0x8de   : > { %vm2306_vm1 = vmor %vm2304_vm15, %vm2305_vm14  ;;  %2713 = vmatpush.bf16.msra.mxu2 %v7504_v28 }
 0x8df   : > { %v2300_v37 = vmul.f32 %v7852_v33, %v2299_v36  ;;  %v2297_v39 = vsel %vm2296_vm13, %v7850_v26, %v2293_v34 }
 0x8e0   : > { %v2308_v42 = vmul.f32 %v2297_v39, %v8642_v54 }
 0x8e1   : > { %v2301_v40 = vmul.f32 0.5, %v2300_v37 }
 0x8e2   : > { %v2313_v47 = vmul.f32 %v7784_v41, %v2308_v42 }
 0x8e3   : > { %v2302_v38 = vsub.f32 1.5, %v2301_v40 }
 0x8e4   : > { %v2318_v22 = vadd.f32 %v7785_v46, %v2313_v47  ;;  %v7511_v47 = vld [vmem:[%s9968_s7 + $0x68] sm:$0xff] }
 0x8e5   : > { %v2303_v43 = vmul.f32 %v7852_v33, %v2302_v38  ;;  %2728 = vmatpush.bf16.msra.mxu3 %v7511_v47 }
 0x8e7   : > { %v2307_v45 = vsel %vm2306_vm1, %v7852_v33, %v2303_v43 }
 0x8e8   : > { %v2309_v49 = vmul.f32 %v2307_v45, %v8649_v55 }
 0x8ea   : > { %v2314_v50 = vmul.f32 %v7784_v41, %v2309_v49 }
 0x8ec   : > { %v2319_v51 = vadd.f32 %v7785_v46, %v2314_v50  ;;  %v7503_v46 = vld [vmem:[%s9968_s7 + $0x28] sm:$0xff] }
 0x8ed   : > { %2714 = vmatpush.bf16.msra.mxu2 %v7503_v46 }
 0x8ee   : > { %v2328_v27 = vpack.c.bf16 %v2319_v51, %v2318_v22 }
 0x8f0   : > { %6695 = vmatmul.msk.bf16.vlgmr.msrb.gmra.mxu0 %vm1625_vm0, %v2328_v27  ;;  %6696 = vmatmul.msk.bf16.vlgmr.msra.gmra.mxu1 %vm1625_vm0, %v2328_v27 }
 0x96d   : > { %v2387_v54 = vpop.f32.mrf.mxu0  ;;  %v2401_v57 = vpop.f32.mrf.mxu1 }
 0x96e   : > { %v8679_v58 = vadd.f32 %v2387_v54, %v2331_v53  ;;  %v8681_v59 = vadd.f32 %v2401_v57, %v2332_v56 }
 0x970   : > { %v8684_v60 = vmul.f32 0.70710677, %v8679_v58  ;;  %v8687_v55 = vmul.f32 0.70710677, %v8681_v59 }
 0x972   : > { %v2414_v61 = vmul.f32 %v8684_v60, %v8684_v60  ;;  %v2454_v62 = vmul.f32 %v8687_v55, %v8687_v55 }
 0x974   : > { %v8693_v63 = vmin.f32 %v2414_v61, 16.0  ;;  %v8695_v0 = vmin.f32 %v2454_v62, 16.0  ;;  %v7502_v62 = vld [vmem:[%s9968_s7 + $0x20] sm:$0xff] }
 0x975   : > { %v2389_v1 = vpop.f32.mrf.mxu0  ;;  %v2403_v2 = vpop.f32.mrf.mxu1  ;;  %2715 = vmatpush.bf16.msra.mxu2 %v7502_v62 }
 0x976   : > { %v2416_v3 = vmul.f32 2.1237322e-06, %v8693_v63  ;;  %v2427_v4 = vmul.f32 3.8918573e-05, %v8693_v63  ;;  %v8699_v5 = vadd.f32 %v2389_v1, %v2331_v53  ;;  %v2467_v6 = vmul.f32 3.8918573e-05, %v8695_v0 }
 0x977   : > { %v8702_v7 = vadd.f32 %v2403_v2, %v2332_v56  ;;  %v2456_v15 = vmul.f32 2.1237322e-06, %v8695_v0  ;;  %v7510_v1 = vld [vmem:[%s9968_s7 + $0x60] sm:$0xff] }
 0x978   : > { %v2417_v8 = vadd.f32 0.00028619796, %v2416_v3  ;;  %v2428_v11 = vadd.f32 0.001143296, %v2427_v4  ;;  %v2468_v12 = vadd.f32 0.001143296, %v2467_v6  ;;  %2729 = vmatpush.bf16.msra.mxu3 %v7510_v1 }
 0x979   : > { %v8705_v13 = vmul.f32 0.70710677, %v8699_v5  ;;  %v8710_v16 = vmul.f32 0.70710677, %v8702_v7  ;;  %v2457_v31 = vadd.f32 0.00028619796, %v2456_v15 }
 0x97a   : > { %v2429_v14 = vmul.f32 %v2428_v11, %v8693_v63  ;;  %v2469_v19 = vmul.f32 %v2468_v12, %v8695_v0  ;;  %v2418_v21 = vmul.f32 %v2417_v8, %v8693_v63  ;;  %v7501_v12 = vld [vmem:[%s9968_s7 + $0x18] sm:$0xff] }
 0x97b   : > { %v2494_v20 = vmul.f32 %v8705_v13, %v8705_v13  ;;  %v2534_v24 = vmul.f32 %v8710_v16, %v8710_v16  ;;  %v2458_v43 = vmul.f32 %v2457_v31, %v8695_v0  ;;  %2716 = vmatpush.bf16.msra.mxu2 %v7501_v12 }
 0x97c   : > { %v2430_v23 = vadd.f32 0.014752088, %v2429_v14  ;;  %v2470_v25 = vadd.f32 0.014752088, %v2469_v19  ;;  %v2419_v37 = vadd.f32 0.0036580483, %v2418_v21  ;;  %2730 = vmatpush.bf16.msra.mxu3 %v7509_v18 }
 0x97d   : > { %v8720_v26 = vmin.f32 %v2494_v20, 16.0  ;;  %v8725_v32 = vmin.f32 %v2534_v24, 16.0  ;;  %v2459_v57 = vadd.f32 0.0036580483, %v2458_v43  ;;  %v7500_v24 = vld [vmem:[%s9968_s7 + $0x10] sm:$0xff] }
 0x97e   : > { %v2431_v30 = vmul.f32 %v2430_v23, %v8693_v63  ;;  %v2471_v33 = vmul.f32 %v2470_v25, %v8695_v0  ;;  %v2420_v27 = vmul.f32 %v2419_v37, %v8693_v63  ;;  %v7508_v25 = vld [vmem:[%s9968_s7 + $0x50] sm:$0xff] }
 0x97f   : > { %v2496_v34 = vmul.f32 2.1237322e-06, %v8720_v26  ;;  %v2507_v36 = vmul.f32 3.8918573e-05, %v8720_v26  ;;  %v2536_v45 = vmul.f32 2.1237322e-06, %v8725_v32  ;;  %v2460_v20 = vmul.f32 %v2459_v57, %v8695_v0  ;;  %2717 = vmatpush.bf16.msra.mxu2 %v7500_v24 }
 0x980   : > { %v2432_v39 = vadd.f32 0.112945676, %v2431_v30  ;;  %v2472_v40 = vadd.f32 0.112945676, %v2471_v33  ;;  %v2547_v51 = vmul.f32 3.8918573e-05, %v8725_v32  ;;  %2731 = vmatpush.bf16.msra.mxu3 %v7508_v25 }
 0x981   : > { %v2497_v38 = vadd.f32 0.00028619796, %v2496_v34  ;;  %v2508_v41 = vadd.f32 0.001143296, %v2507_v36  ;;  %v2537_v4 = vadd.f32 0.00028619796, %v2536_v45 }
 0x982   : > { %v2433_v42 = vmul.f32 %v2432_v39, %v8693_v63  ;;  %v2473_v49 = vmul.f32 %v2472_v40, %v8695_v0  ;;  %v2548_v6 = vadd.f32 0.001143296, %v2547_v51  ;;  %v2421_v8 = vadd.f32 0.05243302, %v2420_v27  ;;  %v7499_v40 = vld [vmem:[%s9968_s7 + $0x8] sm:$0xff] }
 0x983   : > { %v2498_v50 = vmul.f32 %v2497_v38, %v8720_v26  ;;  %v2509_v22 = vmul.f32 %v2508_v41, %v8720_v26  ;;  %v2538_v21 = vmul.f32 %v2537_v4, %v8725_v32  ;;  %v2461_v31 = vadd.f32 0.05243302, %v2460_v20  ;;  %v7507_v38 = vld [vmem:[%s9968_s7 + $0x48] sm:$0xff]  ;;  %2718 = vmatpush.bf16.msra.mxu2 %v7499_v40 }
 0x984   : > { %v2434_v52 = vadd.f32 0.4994258, %v2433_v42  ;;  %v2474_v53 = vadd.f32 0.4994258, %v2473_v49  ;;  %v2549_v17 = vmul.f32 %v2548_v6, %v8725_v32  ;;  %v2422_v23 = vmul.f32 %v2421_v8, %v8693_v63  ;;  %2732 = vmatpush.bf16.msra.mxu3 %v7507_v38 }
 0x985   : > { %v2510_v56 = vadd.f32 0.014752088, %v2509_v22  ;;  %v2499_v61 = vadd.f32 0.0036580483, %v2498_v50  ;;  %v2539_v34 = vadd.f32 0.0036580483, %v2538_v21  ;;  %v2462_v50 = vmul.f32 %v2461_v31, %v8695_v0 }
 0x986   : > { %v2435_v54 = vmul.f32 %v2434_v52, %v8693_v63  ;;  %v2475_v2 = vmul.f32 %v2474_v53, %v8695_v0  ;;  %v2550_v29 = vadd.f32 0.014752088, %v2549_v17  ;;  %v2423_v39 = vadd.f32 0.18741608, %v2422_v23  ;;  %v7498_v53 = vld [vmem:[%s9968_s7] sm:$0xff] }
 0x987   : > { %v2511_v3 = vmul.f32 %v2510_v56, %v8720_v26  ;;  %v2500_v19 = vmul.f32 %v2499_v61, %v8720_v26  ;;  %v2540_v51 = vmul.f32 %v2539_v34, %v8725_v32  ;;  %v7506_v56 = vld [vmem:[%s9968_s7 + $0x40] sm:$0xff]  ;;  %2719 = vmatpush.bf16.msra.mxu2 %v7498_v53 }
 0x988   : > { %v8745_v11 = vadd.f32 1.0, %v2435_v54  ;;  %v8748_v14 = vadd.f32 1.0, %v2475_v2  ;;  %v2551_v36 = vmul.f32 %v2550_v29, %v8725_v32  ;;  %v2424_v27 = vmul.f32 %v2423_v39, %v8693_v63  ;;  %2733 = vmatpush.bf16.msra.mxu3 %v7506_v56 }
 0x989   : > { %v2512_v15 = vadd.f32 0.112945676, %v2511_v3  ;;  %v2501_v30 = vadd.f32 0.05243302, %v2500_v19  ;;  %v2463_v3 = vadd.f32 0.18741608, %v2462_v50 }
 0x98a   : > { %7853 = vrcp.f32 %v8745_v11  ;;  %v2552_v47 = vadd.f32 0.112945676, %v2551_v36  ;;  %v2448_v2 = vand.u32 2147483648, %v8745_v11  ;;  %v2541_v4 = vadd.f32 0.05243302, %v2540_v51 }
 0x98b   : > { %7855 = vrcp.f32 %v8748_v14  ;;  %v2513_v28 = vmul.f32 %v2512_v15, %v8720_v26  ;;  %v2502_v46 = vmul.f32 %v2501_v30, %v8720_v26  ;;  %v2425_v6 = vadd.f32 1.1283791, %v2424_v27 }
 0x98c   : > { %v2553_v52 = vmul.f32 %v2552_v47, %v8725_v32  ;;  %vm2442_vm3 = vweird.f32 %v8745_v11  ;;  %v2446_v63 = vand.u32 2147483647, %v8745_v11  ;;  %v2449_v20 = vor.u32 1.1754944e-38, %v2448_v2 }
 0x98d   : > { %v2514_v33 = vadd.f32 0.4994258, %v2513_v28  ;;  %v2503_v61 = vadd.f32 0.18741608, %v2502_v46  ;;  %v2542_v21 = vmul.f32 %v2541_v4, %v8725_v32  ;;  %v2426_v23 = vmul.f32 %v2425_v6, %v8684_v60 }
 0x98e   : > { %v2554_v62 = vadd.f32 0.4994258, %v2553_v52  ;;  %vm2447_vm5 = vcmp.eq.f32.partialorder %v2446_v63, 8.507059e+37  ;;  %v2488_v29 = vand.u32 2147483648, %v8748_v14  ;;  %vm2482_vm7 = vweird.f32 %v8748_v14 }
 0x98f   : > { %v2515_v43 = vmul.f32 %v2514_v33, %v8720_v26  ;;  %v2504_v17 = vmul.f32 %v2503_v61, %v8720_v26  ;;  %v2486_v26 = vand.u32 2147483647, %v8748_v14  ;;  %v2543_v34 = vadd.f32 0.18741608, %v2542_v21 }
 0x990   : > { %v7854_v37 = vpop.eup %7853  ;;  %v2555_v8 = vmul.f32 %v2554_v62, %v8725_v32  ;;  %v2489_v38 = vor.u32 1.1754944e-38, %v2488_v29 }
 0x991   : > { %v8764_v41 = vpop.eup %7855  ;;  %v2438_v42 = vmul.f32 %v7854_v37, %v8745_v11  ;;  %v2516_v22 = vadd.f32 1.0, %v2515_v43  ;;  %vm2443_vm2 = vweird.f32 %v7854_v37  ;;  %v2464_v11 = vmul.f32 %v2463_v3, %v8695_v0 }
 0x992   : > { %v2478_v45 = vmul.f32 %v8764_v41, %v8748_v14  ;;  %vm2444_vm4 = vmor %vm2442_vm3, %vm2443_vm2  ;;  %v8783_v18 = vadd.f32 1.0, %v2555_v8  ;;  %vm2483_vm6 = vweird.f32 %v8764_v41  ;;  %v2505_v30 = vadd.f32 1.1283791, %v2504_v17 }
 0x993   : > { %v2439_v49 = vsub.f32 1.0, %v2438_v42  ;;  %7857 = vrcp.f32 %v2516_v22  ;;  %v2526_v60 = vand.u32 2147483647, %v2516_v22  ;;  %v2528_v33 = vand.u32 2147483648, %v2516_v22  ;;  %vm8794_vm11 = vmor %vm2482_vm7, %vm2483_vm6 }
 0x994   : > { %v2479_v57 = vsub.f32 1.0, %v2478_v45  ;;  %7859 = vrcp.f32 %v8783_v18  ;;  %v2465_v39 = vadd.f32 1.1283791, %v2464_v11  ;;  %vm2487_vm13 = vcmp.eq.f32.partialorder %v2486_v26, 8.507059e+37  ;;  %v7786_v26 = vld [vmem:[%s9971_s22] ss:$0 sm:$0xff] }
 0x995   : > { %v2440_v54 = vmul.f32 %v7854_v37, %v2439_v49  ;;  %vm2522_vm14 = vweird.f32 %v2516_v22  ;;  %v2506_v43 = vmul.f32 %v2505_v30, %v8705_v13  ;;  %vm2527_vm1 = vcmp.eq.f32.partialorder %v2526_v60, 8.507059e+37  ;;  %s9973_s22 = smov 96  }
 0x996   : > { %v2480_v12 = vmul.f32 %v8764_v41, %v2479_v57  ;;  %v2529_v45 = vor.u32 1.1754944e-38, %v2528_v33  ;;  %v2544_v46 = vmul.f32 %v2543_v34, %v8725_v32  ;;  %v2466_v27 = vmul.f32 %v2465_v39, %v8687_v55 }
 0x997   : > { %v2441_v1 = vadd.f32 %v7854_v37, %v2440_v54  ;;  %v2566_v54 = vand.u32 2147483647, %v8783_v18  ;;  %v2568_v13 = vand.u32 2147483648, %v8783_v18  ;;  %v2406_v32 = vmul.f32 0.5, %v8679_v58 }
 0x998   : > { %v2481_v28 = vadd.f32 %v8764_v41, %v2480_v12  ;;  %vm2562_vm3 = vweird.f32 %v8783_v18 }
 0x999   : > { %v2445_v15 = vsel %vm2444_vm4, %v7854_v37, %v2441_v1  ;;  %v7858_v19 = vpop.eup %7857  ;;  %v2408_v1 = vmul.f32 0.5, %v8699_v5  ;;  %v2569_v6 = vor.u32 1.1754944e-38, %v2568_v13  ;;  %v2407_v5 = vmul.f32 0.5, %v8681_v59  ;;  %v7517_v13 = vld [vmem:[%s8236_s30 + $0x54] sm:$0xf0] }
 0x99a   : > { %v2518_v24 = vmul.f32 %v7858_v19, %v2516_v22  ;;  %v2450_v25 = vsel %vm2447_vm5, %v2449_v20, %v2445_v15  ;;  %vm2523_vm12 = vweird.f32 %v7858_v19  ;;  %v2485_v40 = vsel %vm8794_vm11, %v8764_v41, %v2481_v28  ;;  %v7860_v14 = vpop.eup %7859 }
 0x99b   : > { %v2451_v0 = vmul.f32 %v2450_v25, %v2426_v23  ;;  %vm2524_vm15 = vmor %vm2522_vm14, %vm2523_vm12  ;;  %v2490_v49 = vsel %vm2487_vm13, %v2489_v38, %v2485_v40  ;;  %v2558_v51 = vmul.f32 %v7860_v14, %v8783_v18  ;;  %v2545_v22 = vadd.f32 1.1283791, %v2544_v46  ;;  %v7521_v46 = vld [vmem:[%s8236_s30 + $0x74] sm:$0xf0] }
 0x99c   : > { %v2519_v31 = vsub.f32 1.0, %v2518_v24  ;;  %v2491_v56 = vmul.f32 %v2490_v49, %v2466_v27  ;;  %vm2563_vm2 = vweird.f32 %v7860_v14  ;;  %vm2567_vm5 = vcmp.eq.f32.partialorder %v2566_v54, 8.507059e+37  ;;  %v6794_v27 = vld [vmem:[%s8236_s30 + $0x60] sm:$0xf]  ;;  %v6786_v54 = vld [vmem:[%s8236_s30 + $0x50] sm:$0xf] }
 0x99d   : > { %v6697_v47 = vclamps-f32 %v2451_v0, 1.0  ;;  %v2559_v53 = vsub.f32 1.0, %v2558_v51  ;;  %v2546_v4 = vmul.f32 %v2545_v22, %v8710_v16  ;;  %vm2564_vm4 = vmor %vm2562_vm3, %vm2563_vm2  ;;  %v2409_v18 = vmul.f32 0.5, %v8702_v7 }
 0x99e   : > { %v2520_v37 = vmul.f32 %v7858_v19, %v2519_v31  ;;  %v6698_v55 = vclamps-f32 %v2491_v56, 1.0  ;;  %v6796_v56 = vld [vmem:[%s8236_s30 + $0x68] sm:$0xf0] }
 0x99f   : > { %v2574_v57 = vadd.f32 1.0, %v6697_v47  ;;  %v2560_v62 = vmul.f32 %v7860_v14, %v2559_v53  ;;  %v7520_v47 = vld [vmem:[%s8236_s30 + $0x74] sm:$0xf] }
 0x9a0   : > { %v2521_v42 = vadd.f32 %v7858_v19, %v2520_v37  ;;  %v2575_v58 = vadd.f32 1.0, %v6698_v55  ;;  %v7515_v55 = vld [vmem:[%s8236_s30 + $0x44] sm:$0xf0] }
 0x9a1   : > { %v2561_v3 = vadd.f32 %v7860_v14, %v2560_v62  ;;  %v2578_v63 = vmul.f32 %v2574_v57, %v2406_v32  ;;  %v7516_v57 = vld [vmem:[%s8236_s30 + $0x54] sm:$0xf]  ;;  %v6788_v62 = vld [vmem:[%s8236_s30 + $0x58] sm:$0xf0] }
 0x9a2   : > { %v2525_v50 = vsel %vm2524_vm15, %v7858_v19, %v2521_v42  ;;  %v2579_v23 = vmul.f32 %v2575_v58, %v2407_v5  ;;  %v8018_v58 = vld [vmem:[%s9949_s21 + $0x10] sm:$0xff] }
 0x9a3   : > { %v2530_v41 = vsel %vm2527_vm1, %v2529_v45, %v2525_v50  ;;  %v2565_v12 = vsel %vm2564_vm4, %v7860_v14, %v2561_v3  ;;  %v6802_v45 = vld [vmem:[%s8236_s30 + $0x70] sm:$0xf]  ;;  %v6804_v50 = vld [vmem:[%s8236_s30 + $0x78] sm:$0xf0]  ;;  %v6778_v3 = vld [vmem:[%s8236_s30 + $0x40] sm:$0xf] }
 0x9a4   : > { %v2531_v52 = vmul.f32 %v2530_v41, %v2506_v43  ;;  %v2570_v15 = vsel %vm2567_vm5, %v2569_v6, %v2565_v12  ;;  %v6803_v49 = vor.u32 %v7521_v46, %v6802_v45  ;;  %v6807_v51 = vor.u32 %v7520_v47, %v6804_v50  ;;  %v7519_v41 = vld [vmem:[%s8236_s30 + $0x64] sm:$0xf0] }
 0x9a5   : > { %v2571_v17 = vmul.f32 %v2570_v15, %v2546_v4  ;;  %v6795_v53 = vor.u32 %v7519_v41, %v6794_v27  ;;  %v7514_v4 = vld [vmem:[%s8236_s30 + $0x44] sm:$0xf]  ;;  %v8017_v15 = vld [vmem:[%s9949_s21 + $0x18] sm:$0xff] }
 0x9a6   : > { %v6699_v61 = vclamps-f32 %v2531_v52, 1.0  ;;  %2870 = vmatpush.bf16.msra.mxu0 %v6803_v49  ;;  %2884 = vmatpush.bf16.msrb.mxu1 %v6807_v51  ;;  %v7518_v52 = vld [vmem:[%s8236_s30 + $0x64] sm:$0xf] }
 0x9a7   : > { %v6700_v20 = vclamps-f32 %v2571_v17, 1.0  ;;  %v6799_v22 = vor.u32 %v7518_v52, %v6796_v56 }
 0x9a8   : > { %v2576_v2 = vadd.f32 1.0, %v6699_v61  ;;  %v6787_v61 = vor.u32 %v7517_v13, %v6786_v54  ;;  %v8021_v13 = vld [vmem:[%s9952_s17] sm:$0xff] }
 0x9a9   : > { %v2577_v21 = vadd.f32 1.0, %v6700_v20 }
 0x9aa   : > { %v2580_v8 = vmul.f32 %v2576_v2, %v2408_v1  ;;  %2871 = vmatpush.bf16.msra.mxu0 %v6795_v53  ;;  %2885 = vmatpush.bf16.msrb.mxu1 %v6799_v22  ;;  %v6791_v1 = vor.u32 %v7516_v57, %v6788_v62  ;;  %v8022_v62 = vld [vmem:[%s9953_s13] sm:$0xff] }
 0x9ab   : > { %v2581_v16 = vmul.f32 %v2577_v21, %v2409_v18 }
 0x9ac   : > { %v2614_v19 = vpack.c.bf16 %v2580_v8, %v2578_v63  ;;  %v6779_v63 = vor.u32 %v7515_v55, %v6778_v3  ;;  %v6780_v8 = vld [vmem:[%s8236_s30 + $0x48] sm:$0xf0] }
 0x9ad   : > { %v2615_v11 = vpack.c.bf16 %v2581_v16, %v2579_v23  ;;  %v6783_v12 = vor.u32 %v7514_v4, %v6780_v8  ;;  %v8019_v23 = vld [vmem:[%s9949_s21 + $0x8] sm:$0xff] }
 0x9ae   : > { %2720 = vmatmul.bf16.vlgmr.msra.gmra.mxu2 %v2614_v19  ;;  %2872 = vmatpush.bf16.msra.mxu0 %v6787_v61  ;;  %v8024_v3 = vld [vmem:[%s9952_s17 + $0x8] sm:$0xff]  ;;  %s9999_s17 = sld [smem:[#allocation42_spill]] }
 0x9af   : > { %2734 = vmatmul.bf16.vlgmr.msra.gmra.mxu3 %v2615_v11  ;;  %2886 = vmatpush.bf16.msrb.mxu1 %v6791_v1  ;;  %v8023_v1 = vld [vmem:[%s9953_s13 + $0x8] sm:$0xff]  ;;  %s9996_s13 = smov 80  }
 0x9b2   : > { %2873 = vmatpush.bf16.msra.mxu0 %v6779_v63 }
 0x9b3   : > { %2887 = vmatpush.bf16.msrb.mxu1 %v6783_v12 }
 0x9b6   : > { %2904 = vmatpush.bf16.msrb.mxu0 %v8017_v15 }
 0x9b7   : > { %2930 = vmatpush.bf16.msra.mxu1 %v8017_v15 }
 0x9ba   : > { %2905 = vmatpush.bf16.msrb.mxu0 %v8018_v58 }
 0x9bb   : > { %2931 = vmatpush.bf16.msra.mxu1 %v8018_v58 }
 0x9be   : > { %2906 = vmatpush.bf16.msrb.mxu0 %v8019_v23 }
 0x9bf   : > { %2932 = vmatpush.bf16.msra.mxu1 %v8019_v23 }
 0xa31   : > { %v2721_v24 = vpop.f32.mrf.mxu2 }
 0xa32   : > { %v2735_v25 = vpop.f32.mrf.mxu3 }
 0xa33   : > { %v2736_v28 = vadd.f32 %v2735_v25, %v2721_v24  ;;  %v8020_v24 = vld [vmem:[%s9949_s21] sm:$0xff]  ;;  %s10003_s21 = sld [smem:[#allocation44_spill]] }
 0xa34   : > { %2907 = vmatpush.bf16.msrb.mxu0 %v8020_v24  ;;  %2933 = vmatpush.bf16.msra.mxu1 %v8020_v24 }
 0xa35   : > { %v2740_v29 = vadd.f32 %v2736_v28, %v8631_v44 }
 0xa37   : > { %v8815_v30 = vadd.f32 %v7786_v26, %v2740_v29 }
 0xa39   : > { %v2723_v31 = vpop.f32.mrf.mxu2  ;;  %v2752_v60 = vsel %vm1625_vm0, %v8815_v30, 0.0 }
 0xa3a   : > { %v2737_v59 = vpop.f32.mrf.mxu3  ;;  %2753 = vadd.xlane.f32.xlu2 %v2752_v60 }
 0xa3b   : > { %v2738_v7 = vadd.f32 %v2737_v59, %v2723_v31 }
 0xa3d   : > { %v2741_v33 = vadd.f32 %v2738_v7, %v8636_v48  ;;  %v7787_v7 = vld [vmem:[%s9951_s19 + $0x1] ss:$0 sm:$0xff]  ;;  %s10001_s19 = sld [smem:[#allocation41_spill]] }
 0xa3f   : > { %v8820_v34 = vadd.f32 %v7786_v26, %v2741_v33 }
 0xa41   : > { %v2755_v0 = vsel %vm1625_vm0, %v8820_v34, 0.0 }
 0xa42   : > { %2756 = vadd.xlane.f32.xlu0 %v2755_v0 }
 0xaad   : > { %v2754_v44 = vpop.xlane.xlu2 %2753 }
 0xaae   : > { %v2758_v36 = vmul.f32 %v2754_v44, %v8497_v35 }
 0xab0   : > { %v8826_v37 = vsub.f32 %v8815_v30, %v2758_v36  ;;  %v7788_v36 = vld [vmem:[%s8231_s24 + $0x1] ss:$0 sm:$0xff] }
 0xab2   : > { %v2762_v39 = vmul.f32 %v8826_v37, %v8826_v37 }
 0xab4   : > { %v2764_v48 = vsel %vm1625_vm0, %v2762_v39, 0.0 }
 0xab5   : > { %2765 = vadd.xlane.f32.xlu1 %v2764_v48  ;;  %v2757_v40 = vpop.xlane.xlu0 %2756 }
 0xab6   : > { %v2759_v38 = vmul.f32 %v2757_v40, %v8497_v35 }
 0xab8   : > { %v8833_v42 = vsub.f32 %v8820_v34, %v2759_v38 }
 0xaba   : > { %v2763_v14 = vmul.f32 %v8833_v42, %v8833_v42 }
 0xabc   : > { %v2767_v43 = vsel %vm1625_vm0, %v2763_v14, 0.0 }
 0xabd   : > { %2768 = vadd.xlane.f32.xlu2 %v2767_v43 }
 0xb28   : > { %v2766_v32 = vpop.xlane.xlu1 %2765 }
 0xb29   : > { %v2770_v2 = vmul.f32 %v2766_v32, %v8497_v35 }
 0xb2b   : > { %v2772_v6 = vadd.f32 1e-06, %v2770_v2 }
 0xb2d   : > { %7861 = vrsqrt.f32 %v2772_v6  ;;  %vm2780_vm7 = vweird.f32 %v2772_v6 }
 0xb30   : > { %v2769_v17 = vpop.xlane.xlu2 %2768 }
 0xb31   : > { %v2771_v19 = vmul.f32 %v2769_v17, %v8497_v35 }
 0xb33   : > { %v7862_v20 = vpop.eup %7861  ;;  %v2773_v5 = vadd.f32 1e-06, %v2771_v19 }
 0xb34   : > { %v2775_v18 = vmul.f32 %v7862_v20, %v2772_v6  ;;  %vm2781_vm6 = vweird.f32 %v7862_v20 }
 0xb35   : > { %7863 = vrsqrt.f32 %v2773_v5  ;;  %vm2782_vm11 = vmor %vm2780_vm7, %vm2781_vm6  ;;  %vm2790_vm13 = vweird.f32 %v2773_v5 }
 0xb36   : > { %v2776_v21 = vmul.f32 %v7862_v20, %v2775_v18 }
 0xb38   : > { %v2777_v16 = vmul.f32 0.5, %v2776_v21 }
 0xb3a   : > { %v2778_v11 = vsub.f32 1.5, %v2777_v16 }
 0xb3b   : > { %v7864_v25 = vpop.eup %7863 }
 0xb3c   : > { %v2779_v28 = vmul.f32 %v7862_v20, %v2778_v11  ;;  %v2785_v26 = vmul.f32 %v7864_v25, %v2773_v5  ;;  %vm2791_vm12 = vweird.f32 %v7864_v25 }
 0xb3d   : > { %vm2792_vm14 = vmor %vm2790_vm13, %vm2791_vm12 }
 0xb3e   : > { %v2786_v29 = vmul.f32 %v7864_v25, %v2785_v26  ;;  %v2783_v31 = vsel %vm2782_vm11, %v7862_v20, %v2779_v28 }
 0xb3f   : > { %v2794_v33 = vmul.f32 %v2783_v31, %v8826_v37  ;;  %v6775_v37 = vld [vmem:[%s9957_s6 + $0x2] sm:$0x3]  ;;  %s9980_s6 = sld [smem:[#allocation28_spill]] }
 0xb40   : > { %v2787_v60 = vmul.f32 0.5, %v2786_v29  ;;  %v2819_v47 = vperm.slane %v6775_v37, 0  ;;  %v2820_v49 = vperm.slane %v6775_v37, 1 }
 0xb41   : > { %v2799_v39 = vmul.f32 %v7787_v7, %v2794_v33 }
 0xb42   : > { %v2788_v59 = vsub.f32 1.5, %v2787_v60 }
 0xb43   : > { %v2804_v38 = vadd.f32 %v7788_v36, %v2799_v39 }
 0xb44   : > { %v2789_v0 = vmul.f32 %v7864_v25, %v2788_v59 }
 0xb46   : > { %v2793_v44 = vsel %vm2792_vm14, %v7864_v25, %v2789_v0 }
 0xb47   : > { %v2795_v48 = vmul.f32 %v2793_v44, %v8833_v42 }
 0xb49   : > { %v2800_v40 = vmul.f32 %v7787_v7, %v2795_v48 }
 0xb4b   : > { %v2805_v14 = vadd.f32 %v7788_v36, %v2800_v40 }
 0xb4d   : > { %v2815_v43 = vpack.c.bf16 %v2805_v14, %v2804_v38 }
 0xb4f   : > { %6808 = vmatmul.msk.bf16.vlgmr.msra.gmra.mxu0 %vm1625_vm0, %v2815_v43  ;;  %6809 = vmatmul.msk.bf16.vlgmr.msrb.gmra.mxu1 %vm1625_vm0, %v2815_v43 }
 0xbcc   : > { %v2875_v45 = vpop.f32.mrf.mxu0  ;;  %v2889_v46 = vpop.f32.mrf.mxu1 }
 0xbcd   : > { %v2876_v27 = vadd.f32 %v2875_v45, %v2819_v47  ;;  %v2890_v41 = vadd.f32 %v2889_v46, %v2820_v49 }
 0xbcf   : > { %v2894_v32 = vmul.f32 %v8022_v62, %v2876_v27  ;;  %v2918_v20 = vmul.f32 %v2876_v27, %v8562_v10 }
 0xbd4   : > { %v2877_v50 = vpop.f32.mrf.mxu0  ;;  %v2891_v51 = vpop.f32.mrf.mxu1 }
 0xbd5   : > { %v2878_v42 = vadd.f32 %v2877_v50, %v2819_v47  ;;  %v2892_v52 = vadd.f32 %v2891_v51, %v2820_v49 }
 0xbd7   : > { %v8867_v53 = vpack.c.bf16 %v2892_v52, %v2890_v41  ;;  %v2896_v56 = vpack.c.bf16 %v2878_v42, %v2876_v27  ;;  %v2895_v2 = vmul.f32 %v8023_v1, %v2878_v42  ;;  %v2919_v58 = vmul.f32 %v2878_v42, %v8564_v9 }
 0xbd9   : > { %3013 = vmatpush.bf16.msrb.mxu3 %v8867_v53  ;;  %2921 = vrot.lane.b32.xlu0 %v2896_v56, %s9882_s0 }
 0xbda   : > { %6810 = vmatmul.msk.bf16.vlgmr.msrb.gmra.mxu0 %vm1625_vm0, %v2896_v56 }
 0xc4b   : > { %v2922_v22 = vpop.permute.xlu0 %2921 }
 0xc4c   : > { %6811 = vmatmul.msk.bf16.vlgmr.msra.gmra.mxu1 %vm1625_vm0, %v2922_v22 }
 0xc57   : > { %v2909_v54 = vpop.f32.mrf.mxu0 }
 0xc58   : > { %v2914_v57 = vmul.f32 %v8021_v13, %v2909_v54 }
 0xc5a   : > { %v2916_v4 = vadd.f32 %v2914_v57, %v2894_v32 }
 0xc5f   : > { %v2911_v61 = vpop.f32.mrf.mxu0 }
 0xc60   : > { %v2915_v55 = vmul.f32 %v8024_v3, %v2911_v61 }
 0xc62   : > { %v2917_v6 = vadd.f32 %v2915_v55, %v2895_v2 }
 0xc64   : > { %v2952_v63 = vpack.c.bf16 %v2917_v6, %v2916_v4 }
 0xcc9   : > { %v2935_v8 = vpop.f32.mrf.mxu1 }
 0xcca   : > { %v2940_v12 = vmul.f32 %v8021_v13, %v2935_v8 }
 0xccc   : > { %2944 = vrot.lane.b32.xlu1 %v2940_v12, %s9882_s0 }
 0xcd1   : > { %v2937_v15 = vpop.f32.mrf.mxu1 }
 0xcd2   : > { %v2941_v17 = vmul.f32 %v8024_v3, %v2937_v15 }
 0xcd4   : > { %2946 = vrot.lane.b32.xlu2 %v2941_v17, %s9882_s0 }
 0xcdc   : > { %3021 = vrot.lane.b32.xlu2 %v2952_v63, %s9880_s1  ;;  %s9974_s1 = smov 16  }
 0xce4   : > { %3160 = vrot.lane.b32.xlu2 %v2952_v63, %s9884_s16 }
 0xd2e   : > { %v2947_v19 = vpop.permute.xlu2 %2946 }
 0xd2f   : > { %v2951_v18 = vadd.f32 %v2947_v19, %v2919_v58 }
 0xd36   : > { %v3022_v24 = vpop.permute.xlu2 %3021 }
 0xd3e   : > { %v2945_v5 = vpop.permute.xlu1 %2944  ;;  %v3161_v31 = vpop.permute.xlu2 %3160 }
 0xd3f   : > { %v2950_v21 = vadd.f32 %v2945_v5, %v2918_v20 }
 0xd41   : > { %v2953_v23 = vpack.c.bf16 %v2951_v18, %v2950_v21 }
 0xd43   : > { %3023 = vrot.lane.b32.xlu1 %v2953_v23, %s9888_s11  ;;  %2956 = vrot.lane.b32.xlu0 %v2953_v23, %s9882_s0  ;;  %s9975_s0 = smov 112  }
 0xd4b   : > { %3093 = vrot.lane.b32.xlu0 %v2953_v23, %s9886_s15  ;;  %3091 = vrot.lane.b32.xlu1 %v2952_v63, %s9973_s22 }
 0xd53   : > { %3162 = vrot.lane.b32.xlu0 %v2953_v23, %s9974_s1 }
 0xdb5   : > { %v3024_v16 = vpop.permute.xlu1 %3023  ;;  %v2957_v11 = vpop.permute.xlu0 %2956 }
 0xdb6   : > { %v3029_v9 = vsel %vm1902_vm8, %v3024_v16, 0  ;;  %v2962_v10 = vsel %vm1902_vm8, %v2957_v11, 0 }
 0xdb7   : > { %2971 = vmatpush.bf16.xpose.msrb.mxu2 %v2962_v10  ;;  %3038 = vmatpush.bf16.xpose.msra.mxu0 %v3029_v9 }
 0xdbd   : > { %v3094_v25 = vpop.permute.xlu0 %3093  ;;  %v3092_v60 = vpop.permute.xlu1 %3091 }
 0xdbe   : > { %v3099_v28 = vsel %vm1902_vm8, %v3094_v25, 0  ;;  %6812 = vmatmul.msk.bf16.vlgmr.msrb.gmra.mxu2 %vm1902_vm8, %v2952_v63  ;;  %6814 = vmatmul.msk.bf16.vlgmr.msra.gmra.mxu0 %vm1902_vm8, %v3022_v24 }
 0xdbf   : > { %3108 = vmatpush.bf16.xpose.msra.mxu2 %v3099_v28 }
 0xdc5   : > { %v3163_v26 = vpop.permute.xlu0 %3162 }
 0xdc6   : > { %v3168_v29 = vsel %vm1902_vm8, %v3163_v26, 0 }
 0xdc7   : > { %3177 = vmatpush.bf16.xpose.msrb.mxu0 %v3168_v29 }
 0xdce   : > { %6816 = vmatmul.msk.bf16.vlgmr.msra.gmra.mxu2 %vm1902_vm8, %v3092_v60  ;;  %6818 = vmatmul.msk.bf16.vlgmr.msrb.gmra.mxu0 %vm1902_vm8, %v3161_v31 }
 0xe3b   : > { %v3040_v59 = vpop.f32.mrf.mxu0 }
 0xe3c   : > { %v3045_v7 = vmul.f32 0.25, %v3040_v59 }
 0xe3e   : > { %v3047_v33 = vsel %vm1902_vm8, %v3045_v7, -inf }
 0xe3f   : > { %3048 = vmax.xlane.f32.xlu2 %v3047_v33 }
 0xe41   : > { %v2973_v0 = vpop.f32.mrf.mxu2 }
 0xe42   : > { %v2978_v44 = vmul.f32 0.25, %v2973_v0 }
 0xe43   : > { %v3042_v36 = vpop.f32.mrf.mxu0 }
 0xe44   : > { %v2980_v39 = vsel %vm1902_vm8, %v2978_v44, -inf  ;;  %v3046_v48 = vmul.f32 0.25, %v3042_v36 }
 0xe45   : > { %2981 = vmax.xlane.f32.xlu1 %v2980_v39 }
 0xe46   : > { %v3050_v43 = vsel %vm1902_vm8, %v3046_v48, -inf }
 0xe49   : > { %v2975_v40 = vpop.f32.mrf.mxu2 }
 0xe4a   : > { %v2979_v38 = vmul.f32 0.25, %v2975_v40 }
 0xe4b   : > { %v3179_v14 = vpop.f32.mrf.mxu0 }
 0xe4c   : > { %v2983_v45 = vsel %vm1902_vm8, %v2979_v38, -inf  ;;  %v3184_v46 = vmul.f32 0.25, %v3179_v14 }
 0xe4d   : > { %3051 = vmax.xlane.f32.xlu1 %v3050_v43  ;;  %2984 = vmax.xlane.f32.xlu0 %v2983_v45 }
 0xe4e   : > { %v3186_v49 = vsel %vm1902_vm8, %v3184_v46, -inf }
 0xe51   : > { %v3110_v37 = vpop.f32.mrf.mxu2 }
 0xe52   : > { %v3115_v47 = vmul.f32 0.25, %v3110_v37 }
 0xe53   : > { %v3181_v51 = vpop.f32.mrf.mxu0 }
 0xe54   : > { %v3117_v50 = vsel %vm1902_vm8, %v3115_v47, -inf  ;;  %v3185_v27 = vmul.f32 0.25, %v3181_v51 }
 0xe55   : > { %3187 = vmax.xlane.f32.xlu1 %v3186_v49  ;;  %3118 = vmax.xlane.f32.xlu0 %v3117_v50 }
 0xe56   : > { %v3189_v56 = vsel %vm1902_vm8, %v3185_v27, -inf }
 0xe59   : > { %v3112_v41 = vpop.f32.mrf.mxu2 }
 0xe5a   : > { %v3116_v42 = vmul.f32 0.25, %v3112_v41 }
 0xe5c   : > { %v3120_v52 = vsel %vm1902_vm8, %v3116_v42, -inf }
 0xe5d   : > { %3121 = vmax.xlane.f32.xlu2 %v3120_v52  ;;  %3190 = vmax.xlane.f32.xlu0 %v3189_v56 }
 0xeb2   : > { %v3049_v22 = vpop.xlane.xlu2 %3048 }
 0xeb3   : > { %v3053_v54 = vsub.f32 %v3045_v7, %v3049_v22 }
 0xeb5   : > { %v3055_v13 = vmul.f32 1.442695, %v3053_v54 }
 0xeb7   : > { %7865 = vpow2.f32 %v3055_v13 }
 0xeb8   : > { %v2982_v57 = vpop.xlane.xlu1 %2981 }
 0xeb9   : > { %v2986_v61 = vsub.f32 %v2978_v44, %v2982_v57 }
 0xebb   : > { %v2988_v62 = vmul.f32 1.442695, %v2986_v61 }
 0xebd   : > { %v8904_v32 = vpop.eup %7865  ;;  %7867 = vpow2.f32 %v2988_v62 }
 0xebe   : > { %v3059_v1 = vsel %vm1902_vm8, %v8904_v32, 0.0 }
 0xebf   : > { %3060 = vadd.xlane.f32.xlu0 %v3059_v1 }
 0xec0   : > { %v3052_v2 = vpop.xlane.xlu1 %3051  ;;  %v2985_v3 = vpop.xlane.xlu0 %2984 }
 0xec1   : > { %v3054_v55 = vsub.f32 %v3046_v48, %v3052_v2  ;;  %v2987_v4 = vsub.f32 %v2979_v38, %v2985_v3 }
 0xec3   : > { %v7868_v6 = vpop.eup %7867  ;;  %v3057_v63 = vmul.f32 1.442695, %v3054_v55  ;;  %v2990_v8 = vmul.f32 1.442695, %v2987_v4 }
 0xec4   : > { %v2992_v12 = vsel %vm1902_vm8, %v7868_v6, 0.0 }
 0xec5   : > { %7869 = vpow2.f32 %v3057_v63  ;;  %2993 = vadd.xlane.f32.xlu2 %v2992_v12 }
 0xec6   : > { %7871 = vpow2.f32 %v2990_v8 }
 0xec8   : > { %v3188_v15 = vpop.xlane.xlu1 %3187  ;;  %v3119_v17 = vpop.xlane.xlu0 %3118 }
 0xec9   : > { %v3192_v19 = vsub.f32 %v3184_v46, %v3188_v15  ;;  %v3123_v5 = vsub.f32 %v3115_v47, %v3119_v17 }
 0xecb   : > { %v7870_v58 = vpop.eup %7869  ;;  %v3194_v20 = vmul.f32 1.442695, %v3192_v19  ;;  %v3125_v16 = vmul.f32 1.442695, %v3123_v5  ;;  %v7525_v5 = vld [vmem:[%s9954_s12 + $0x38] sm:$0xff] }
 0xecc   : > { %v7872_v18 = vpop.eup %7871  ;;  %v3062_v21 = vsel %vm1902_vm8, %v7870_v58, 0.0  ;;  %3300 = vmatpush.bf16.msrb.mxu2 %v7525_v5 }
 0xecd   : > { %7873 = vpow2.f32 %v3194_v20  ;;  %3063 = vadd.xlane.f32.xlu2 %v3062_v21  ;;  %v2995_v23 = vsel %vm1902_vm8, %v7872_v18, 0.0  ;;  %v7523_v21 = vld [vmem:[%s9954_s12 + $0x28] sm:$0xff] }
 0xece   : > { %2996 = vadd.xlane.f32.xlu1 %v2995_v23  ;;  %7875 = vpow2.f32 %v3125_v16  ;;  %v7522_v23 = vld [vmem:[%s9954_s12 + $0x20] sm:$0xff] }
 0xed0   : > { %v3191_v11 = vpop.xlane.xlu0 %3190  ;;  %v3122_v9 = vpop.xlane.xlu2 %3121 }
 0xed1   : > { %v3193_v10 = vsub.f32 %v3185_v27, %v3191_v11  ;;  %v3124_v28 = vsub.f32 %v3116_v42, %v3122_v9 }
 0xed3   : > { %v8911_v24 = vpop.eup %7873  ;;  %v3196_v25 = vmul.f32 1.442695, %v3193_v10  ;;  %v3127_v29 = vmul.f32 1.442695, %v3124_v28 }
 0xed4   : > { %v3198_v26 = vsel %vm1902_vm8, %v8911_v24, 0.0  ;;  %v7876_v31 = vpop.eup %7875 }
 0xed5   : > { %3199 = vadd.xlane.f32.xlu0 %v3198_v26  ;;  %7877 = vpow2.f32 %v3196_v25  ;;  %v3129_v59 = vsel %vm1902_vm8, %v7876_v31, 0.0 }
 0xed6   : > { %7879 = vpow2.f32 %v3127_v29 }
 0xedb   : > { %v7878_v60 = vpop.eup %7877 }
 0xedc   : > { %v3201_v7 = vsel %vm1902_vm8, %v7878_v60, 0.0  ;;  %v7880_v33 = vpop.eup %7879 }
 0xedd   : > { %3130 = vadd.xlane.f32.xlu0 %v3129_v59  ;;  %3202 = vadd.xlane.f32.xlu2 %v3201_v7  ;;  %v3132_v0 = vsel %vm1902_vm8, %v7880_v33, 0.0 }
 0xee5   : > { %3133 = vadd.xlane.f32.xlu2 %v3132_v0 }
 0xee7   : > { %3071 = vrot.lane.b32.xlu1 %v8867_v53, %s9975_s0 }
 0xef1   : > { %3140 = vrot.lane.b32.xlu0 %v8867_v53, %s9973_s22 }
 0xefd   : > { %3209 = vrot.lane.b32.xlu2 %v8867_v53, %s9884_s16  ;;  %s9978_s16 = sld [smem:[#allocation30_spill]] }
 0xf32   : > { %v3061_v39 = vpop.xlane.xlu0 %3060 }
 0xf38   : > { %v2994_v44 = vpop.xlane.xlu2 %2993 }
 0xf39   : > { %7881 = vrcp.f32 %v2994_v44 }
 0xf3f   : > { %v7882_v48 = vpop.eup %7881 }
 0xf40   : > { %v3000_v38 = vmul.f32 %v7882_v48, %v7868_v6  ;;  %v3064_v14 = vpop.xlane.xlu2 %3063 }
 0xf41   : > { %v2997_v36 = vpop.xlane.xlu1 %2996 }
 0xf42   : > { %7883 = vrcp.f32 %v2997_v36  ;;  %v7789_v36 = vld [vmem:[%s9950_s20 + $0x1] ss:$0 sm:$0xff]  ;;  %s10002_s20 = sld [smem:[#allocation43_spill]] }
 0xf43   : > { %7885 = vrcp.f32 %v3064_v14 }
 0xf44   : > { %7887 = vrcp.f32 %v3061_v39 }
 0xf48   : > { %v7884_v40 = vpop.eup %7883  ;;  %v3200_v46 = vpop.xlane.xlu0 %3199 }
 0xf49   : > { %v3001_v43 = vmul.f32 %v7884_v40, %v7872_v18  ;;  %v7886_v47 = vpop.eup %7885  ;;  %v7524_v18 = vld [vmem:[%s9954_s12 + $0x30] sm:$0xff]  ;;  %s9995_s12 = smov 32  }
 0xf4a   : > { %v7888_v49 = vpop.eup %7887  ;;  %v3068_v50 = vmul.f32 %v7886_v47, %v7870_v58  ;;  %3301 = vmatpush.bf16.msrb.mxu2 %v7524_v18  ;;  %v6861_v18 = vld [vmem:[%s9963_s18 + $0x48] sm:$0xf0] }
 0xf4b   : > { %v3002_v45 = vpack.c.bf16 %v3001_v43, %v3000_v38  ;;  %v3067_v51 = vmul.f32 %v7888_v49, %v8904_v32 }
 0xf4d   : > { %6813 = vmatmul.msk.bf16.vlgmr.msrb.gmra.mxu3 %vm1902_vm8, %v3002_v45  ;;  %v3069_v42 = vpack.c.bf16 %v3068_v50, %v3067_v51 }
 0xf4e   : > { %3302 = vmatpush.bf16.msrb.mxu2 %v7523_v21 }
 0xf50   : > { %v3203_v37 = vpop.xlane.xlu2 %3202  ;;  %v3131_v53 = vpop.xlane.xlu0 %3130 }
 0xf51   : > { %7889 = vrcp.f32 %v3131_v53 }
 0xf52   : > { %3303 = vmatpush.bf16.msrb.mxu2 %v7522_v23 }
 0xf57   : > { %v7890_v52 = vpop.eup %7889 }
 0xf58   : > { %v3134_v41 = vpop.xlane.xlu2 %3133  ;;  %v3137_v13 = vmul.f32 %v7890_v52, %v7876_v31  ;;  %v7533_v52 = vld [vmem:[%s9963_s18 + $0x74] sm:$0xf0] }
 0xf59   : > { %v3072_v27 = vpop.permute.xlu1 %3071  ;;  %7891 = vrcp.f32 %v3134_v41 }
 0xf5a   : > { %3084 = vmatpush.bf16.msrb.mxu1 %v3072_v27  ;;  %7893 = vrcp.f32 %v3203_v37 }
 0xf5b   : > { %7895 = vrcp.f32 %v3200_v46 }
 0xf5d   : > { %6815 = vmatmul.msk.bf16.vlgmr.msrb.gmra.mxu1 %vm1902_vm8, %v3069_v42  ;;  %v6883_v42 = vld [vmem:[%s9963_s18 + $0x70] sm:$0xf] }
 0xf5f   : > { %v7892_v56 = vpop.eup %7891 }
 0xf60   : > { %v3138_v22 = vmul.f32 %v7892_v56, %v7880_v33  ;;  %v3210_v54 = vpop.permute.xlu2 %3209  ;;  %v7894_v61 = vpop.eup %7893  ;;  %v7532_v56 = vld [vmem:[%s9963_s18 + $0x74] sm:$0xf] }
 0xf61   : > { %3222 = vmatpush.bf16.msra.mxu1 %v3210_v54  ;;  %v7896_v32 = vpop.eup %7895  ;;  %v3207_v1 = vmul.f32 %v7894_v61, %v7878_v60  ;;  %v6885_v54 = vld [vmem:[%s9963_s18 + $0x78] sm:$0xf0]  ;;  %v7531_v61 = vld [vmem:[%s9963_s18 + $0x64] sm:$0xf0] }
 0xf62   : > { %v3139_v62 = vpack.c.bf16 %v3138_v22, %v3137_v13  ;;  %v3206_v2 = vmul.f32 %v7896_v32, %v8911_v24  ;;  %v6884_v22 = vor.u32 %v7533_v52, %v6883_v42  ;;  %v6888_v13 = vor.u32 %v7532_v56, %v6885_v54  ;;  %v7549_v56 = vld [vmem:[%s9968_s7 + $0xf8] sm:$0xff] }
 0xf63   : > { %v3141_v57 = vpop.permute.xlu0 %3140  ;;  %3786 = vmatpush.bf16.msra.mxu2 %v7549_v56  ;;  %v7544_v56 = vld [vmem:[%s9968_s7 + $0xd0] sm:$0xff] }
 0xf64   : > { %3153 = vmatpush.bf16.msra.mxu3 %v3141_v57  ;;  %v3208_v3 = vpack.c.bf16 %v3207_v1, %v3206_v2  ;;  %3455 = vmatpush.bf16.msra.mxu0 %v6888_v13  ;;  %v6875_v57 = vld [vmem:[%s9963_s18 + $0x60] sm:$0xf]  ;;  %v6877_v1 = vld [vmem:[%s9963_s18 + $0x68] sm:$0xf0] }
 0xf65   : > { %v6876_v32 = vor.u32 %v7531_v61, %v6875_v57 }
 0xf67   : > { %6817 = vmatmul.msk.bf16.vlgmr.msra.gmra.mxu3 %vm1902_vm8, %v3139_v62  ;;  %v7530_v62 = vld [vmem:[%s9963_s18 + $0x64] sm:$0xf] }
 0xf68   : > { %3441 = vmatpush.bf16.msrb.mxu3 %v6884_v22  ;;  %v6880_v2 = vor.u32 %v7530_v62, %v6877_v1 }
 0xf6a   : > { %3456 = vmatpush.bf16.msra.mxu0 %v6880_v2 }
 0xf6c   : > { %3442 = vmatpush.bf16.msrb.mxu3 %v6876_v32  ;;  %v7548_v32 = vld [vmem:[%s9968_s7 + $0xf0] sm:$0xff] }
 0xf6d   : > { %6819 = vmatmul.msk.bf16.vlgmr.msra.gmra.mxu1 %vm1902_vm8, %v3208_v3  ;;  %v6867_v3 = vld [vmem:[%s9963_s18 + $0x50] sm:$0xf]  ;;  %3787 = vmatpush.bf16.msra.mxu2 %v7548_v32 }
 0xfd0   : > { %v3015_v55 = vpop.f32.mrf.mxu3 }
 0xfd8   : > { %v3017_v6 = vpop.f32.mrf.mxu3 }
 0xfda   : > { %v3086_v4 = vpop.f32.mrf.mxu1 }
 0xfe2   : > { %v3088_v63 = vpop.f32.mrf.mxu1 }
 0xfe3   : > { %v7735_v8 = vpack.i.bf16 %v3088_v63, %v3086_v4  ;;  %v7528_v4 = vld [vmem:[%s9963_s18 + $0x54] sm:$0xf]  ;;  %v6869_v63 = vld [vmem:[%s9963_s18 + $0x58] sm:$0xf0] }
 0xfe5   : > { %7736 = vrot.lane.b32.xlu1 %v7735_v8, %s9974_s1 }
 0xfea   : > { %v3224_v12 = vpop.f32.mrf.mxu1  ;;  %v3155_v15 = vpop.f32.mrf.mxu3 }
 0xff2   : > { %v3226_v17 = vpop.f32.mrf.mxu1  ;;  %v3157_v19 = vpop.f32.mrf.mxu3 }
 0xff3   : > { %v7745_v58 = vpack.i.bf16 %v3226_v17, %v3224_v12  ;;  %v7740_v20 = vpack.i.bf16 %v3157_v19, %v3155_v15  ;;  %v6872_v12 = vor.u32 %v7528_v4, %v6869_v63  ;;  %v6859_v17 = vld [vmem:[%s9963_s18 + $0x40] sm:$0xf]  ;;  %v7527_v19 = vld [vmem:[%s9963_s18 + $0x44] sm:$0xf0]  ;;  %v7541_v4 = vld [vmem:[%s9968_s7 + $0xb8] sm:$0xff] }
 0xff4   : > { %v6860_v5 = vor.u32 %v7527_v19, %v6859_v17  ;;  %3772 = vmatpush.bf16.msrb.mxu1 %v7541_v4  ;;  %v7547_v17 = vld [vmem:[%s9968_s7 + $0xe8] sm:$0xff] }
 0xff5   : > { %7746 = vrot.lane.b32.xlu0 %v7745_v58, %s9888_s11  ;;  %7741 = vrot.lane.b32.xlu1 %v7740_v20, %s9886_s15  ;;  %v7526_v58 = vld [vmem:[%s9963_s18 + $0x44] sm:$0xf]  ;;  %s9979_s15 = sld [smem:[#allocation9_spill]]  ;;  %s9137_s11 = sshll.u32 %s10015_s26, 4 }
 0xff6   : > { %3457 = vmatpush.bf16.msra.mxu0 %v6872_v12  ;;  %v6864_v21 = vor.u32 %v7526_v58, %v6861_v18  ;;  %3788 = vmatpush.bf16.msra.mxu2 %v7547_v17 }
 0xffa   : > { %3458 = vmatpush.bf16.msra.mxu0 %v6864_v21  ;;  %v7540_v21 = vld [vmem:[%s9968_s7 + $0xb0] sm:$0xff] }
 0xffb   : > { %3773 = vmatpush.bf16.msrb.mxu1 %v7540_v21  ;;  %v7536_v21 = vld [vmem:[%s9968_s7 + $0x90] sm:$0xff] }
0x1057   : > { %v7737_v16 = vpop.permute.xlu1 %7736 }
0x1058   : > { %v7739_v11 = vunpack.i.h.bf16 %v7737_v16  ;;  %v7738_v9 = vunpack.i.l.bf16 %v7737_v16 }
0x105a   : > { %v3254_v26 = vsel %vm1902_vm8, %v3017_v6, %v7739_v11  ;;  %v3253_v29 = vsel %vm1902_vm8, %v3015_v55, %v7738_v9  ;;  %v7529_v55 = vld [vmem:[%s9963_s18 + $0x54] sm:$0xf0]  ;;  %s10000_s18 = sld [smem:[#allocation40_spill]] }
0x105b   : > { %v6868_v6 = vor.u32 %v7529_v55, %v6867_v3 }
0x105d   : > { %3443 = vmatpush.bf16.msrb.mxu3 %v6868_v6 }
0x1061   : > { %3444 = vmatpush.bf16.msrb.mxu3 %v6860_v5 }
0x1067   : > { %v7747_v10 = vpop.permute.xlu0 %7746  ;;  %v7742_v24 = vpop.permute.xlu1 %7741 }
0x1068   : > { %v7744_v25 = vunpack.i.h.bf16 %v7742_v24  ;;  %v7743_v28 = vunpack.i.l.bf16 %v7742_v24  ;;  %v7749_v31 = vunpack.i.h.bf16 %v7747_v10  ;;  %v7748_v60 = vunpack.i.l.bf16 %v7747_v10 }
0x106a   : > { %v3256_v59 = vsel %vm2200_vm9, %v3254_v26, %v7744_v25  ;;  %v3255_v7 = vsel %vm2200_vm9, %v3253_v29, %v7743_v28 }
0x106b   : > { %v3257_v33 = vsel %vm2203_vm10, %v3255_v7, %v7748_v60  ;;  %v3258_v0 = vsel %vm2203_vm10, %v3256_v59, %v7749_v31 }
0x106c   : > { %v3268_v44 = vpack.c.bf16 %v3258_v0, %v3257_v33  ;;  %v7790_v0 = vld [vmem:[%s9964_s28 + $0x1] ss:$0 sm:$0xff] }
0x106e   : > { %6844 = vmatmul.msk.bf16.vlgmr.msrb.gmra.mxu2 %vm1625_vm0, %v3268_v44 }
0x10f1   : > { %v3305_v39 = vpop.f32.mrf.mxu2 }
0x10f2   : > { %v3310_v48 = vadd.f32 %v3305_v39, %v8815_v30 }
0x10f4   : > { %v8946_v40 = vadd.f32 %v7789_v36, %v3310_v48  ;;  %v7791_v48 = vld [vmem:[%s9965_s10 + $0x1] ss:$0 sm:$0xff]  ;;  %s9994_s10 = smov 48  }
0x10f6   : > { %v3323_v38 = vsel %vm1625_vm0, %v8946_v40, 0.0 }
0x10f7   : > { %3324 = vadd.xlane.f32.xlu1 %v3323_v38 }
0x10f9   : > { %v3307_v14 = vpop.f32.mrf.mxu2 }
0x10fa   : > { %v3311_v43 = vadd.f32 %v3307_v14, %v8820_v34 }
0x10fc   : > { %v8951_v45 = vadd.f32 %v7789_v36, %v3311_v43 }
0x10fe   : > { %v3326_v46 = vsel %vm1625_vm0, %v8951_v45, 0.0 }
0x10ff   : > { %3327 = vadd.xlane.f32.xlu2 %v3326_v46 }
0x116a   : > { %v3325_v37 = vpop.xlane.xlu1 %3324 }
0x116b   : > { %v3329_v30 = vmul.f32 %v3325_v37, %v8497_v35 }
0x116d   : > { %v8957_v47 = vsub.f32 %v8946_v40, %v3329_v30 }
0x116f   : > { %v3333_v49 = vmul.f32 %v8957_v47, %v8957_v47 }
0x1171   : > { %v3335_v34 = vsel %vm1625_vm0, %v3333_v49, 0.0  ;;  %v6856_v49 = vld [vmem:[%s9966_s23 + $0x2] sm:$0x3]  ;;  %s10006_s23 = sld [smem:[#allocation45_spill]] }
0x1172   : > { %3336 = vadd.xlane.f32.xlu0 %v3335_v34  ;;  %v3328_v53 = vpop.xlane.xlu2 %3327  ;;  %v3391_v34 = vperm.slane %v6856_v49, 1 }
0x1173   : > { %v3330_v50 = vmul.f32 %v3328_v53, %v8497_v35 }
0x1175   : > { %v8964_v51 = vsub.f32 %v8951_v45, %v3330_v50 }
0x1177   : > { %v3334_v27 = vmul.f32 %v8964_v51, %v8964_v51 }
0x1179   : > { %v3338_v41 = vsel %vm1625_vm0, %v3334_v27, 0.0  ;;  %v3390_v27 = vperm.slane %v6856_v49, 0  ;;  %v7538_v49 = vld [vmem:[%s9968_s7 + $0xa0] sm:$0xff] }
0x117a   : > { %3339 = vadd.xlane.f32.xlu1 %v3338_v41 }
0x11e5   : > { %v3337_v8 = vpop.xlane.xlu0 %3336 }
0x11e6   : > { %v3341_v15 = vmul.f32 %v3337_v8, %v8497_v35 }
0x11e8   : > { %v3343_v20 = vadd.f32 1e-06, %v3341_v15 }
0x11ea   : > { %7897 = vrsqrt.f32 %v3343_v20  ;;  %vm3351_vm1 = vweird.f32 %v3343_v20 }
0x11ed   : > { %v3340_v23 = vpop.xlane.xlu1 %3339 }
0x11ee   : > { %v3342_v16 = vmul.f32 %v3340_v23, %v8497_v35 }
0x11f0   : > { %v7898_v11 = vpop.eup %7897  ;;  %v3344_v9 = vadd.f32 1e-06, %v3342_v16 }
0x11f1   : > { %v3346_v10 = vmul.f32 %v7898_v11, %v3343_v20  ;;  %vm3352_vm15 = vweird.f32 %v7898_v11 }
0x11f2   : > { %7899 = vrsqrt.f32 %v3344_v9  ;;  %vm3353_vm2 = vmor %vm3351_vm1, %vm3352_vm15  ;;  %vm3361_vm4 = vweird.f32 %v3344_v9 }
0x11f3   : > { %v3347_v24 = vmul.f32 %v7898_v11, %v3346_v10 }
0x11f5   : > { %v3348_v25 = vmul.f32 0.5, %v3347_v24 }
0x11f7   : > { %v3349_v28 = vsub.f32 1.5, %v3348_v25 }
0x11f8   : > { %v7900_v26 = vpop.eup %7899 }
0x11f9   : > { %v3350_v29 = vmul.f32 %v7898_v11, %v3349_v28  ;;  %v3356_v31 = vmul.f32 %v7900_v26, %v3344_v9  ;;  %vm3362_vm3 = vweird.f32 %v7900_v26 }
0x11fa   : > { %vm3363_vm5 = vmor %vm3361_vm4, %vm3362_vm3 }
0x11fb   : > { %v3357_v60 = vmul.f32 %v7900_v26, %v3356_v31  ;;  %v3354_v59 = vsel %vm3353_vm2, %v7898_v11, %v3350_v29 }
0x11fc   : > { %v3365_v44 = vmul.f32 %v3354_v59, %v8957_v47 }
0x11fd   : > { %v3358_v7 = vmul.f32 0.5, %v3357_v60 }
0x11fe   : > { %v3370_v38 = vmul.f32 %v7790_v0, %v3365_v44 }
0x11ff   : > { %v3359_v33 = vsub.f32 1.5, %v3358_v7  ;;  %v7539_v7 = vld [vmem:[%s9968_s7 + $0xa8] sm:$0xff] }
0x1200   : > { %v3375_v46 = vadd.f32 %v7791_v48, %v3370_v38  ;;  %3774 = vmatpush.bf16.msrb.mxu1 %v7539_v7 }
0x1201   : > { %v3360_v36 = vmul.f32 %v7900_v26, %v3359_v33 }
0x1203   : > { %v3364_v39 = vsel %vm3363_vm5, %v7900_v26, %v3360_v36  ;;  %v7546_v26 = vld [vmem:[%s9968_s7 + $0xe0] sm:$0xff] }
0x1204   : > { %v3366_v14 = vmul.f32 %v3364_v39, %v8964_v51  ;;  %3789 = vmatpush.bf16.msra.mxu2 %v7546_v26  ;;  %3775 = vmatpush.bf16.msrb.mxu1 %v7538_v49 }
0x1206   : > { %v3371_v43 = vmul.f32 %v7790_v0, %v3366_v14  ;;  %v7545_v14 = vld [vmem:[%s9968_s7 + $0xd8] sm:$0xff] }
0x1208   : > { %v3376_v37 = vadd.f32 %v7791_v48, %v3371_v43  ;;  %3790 = vmatpush.bf16.msra.mxu2 %v7545_v14 }
0x120a   : > { %v3386_v30 = vpack.c.bf16 %v3376_v37, %v3375_v46 }
0x120c   : > { %6889 = vmatmul.msk.bf16.vlgmr.msrb.gmra.mxu3 %vm1625_vm0, %v3386_v30  ;;  %6890 = vmatmul.msk.bf16.vlgmr.msra.gmra.mxu0 %vm1625_vm0, %v3386_v30 }
0x120d   : > { %3791 = vmatpush.bf16.msra.mxu2 %v7544_v56 }
0x1289   : > { %v3460_v47 = vpop.f32.mrf.mxu0 }
0x128a   : > { %v8994_v53 = vadd.f32 %v3460_v47, %v3391_v34 }
0x128c   : > { %v8997_v50 = vmul.f32 0.70710677, %v8994_v53 }
0x128e   : > { %v3513_v51 = vmul.f32 %v8997_v50, %v8997_v50 }
0x128f   : > { %v3446_v41 = vpop.f32.mrf.mxu3 }
0x1290   : > { %v9001_v42 = vmin.f32 %v3513_v51, 16.0  ;;  %v9003_v52 = vadd.f32 %v3446_v41, %v3390_v27 }
0x1291   : > { %v3462_v22 = vpop.f32.mrf.mxu0 }
0x1292   : > { %v3515_v54 = vmul.f32 2.1237322e-06, %v9001_v42  ;;  %v3526_v13 = vmul.f32 3.8918573e-05, %v9001_v42  ;;  %v9008_v57 = vadd.f32 %v3462_v22, %v3391_v34  ;;  %v9011_v61 = vmul.f32 0.70710677, %v9003_v52 }
0x1294   : > { %v3527_v62 = vadd.f32 0.001143296, %v3526_v13  ;;  %v3516_v1 = vadd.f32 0.00028619796, %v3515_v54  ;;  %v3473_v2 = vmul.f32 %v9011_v61, %v9011_v61  ;;  %v9017_v3 = vmul.f32 0.70710677, %v9008_v57 }
0x1296   : > { %v3528_v55 = vmul.f32 %v3527_v62, %v9001_v42  ;;  %v9021_v6 = vmin.f32 %v3473_v2, 16.0  ;;  %v3593_v63 = vmul.f32 %v9017_v3, %v9017_v3  ;;  %v3517_v19 = vmul.f32 %v3516_v1, %v9001_v42  ;;  %v7537_v1 = vld [vmem:[%s9968_s7 + $0x98] sm:$0xff] }
0x1297   : > { %v3448_v8 = vpop.f32.mrf.mxu3  ;;  %3776 = vmatpush.bf16.msrb.mxu1 %v7537_v1 }
0x1298   : > { %v3529_v12 = vadd.f32 0.014752088, %v3528_v55  ;;  %v9025_v15 = vadd.f32 %v3448_v8, %v3390_v27  ;;  %v3486_v58 = vmul.f32 3.8918573e-05, %v9021_v6  ;;  %v9030_v20 = vmin.f32 %v3593_v63, 16.0  ;;  %v7543_v63 = vld [vmem:[%s9968_s7 + $0xc8] sm:$0xff] }
0x1299   : > { %v3475_v23 = vmul.f32 2.1237322e-06, %v9021_v6  ;;  %v3518_v25 = vadd.f32 0.0036580483, %v3517_v19  ;;  %3792 = vmatpush.bf16.msra.mxu2 %v7543_v63 }
0x129a   : > { %v3530_v5 = vmul.f32 %v3529_v12, %v9001_v42  ;;  %v9034_v18 = vmul.f32 0.70710677, %v9025_v15  ;;  %v3487_v16 = vadd.f32 0.001143296, %v3486_v58  ;;  %v3595_v11 = vmul.f32 2.1237322e-06, %v9030_v20 }
0x129b   : > { %v3606_v10 = vmul.f32 3.8918573e-05, %v9030_v20  ;;  %v3476_v33 = vadd.f32 0.00028619796, %v3475_v23  ;;  %v3519_v43 = vmul.f32 %v3518_v25, %v9001_v42  ;;  %3777 = vmatpush.bf16.msrb.mxu1 %v7536_v21 }
0x129c   : > { %v3531_v9 = vadd.f32 0.112945676, %v3530_v5  ;;  %v3553_v24 = vmul.f32 %v9034_v18, %v9034_v18  ;;  %v3488_v28 = vmul.f32 %v3487_v16, %v9021_v6  ;;  %v3596_v31 = vadd.f32 0.00028619796, %v3595_v11 }
0x129d   : > { %v3607_v60 = vadd.f32 0.001143296, %v3606_v10  ;;  %v3477_v34 = vmul.f32 %v3476_v33, %v9021_v6  ;;  %v3520_v13 = vadd.f32 0.05243302, %v3519_v43  ;;  %v7534_v43 = vld [vmem:[%s9968_s7 + $0x80] sm:$0xff] }
0x129e   : > { %v3532_v29 = vmul.f32 %v3531_v9, %v9001_v42  ;;  %v9045_v59 = vmin.f32 %v3553_v24, 16.0  ;;  %v3489_v0 = vadd.f32 0.014752088, %v3488_v28  ;;  %v3597_v37 = vmul.f32 %v3596_v31, %v9030_v20  ;;  %v7542_v24 = vld [vmem:[%s9968_s7 + $0xc0] sm:$0xff]  ;;  %v7535_v31 = vld [vmem:[%s9968_s7 + $0x88] sm:$0xff]  ;;  %s9991_s7 = sld [smem:[#allocation15_spill]] }
0x129f   : > { %v3608_v36 = vmul.f32 %v3607_v60, %v9030_v20  ;;  %v3478_v2 = vadd.f32 0.0036580483, %v3477_v34  ;;  %v3521_v17 = vmul.f32 %v3520_v13, %v9001_v42  ;;  %3793 = vmatpush.bf16.msra.mxu2 %v7542_v24  ;;  %3778 = vmatpush.bf16.msrb.mxu1 %v7535_v31 }
0x12a0   : > { %v3533_v44 = vadd.f32 0.4994258, %v3532_v29  ;;  %v3490_v39 = vmul.f32 %v3489_v0, %v9021_v6  ;;  %v3555_v48 = vmul.f32 2.1237322e-06, %v9045_v59  ;;  %v3566_v38 = vmul.f32 3.8918573e-05, %v9045_v59 }
0x12a1   : > { %v3609_v30 = vadd.f32 0.014752088, %v3608_v36  ;;  %v3598_v62 = vadd.f32 0.0036580483, %v3597_v37  ;;  %v3479_v23 = vmul.f32 %v3478_v2, %v9021_v6  ;;  %v3522_v26 = vadd.f32 0.18741608, %v3521_v17 }
0x12a2   : > { %v3534_v46 = vmul.f32 %v3533_v44, %v9001_v42  ;;  %v3491_v47 = vadd.f32 0.112945676, %v3490_v39  ;;  %v3567_v27 = vadd.f32 0.001143296, %v3566_v38  ;;  %v3556_v54 = vadd.f32 0.00028619796, %v3555_v48 }
0x12a3   : > { %v3610_v41 = vmul.f32 %v3609_v30, %v9030_v20  ;;  %v3599_v19 = vmul.f32 %v3598_v62, %v9030_v20  ;;  %v3480_v7 = vadd.f32 0.05243302, %v3479_v23  ;;  %v3523_v38 = vmul.f32 %v3522_v26, %v9001_v42  ;;  %3779 = vmatpush.bf16.msrb.mxu1 %v7534_v43 }
0x12a4   : > { %v9058_v51 = vadd.f32 1.0, %v3534_v46  ;;  %v3492_v22 = vmul.f32 %v3491_v47, %v9021_v6  ;;  %v3568_v32 = vmul.f32 %v3567_v27, %v9045_v59  ;;  %v3557_v12 = vmul.f32 %v3556_v54, %v9045_v59 }
0x12a5   : > { %v3611_v4 = vadd.f32 0.112945676, %v3610_v41  ;;  %v3600_v29 = vadd.f32 0.05243302, %v3599_v19  ;;  %v3481_v30 = vmul.f32 %v3480_v7, %v9021_v6 }
0x12a6   : > { %7901 = vrcp.f32 %v9058_v51  ;;  %v3493_v55 = vadd.f32 0.4994258, %v3492_v22  ;;  %v3569_v5 = vadd.f32 0.014752088, %v3568_v32  ;;  %v3558_v28 = vadd.f32 0.0036580483, %v3557_v12 }
0x12a7   : > { %v3612_v58 = vmul.f32 %v3611_v4, %v9030_v20  ;;  %v3601_v14 = vmul.f32 %v3600_v29, %v9030_v20  ;;  %v3547_v49 = vand.u32 2147483648, %v9058_v51  ;;  %vm3541_vm7 = vweird.f32 %v9058_v51 }
0x12a8   : > { %v3494_v8 = vmul.f32 %v3493_v55, %v9021_v6  ;;  %v3570_v10 = vmul.f32 %v3569_v5, %v9045_v59  ;;  %v3559_v39 = vmul.f32 %v3558_v28, %v9045_v59  ;;  %v3545_v47 = vand.u32 2147483647, %v9058_v51 }
0x12a9   : > { %v3613_v9 = vadd.f32 0.4994258, %v3612_v58  ;;  %v3602_v56 = vadd.f32 0.18741608, %v3601_v14  ;;  %v3524_v22 = vadd.f32 1.1283791, %v3523_v38 }
0x12aa   : > { %v9074_v16 = vadd.f32 1.0, %v3494_v8  ;;  %v3571_v0 = vadd.f32 0.112945676, %v3570_v10  ;;  %v3560_v42 = vadd.f32 0.05243302, %v3559_v39  ;;  %v3548_v32 = vor.u32 1.1754944e-38, %v3547_v49 }
0x12ab   : > { %v3614_v33 = vmul.f32 %v3613_v9, %v9030_v20  ;;  %v3482_v13 = vadd.f32 0.18741608, %v3481_v30  ;;  %vm3546_vm12 = vcmp.eq.f32.partialorder %v3545_v47, 8.507059e+37  ;;  %v3525_v12 = vmul.f32 %v3524_v22, %v8997_v50 }
0x12ac   : > { %v7902_v11 = vpop.eup %7901  ;;  %7903 = vrcp.f32 %v9074_v16  ;;  %v3572_v48 = vmul.f32 %v3571_v0, %v9045_v59  ;;  %v3561_v55 = vmul.f32 %v3560_v42, %v9045_v59  ;;  %vm3501_vm13 = vweird.f32 %v9074_v16 }
0x12ad   : > { %v3537_v25 = vmul.f32 %v7902_v11, %v9058_v51  ;;  %v9082_v36 = vadd.f32 1.0, %v3614_v33  ;;  %vm3542_vm6 = vweird.f32 %v7902_v11  ;;  %v3603_v51 = vmul.f32 %v3602_v56, %v9030_v20 }
0x12ae   : > { %v3573_v27 = vadd.f32 0.4994258, %v3572_v48  ;;  %vm3543_vm11 = vmor %vm3541_vm7, %vm3542_vm6  ;;  %v3483_v17 = vmul.f32 %v3482_v13, %v9021_v6  ;;  %v3505_v58 = vand.u32 2147483647, %v9074_v16  ;;  %v3507_v23 = vand.u32 2147483648, %v9074_v16 }
0x12af   : > { %v3538_v60 = vsub.f32 1.0, %v3537_v25  ;;  %7905 = vrcp.f32 %v9082_v36  ;;  %v3562_v20 = vadd.f32 0.18741608, %v3561_v55  ;;  %v3604_v9 = vadd.f32 1.1283791, %v3603_v51 }
0x12b0   : > { %v3574_v62 = vmul.f32 %v3573_v27, %v9045_v59  ;;  %v3625_v50 = vand.u32 2147483647, %v9082_v36  ;;  %v3484_v6 = vadd.f32 1.1283791, %v3483_v17  ;;  %vm3506_vm2 = vcmp.eq.f32.partialorder %v3505_v58, 8.507059e+37 }
0x12b1   : > { %v3539_v44 = vmul.f32 %v7902_v11, %v3538_v60  ;;  %vm3621_vm3 = vweird.f32 %v9082_v36  ;;  %v3508_v31 = vor.u32 1.1754944e-38, %v3507_v23  ;;  %v3563_v7 = vmul.f32 %v3562_v20, %v9045_v59  ;;  %v7792_v17 = vld [vmem:[%s9972_s2 + $0x1] ss:$0 sm:$0xff]  ;;  %s1473_s2 = scalar_lea.vmem %s9979_s15, %s9137_s11  ;;  %s9981_s15 = sld [smem:[#allocation29_spill]] }
0x12b2   : > { %v7904_v46 = vpop.eup %7903  ;;  %v3575_v4 = vadd.f32 1.0, %v3574_v62  ;;  %vm3626_vm5 = vcmp.eq.f32.partialorder %v3625_v50, 8.507059e+37  ;;  %v3485_v48 = vmul.f32 %v3484_v6, %v9011_v61  ;;  %v3466_v59 = vmul.f32 0.5, %v8994_v53 }
0x12b3   : > { %v3540_v37 = vadd.f32 %v7902_v11, %v3539_v44  ;;  %v3497_v34 = vmul.f32 %v7904_v46, %v9074_v16  ;;  %vm3502_vm14 = vweird.f32 %v7904_v46  ;;  %v3605_v16 = vmul.f32 %v3604_v9, %v9017_v3 }
0x12b4   : > { %7907 = vrcp.f32 %v3575_v4  ;;  %vm9108_vm1 = vmor %vm3501_vm13, %vm3502_vm14  ;;  %v3468_v3 = vmul.f32 0.5, %v9008_v57  ;;  %vm3581_vm7 = vweird.f32 %v3575_v4  ;;  %v3465_v57 = vmul.f32 0.5, %v9003_v52 }
0x12b5   : > { %v3498_v41 = vsub.f32 1.0, %v3497_v34  ;;  %v3544_v54 = vsel %vm3543_vm11, %v7902_v11, %v3540_v37  ;;  %v7906_v2 = vpop.eup %7905  ;;  %v3627_v11 = vand.u32 2147483648, %v9082_v36  ;;  %v3587_v37 = vand.u32 2147483648, %v3575_v4 }
0x12b6   : > { %v3549_v63 = vsel %vm3546_vm12, %v3548_v32, %v3544_v54  ;;  %v3617_v8 = vmul.f32 %v7906_v2, %v9082_v36  ;;  %vm3622_vm15 = vweird.f32 %v7906_v2  ;;  %v3564_v36 = vadd.f32 1.1283791, %v3563_v7 }
0x12b7   : > { %v3499_v1 = vmul.f32 %v7904_v46, %v3498_v41  ;;  %v3550_v21 = vmul.f32 %v3549_v63, %v3525_v12  ;;  %vm3623_vm4 = vmor %vm3621_vm3, %vm3622_vm15  ;;  %v3628_v60 = vor.u32 1.1754944e-38, %v3627_v11  ;;  %v3588_v41 = vor.u32 1.1754944e-38, %v3587_v37 }
0x12b8   : > { %v3618_v5 = vsub.f32 1.0, %v3617_v8  ;;  %v3565_v61 = vmul.f32 %v3564_v36, %v9034_v18 }
0x12b9   : > { %v3500_v19 = vadd.f32 %v7904_v46, %v3499_v1  ;;  %v6892_v29 = vclamps-f32 %v3550_v21, 1.0 }
0x12ba   : > { %v3619_v10 = vmul.f32 %v7906_v2, %v3618_v5  ;;  %v7908_v26 = vpop.eup %7907 }
0x12bb   : > { %v3504_v25 = vsel %vm9108_vm1, %v7904_v46, %v3500_v19  ;;  %v3577_v0 = vmul.f32 %v7908_v26, %v3575_v4  ;;  %v3634_v43 = vadd.f32 1.0, %v6892_v29  ;;  %v3585_v46 = vand.u32 2147483647, %v3575_v4  ;;  %v7553_v29 = vld [vmem:[%s9978_s16 + $0x18] sm:$0xff] }
0x12bc   : > { %v3620_v28 = vadd.f32 %v7906_v2, %v3619_v10  ;;  %v3509_v44 = vsel %vm3506_vm2, %v3508_v31, %v3504_v25  ;;  %vm3582_vm6 = vweird.f32 %v7908_v26  ;;  %3909 = vmatpush.bf16.msra.mxu3 %v7553_v29  ;;  %v7552_v31 = vld [vmem:[%s9978_s16 + $0x10] sm:$0xff] }
0x12bd   : > { %v3578_v14 = vsub.f32 1.0, %v3577_v0  ;;  %v3510_v30 = vmul.f32 %v3509_v44, %v3485_v48  ;;  %v3638_v27 = vmul.f32 %v3634_v43, %v3466_v59  ;;  %vm3583_vm11 = vmor %vm3581_vm7, %vm3582_vm6  ;;  %vm3586_vm12 = vcmp.eq.f32.partialorder %v3585_v46, 8.507059e+37  ;;  %v7550_v0 = vld [vmem:[%s9978_s16] sm:$0xff] }
0x12be   : > { %v3624_v33 = vsel %vm3623_vm4, %v7906_v2, %v3620_v28  ;;  %v3467_v2 = vmul.f32 0.5, %v9025_v15  ;;  %v3929_v44 = vld [vmem:[%s1473_s2] sm:$0xff]  ;;  %vm3957_vm4 = vcmask 64512  }
0x12bf   : > { %v3629_v39 = vsel %vm3626_vm5, %v3628_v60, %v3624_v33  ;;  %v3579_v34 = vmul.f32 %v7908_v26, %v3578_v14  ;;  %v6891_v56 = vclamps-f32 %v3510_v30, 1.0  ;;  %v7551_v60 = vld [vmem:[%s9978_s16 + $0x8] sm:$0xff]  ;;  %vm3961_vm5 = vcmask 1043456   ;;  %s9998_s16 = sld [smem:[#allocation39_spill]] }
0x12c0   : > { %v3630_v38 = vmul.f32 %v3629_v39, %v3605_v16  ;;  %3910 = vmatpush.bf16.msra.mxu3 %v7552_v31  ;;  %v3930_v39 = vld [vmem:[%s1473_s2 + $0x8] sm:$0xff]  ;;  %s1483_s2 = scalar_lea.vmem %s8401_s29, %s9137_s11 }
0x12c1   : > { %v3580_v42 = vadd.f32 %v7908_v26, %v3579_v34  ;;  %v3633_v1 = vadd.f32 1.0, %v6891_v56 }
0x12c2   : > { %v6894_v49 = vclamps-f32 %v3630_v38, 1.0 }
0x12c3   : > { %v3584_v54 = vsel %vm3583_vm11, %v7908_v26, %v3580_v42  ;;  %v3637_v4 = vmul.f32 %v3633_v1, %v3465_v57 }
0x12c4   : > { %v3636_v47 = vadd.f32 1.0, %v6894_v49  ;;  %v3589_v13 = vsel %vm3586_vm12, %v3588_v41, %v3584_v54  ;;  %3911 = vmatpush.bf16.msra.mxu3 %v7551_v60  ;;  %v7794_v54 = vld [vmem:[%s9981_s15] ss:$0 sm:$0xff]  ;;  %s9892_s15 = smov 120  }
0x12c5   : > { %v3590_v32 = vmul.f32 %v3589_v13, %v3565_v61  ;;  %v7793_v61 = vld [vmem:[%s9980_s6] ss:$0 sm:$0xff]  ;;  %s9984_s6 = sld [smem:[#allocation32_spill]] }
0x12c6   : > { %v3640_v22 = vmul.f32 %v3636_v47, %v3468_v3 }
0x12c7   : > { %v6893_v53 = vclamps-f32 %v3590_v32, 1.0 }
0x12c8   : > { %v3675_v62 = vpack.c.bf16 %v3640_v22, %v3638_v27  ;;  %3912 = vmatpush.bf16.msra.mxu3 %v7550_v0 }
0x12c9   : > { %v3635_v55 = vadd.f32 1.0, %v6893_v53 }
0x12ca   : > { %3794 = vmatmul.bf16.vlgmr.msra.gmra.mxu2 %v3675_v62 }
0x12cb   : > { %v3639_v18 = vmul.f32 %v3635_v55, %v3467_v2 }
0x12cd   : > { %v3674_v63 = vpack.c.bf16 %v3639_v18, %v3637_v4 }
0x12cf   : > { %3780 = vmatmul.bf16.vlgmr.msrb.gmra.mxu1 %v3674_v63 }
0x134c   : > { %v3781_v8 = vpop.f32.mrf.mxu1 }
0x134d   : > { %v3795_v51 = vpop.f32.mrf.mxu2 }
0x134e   : > { %v3796_v12 = vadd.f32 %v3795_v51, %v3781_v8 }
0x1350   : > { %v3800_v19 = vadd.f32 %v3796_v12, %v8946_v40 }
0x1352   : > { %v3807_v58 = vadd.f32 %v7792_v17, %v3800_v19 }
0x1354   : > { %v3811_v21 = vsel %vm1625_vm0, %v3807_v58, 0.0  ;;  %v3783_v23 = vpop.f32.mrf.mxu1 }
0x1355   : > { %v3797_v5 = vpop.f32.mrf.mxu2  ;;  %3812 = vadd.xlane.f32.xlu2 %v3811_v21 }
0x1356   : > { %v3798_v52 = vadd.f32 %v3797_v5, %v3783_v23 }
0x1358   : > { %v3801_v15 = vadd.f32 %v3798_v52, %v8951_v45 }
0x135a   : > { %v3808_v11 = vadd.f32 %v7792_v17, %v3801_v15 }
0x135c   : > { %v3814_v20 = vsel %vm1625_vm0, %v3808_v11, 0.0 }
0x135d   : > { %3815 = vadd.xlane.f32.xlu0 %v3814_v20 }
0x1371   : > { %3933 = vrot.lane.b32.xlu0 %v3929_v44, %s8166_s5 }
0x13c8   : > { %v3813_v9 = vpop.xlane.xlu2 %3812 }
0x13c9   : > { %v3817_v10 = vmul.f32 %v3813_v9, %v8497_v35 }
0x13cb   : > { %v3819_v40 = vsub.f32 %v3807_v58, %v3817_v10 }
0x13cd   : > { %v3821_v50 = vmul.f32 %v3819_v40, %v3819_v40 }
0x13cf   : > { %v3823_v6 = vsel %vm1625_vm0, %v3821_v50, 0.0  ;;  %v3951_v50 = vld [vmem:[%s9984_s6] sm:$0xf]  ;;  %s9986_s6 = sld [smem:[#allocation36_spill]] }
0x13d0   : > { %3824 = vadd.xlane.f32.xlu1 %v3823_v6  ;;  %v3816_v24 = vpop.xlane.xlu0 %3815  ;;  %v3963_v6 = vsel %vm3961_vm5, %v3951_v50, 0 }
0x13d1   : > { %v3818_v45 = vmul.f32 %v3816_v24, %v8497_v35  ;;  %3972 = vmatpush.bf16.msrb.mxu0 %v3963_v6 }
0x13d3   : > { %v3820_v25 = vsub.f32 %v3808_v11, %v3818_v45 }
0x13d5   : > { %v3822_v28 = vmul.f32 %v3820_v25, %v3820_v25 }
0x13d7   : > { %v3826_v26 = vsel %vm1625_vm0, %v3822_v28, 0.0 }
0x13d8   : > { %3827 = vadd.xlane.f32.xlu2 %v3826_v26 }
0x13e3   : > { %v3934_v21 = vpop.permute.xlu0 %3933 }
0x13e9   : > { %3935 = vrot.lane.b32.xlu1 %v3930_v39, %s8166_s5  ;;  %s9982_s5 = sld [smem:[#allocation31_spill]] }
0x13ef   : > { %v7795_v2 = vld [vmem:[%s9982_s5] ss:$0 sm:$0xff]  ;;  %s9985_s5 = sld [smem:[#allocation33_spill]] }
0x13f5   : > { %v7796_v28 = vld [vmem:[%s9985_s5] ss:$0 sm:$0xff]  ;;  %s9987_s5 = sld [smem:[#allocation13_spill]] }
0x1443   : > { %v3825_v7 = vpop.xlane.xlu1 %3824 }
0x1444   : > { %v3829_v16 = vmul.f32 %v3825_v7, %v8497_v35 }
0x1446   : > { %v3831_v33 = vadd.f32 1e-06, %v3829_v16 }
0x1448   : > { %7909 = vrsqrt.f32 %v3831_v33  ;;  %vm3839_vm14 = vweird.f32 %v3831_v33 }
0x144b   : > { %v3828_v48 = vpop.xlane.xlu2 %3827 }
0x144c   : > { %v3830_v38 = vmul.f32 %v3828_v48, %v8497_v35 }
0x144e   : > { %v7910_v14 = vpop.eup %7909  ;;  %v3832_v43 = vadd.f32 1e-06, %v3830_v38 }
0x144f   : > { %v3834_v36 = vmul.f32 %v7910_v14, %v3831_v33  ;;  %vm3840_vm13 = vweird.f32 %v7910_v14 }
0x1450   : > { %7911 = vrsqrt.f32 %v3832_v43  ;;  %vm3841_vm15 = vmor %vm3839_vm14, %vm3840_vm13  ;;  %vm3849_vm2 = vweird.f32 %v3832_v43 }
0x1451   : > { %v3835_v46 = vmul.f32 %v7910_v14, %v3834_v36 }
0x1453   : > { %v3836_v37 = vmul.f32 0.5, %v3835_v46 }
0x1455   : > { %v3837_v30 = vsub.f32 1.5, %v3836_v37  ;;  %v7036_v37 = vld [vmem:[%s9986_s6 + $0x30] sm:$0xf] }
0x1456   : > { %v7912_v49 = vpop.eup %7911 }
0x1457   : > { %v3838_v34 = vmul.f32 %v7910_v14, %v3837_v30  ;;  %v3844_v59 = vmul.f32 %v7912_v49, %v3832_v43  ;;  %vm3850_vm1 = vweird.f32 %v7912_v49  ;;  %v7561_v30 = vld [vmem:[%s9986_s6 + $0x34] sm:$0xf0] }
0x1458   : > { %vm3851_vm3 = vmor %vm3849_vm2, %vm3850_vm1 }
0x1459   : > { %v3845_v3 = vmul.f32 %v7912_v49, %v3844_v59  ;;  %v3842_v47 = vsel %vm3841_vm15, %v7910_v14, %v3838_v34  ;;  %v7037_v34 = vor.u32 %v7561_v30, %v7036_v37  ;;  %v7038_v59 = vld [vmem:[%s9986_s6 + $0x38] sm:$0xf0]  ;;  %v4044_v30 = vld [vmem:[%s9992_s8] sm:$0x3] }
0x145a   : > { %v3853_v41 = vmul.f32 %v3842_v47, %v3819_v40  ;;  %v7028_v47 = vld [vmem:[%s9986_s6 + $0x20] sm:$0xf] }
0x145b   : > { %v3846_v42 = vmul.f32 0.5, %v3845_v3  ;;  %v3936_v11 = vpop.permute.xlu1 %3935  ;;  %4097 = vmatpush.bf16.msrb.mxu3 %v7037_v34 }
0x145c   : > { %v3858_v13 = vmul.f32 %v7793_v61, %v3853_v41  ;;  %v7030_v41 = vld [vmem:[%s9986_s6 + $0x28] sm:$0xf0] }
0x145d   : > { %v3847_v27 = vsub.f32 1.5, %v3846_v42  ;;  %v7559_v42 = vld [vmem:[%s9986_s6 + $0x24] sm:$0xf0] }
0x145e   : > { %v3863_v1 = vadd.f32 %v7794_v54, %v3858_v13  ;;  %v7556_v13 = vld [vmem:[%s9986_s6 + $0x14] sm:$0xf] }
0x145f   : > { %v3848_v56 = vmul.f32 %v7912_v49, %v3847_v27  ;;  %v7558_v27 = vld [vmem:[%s9986_s6 + $0x24] sm:$0xf] }
0x1461   : > { %v3852_v22 = vsel %vm3851_vm3, %v7912_v49, %v3848_v56  ;;  %v7560_v49 = vld [vmem:[%s9986_s6 + $0x34] sm:$0xf]  ;;  %v7033_v56 = vor.u32 %v7558_v27, %v7030_v41 }
0x1462   : > { %v3854_v62 = vmul.f32 %v3852_v22, %v3820_v25  ;;  %v7041_v3 = vor.u32 %v7560_v49, %v7038_v59  ;;  %v7020_v22 = vld [vmem:[%s9986_s6 + $0x10] sm:$0xf]  ;;  %v4047_v49 = vperm.slane %v4044_v30, 1 }
0x1464   : > { %v3859_v32 = vmul.f32 %v7793_v61, %v3854_v62  ;;  %4111 = vmatpush.bf16.msra.mxu0 %v7041_v3  ;;  %v7029_v61 = vor.u32 %v7559_v42, %v7028_v47  ;;  %v4046_v42 = vperm.slane %v4044_v30, 0 }
0x1466   : > { %v3864_v53 = vadd.f32 %v7794_v54, %v3859_v32  ;;  %4098 = vmatpush.bf16.msrb.mxu3 %v7029_v61  ;;  %v7557_v54 = vld [vmem:[%s9986_s6 + $0x14] sm:$0xf0]  ;;  %v7022_v32 = vld [vmem:[%s9986_s6 + $0x18] sm:$0xf0] }
0x1467   : > { %v7021_v62 = vor.u32 %v7557_v54, %v7020_v22 }
0x1468   : > { %v3873_v57 = vpack.c.bf16 %v3864_v53, %v3863_v1  ;;  %4112 = vmatpush.bf16.msra.mxu0 %v7033_v56  ;;  %v7025_v53 = vor.u32 %v7556_v13, %v7022_v32  ;;  %v1510_v32 = vld [vmem:[%s9993_s9 + $0x8] sm:$0xff] }
0x146a   : > { %7008 = vmatmul.msk.bf16.vlgmr.msra.gmra.mxu3 %vm1625_vm0, %v3873_v57 }
0x146b   : > { %4099 = vmatpush.bf16.msrb.mxu3 %v7021_v62  ;;  %v1509_v62 = vld [vmem:[%s9993_s9] sm:$0xff] }
0x146c   : > { %4113 = vmatpush.bf16.msra.mxu0 %v7025_v53 }
0x14ed   : > { %v3914_v55 = vpop.f32.mrf.mxu3 }
0x14ee   : > { %v3915_v4 = vadd.f32 %v7795_v2, %v3914_v55  ;;  %v7555_v55 = vld [vmem:[%s9986_s6 + $0x4] sm:$0xf0] }
0x14f0   : > { %v3919_v18 = vmax.f32 %v3915_v4, -30.0  ;;  %6267 = vst.msk [vmem:[%s1483_s2] sm:$0xff] %vm3957_vm4, %v3915_v4 }
0x14f2   : > { %v9150_v63 = vmin.f32 %v3919_v18, 20.0 }
0x14f4   : > { %v3923_v51 = vmul.f32 0.5, %v9150_v63 }
0x14f5   : > { %v3916_v8 = vpop.f32.mrf.mxu3 }
0x14f6   : > { %v3917_v12 = vadd.f32 %v7795_v2, %v3916_v8  ;;  %v3925_v17 = vmul.f32 1.442695, %v3923_v51  ;;  %v7012_v2 = vld [vmem:[%s9986_s6] sm:$0xf]  ;;  %v7014_v8 = vld [vmem:[%s9986_s6 + $0x8] sm:$0xf0] }
0x14f7   : > { %v7013_v51 = vor.u32 %v7555_v55, %v7012_v2 }
0x14f8   : > { %v3920_v19 = vmax.f32 %v3917_v12, -30.0  ;;  %6268 = vst.msk [vmem:[%s1483_s2 + $0x8] sm:$0xff] %vm3957_vm4, %v3917_v12  ;;  %7913 = vpow2.f32 %v3925_v17  ;;  %s1493_s2 = scalar_lea.vmem %s9983_s3, %s9137_s11  ;;  %v9206_v17 = vld [vmem:[%s9987_s5] sm:$0xff]  ;;  %s9990_s3 = sld [smem:[#allocation35_spill]] }
0x14f9   : > { %4100 = vmatpush.bf16.msrb.mxu3 %v7013_v51 }
0x14fa   : > { %v9154_v58 = vmin.f32 %v3920_v19, 20.0  ;;  %v9209_v19 = vld [vmem:[%s9987_s5 + $0x8] sm:$0xff] }
0x14fc   : > { %v3924_v5 = vmul.f32 0.5, %v9154_v58 }
0x14fe   : > { %v7914_v23 = vpop.eup %7913  ;;  %v3927_v52 = vmul.f32 1.442695, %v3924_v5 }
0x14ff   : > { %v3939_v15 = vmul.f32 %v7914_v23, %v3934_v21 }
0x1500   : > { %7915 = vpow2.f32 %v3927_v52 }
0x1501   : > { %3943 = vrot.lane.b32.xlu2 %v3939_v15, %s9892_s15 }
0x1506   : > { %v7916_v20 = vpop.eup %7915 }
0x1507   : > { %v3940_v9 = vmul.f32 %v7916_v20, %v3936_v11 }
0x1509   : > { %3945 = vrot.lane.b32.xlu0 %v3940_v9, %s9892_s15  ;;  %s9989_s15 = sld [smem:[#allocation34_spill]] }
0x155b   : > { %v3944_v10 = vpop.permute.xlu2 %3943 }
0x155c   : > { %v3949_v40 = vadd.f32 %v3944_v10, %v3915_v4  ;;  %v7554_v4 = vld [vmem:[%s9986_s6 + $0x4] sm:$0xf] }
0x155e   : > { %6279 = vst.msk [vmem:[%s1493_s2] sm:$0xff] %vm3957_vm4, %v3949_v40 }
0x157b   : > { %v3946_v24 = vpop.permute.xlu0 %3945 }
0x157c   : > { %v3950_v45 = vadd.f32 %v3946_v24, %v3917_v12  ;;  %v7017_v12 = vor.u32 %v7554_v4, %v7014_v8 }
0x157e   : > { %v3952_v25 = vpack.c.bf16 %v3950_v45, %v3949_v40  ;;  %6280 = vst.msk [vmem:[%s1493_s2 + $0x8] sm:$0xff] %vm3957_vm4, %v3950_v45  ;;  %4114 = vmatpush.bf16.msra.mxu0 %v7017_v12  ;;  %s9988_s2 = smov 64  }
0x1580   : > { %7009 = vmatmul.msk.bf16.vlgmr.msrb.gmra.mxu0 %vm3957_vm4, %v3952_v25 }
0x15fd   : > { %v3974_v26 = vpop.f32.mrf.mxu0 }
0x15fe   : > { %v9166_v29 = vadd.f32 %v7796_v28, %v3974_v26 }
0x1600   : > { %v3981_v31 = vsel %vm1625_vm0, %v9166_v29, 0.0 }
0x1601   : > { %3982 = vadd.xlane.f32.xlu0 %v3981_v31 }
0x1605   : > { %v3976_v60 = vpop.f32.mrf.mxu0 }
0x1606   : > { %v9170_v7 = vadd.f32 %v7796_v28, %v3976_v60  ;;  %v7797_v28 = vld [vmem:[%s9989_s15] ss:$0 sm:$0xff] }
0x1608   : > { %v3984_v16 = vsel %vm1625_vm0, %v9170_v7, 0.0 }
0x1609   : > { %3985 = vadd.xlane.f32.xlu2 %v3984_v16  ;;  %v7798_v16 = vld [vmem:[%s9990_s3] ss:$0 sm:$0xff] }
0x1674   : > { %v3983_v33 = vpop.xlane.xlu0 %3982 }
0x1675   : > { %v3987_v0 = vmul.f32 %v3983_v33, %v8497_v35 }
0x1677   : > { %v9176_v44 = vsub.f32 %v9166_v29, %v3987_v0 }
0x1679   : > { %v3991_v39 = vmul.f32 %v9176_v44, %v9176_v44 }
0x167b   : > { %v3993_v48 = vsel %vm1625_vm0, %v3991_v39, 0.0 }
0x167c   : > { %v3986_v38 = vpop.xlane.xlu2 %3985  ;;  %3994 = vadd.xlane.f32.xlu1 %v3993_v48 }
0x167d   : > { %v3988_v14 = vmul.f32 %v3986_v38, %v8497_v35 }
0x167f   : > { %v9183_v43 = vsub.f32 %v9170_v7, %v3988_v14 }
0x1681   : > { %v3992_v36 = vmul.f32 %v9183_v43, %v9183_v43 }
0x1683   : > { %v3996_v46 = vsel %vm1625_vm0, %v3992_v36, 0.0  ;;  %v7464_v36 = vld [vmem:[%s9991_s7 + $0x10] sm:$0xff] }
0x1684   : > { %3997 = vadd.xlane.f32.xlu2 %v3996_v46  ;;  %v7463_v46 = vld [vmem:[%s9991_s7 + $0x8] sm:$0xff] }
0x1695   : > { %4171 = vrot.lane.b32.xlu1 %v9206_v17, %s9988_s2 }
0x169c   : > { %4173 = vrot.lane.b32.xlu2 %v9209_v19, %s9988_s2 }
0x16ef   : > { %v3995_v1 = vpop.xlane.xlu1 %3994 }
0x16f0   : > { %v3999_v57 = vmul.f32 %v3995_v1, %v8497_v35 }
0x16f2   : > { %v4001_v18 = vadd.f32 1e-06, %v3999_v57 }
0x16f4   : > { %7917 = vrsqrt.f32 %v4001_v18  ;;  %vm4009_vm7 = vweird.f32 %v4001_v18 }
0x16f7   : > { %v3998_v5 = vpop.xlane.xlu2 %3997 }
0x16f8   : > { %v4000_v21 = vmul.f32 %v3998_v5, %v8497_v35 }
0x16fa   : > { %v7918_v23 = vpop.eup %7917  ;;  %v4002_v52 = vadd.f32 1e-06, %v4000_v21 }
0x16fb   : > { %v4004_v15 = vmul.f32 %v7918_v23, %v4001_v18  ;;  %vm4010_vm6 = vweird.f32 %v7918_v23 }
0x16fc   : > { %7919 = vrsqrt.f32 %v4002_v52  ;;  %vm4011_vm11 = vmor %vm4009_vm7, %vm4010_vm6  ;;  %vm4019_vm13 = vweird.f32 %v4002_v52 }
0x16fd   : > { %v4005_v11 = vmul.f32 %v7918_v23, %v4004_v15 }
0x16ff   : > { %v4006_v20 = vmul.f32 0.5, %v4005_v11 }
0x1701   : > { %v4007_v9 = vsub.f32 1.5, %v4006_v20 }
0x1702   : > { %v7920_v10 = vpop.eup %7919 }
0x1703   : > { %v4008_v40 = vmul.f32 %v7918_v23, %v4007_v9  ;;  %v4014_v50 = vmul.f32 %v7920_v10, %v4002_v52  ;;  %vm4020_vm12 = vweird.f32 %v7920_v10 }
0x1704   : > { %vm4021_vm14 = vmor %vm4019_vm13, %vm4020_vm12 }
0x1705   : > { %v4015_v6 = vmul.f32 %v7920_v10, %v4014_v50  ;;  %v4012_v24 = vsel %vm4011_vm11, %v7918_v23, %v4008_v40 }
0x1706   : > { %v4023_v26 = vmul.f32 %v4012_v24, %v9176_v44  ;;  %v7465_v44 = vld [vmem:[%s9991_s7 + $0x18] sm:$0xff] }
0x1707   : > { %v4016_v45 = vmul.f32 0.5, %v4015_v6  ;;  %4155 = vmatpush.bf16.msra.mxu1 %v7465_v44  ;;  %4189 = vmatpush.bf16.msrb.mxu2 %v7465_v44  ;;  %v9241_v23 = vpop.permute.xlu1 %4171 }
0x1708   : > { %v4028_v33 = vmul.f32 %v7797_v28, %v4023_v26 }
0x1709   : > { %v4017_v25 = vsub.f32 1.5, %v4016_v45 }
0x170a   : > { %v4033_v48 = vadd.f32 %v7798_v16, %v4028_v33 }
0x170b   : > { %v4018_v31 = vmul.f32 %v7920_v10, %v4017_v25  ;;  %4156 = vmatpush.bf16.msra.mxu1 %v7464_v36  ;;  %4190 = vmatpush.bf16.msrb.mxu2 %v7464_v36 }
0x170d   : > { %v4022_v60 = vsel %vm4021_vm14, %v7920_v10, %v4018_v31 }
0x170e   : > { %v4024_v0 = vmul.f32 %v4022_v60, %v9183_v43  ;;  %v7462_v43 = vld [vmem:[%s9991_s7] sm:$0xff] }
0x170f   : > { %4157 = vmatpush.bf16.msra.mxu1 %v7463_v46  ;;  %4191 = vmatpush.bf16.msrb.mxu2 %v7463_v46 }
0x1710   : > { %v4029_v39 = vmul.f32 %v7797_v28, %v4024_v0 }
0x1712   : > { %v4034_v38 = vadd.f32 %v7798_v16, %v4029_v39 }
0x1713   : > { %4158 = vmatpush.bf16.msra.mxu1 %v7462_v43  ;;  %4192 = vmatpush.bf16.msrb.mxu2 %v7462_v43 }
0x1714   : > { %v4043_v14 = vpack.c.bf16 %v4034_v38, %v4033_v48 }
0x1716   : > { %7042 = vmatmul.msk.bf16.vlgmr.msrb.gmra.mxu3 %vm1625_vm0, %v4043_v14  ;;  %7043 = vmatmul.msk.bf16.vlgmr.msra.gmra.mxu0 %vm1625_vm0, %v4043_v14 }
0x1793   : > { %v4116_v37 = vpop.f32.mrf.mxu0 }
0x1794   : > { %v4117_v3 = vadd.f32 %v4116_v37, %v4047_v49 }
0x1799   : > { %v4102_v34 = vpop.f32.mrf.mxu3 }
0x179a   : > { %v4103_v41 = vadd.f32 %v4102_v34, %v4046_v42 }
0x179b   : > { %v4118_v59 = vpop.f32.mrf.mxu0 }
0x179c   : > { %v4119_v47 = vadd.f32 %v4118_v59, %v4047_v49  ;;  %v4121_v57 = vmul.f32 %v4103_v41, %v9206_v17  ;;  %v9243_v17 = vpop.permute.xlu2 %4173  ;;  %v4177_v52 = vmul.f32 %v9241_v23, %v4103_v41 }
0x179e   : > { %v9227_v27 = vpack.c.bf16 %v4119_v47, %v4117_v3 }
0x17a0   : > { %4272 = vmatpush.bf16.msrb.mxu0 %v9227_v27 }
0x17a1   : > { %v4104_v61 = vpop.f32.mrf.mxu3 }
0x17a2   : > { %v4105_v56 = vadd.f32 %v4104_v61, %v4046_v42 }
0x17a4   : > { %v4123_v22 = vpack.c.bf16 %v4105_v56, %v4103_v41  ;;  %v4122_v2 = vmul.f32 %v4105_v56, %v9209_v19  ;;  %v4178_v15 = vmul.f32 %v9243_v17, %v4105_v56 }
0x17a6   : > { %4180 = vrot.lane.b32.xlu0 %v4123_v22, %s9988_s2  ;;  %7060 = vmatmul.msk.bf16.vlgmr.msra.gmra.mxu1 %vm1625_vm0, %v4123_v22 }
0x1818   : > { %v4181_v54 = vpop.permute.xlu0 %4180 }
0x1819   : > { %7061 = vmatmul.msk.bf16.vlgmr.msrb.gmra.mxu2 %vm1625_vm0, %v4181_v54 }
0x1823   : > { %v4160_v13 = vpop.f32.mrf.mxu1 }
0x1824   : > { %v4165_v1 = vmul.f32 %v4160_v13, %v1509_v62 }
0x1826   : > { %v4167_v4 = vadd.f32 %v4165_v1, %v4121_v57 }
0x182b   : > { %v4162_v53 = vpop.f32.mrf.mxu1 }
0x182c   : > { %v4166_v55 = vmul.f32 %v4162_v53, %v1510_v32 }
0x182e   : > { %v4168_v18 = vadd.f32 %v4166_v55, %v4122_v2 }
0x1830   : > { %v4211_v51 = vpack.c.bf16 %v4168_v18, %v4167_v4 }
0x189c   : > { %v4194_v8 = vpop.f32.mrf.mxu2 }
0x189d   : > { %v4199_v12 = vmul.f32 %v4194_v8, %v1509_v62 }
0x189f   : > { %4203 = vrot.lane.b32.xlu0 %v4199_v12, %s9988_s2 }
0x18a4   : > { %v4196_v5 = vpop.f32.mrf.mxu2 }
0x18a5   : > { %v4200_v21 = vmul.f32 %v4196_v5, %v1510_v32 }
0x18a7   : > { %4205 = vrot.lane.b32.xlu1 %v4200_v21, %s9988_s2 }
0x18af   : > { %4280 = vrot.lane.b32.xlu1 %v4211_v51, %s9975_s0 }
0x18b7   : > { %4350 = vrot.lane.b32.xlu1 %v4211_v51, %s9973_s22 }
0x1911   : > { %v4204_v19 = vpop.permute.xlu0 %4203 }
0x1912   : > { %v4209_v20 = vadd.f32 %v4204_v19, %v4177_v52 }
0x1919   : > { %v4206_v11 = vpop.permute.xlu1 %4205 }
0x191a   : > { %v4210_v9 = vadd.f32 %v4206_v11, %v4178_v15 }
0x191c   : > { %v4212_v10 = vpack.c.bf16 %v4210_v9, %v4209_v20 }
0x191e   : > { %4282 = vrot.lane.b32.xlu2 %v4212_v10, %s9994_s10  ;;  %4215 = vrot.lane.b32.xlu0 %v4212_v10, %s9988_s2 }
0x1921   : > { %v4281_v6 = vpop.permute.xlu1 %4280 }
0x1926   : > { %4421 = vrot.lane.b32.xlu2 %v4212_v10, %s9974_s1  ;;  %4352 = vrot.lane.b32.xlu0 %v4212_v10, %s9995_s12 }
0x1929   : > { %v4351_v16 = vpop.permute.xlu1 %4350 }
0x192e   : > { %4419 = vrot.lane.b32.xlu0 %v4211_v51, %s9996_s13 }
0x1978   : > { %v4283_v40 = vpop.permute.xlu2 %4282 }
0x1979   : > { %v4288_v50 = vsel %vm1902_vm8, %v4283_v40, 0 }
0x197a   : > { %4297 = vmatpush.bf16.xpose.msrb.mxu1 %v4288_v50 }
0x1980   : > { %v4422_v24 = vpop.permute.xlu2 %4421 }
0x1981   : > { %v4427_v45 = vsel %vm1902_vm8, %v4422_v24, 0  ;;  %7064 = vmatmul.msk.bf16.vlgmr.msrb.gmra.mxu1 %vm1902_vm8, %v4281_v6 }
0x1982   : > { %4436 = vmatpush.bf16.xpose.msra.mxu1 %v4427_v45 }
0x1990   : > { %v4216_v25 = vpop.permute.xlu0 %4215 }
0x1991   : > { %v4221_v28 = vsel %vm1902_vm8, %v4216_v25, 0 }
0x1992   : > { %4230 = vmatpush.bf16.xpose.msra.mxu3 %v4221_v28 }
0x1998   : > { %v4353_v26 = vpop.permute.xlu0 %4352 }
0x1999   : > { %v4358_v31 = vsel %vm1902_vm8, %v4353_v26, 0  ;;  %7062 = vmatmul.msk.bf16.vlgmr.msra.gmra.mxu3 %vm1902_vm8, %v4211_v51 }
0x199a   : > { %4367 = vmatpush.bf16.xpose.msrb.mxu3 %v4358_v31 }
0x19a0   : > { %v4420_v60 = vpop.permute.xlu0 %4419 }
0x19a1   : > { %7068 = vmatmul.msk.bf16.vlgmr.msra.gmra.mxu1 %vm1902_vm8, %v4420_v60 }
0x19a9   : > { %7066 = vmatmul.msk.bf16.vlgmr.msrb.gmra.mxu3 %vm1902_vm8, %v4351_v16 }
0x19fe   : > { %v4299_v33 = vpop.f32.mrf.mxu1 }
0x19ff   : > { %v4304_v0 = vmul.f32 0.25, %v4299_v33 }
0x1a01   : > { %v4306_v39 = vsel %vm1902_vm8, %v4304_v0, -inf }
0x1a02   : > { %4307 = vmax.xlane.f32.xlu2 %v4306_v39 }
0x1a06   : > { %v4301_v48 = vpop.f32.mrf.mxu1 }
0x1a07   : > { %v4305_v38 = vmul.f32 0.25, %v4301_v48 }
0x1a09   : > { %v4309_v14 = vsel %vm1902_vm8, %v4305_v38, -inf }
0x1a0a   : > { %4310 = vmax.xlane.f32.xlu1 %v4309_v14 }
0x1a1c   : > { %v4232_v44 = vpop.f32.mrf.mxu3 }
0x1a1d   : > { %v4237_v36 = vmul.f32 0.25, %v4232_v44 }
0x1a1e   : > { %v4438_v46 = vpop.f32.mrf.mxu1 }
0x1a1f   : > { %v4443_v43 = vmul.f32 0.25, %v4438_v46  ;;  %v4239_v37 = vsel %vm1902_vm8, %v4237_v36, -inf }
0x1a20   : > { %4240 = vmax.xlane.f32.xlu0 %v4239_v37 }
0x1a21   : > { %v4445_v30 = vsel %vm1902_vm8, %v4443_v43, -inf }
0x1a22   : > { %4446 = vmax.xlane.f32.xlu1 %v4445_v30 }
0x1a24   : > { %v4234_v49 = vpop.f32.mrf.mxu3 }
0x1a25   : > { %v4238_v34 = vmul.f32 0.25, %v4234_v49 }
0x1a26   : > { %v4440_v59 = vpop.f32.mrf.mxu1 }
0x1a27   : > { %v4444_v3 = vmul.f32 0.25, %v4440_v59  ;;  %v4242_v47 = vsel %vm1902_vm8, %v4238_v34, -inf }
0x1a28   : > { %4243 = vmax.xlane.f32.xlu2 %v4242_v47 }
0x1a29   : > { %v4448_v42 = vsel %vm1902_vm8, %v4444_v3, -inf }
0x1a2a   : > { %4449 = vmax.xlane.f32.xlu0 %v4448_v42 }
0x1a2c   : > { %v4369_v61 = vpop.f32.mrf.mxu3 }
0x1a2d   : > { %v4374_v41 = vmul.f32 0.25, %v4369_v61 }
0x1a2f   : > { %v4376_v56 = vsel %vm1902_vm8, %v4374_v41, -inf }
0x1a30   : > { %4377 = vmax.xlane.f32.xlu2 %v4376_v56 }
0x1a34   : > { %v4371_v22 = vpop.f32.mrf.mxu3 }
0x1a35   : > { %v4375_v54 = vmul.f32 0.25, %v4371_v22 }
0x1a37   : > { %v4379_v13 = vsel %vm1902_vm8, %v4375_v54, -inf }
0x1a38   : > { %4380 = vmax.xlane.f32.xlu1 %v4379_v13 }
0x1a75   : > { %v4308_v62 = vpop.xlane.xlu2 %4307 }
0x1a76   : > { %v4312_v32 = vsub.f32 %v4304_v0, %v4308_v62 }
0x1a78   : > { %v4314_v1 = vmul.f32 1.442695, %v4312_v32 }
0x1a7a   : > { %7921 = vpow2.f32 %v4314_v1 }
0x1a7d   : > { %v4311_v53 = vpop.xlane.xlu1 %4310 }
0x1a7e   : > { %v4313_v57 = vsub.f32 %v4305_v38, %v4311_v53 }
0x1a80   : > { %v7922_v2 = vpop.eup %7921  ;;  %v4316_v55 = vmul.f32 1.442695, %v4313_v57 }
0x1a81   : > { %v4318_v4 = vsel %vm1902_vm8, %v7922_v2, 0.0 }
0x1a82   : > { %7923 = vpow2.f32 %v4316_v55  ;;  %4319 = vadd.xlane.f32.xlu0 %v4318_v4 }
0x1a88   : > { %v7924_v18 = vpop.eup %7923 }
0x1a89   : > { %v4321_v51 = vsel %vm1902_vm8, %v7924_v18, 0.0 }
0x1a8a   : > { %4322 = vadd.xlane.f32.xlu2 %v4321_v51 }
0x1a93   : > { %v4241_v8 = vpop.xlane.xlu0 %4240 }
0x1a94   : > { %v4245_v12 = vsub.f32 %v4237_v36, %v4241_v8 }
0x1a95   : > { %v4447_v5 = vpop.xlane.xlu1 %4446 }
0x1a96   : > { %v4247_v21 = vmul.f32 1.442695, %v4245_v12  ;;  %v4451_v19 = vsub.f32 %v4443_v43, %v4447_v5 }
0x1a98   : > { %7925 = vpow2.f32 %v4247_v21  ;;  %v4453_v52 = vmul.f32 1.442695, %v4451_v19 }
0x1a9a   : > { %7927 = vpow2.f32 %v4453_v52 }
0x1a9b   : > { %v4244_v15 = vpop.xlane.xlu2 %4243 }
0x1a9c   : > { %v4246_v11 = vsub.f32 %v4238_v34, %v4244_v15 }
0x1a9d   : > { %v4450_v20 = vpop.xlane.xlu0 %4449 }
0x1a9e   : > { %v7926_v9 = vpop.eup %7925  ;;  %v4249_v10 = vmul.f32 1.442695, %v4246_v11  ;;  %v4452_v40 = vsub.f32 %v4444_v3, %v4450_v20 }
0x1a9f   : > { %v4251_v50 = vsel %vm1902_vm8, %v7926_v9, 0.0 }
0x1aa0   : > { %7929 = vpow2.f32 %v4249_v10  ;;  %4252 = vadd.xlane.f32.xlu1 %v4251_v50  ;;  %v4455_v6 = vmul.f32 1.442695, %v4452_v40  ;;  %v7928_v45 = vpop.eup %7927 }
0x1aa1   : > { %v4457_v60 = vsel %vm1902_vm8, %v7928_v45, 0.0 }
0x1aa2   : > { %4330 = vrot.lane.b32.xlu2 %v9227_v27, %s9975_s0  ;;  %7931 = vpow2.f32 %v4455_v6 }
0x1aa3   : > { %v4378_v24 = vpop.xlane.xlu2 %4377 }
0x1aa4   : > { %v4382_v25 = vsub.f32 %v4374_v41, %v4378_v24 }
0x1aa6   : > { %v7930_v28 = vpop.eup %7929  ;;  %v4384_v26 = vmul.f32 1.442695, %v4382_v25  ;;  %v7564_v25 = vld [vmem:[%s9997_s14 + $0x10] sm:$0xff] }
0x1aa7   : > { %v4254_v31 = vsel %vm1902_vm8, %v7930_v28, 0.0 }
0x1aa8   : > { %7933 = vpow2.f32 %v4384_v26  ;;  %4255 = vadd.xlane.f32.xlu0 %v4254_v31  ;;  %4458 = vadd.xlane.f32.xlu1 %v4457_v60  ;;  %v7932_v33 = vpop.eup %7931  ;;  %v7562_v26 = vld [vmem:[%s9997_s14] sm:$0xff] }
0x1aa9   : > { %v4460_v38 = vsel %vm1902_vm8, %v7932_v33, 0.0 }
0x1aab   : > { %v4381_v16 = vpop.xlane.xlu1 %4380 }
0x1aac   : > { %v4383_v0 = vsub.f32 %v4375_v54, %v4381_v16 }
0x1aae   : > { %v7934_v39 = vpop.eup %7933  ;;  %v4386_v48 = vmul.f32 1.442695, %v4383_v0 }
0x1aaf   : > { %v4388_v14 = vsel %vm1902_vm8, %v7934_v39, 0.0 }
0x1ab0   : > { %7935 = vpow2.f32 %v4386_v48  ;;  %4461 = vadd.xlane.f32.xlu0 %v4460_v38  ;;  %4389 = vadd.xlane.f32.xlu1 %v4388_v14 }
0x1ab6   : > { %v7936_v44 = vpop.eup %7935 }
0x1ab7   : > { %v4391_v36 = vsel %vm1902_vm8, %v7936_v44, 0.0 }
0x1ab8   : > { %4392 = vadd.xlane.f32.xlu0 %v4391_v36 }
0x1ac9   : > { %4468 = vrot.lane.b32.xlu1 %v9227_v27, %s9996_s13 }
0x1acc   : > { %4399 = vrot.lane.b32.xlu0 %v9227_v27, %s9973_s22 }
0x1af5   : > { %v4320_v46 = vpop.xlane.xlu0 %4319 }
0x1af6   : > { %7937 = vrcp.f32 %v4320_v46 }
0x1afc   : > { %v7938_v37 = vpop.eup %7937 }
0x1afd   : > { %v4323_v43 = vpop.xlane.xlu2 %4322  ;;  %v4326_v49 = vmul.f32 %v7938_v37, %v7922_v2 }
0x1afe   : > { %7939 = vrcp.f32 %v4323_v43 }
0x1b04   : > { %v7940_v30 = vpop.eup %7939 }
0x1b05   : > { %v4327_v34 = vmul.f32 %v7940_v30, %v7924_v18  ;;  %v4331_v59 = vpop.permute.xlu2 %4330 }
0x1b06   : > { %4343 = vmatpush.bf16.msra.mxu2 %v4331_v59 }
0x1b07   : > { %v4328_v3 = vpack.c.bf16 %v4327_v34, %v4326_v49  ;;  %v7799_v34 = vld [vmem:[%s9998_s16] ss:$0 sm:$0xff] }
0x1b09   : > { %7065 = vmatmul.msk.bf16.vlgmr.msra.gmra.mxu2 %vm1902_vm8, %v4328_v3 }
0x1b13   : > { %v4253_v47 = vpop.xlane.xlu1 %4252 }
0x1b14   : > { %7941 = vrcp.f32 %v4253_v47 }
0x1b1a   : > { %v7942_v61 = vpop.eup %7941 }
0x1b1b   : > { %v4256_v42 = vpop.xlane.xlu0 %4255  ;;  %v4259_v27 = vmul.f32 %v7942_v61, %v7926_v9  ;;  %v4459_v13 = vpop.xlane.xlu1 %4458 }
0x1b1c   : > { %7943 = vrcp.f32 %v4256_v42 }
0x1b22   : > { %v7944_v41 = vpop.eup %7943 }
0x1b23   : > { %v4260_v56 = vmul.f32 %v7944_v41, %v7930_v28  ;;  %v4462_v54 = vpop.xlane.xlu0 %4461  ;;  %v4390_v32 = vpop.xlane.xlu1 %4389  ;;  %v7563_v28 = vld [vmem:[%s9997_s14 + $0x8] sm:$0xff] }
0x1b24   : > { %7945 = vrcp.f32 %v4462_v54 }
0x1b25   : > { %v4261_v22 = vpack.c.bf16 %v4260_v56, %v4259_v27  ;;  %7947 = vrcp.f32 %v4459_v13 }
0x1b27   : > { %7063 = vmatmul.msk.bf16.vlgmr.msrb.gmra.mxu0 %vm1902_vm8, %v4261_v22 }
0x1b2a   : > { %v7946_v1 = vpop.eup %7945 }
0x1b2b   : > { %v4393_v62 = vpop.xlane.xlu0 %4392  ;;  %v7948_v53 = vpop.eup %7947  ;;  %v4466_v2 = vmul.f32 %v7946_v1, %v7932_v33 }
0x1b2c   : > { %7949 = vrcp.f32 %v4393_v62  ;;  %v4465_v4 = vmul.f32 %v7948_v53, %v7928_v45  ;;  %v7565_v45 = vld [vmem:[%s9997_s14 + $0x18] sm:$0xff] }
0x1b2d   : > { %7951 = vrcp.f32 %v4390_v32  ;;  %4558 = vmatpush.bf16.msra.mxu3 %v7565_v45  ;;  %v7089_v45 = vld [vmem:[%s9999_s17] sm:$0xf] }
0x1b2e   : > { %v4467_v8 = vpack.c.bf16 %v4466_v2, %v4465_v4  ;;  %v7113_v2 = vld [vmem:[%s9999_s17 + $0x30] sm:$0xf]  ;;  %v7572_v4 = vld [vmem:[%s9999_s17 + $0x34] sm:$0xf] }
0x1b31   : > { %4559 = vmatpush.bf16.msra.mxu3 %v7564_v25  ;;  %v7567_v25 = vld [vmem:[%s9999_s17 + $0x4] sm:$0xf0] }
0x1b32   : > { %v7950_v57 = vpop.eup %7949 }
0x1b33   : > { %v7952_v55 = vpop.eup %7951  ;;  %v4397_v51 = vmul.f32 %v7950_v57, %v7936_v44 }
0x1b34   : > { %v4396_v12 = vmul.f32 %v7952_v55, %v7934_v39  ;;  %v7573_v55 = vld [vmem:[%s9999_s17 + $0x34] sm:$0xf0] }
0x1b35   : > { %4560 = vmatpush.bf16.msra.mxu3 %v7563_v28  ;;  %v7566_v28 = vld [vmem:[%s9999_s17 + $0x4] sm:$0xf] }
0x1b36   : > { %v4398_v21 = vpack.c.bf16 %v4397_v51, %v4396_v12  ;;  %v7115_v51 = vld [vmem:[%s9999_s17 + $0x38] sm:$0xf0]  ;;  %v7105_v12 = vld [vmem:[%s9999_s17 + $0x20] sm:$0xf] }
0x1b39   : > { %4561 = vmatpush.bf16.msra.mxu3 %v7562_v26 }
0x1b3b   : > { %v4469_v18 = vpop.permute.xlu1 %4468 }
0x1b3c   : > { %4481 = vmatpush.bf16.msrb.mxu2 %v4469_v18  ;;  %v7114_v18 = vor.u32 %v7573_v55, %v7113_v2 }
0x1b3e   : > { %v4400_v5 = vpop.permute.xlu0 %4399 }
0x1b3f   : > { %4412 = vmatpush.bf16.msra.mxu0 %v4400_v5  ;;  %7069 = vmatmul.msk.bf16.vlgmr.msrb.gmra.mxu2 %vm1902_vm8, %v4467_v8  ;;  %v7118_v8 = vor.u32 %v7572_v4, %v7115_v51  ;;  %v7571_v5 = vld [vmem:[%s9999_s17 + $0x24] sm:$0xf0] }
0x1b41   : > { %4708 = vmatpush.bf16.msrb.mxu1 %v7118_v8 }
0x1b42   : > { %7067 = vmatmul.msk.bf16.vlgmr.msra.gmra.mxu0 %vm1902_vm8, %v4398_v21  ;;  %v7570_v21 = vld [vmem:[%s9999_s17 + $0x24] sm:$0xf] }
0x1b43   : > { %4694 = vmatpush.bf16.msrb.mxu0 %v7114_v18 }
0x1b8c   : > { %v4345_v19 = vpop.f32.mrf.mxu2 }
0x1b94   : > { %v4347_v52 = vpop.f32.mrf.mxu2 }
0x1b95   : > { %v7750_v15 = vpack.i.bf16 %v4347_v52, %v4345_v19  ;;  %v7106_v19 = vor.u32 %v7571_v5, %v7105_v12  ;;  %v7107_v52 = vld [vmem:[%s9999_s17 + $0x28] sm:$0xf0] }
0x1b97   : > { %7751 = vrot.lane.b32.xlu2 %v7750_v15, %s9974_s1  ;;  %v7110_v15 = vor.u32 %v7570_v21, %v7107_v52  ;;  %4695 = vmatpush.bf16.msrb.mxu0 %v7106_v19 }
0x1b99   : > { %4709 = vmatpush.bf16.msrb.mxu1 %v7110_v15 }
0x1ba4   : > { %v4274_v11 = vpop.f32.mrf.mxu0 }
0x1bac   : > { %v4276_v20 = vpop.f32.mrf.mxu0 }
0x1bbf   : > { %v4414_v9 = vpop.f32.mrf.mxu0 }
0x1bc2   : > { %v4483_v10 = vpop.f32.mrf.mxu2 }
0x1bc7   : > { %v4416_v40 = vpop.f32.mrf.mxu0 }
0x1bc8   : > { %v7755_v50 = vpack.i.bf16 %v4416_v40, %v4414_v9  ;;  %v7568_v9 = vld [vmem:[%s9999_s17 + $0x14] sm:$0xf]  ;;  %v7099_v40 = vld [vmem:[%s9999_s17 + $0x18] sm:$0xf0] }
0x1bca   : > { %7756 = vrot.lane.b32.xlu2 %v7755_v50, %s9995_s12  ;;  %v4485_v6 = vpop.f32.mrf.mxu2 }
0x1bcb   : > { %v7760_v24 = vpack.i.bf16 %v4485_v6, %v4483_v10  ;;  %v7102_v6 = vor.u32 %v7568_v9, %v7099_v40 }
0x1bcd   : > { %4710 = vmatpush.bf16.msrb.mxu1 %v7102_v6 }
0x1bd2   : > { %7761 = vrot.lane.b32.xlu2 %v7760_v24, %s9994_s10 }
0x1bf1   : > { %v7752_v31 = vpop.permute.xlu2 %7751 }
0x1bf2   : > { %v7754_v16 = vunpack.i.h.bf16 %v7752_v31  ;;  %v7753_v33 = vunpack.i.l.bf16 %v7752_v31  ;;  %v7090_v31 = vor.u32 %v7567_v25, %v7089_v45 }
0x1bf4   : > { %v4512_v38 = vsel %vm1902_vm8, %v4274_v11, %v7753_v33  ;;  %v4513_v14 = vsel %vm1902_vm8, %v4276_v20, %v7754_v16  ;;  %v7097_v11 = vld [vmem:[%s9999_s17 + $0x10] sm:$0xf]  ;;  %v7569_v20 = vld [vmem:[%s9999_s17 + $0x14] sm:$0xf0] }
0x1bf5   : > { %v7098_v10 = vor.u32 %v7569_v20, %v7097_v11 }
0x1bf7   : > { %4696 = vmatpush.bf16.msrb.mxu0 %v7098_v10 }
0x1bfb   : > { %4697 = vmatpush.bf16.msrb.mxu0 %v7090_v31  ;;  %v7589_v31 = vld [vmem:[%s10003_s21 + $0x78] sm:$0xff] }
0x1bfc   : > { %5038 = vmatpush.bf16.msrb.mxu3 %v7589_v31 }
0x1c24   : > { %v7757_v60 = vpop.permute.xlu2 %7756 }
0x1c25   : > { %v7759_v0 = vunpack.i.h.bf16 %v7757_v60  ;;  %v7758_v39 = vunpack.i.l.bf16 %v7757_v60  ;;  %v7091_v60 = vld [vmem:[%s9999_s17 + $0x8] sm:$0xf0] }
0x1c26   : > { %v7094_v16 = vor.u32 %v7566_v28, %v7091_v60 }
0x1c27   : > { %v4515_v46 = vsel %vm2200_vm9, %v4513_v14, %v7759_v0  ;;  %v4514_v43 = vsel %vm2200_vm9, %v4512_v38, %v7758_v39 }
0x1c28   : > { %4711 = vmatpush.bf16.msrb.mxu1 %v7094_v16 }
0x1c2c   : > { %v7762_v48 = vpop.permute.xlu2 %7761 }
0x1c2d   : > { %v7764_v44 = vunpack.i.h.bf16 %v7762_v48  ;;  %v7763_v36 = vunpack.i.l.bf16 %v7762_v48 }
0x1c2f   : > { %v4517_v37 = vsel %vm2203_vm10, %v4515_v46, %v7764_v44  ;;  %v4516_v30 = vsel %vm2203_vm10, %v4514_v43, %v7763_v36 }
0x1c30   : > { %v4526_v49 = vpack.c.bf16 %v4517_v37, %v4516_v30 }
0x1c32   : > { %7086 = vmatmul.msk.bf16.vlgmr.msra.gmra.mxu3 %vm1625_vm0, %v4526_v49 }
0x1cb5   : > { %v4563_v59 = vpop.f32.mrf.mxu3 }
0x1cb6   : > { %v4568_v3 = vadd.f32 %v4563_v59, %v9166_v29 }
0x1cb8   : > { %v9302_v47 = vadd.f32 %v7799_v34, %v4568_v3  ;;  %v7800_v3 = vld [vmem:[%s10000_s18] ss:$0 sm:$0xff] }
0x1cba   : > { %v4578_v42 = vsel %vm1625_vm0, %v9302_v47, 0.0 }
0x1cbb   : > { %4579 = vadd.xlane.f32.xlu0 %v4578_v42 }
0x1cbd   : > { %v4565_v61 = vpop.f32.mrf.mxu3 }
0x1cbe   : > { %v4569_v41 = vadd.f32 %v4565_v61, %v9170_v7 }
0x1cc0   : > { %v9307_v27 = vadd.f32 %v7799_v34, %v4569_v41 }
0x1cc2   : > { %v4581_v56 = vsel %vm1625_vm0, %v9307_v27, 0.0 }
0x1cc3   : > { %4582 = vadd.xlane.f32.xlu1 %v4581_v56  ;;  %v7801_v56 = vld [vmem:[%s10001_s19] ss:$0 sm:$0xff] }
0x1d2e   : > { %v4580_v22 = vpop.xlane.xlu0 %4579 }
0x1d2f   : > { %v4584_v29 = vmul.f32 %v4580_v22, %v8497_v35 }
0x1d31   : > { %v9313_v54 = vsub.f32 %v9302_v47, %v4584_v29 }
0x1d33   : > { %v4588_v13 = vmul.f32 %v9313_v54, %v9313_v54 }
0x1d35   : > { %v4590_v7 = vsel %vm1625_vm0, %v4588_v13, 0.0 }
0x1d36   : > { %4591 = vadd.xlane.f32.xlu2 %v4590_v7  ;;  %v4583_v62 = vpop.xlane.xlu1 %4582 }
0x1d37   : > { %v4585_v32 = vmul.f32 %v4583_v62, %v8497_v35 }
0x1d39   : > { %v9320_v1 = vsub.f32 %v9307_v27, %v4585_v32 }
0x1d3b   : > { %v4589_v53 = vmul.f32 %v9320_v1, %v9320_v1 }
0x1d3d   : > { %v4593_v57 = vsel %vm1625_vm0, %v4589_v53, 0.0  ;;  %v4641_v53 = vld [vmem:[%s10002_s20] sm:$0x3] }
0x1d3e   : > { %4594 = vadd.xlane.f32.xlu0 %v4593_v57  ;;  %v4643_v57 = vperm.slane %v4641_v53, 0  ;;  %v4644_v2 = vperm.slane %v4641_v53, 1 }
0x1da9   : > { %v4592_v50 = vpop.xlane.xlu2 %4591 }
0x1daa   : > { %v4596_v24 = vmul.f32 %v4592_v50, %v8497_v35 }
0x1dac   : > { %v4598_v26 = vadd.f32 1e-06, %v4596_v24 }
0x1dae   : > { %7953 = vrsqrt.f32 %v4598_v26  ;;  %vm4606_vm1 = vweird.f32 %v4598_v26 }
0x1db1   : > { %v4595_v33 = vpop.xlane.xlu0 %4594 }
0x1db2   : > { %v4597_v0 = vmul.f32 %v4595_v33, %v8497_v35 }
0x1db4   : > { %v7954_v39 = vpop.eup %7953  ;;  %v4599_v48 = vadd.f32 1e-06, %v4597_v0 }
0x1db5   : > { %v4601_v38 = vmul.f32 %v7954_v39, %v4598_v26  ;;  %vm4607_vm15 = vweird.f32 %v7954_v39  ;;  %v7581_v26 = vld [vmem:[%s10003_s21 + $0x38] sm:$0xff] }
0x1db6   : > { %7955 = vrsqrt.f32 %v4599_v48  ;;  %vm4608_vm2 = vmor %vm4606_vm1, %vm4607_vm15  ;;  %vm4616_vm5 = vweird.f32 %v4599_v48  ;;  %5024 = vmatpush.bf16.msra.mxu2 %v7581_v26 }
0x1db7   : > { %v4602_v14 = vmul.f32 %v7954_v39, %v4601_v38 }
0x1db9   : > { %v4603_v44 = vmul.f32 0.5, %v4602_v14  ;;  %v7580_v14 = vld [vmem:[%s10003_s21 + $0x30] sm:$0xff] }
0x1dba   : > { %5025 = vmatpush.bf16.msra.mxu2 %v7580_v14  ;;  %v7576_v14 = vld [vmem:[%s10003_s21 + $0x10] sm:$0xff] }
0x1dbb   : > { %v4604_v36 = vsub.f32 1.5, %v4603_v44  ;;  %v7588_v44 = vld [vmem:[%s10003_s21 + $0x70] sm:$0xff] }
0x1dbc   : > { %v7956_v46 = vpop.eup %7955  ;;  %5039 = vmatpush.bf16.msrb.mxu3 %v7588_v44  ;;  %v7584_v44 = vld [vmem:[%s10003_s21 + $0x50] sm:$0xff] }
0x1dbd   : > { %v4605_v43 = vmul.f32 %v7954_v39, %v4604_v36  ;;  %v4611_v37 = vmul.f32 %v7956_v46, %v4599_v48  ;;  %vm4617_vm3 = vweird.f32 %v7956_v46 }
0x1dbe   : > { %vm4618_vm6 = vmor %vm4616_vm5, %vm4617_vm3 }
0x1dbf   : > { %v4612_v30 = vmul.f32 %v7956_v46, %v4611_v37  ;;  %v4609_v49 = vsel %vm4608_vm2, %v7954_v39, %v4605_v43 }
0x1dc0   : > { %v4620_v42 = vmul.f32 %v4609_v49, %v9313_v54 }
0x1dc1   : > { %v4613_v34 = vmul.f32 0.5, %v4612_v30 }
0x1dc2   : > { %v4625_v22 = vmul.f32 %v7800_v3, %v4620_v42 }
0x1dc3   : > { %v4614_v59 = vsub.f32 1.5, %v4613_v34 }
0x1dc4   : > { %v4630_v7 = vadd.f32 %v7801_v56, %v4625_v22 }
0x1dc5   : > { %v4615_v61 = vmul.f32 %v7956_v46, %v4614_v59 }
0x1dc7   : > { %v4619_v41 = vsel %vm4618_vm6, %v7956_v46, %v4615_v61 }
0x1dc8   : > { %v4621_v29 = vmul.f32 %v4619_v41, %v9320_v1 }
0x1dca   : > { %v4626_v13 = vmul.f32 %v7800_v3, %v4621_v29  ;;  %v7579_v29 = vld [vmem:[%s10003_s21 + $0x28] sm:$0xff] }
0x1dcb   : > { %5026 = vmatpush.bf16.msra.mxu2 %v7579_v29 }
0x1dcc   : > { %v4631_v62 = vadd.f32 %v7801_v56, %v4626_v13  ;;  %v7587_v13 = vld [vmem:[%s10003_s21 + $0x68] sm:$0xff] }
0x1dcd   : > { %5040 = vmatpush.bf16.msrb.mxu3 %v7587_v13 }
0x1dce   : > { %v4640_v32 = vpack.c.bf16 %v4631_v62, %v4630_v7 }
0x1dd0   : > { %7119 = vmatmul.msk.bf16.vlgmr.msrb.gmra.mxu0 %vm1625_vm0, %v4640_v32  ;;  %7120 = vmatmul.msk.bf16.vlgmr.msrb.gmra.mxu1 %vm1625_vm0, %v4640_v32 }
0x1e4d   : > { %v4699_v54 = vpop.f32.mrf.mxu0  ;;  %v4713_v55 = vpop.f32.mrf.mxu1 }
0x1e4e   : > { %v9350_v4 = vadd.f32 %v4699_v54, %v4643_v57  ;;  %v9352_v18 = vadd.f32 %v4713_v55, %v4644_v2 }
0x1e50   : > { %v9355_v51 = vmul.f32 0.70710677, %v9350_v4  ;;  %v9358_v1 = vmul.f32 0.70710677, %v9352_v18 }
0x1e52   : > { %v4726_v8 = vmul.f32 %v9355_v51, %v9355_v51  ;;  %v4766_v12 = vmul.f32 %v9358_v1, %v9358_v1 }
0x1e54   : > { %v9364_v5 = vmin.f32 %v4726_v8, 16.0  ;;  %v9366_v21 = vmin.f32 %v4766_v12, 16.0 }
0x1e55   : > { %v4701_v19 = vpop.f32.mrf.mxu0  ;;  %v4715_v52 = vpop.f32.mrf.mxu1 }
0x1e56   : > { %v4728_v15 = vmul.f32 2.1237322e-06, %v9364_v5  ;;  %v4739_v11 = vmul.f32 3.8918573e-05, %v9364_v5  ;;  %v9370_v20 = vadd.f32 %v4701_v19, %v4643_v57  ;;  %v4779_v9 = vmul.f32 3.8918573e-05, %v9366_v21 }
0x1e57   : > { %v9373_v10 = vadd.f32 %v4715_v52, %v4644_v2  ;;  %v4768_v25 = vmul.f32 2.1237322e-06, %v9366_v21  ;;  %v7578_v52 = vld [vmem:[%s10003_s21 + $0x20] sm:$0xff] }
0x1e58   : > { %v4729_v40 = vadd.f32 0.00028619796, %v4728_v15  ;;  %v4740_v50 = vadd.f32 0.001143296, %v4739_v11  ;;  %v4780_v6 = vadd.f32 0.001143296, %v4779_v9  ;;  %5027 = vmatpush.bf16.msra.mxu2 %v7578_v52 }
0x1e59   : > { %v9376_v24 = vmul.f32 0.70710677, %v9370_v20  ;;  %v9381_v28 = vmul.f32 0.70710677, %v9373_v10  ;;  %v4769_v46 = vadd.f32 0.00028619796, %v4768_v25 }
0x1e5a   : > { %v4741_v45 = vmul.f32 %v4740_v50, %v9364_v5  ;;  %v4781_v60 = vmul.f32 %v4780_v6, %v9366_v21  ;;  %v4730_v33 = vmul.f32 %v4729_v40, %v9364_v5  ;;  %v7586_v15 = vld [vmem:[%s10003_s21 + $0x60] sm:$0xff]  ;;  %v7577_v25 = vld [vmem:[%s10003_s21 + $0x18] sm:$0xff] }
0x1e5b   : > { %v4806_v16 = vmul.f32 %v9376_v24, %v9376_v24  ;;  %v4846_v39 = vmul.f32 %v9381_v28, %v9381_v28  ;;  %v4770_v56 = vmul.f32 %v4769_v46, %v9366_v21  ;;  %5041 = vmatpush.bf16.msrb.mxu3 %v7586_v15 }
0x1e5c   : > { %v4742_v0 = vadd.f32 0.014752088, %v4741_v45  ;;  %v4782_v48 = vadd.f32 0.014752088, %v4781_v60  ;;  %v4731_v34 = vadd.f32 0.0036580483, %v4730_v33  ;;  %5028 = vmatpush.bf16.msra.mxu2 %v7577_v25 }
0x1e5d   : > { %v9391_v38 = vmin.f32 %v4806_v16, 16.0  ;;  %v9396_v43 = vmin.f32 %v4846_v39, 16.0  ;;  %v4771_v12 = vadd.f32 0.0036580483, %v4770_v56  ;;  %v7585_v16 = vld [vmem:[%s10003_s21 + $0x58] sm:$0xff] }
0x1e5e   : > { %v4743_v36 = vmul.f32 %v4742_v0, %v9364_v5  ;;  %v4783_v37 = vmul.f32 %v4782_v48, %v9366_v21  ;;  %v4732_v57 = vmul.f32 %v4731_v34, %v9364_v5 }
0x1e5f   : > { %v4808_v30 = vmul.f32 2.1237322e-06, %v9391_v38  ;;  %v4819_v49 = vmul.f32 3.8918573e-05, %v9391_v38  ;;  %v4848_v22 = vmul.f32 2.1237322e-06, %v9396_v43  ;;  %v4772_v0 = vmul.f32 %v4771_v12, %v9366_v21  ;;  %5042 = vmatpush.bf16.msrb.mxu3 %v7585_v16 }
0x1e60   : > { %v4744_v59 = vadd.f32 0.112945676, %v4743_v36  ;;  %v4784_v3 = vadd.f32 0.112945676, %v4783_v37  ;;  %v4859_v53 = vmul.f32 3.8918573e-05, %v9396_v43  ;;  %5029 = vmatpush.bf16.msra.mxu2 %v7576_v14 }
0x1e61   : > { %v4809_v42 = vadd.f32 0.00028619796, %v4808_v30  ;;  %v4820_v61 = vadd.f32 0.001143296, %v4819_v49  ;;  %v4849_v40 = vadd.f32 0.00028619796, %v4848_v22 }
0x1e62   : > { %v4745_v41 = vmul.f32 %v4744_v59, %v9364_v5  ;;  %v4785_v7 = vmul.f32 %v4784_v3, %v9366_v21  ;;  %v4860_v50 = vadd.f32 0.001143296, %v4859_v53  ;;  %v4733_v6 = vadd.f32 0.05243302, %v4732_v57  ;;  %v7582_v12 = vld [vmem:[%s10003_s21 + $0x40] sm:$0xff] }
0x1e63   : > { %v4810_v62 = vmul.f32 %v4809_v42, %v9391_v38  ;;  %v4821_v32 = vmul.f32 %v4820_v61, %v9391_v38  ;;  %v4850_v39 = vmul.f32 %v4849_v40, %v9396_v43  ;;  %v4773_v30 = vadd.f32 0.05243302, %v4772_v0  ;;  %5043 = vmatpush.bf16.msrb.mxu3 %v7584_v44  ;;  %v7575_v61 = vld [vmem:[%s10003_s21 + $0x8] sm:$0xff] }
0x1e64   : > { %v4746_v2 = vadd.f32 0.4994258, %v4745_v41  ;;  %v4786_v54 = vadd.f32 0.4994258, %v4785_v7  ;;  %v4861_v60 = vmul.f32 %v4860_v50, %v9396_v43  ;;  %v4734_v48 = vmul.f32 %v4733_v6, %v9364_v5  ;;  %v7583_v41 = vld [vmem:[%s10003_s21 + $0x48] sm:$0xff]  ;;  %5030 = vmatpush.bf16.msra.mxu2 %v7575_v61 }
0x1e65   : > { %v4822_v55 = vadd.f32 0.014752088, %v4821_v32  ;;  %v4811_v19 = vadd.f32 0.0036580483, %v4810_v62  ;;  %v4851_v34 = vadd.f32 0.0036580483, %v4850_v39  ;;  %v4774_v53 = vmul.f32 %v4773_v30, %v9366_v21 }
0x1e66   : > { %v4747_v8 = vmul.f32 %v4746_v2, %v9364_v5  ;;  %v4787_v11 = vmul.f32 %v4786_v54, %v9366_v21  ;;  %v4862_v46 = vadd.f32 0.014752088, %v4861_v60  ;;  %v4735_v42 = vadd.f32 0.18741608, %v4734_v48 }
0x1e67   : > { %v4823_v9 = vmul.f32 %v4822_v55, %v9391_v38  ;;  %v4812_v33 = vmul.f32 %v4811_v19, %v9391_v38  ;;  %v4852_v2 = vmul.f32 %v4851_v34, %v9396_v43  ;;  %5044 = vmatpush.bf16.msrb.mxu3 %v7583_v41  ;;  %v4775_v50 = vadd.f32 0.18741608, %v4774_v53 }
0x1e68   : > { %v9416_v45 = vadd.f32 1.0, %v4747_v8  ;;  %v9419_v26 = vadd.f32 1.0, %v4787_v11  ;;  %v4863_v59 = vmul.f32 %v4862_v46, %v9396_v43  ;;  %v4736_v54 = vmul.f32 %v4735_v42, %v9364_v5  ;;  %v7574_v8 = vld [vmem:[%s10003_s21] sm:$0xff] }
0x1e69   : > { %v4824_v31 = vadd.f32 0.112945676, %v4823_v9  ;;  %v4813_v37 = vadd.f32 0.05243302, %v4812_v33  ;;  %v4853_v6 = vadd.f32 0.05243302, %v4852_v2  ;;  %5031 = vmatpush.bf16.msra.mxu2 %v7574_v8 }
0x1e6a   : > { %7957 = vrcp.f32 %v9416_v45  ;;  %v4864_v62 = vadd.f32 0.112945676, %v4863_v59  ;;  %v4760_v40 = vand.u32 2147483648, %v9416_v45  ;;  %v4737_v25 = vadd.f32 1.1283791, %v4736_v54 }
0x1e6b   : > { %7959 = vrcp.f32 %v9419_v26  ;;  %v4825_v36 = vmul.f32 %v4824_v31, %v9391_v38  ;;  %v4814_v7 = vmul.f32 %v4813_v37, %v9391_v38  ;;  %vm4754_vm11 = vweird.f32 %v9416_v45  ;;  %5045 = vmatpush.bf16.msrb.mxu3 %v7582_v12 }
0x1e6c   : > { %v4865_v55 = vmul.f32 %v4864_v62, %v9396_v43  ;;  %v4758_v5 = vand.u32 2147483647, %v9416_v45  ;;  %v4761_v48 = vor.u32 1.1754944e-38, %v4760_v40  ;;  %v4854_v14 = vmul.f32 %v4853_v6, %v9396_v43 }
0x1e6d   : > { %v4826_v49 = vadd.f32 0.4994258, %v4825_v36  ;;  %v4815_v15 = vadd.f32 0.18741608, %v4814_v7  ;;  %v4738_v44 = vmul.f32 %v4737_v25, %v9355_v51  ;;  %v4800_v30 = vand.u32 2147483648, %v9419_v26 }
0x1e6e   : > { %v4866_v11 = vadd.f32 0.4994258, %v4865_v55  ;;  %vm4759_vm13 = vcmp.eq.f32.partialorder %v4758_v5, 8.507059e+37  ;;  %vm4794_vm15 = vweird.f32 %v9419_v26 }
0x1e6f   : > { %v4827_v29 = vmul.f32 %v4826_v49, %v9391_v38  ;;  %v4816_v33 = vmul.f32 %v4815_v15, %v9391_v38  ;;  %v4798_v38 = vand.u32 2147483647, %v9419_v26 }
0x1e70   : > { %v7958_v3 = vpop.eup %7957  ;;  %v4867_v31 = vmul.f32 %v4866_v11, %v9396_v43 }
0x1e71   : > { %v9435_v56 = vpop.eup %7959  ;;  %v4750_v22 = vmul.f32 %v7958_v3, %v9416_v45  ;;  %v4828_v57 = vadd.f32 1.0, %v4827_v29  ;;  %vm4755_vm7 = vweird.f32 %v7958_v3  ;;  %v4776_v45 = vmul.f32 %v4775_v50, %v9366_v21 }
0x1e72   : > { %v4790_v13 = vmul.f32 %v9435_v56, %v9419_v26  ;;  %vm4756_vm12 = vmor %vm4754_vm11, %vm4755_vm7  ;;  %v9454_v0 = vadd.f32 1.0, %v4867_v31  ;;  %vm4795_vm14 = vweird.f32 %v9435_v56  ;;  %v4817_v49 = vadd.f32 1.1283791, %v4816_v33 }
0x1e73   : > { %v4751_v32 = vsub.f32 1.0, %v4750_v22  ;;  %7961 = vrcp.f32 %v4828_v57  ;;  %v4838_v51 = vand.u32 2147483647, %v4828_v57  ;;  %v4840_v59 = vand.u32 2147483648, %v4828_v57  ;;  %vm9465_vm1 = vmor %vm4794_vm15, %vm4795_vm14 }
0x1e74   : > { %v4791_v52 = vsub.f32 1.0, %v4790_v13  ;;  %7963 = vrcp.f32 %v9454_v0  ;;  %v4777_v41 = vadd.f32 1.1283791, %v4776_v45  ;;  %vm4799_vm3 = vcmp.eq.f32.partialorder %v4798_v38, 8.507059e+37 }
0x1e75   : > { %v4752_v19 = vmul.f32 %v7958_v3, %v4751_v32  ;;  %v4801_v29 = vor.u32 1.1754944e-38, %v4800_v30  ;;  %vm4834_vm5 = vweird.f32 %v4828_v57  ;;  %v4818_v7 = vmul.f32 %v4817_v49, %v9376_v24  ;;  %v7802_v49 = vld [vmem:[%s10006_s23] ss:$0 sm:$0xff] }
0x1e76   : > { %v4792_v60 = vmul.f32 %v9435_v56, %v4791_v52  ;;  %vm4839_vm7 = vcmp.eq.f32.partialorder %v4838_v51, 8.507059e+37  ;;  %v4841_v62 = vor.u32 1.1754944e-38, %v4840_v59  ;;  %v4778_v8 = vmul.f32 %v4777_v41, %v9358_v1 }
0x1e77   : > { %v4753_v9 = vadd.f32 %v7958_v3, %v4752_v19  ;;  %v4878_v15 = vand.u32 2147483647, %v9454_v0  ;;  %v4880_v24 = vand.u32 2147483648, %v9454_v0  ;;  %v4720_v50 = vmul.f32 0.5, %v9370_v20 }
0x1e78   : > { %v4793_v37 = vadd.f32 %v9435_v56, %v4792_v60  ;;  %v4719_v20 = vmul.f32 0.5, %v9352_v18 }
0x1e79   : > { %v4757_v16 = vsel %vm4756_vm12, %v7958_v3, %v4753_v9  ;;  %v7962_v39 = vpop.eup %7961  ;;  %v4855_v3 = vadd.f32 0.18741608, %v4854_v14  ;;  %vm4874_vm12 = vweird.f32 %v9454_v0  ;;  %v4881_v31 = vor.u32 1.1754944e-38, %v4880_v24 }
0x1e7a   : > { %v4830_v36 = vmul.f32 %v7962_v39, %v4828_v57  ;;  %v4762_v46 = vsel %vm4759_vm13, %v4761_v48, %v4757_v16  ;;  %vm4835_vm2 = vweird.f32 %v7962_v39  ;;  %v4797_v22 = vsel %vm9465_vm1, %v9435_v56, %v4793_v37  ;;  %v7964_v26 = vpop.eup %7963 }
0x1e7b   : > { %v4763_v21 = vmul.f32 %v4762_v46, %v4738_v44  ;;  %vm4836_vm6 = vmor %vm4834_vm5, %vm4835_vm2  ;;  %v4856_v32 = vmul.f32 %v4855_v3, %v9396_v43  ;;  %v4802_v2 = vsel %vm4799_vm3, %v4801_v29, %v4797_v22  ;;  %v4870_v55 = vmul.f32 %v7964_v26, %v9454_v0 }
0x1e7c   : > { %v4831_v34 = vsub.f32 1.0, %v4830_v36  ;;  %v4803_v52 = vmul.f32 %v4802_v2, %v4778_v8  ;;  %vm4875_vm11 = vweird.f32 %v7964_v26  ;;  %v4718_v43 = vmul.f32 0.5, %v9350_v4  ;;  %v7597_v2 = vld [vmem:[%s9986_s6 + $0x74] sm:$0xf0]  ;;  %v7228_v8 = vld [vmem:[%s9986_s6 + $0x78] sm:$0xf0] }
0x1e7d   : > { %v7121_v53 = vclamps-f32 %v4763_v21, 1.0  ;;  %v4871_v19 = vsub.f32 1.0, %v4870_v55  ;;  %v4857_v57 = vadd.f32 1.1283791, %v4856_v32  ;;  %vm4876_vm13 = vmor %vm4874_vm12, %vm4875_vm11  ;;  %vm4879_vm14 = vcmp.eq.f32.partialorder %v4878_v15, 8.507059e+37 }
0x1e7e   : > { %v4832_v61 = vmul.f32 %v7962_v39, %v4831_v34  ;;  %v7122_v1 = vclamps-f32 %v4803_v52, 1.0  ;;  %v4721_v0 = vmul.f32 0.5, %v9373_v10  ;;  %v7594_v52 = vld [vmem:[%s9986_s6 + $0x64] sm:$0xf]  ;;  %v7220_v15 = vld [vmem:[%s9986_s6 + $0x68] sm:$0xf0] }
0x1e7f   : > { %v4886_v11 = vadd.f32 1.0, %v7121_v53  ;;  %v4872_v40 = vmul.f32 %v7964_v26, %v4871_v19  ;;  %v4858_v5 = vmul.f32 %v4857_v57, %v9381_v28  ;;  %v7226_v53 = vld [vmem:[%s9986_s6 + $0x70] sm:$0xf]  ;;  %v7595_v19 = vld [vmem:[%s9986_s6 + $0x64] sm:$0xf0]  ;;  %v7223_v24 = vor.u32 %v7594_v52, %v7220_v15 }
0x1e80   : > { %v4833_v13 = vadd.f32 %v7962_v39, %v4832_v61  ;;  %v4887_v4 = vadd.f32 1.0, %v7122_v1  ;;  %v7227_v55 = vor.u32 %v7597_v2, %v7226_v53 }
0x1e81   : > { %v4873_v25 = vadd.f32 %v7964_v26, %v4872_v40  ;;  %v4890_v60 = vmul.f32 %v4886_v11, %v4718_v43  ;;  %v7210_v11 = vld [vmem:[%s9986_s6 + $0x50] sm:$0xf]  ;;  %v7592_v40 = vld [vmem:[%s9986_s6 + $0x54] sm:$0xf] }
0x1e82   : > { %v4837_v54 = vsel %vm4836_vm6, %v7962_v39, %v4833_v13  ;;  %v4891_v36 = vmul.f32 %v4887_v4, %v4719_v20  ;;  %5182 = vmatpush.bf16.msra.mxu0 %v7227_v55  ;;  %v8026_v20 = vld [vmem:[%s9991_s7 + $0x10] sm:$0xff] }
0x1e83   : > { %v4842_v56 = vsel %vm4839_vm7, %v4841_v62, %v4837_v54  ;;  %v4877_v33 = vsel %vm4876_vm13, %v7964_v26, %v4873_v25  ;;  %v7596_v54 = vld [vmem:[%s9986_s6 + $0x74] sm:$0xf] }
0x1e84   : > { %v4843_v12 = vmul.f32 %v4842_v56, %v4818_v7  ;;  %v4882_v39 = vsel %vm4879_vm14, %v4881_v31, %v4877_v33  ;;  %v7231_v56 = vor.u32 %v7596_v54, %v7228_v8  ;;  %v7591_v31 = vld [vmem:[%s9986_s6 + $0x44] sm:$0xf0] }
0x1e85   : > { %v4883_v14 = vmul.f32 %v4882_v39, %v4858_v5  ;;  %v7202_v5 = vld [vmem:[%s9986_s6 + $0x40] sm:$0xf]  ;;  %v7204_v39 = vld [vmem:[%s9986_s6 + $0x48] sm:$0xf0] }
0x1e86   : > { %v7123_v9 = vclamps-f32 %v4843_v12, 1.0  ;;  %5196 = vmatpush.bf16.msra.mxu1 %v7231_v56  ;;  %v7218_v12 = vld [vmem:[%s9986_s6 + $0x60] sm:$0xf]  ;;  %v7203_v33 = vor.u32 %v7591_v31, %v7202_v5  ;;  %v8031_v5 = vld [vmem:[%s9987_s5 + $0x8] sm:$0xff] }
0x1e87   : > { %v7124_v44 = vclamps-f32 %v4883_v14, 1.0  ;;  %v7219_v57 = vor.u32 %v7595_v19, %v7218_v12  ;;  %v8025_v14 = vld [vmem:[%s9991_s7 + $0x18] sm:$0xff] }
0x1e88   : > { %v4888_v6 = vadd.f32 1.0, %v7123_v9  ;;  %v7593_v9 = vld [vmem:[%s9986_s6 + $0x54] sm:$0xf0] }
0x1e89   : > { %v4889_v45 = vadd.f32 1.0, %v7124_v44  ;;  %5183 = vmatpush.bf16.msra.mxu0 %v7219_v57  ;;  %v7211_v43 = vor.u32 %v7593_v9, %v7210_v11 }
0x1e8a   : > { %v4892_v16 = vmul.f32 %v4888_v6, %v4720_v50  ;;  %5197 = vmatpush.bf16.msra.mxu1 %v7223_v24  ;;  %v7212_v50 = vld [vmem:[%s9986_s6 + $0x58] sm:$0xf0] }
0x1e8b   : > { %v4893_v28 = vmul.f32 %v4889_v45, %v4721_v0  ;;  %v7215_v25 = vor.u32 %v7592_v40, %v7212_v50 }
0x1e8c   : > { %v4926_v48 = vpack.c.bf16 %v4892_v16, %v4890_v60  ;;  %v7590_v60 = vld [vmem:[%s9986_s6 + $0x44] sm:$0xf] }
0x1e8d   : > { %v4927_v46 = vpack.c.bf16 %v4893_v28, %v4891_v36  ;;  %5184 = vmatpush.bf16.msra.mxu0 %v7211_v43  ;;  %v8029_v43 = vld [vmem:[%s9993_s9] sm:$0xff] }
0x1e8e   : > { %5032 = vmatmul.bf16.vlgmr.msra.gmra.mxu2 %v4926_v48  ;;  %5198 = vmatpush.bf16.msra.mxu1 %v7215_v25  ;;  %v7207_v48 = vor.u32 %v7590_v60, %v7204_v39  ;;  %v8030_v25 = vld [vmem:[%s9987_s5] sm:$0xff]  ;;  %v8032_v60 = vld [vmem:[%s9993_s9 + $0x8] sm:$0xff] }
0x1e8f   : > { %5046 = vmatmul.bf16.vlgmr.msrb.gmra.mxu3 %v4927_v46  ;;  %v8027_v46 = vld [vmem:[%s9991_s7 + $0x8] sm:$0xff] }
0x1e91   : > { %5185 = vmatpush.bf16.msra.mxu0 %v7203_v33 }
0x1e92   : > { %5199 = vmatpush.bf16.msra.mxu1 %v7207_v48 }
0x1e95   : > { %5216 = vmatpush.bf16.msrb.mxu0 %v8025_v14 }
0x1e96   : > { %5242 = vmatpush.bf16.msrb.mxu1 %v8025_v14 }
0x1e99   : > { %5217 = vmatpush.bf16.msrb.mxu0 %v8026_v20 }
0x1e9a   : > { %5243 = vmatpush.bf16.msrb.mxu1 %v8026_v20 }
0x1e9d   : > { %5218 = vmatpush.bf16.msrb.mxu0 %v8027_v46 }
0x1e9e   : > { %5244 = vmatpush.bf16.msrb.mxu1 %v8027_v46 }
0x1f11   : > { %v5033_v37 = vpop.f32.mrf.mxu2 }
0x1f12   : > { %v5047_v38 = vpop.f32.mrf.mxu3 }
0x1f13   : > { %v5048_v30 = vadd.f32 %v5047_v38, %v5033_v37 }
0x1f15   : > { %v5052_v34 = vadd.f32 %v5048_v30, %v9302_v47  ;;  %v8028_v30 = vld [vmem:[%s9991_s7] sm:$0xff] }
0x1f16   : > { %5219 = vmatpush.bf16.msrb.mxu0 %v8028_v30  ;;  %5245 = vmatpush.bf16.msrb.mxu1 %v8028_v30 }
0x1f17   : > { %v9486_v51 = vadd.f32 %v7802_v49, %v5052_v34 }
0x1f19   : > { %v5035_v59 = vpop.f32.mrf.mxu2  ;;  %v5064_v3 = vsel %vm1625_vm0, %v9486_v51, 0.0 }
0x1f1a   : > { %v5049_v18 = vpop.f32.mrf.mxu3  ;;  %5065 = vadd.xlane.f32.xlu1 %v5064_v3 }
0x1f1b   : > { %v5050_v10 = vadd.f32 %v5049_v18, %v5035_v59 }
0x1f1d   : > { %v5053_v21 = vadd.f32 %v5050_v10, %v9307_v27 }
0x1f1f   : > { %v9491_v42 = vadd.f32 %v7802_v49, %v5053_v21 }
0x1f21   : > { %v5067_v61 = vsel %vm1625_vm0, %v9491_v42, 0.0 }
0x1f22   : > { %5068 = vadd.xlane.f32.xlu2 %v5067_v61  ;;  %v7803_v61 = vld [vmem:[%s9989_s15 + $0x1] ss:$0 sm:$0xff] }
0x1f8d   : > { %v5066_v47 = vpop.xlane.xlu1 %5065 }
0x1f8e   : > { %v5070_v41 = vmul.f32 %v5066_v47, %v8497_v35 }
0x1f90   : > { %v9497_v22 = vsub.f32 %v9486_v51, %v5070_v41 }
0x1f92   : > { %v5074_v29 = vmul.f32 %v9497_v22, %v9497_v22 }
0x1f94   : > { %v5076_v27 = vsel %vm1625_vm0, %v5074_v29, 0.0 }
0x1f95   : > { %5077 = vadd.xlane.f32.xlu0 %v5076_v27  ;;  %v5069_v13 = vpop.xlane.xlu2 %5068  ;;  %v7804_v27 = vld [vmem:[%s9990_s3 + $0x1] ss:$0 sm:$0xff] }
0x1f96   : > { %v5071_v26 = vmul.f32 %v5069_v13, %v8497_v35 }
0x1f98   : > { %v9504_v7 = vsub.f32 %v9491_v42, %v5071_v26 }
0x1f9a   : > { %v5075_v62 = vmul.f32 %v9504_v7, %v9504_v7 }
0x1f9c   : > { %v5079_v32 = vsel %vm1625_vm0, %v5075_v62, 0.0 }
0x1f9d   : > { %5080 = vadd.xlane.f32.xlu1 %v5079_v32 }
0x2008   : > { %v5078_v6 = vpop.xlane.xlu0 %5077 }
0x2009   : > { %v5082_v1 = vmul.f32 %v5078_v6, %v8497_v35 }
0x200b   : > { %v5084_v16 = vadd.f32 1e-06, %v5082_v1 }
0x200d   : > { %7965 = vrsqrt.f32 %v5084_v16  ;;  %vm5092_vm1 = vweird.f32 %v5084_v16 }
0x2010   : > { %v5081_v4 = vpop.xlane.xlu1 %5080 }
0x2011   : > { %v5083_v44 = vmul.f32 %v5081_v4, %v8497_v35 }
0x2013   : > { %v7966_v0 = vpop.eup %7965  ;;  %v5085_v45 = vadd.f32 1e-06, %v5083_v44 }
0x2014   : > { %v5087_v36 = vmul.f32 %v7966_v0, %v5084_v16  ;;  %vm5093_vm15 = vweird.f32 %v7966_v0 }
0x2015   : > { %7967 = vrsqrt.f32 %v5085_v45  ;;  %vm5094_vm2 = vmor %vm5092_vm1, %vm5093_vm15  ;;  %vm5102_vm5 = vweird.f32 %v5085_v45 }
0x2016   : > { %v5088_v28 = vmul.f32 %v7966_v0, %v5087_v36 }
0x2018   : > { %v5089_v37 = vmul.f32 0.5, %v5088_v28 }
0x201a   : > { %v5090_v38 = vsub.f32 1.5, %v5089_v37 }
0x201b   : > { %v7968_v49 = vpop.eup %7967 }
0x201c   : > { %v5091_v34 = vmul.f32 %v7966_v0, %v5090_v38  ;;  %v5097_v59 = vmul.f32 %v7968_v49, %v5085_v45  ;;  %vm5103_vm3 = vweird.f32 %v7968_v49 }
0x201d   : > { %vm5104_vm6 = vmor %vm5102_vm5, %vm5103_vm3 }
0x201e   : > { %v5098_v3 = vmul.f32 %v7968_v49, %v5097_v59  ;;  %v5095_v18 = vsel %vm5094_vm2, %v7966_v0, %v5091_v34 }
0x201f   : > { %v5106_v47 = vmul.f32 %v5095_v18, %v9497_v22  ;;  %v7199_v22 = vld [vmem:[%s9992_s8 + $0x2] sm:$0x3] }
0x2020   : > { %v5099_v10 = vmul.f32 0.5, %v5098_v3  ;;  %v5131_v8 = vperm.slane %v7199_v22, 0  ;;  %v5132_v56 = vperm.slane %v7199_v22, 1 }
0x2021   : > { %v5111_v13 = vmul.f32 %v7803_v61, %v5106_v47 }
0x2022   : > { %v5100_v21 = vsub.f32 1.5, %v5099_v10 }
0x2023   : > { %v5116_v32 = vadd.f32 %v7804_v27, %v5111_v13 }
0x2024   : > { %v5101_v41 = vmul.f32 %v7968_v49, %v5100_v21 }
0x2026   : > { %v5105_v29 = vsel %vm5104_vm6, %v7968_v49, %v5101_v41 }
0x2027   : > { %v5107_v26 = vmul.f32 %v5105_v29, %v9504_v7 }
0x2029   : > { %v5112_v62 = vmul.f32 %v7803_v61, %v5107_v26 }
0x202b   : > { %v5117_v53 = vadd.f32 %v7804_v27, %v5112_v62 }
0x202d   : > { %v5127_v2 = vpack.c.bf16 %v5117_v53, %v5116_v32 }
0x202f   : > { %7232 = vmatmul.msk.bf16.vlgmr.msra.gmra.mxu0 %vm1625_vm0, %v5127_v2  ;;  %7233 = vmatmul.msk.bf16.vlgmr.msra.gmra.mxu1 %vm1625_vm0, %v5127_v2 }
0x20ac   : > { %v5187_v54 = vpop.f32.mrf.mxu0  ;;  %v5201_v55 = vpop.f32.mrf.mxu1 }
0x20ad   : > { %v5188_v52 = vadd.f32 %v5187_v54, %v5131_v8  ;;  %v5202_v57 = vadd.f32 %v5201_v55, %v5132_v56 }
0x20af   : > { %v5206_v1 = vmul.f32 %v8030_v25, %v5188_v52  ;;  %v5230_v45 = vmul.f32 %v5188_v52, %v9241_v23 }
0x20b4   : > { %v5189_v12 = vpop.f32.mrf.mxu0  ;;  %v5203_v19 = vpop.f32.mrf.mxu1 }
0x20b5   : > { %v5190_v7 = vadd.f32 %v5189_v12, %v5131_v8  ;;  %v5204_v15 = vadd.f32 %v5203_v19, %v5132_v56 }
0x20b7   : > { %v9538_v24 = vpack.c.bf16 %v5204_v15, %v5202_v57  ;;  %v5208_v11 = vpack.c.bf16 %v5190_v7, %v5188_v52  ;;  %v5207_v31 = vmul.f32 %v8031_v5, %v5190_v7  ;;  %v5231_v36 = vmul.f32 %v5190_v7, %v9243_v17 }
0x20b9   : > { %5325 = vmatpush.bf16.msra.mxu3 %v9538_v24  ;;  %5233 = vrot.lane.b32.xlu2 %v5208_v11, %s9988_s2 }
0x20ba   : > { %7234 = vmatmul.msk.bf16.vlgmr.msrb.gmra.mxu0 %vm1625_vm0, %v5208_v11 }
0x2113   : > { %v5234_v9 = vpop.permute.xlu2 %5233 }
0x2114   : > { %7235 = vmatmul.msk.bf16.vlgmr.msrb.gmra.mxu1 %vm1625_vm0, %v5234_v9 }
0x2137   : > { %v5221_v40 = vpop.f32.mrf.mxu0 }
0x2138   : > { %v5226_v50 = vmul.f32 %v8029_v43, %v5221_v40 }
0x213a   : > { %v5228_v33 = vadd.f32 %v5226_v50, %v5206_v1 }
0x213f   : > { %v5223_v6 = vpop.f32.mrf.mxu0 }
0x2140   : > { %v5227_v16 = vmul.f32 %v8032_v60, %v5223_v6 }
0x2142   : > { %v5229_v39 = vadd.f32 %v5227_v16, %v5207_v31 }
0x2144   : > { %v5264_v48 = vpack.c.bf16 %v5229_v39, %v5228_v33 }
0x2191   : > { %v5247_v14 = vpop.f32.mrf.mxu1 }
0x2192   : > { %v5252_v4 = vmul.f32 %v8029_v43, %v5247_v14 }
0x2194   : > { %5256 = vrot.lane.b32.xlu0 %v5252_v4, %s9988_s2 }
0x2199   : > { %v5249_v44 = vpop.f32.mrf.mxu1 }
0x219a   : > { %v5253_v20 = vmul.f32 %v8032_v60, %v5249_v44 }
0x219c   : > { %5258 = vrot.lane.b32.xlu1 %v5253_v20, %s9988_s2 }
0x21a4   : > { %5333 = vrot.lane.b32.xlu1 %v5264_v48, %s9975_s0 }
0x21ac   : > { %5472 = vrot.lane.b32.xlu1 %v5264_v48, %s9996_s13 }
0x2206   : > { %v5257_v0 = vpop.permute.xlu0 %5256 }
0x2207   : > { %v5262_v46 = vadd.f32 %v5257_v0, %v5230_v45 }
0x220e   : > { %v5259_v28 = vpop.permute.xlu1 %5258 }
0x220f   : > { %v5263_v37 = vadd.f32 %v5259_v28, %v5231_v36 }
0x2211   : > { %v5265_v38 = vpack.c.bf16 %v5263_v37, %v5262_v46 }
0x2213   : > { %5335 = vrot.lane.b32.xlu2 %v5265_v38, %s9994_s10  ;;  %5268 = vrot.lane.b32.xlu0 %v5265_v38, %s9988_s2 }
0x2216   : > { %v5334_v23 = vpop.permute.xlu1 %5333 }
0x221b   : > { %5405 = vrot.lane.b32.xlu0 %v5265_v38, %s9995_s12  ;;  %5403 = vrot.lane.b32.xlu2 %v5264_v48, %s9973_s22 }
0x221e   : > { %v5473_v21 = vpop.permute.xlu1 %5472 }
0x2223   : > { %5474 = vrot.lane.b32.xlu0 %v5265_v38, %s9974_s1 }
0x226d   : > { %v5336_v30 = vpop.permute.xlu2 %5335 }
0x226e   : > { %v5341_v49 = vsel %vm1902_vm8, %v5336_v30, 0 }
0x226f   : > { %5350 = vmatpush.bf16.xpose.msra.mxu0 %v5341_v49 }
0x2275   : > { %v5404_v61 = vpop.permute.xlu2 %5403 }
0x2276   : > { %7238 = vmatmul.msk.bf16.vlgmr.msra.gmra.mxu0 %vm1902_vm8, %v5334_v23 }
0x2285   : > { %v5269_v17 = vpop.permute.xlu0 %5268 }
0x2286   : > { %v5274_v34 = vsel %vm1902_vm8, %v5269_v17, 0 }
0x2287   : > { %5283 = vmatpush.bf16.xpose.msrb.mxu2 %v5274_v34 }
0x228d   : > { %v5406_v59 = vpop.permute.xlu0 %5405 }
0x228e   : > { %v5411_v3 = vsel %vm1902_vm8, %v5406_v59, 0  ;;  %7236 = vmatmul.msk.bf16.vlgmr.msrb.gmra.mxu2 %vm1902_vm8, %v5264_v48 }
0x228f   : > { %5420 = vmatpush.bf16.xpose.msra.mxu2 %v5411_v3 }
0x2295   : > { %v5475_v18 = vpop.permute.xlu0 %5474 }
0x2296   : > { %v5480_v10 = vsel %vm1902_vm8, %v5475_v18, 0 }
0x2297   : > { %5489 = vmatpush.bf16.xpose.msrb.mxu0 %v5480_v10 }
0x229e   : > { %7240 = vmatmul.msk.bf16.vlgmr.msra.gmra.mxu2 %vm1902_vm8, %v5404_v61  ;;  %7242 = vmatmul.msk.bf16.vlgmr.msrb.gmra.mxu0 %vm1902_vm8, %v5473_v21 }
0x22f3   : > { %v5352_v47 = vpop.f32.mrf.mxu0 }
0x22f4   : > { %v5357_v41 = vmul.f32 0.25, %v5352_v47 }
0x22f6   : > { %v5359_v29 = vsel %vm1902_vm8, %v5357_v41, -inf }
0x22f7   : > { %5360 = vmax.xlane.f32.xlu1 %v5359_v29 }
0x22fb   : > { %v5354_v26 = vpop.f32.mrf.mxu0 }
0x22fc   : > { %v5358_v32 = vmul.f32 0.25, %v5354_v26 }
0x22fe   : > { %v5362_v55 = vsel %vm1902_vm8, %v5358_v32, -inf }
0x2311   : > { %v5285_v27 = vpop.f32.mrf.mxu2 }
0x2312   : > { %v5290_v13 = vmul.f32 0.25, %v5285_v27 }
0x2314   : > { %v5292_v62 = vsel %vm1902_vm8, %v5290_v13, -inf }
0x2315   : > { %5293 = vmax.xlane.f32.xlu2 %v5292_v62 }
0x2319   : > { %v5287_v53 = vpop.f32.mrf.mxu2 }
0x231a   : > { %v5291_v2 = vmul.f32 0.25, %v5287_v53 }
0x231b   : > { %v5491_v54 = vpop.f32.mrf.mxu0 }
0x231c   : > { %v5295_v22 = vsel %vm1902_vm8, %v5291_v2, -inf  ;;  %v5496_v8 = vmul.f32 0.25, %v5491_v54 }
0x231d   : > { %5363 = vmax.xlane.f32.xlu2 %v5362_v55  ;;  %5296 = vmax.xlane.f32.xlu0 %v5295_v22 }
0x231e   : > { %v5498_v19 = vsel %vm1902_vm8, %v5496_v8, -inf }
0x2321   : > { %v5422_v56 = vpop.f32.mrf.mxu2 }
0x2322   : > { %v5427_v12 = vmul.f32 0.25, %v5422_v56 }
0x2323   : > { %v5493_v57 = vpop.f32.mrf.mxu0 }
0x2324   : > { %v5429_v52 = vsel %vm1902_vm8, %v5427_v12, -inf  ;;  %v5497_v7 = vmul.f32 0.25, %v5493_v57 }
0x2325   : > { %5499 = vmax.xlane.f32.xlu2 %v5498_v19  ;;  %5430 = vmax.xlane.f32.xlu0 %v5429_v52 }
0x2326   : > { %v5501_v40 = vsel %vm1902_vm8, %v5497_v7, -inf }
0x2329   : > { %v5424_v15 = vpop.f32.mrf.mxu2 }
0x232a   : > { %v5428_v11 = vmul.f32 0.25, %v5424_v15 }
0x232c   : > { %v5432_v9 = vsel %vm1902_vm8, %v5428_v11, -inf }
0x232d   : > { %5433 = vmax.xlane.f32.xlu1 %v5432_v9  ;;  %5502 = vmax.xlane.f32.xlu0 %v5501_v40 }
0x236a   : > { %v5361_v43 = vpop.xlane.xlu1 %5360 }
0x236b   : > { %v5365_v50 = vsub.f32 %v5357_v41, %v5361_v43 }
0x236d   : > { %v5367_v6 = vmul.f32 1.442695, %v5365_v50 }
0x236f   : > { %7969 = vpow2.f32 %v5367_v6 }
0x2375   : > { %v9575_v25 = vpop.eup %7969 }
0x2376   : > { %v5371_v1 = vsel %vm1902_vm8, %v9575_v25, 0.0 }
0x2377   : > { %5372 = vadd.xlane.f32.xlu0 %v5371_v1 }
0x2388   : > { %v5294_v5 = vpop.xlane.xlu2 %5293 }
0x2389   : > { %v5298_v31 = vsub.f32 %v5290_v13, %v5294_v5 }
0x238b   : > { %v5300_v60 = vmul.f32 1.442695, %v5298_v31 }
0x238d   : > { %7971 = vpow2.f32 %v5300_v60 }
0x2390   : > { %v5364_v16 = vpop.xlane.xlu2 %5363  ;;  %v5297_v33 = vpop.xlane.xlu0 %5296 }
0x2391   : > { %v5366_v39 = vsub.f32 %v5358_v32, %v5364_v16  ;;  %v5299_v48 = vsub.f32 %v5291_v2, %v5297_v33 }
0x2393   : > { %v7972_v14 = vpop.eup %7971  ;;  %v5369_v4 = vmul.f32 1.442695, %v5366_v39  ;;  %v5302_v44 = vmul.f32 1.442695, %v5299_v48 }
0x2394   : > { %v5304_v20 = vsel %vm1902_vm8, %v7972_v14, 0.0 }
0x2395   : > { %7973 = vpow2.f32 %v5369_v4  ;;  %5305 = vadd.xlane.f32.xlu1 %v5304_v20 }
0x2396   : > { %7975 = vpow2.f32 %v5302_v44 }
0x2398   : > { %v5500_v0 = vpop.xlane.xlu2 %5499  ;;  %v5431_v45 = vpop.xlane.xlu0 %5430 }
0x2399   : > { %v5504_v36 = vsub.f32 %v5496_v8, %v5500_v0  ;;  %v5435_v37 = vsub.f32 %v5427_v12, %v5431_v45 }
0x239b   : > { %v7974_v28 = vpop.eup %7973  ;;  %v5506_v46 = vmul.f32 1.442695, %v5504_v36  ;;  %v5437_v23 = vmul.f32 1.442695, %v5435_v37 }
0x239c   : > { %v7976_v38 = vpop.eup %7975  ;;  %v5374_v30 = vsel %vm1902_vm8, %v7974_v28, 0.0 }
0x239d   : > { %7977 = vpow2.f32 %v5506_v46  ;;  %5375 = vadd.xlane.f32.xlu1 %v5374_v30  ;;  %v5307_v49 = vsel %vm1902_vm8, %v7976_v38, 0.0  ;;  %v7601_v30 = vld [vmem:[%s9997_s14 + $0x38] sm:$0xff] }
0x239e   : > { %5308 = vadd.xlane.f32.xlu2 %v5307_v49  ;;  %7979 = vpow2.f32 %v5437_v23  ;;  %5612 = vmatpush.bf16.msrb.mxu2 %v7601_v30  ;;  %v7600_v49 = vld [vmem:[%s9997_s14 + $0x30] sm:$0xff]  ;;  %v7599_v23 = vld [vmem:[%s9997_s14 + $0x28] sm:$0xff]  ;;  %v7602_v30 = vld [vmem:[%s9999_s17 + $0x44] sm:$0xf] }
0x23a0   : > { %v5503_v17 = vpop.xlane.xlu0 %5502  ;;  %v5434_v34 = vpop.xlane.xlu1 %5433 }
0x23a1   : > { %v5505_v59 = vsub.f32 %v5497_v7, %v5503_v17  ;;  %v5436_v10 = vsub.f32 %v5428_v11, %v5434_v34  ;;  %v7598_v17 = vld [vmem:[%s9997_s14 + $0x20] sm:$0xff] }
0x23a2   : > { %5613 = vmatpush.bf16.msrb.mxu2 %v7600_v49 }
0x23a3   : > { %v7978_v3 = vpop.eup %7977  ;;  %v5508_v18 = vmul.f32 1.442695, %v5505_v59  ;;  %v5439_v61 = vmul.f32 1.442695, %v5436_v10 }
0x23a4   : > { %v5510_v21 = vsel %vm1902_vm8, %v7978_v3, 0.0  ;;  %v7980_v47 = vpop.eup %7979 }
0x23a5   : > { %5511 = vadd.xlane.f32.xlu0 %v5510_v21  ;;  %7981 = vpow2.f32 %v5508_v18  ;;  %v5441_v29 = vsel %vm1902_vm8, %v7980_v47, 0.0 }
0x23a6   : > { %7983 = vpow2.f32 %v5439_v61  ;;  %5614 = vmatpush.bf16.msrb.mxu2 %v7599_v23 }
0x23aa   : > { %5615 = vmatpush.bf16.msrb.mxu2 %v7598_v17  ;;  %v7285_v17 = vld [vmem:[%s9999_s17 + $0x48] sm:$0xf0] }
0x23ab   : > { %v7982_v41 = vpop.eup %7981 }
0x23ac   : > { %v5513_v27 = vsel %vm1902_vm8, %v7982_v41, 0.0  ;;  %v7984_v13 = vpop.eup %7983 }
0x23ad   : > { %5442 = vadd.xlane.f32.xlu0 %v5441_v29  ;;  %5514 = vadd.xlane.f32.xlu1 %v5513_v27  ;;  %v5444_v26 = vsel %vm1902_vm8, %v7984_v13, 0.0 }
0x23b5   : > { %5445 = vadd.xlane.f32.xlu1 %v5444_v26 }
0x23b6   : > { %5383 = vrot.lane.b32.xlu2 %v9538_v24, %s9975_s0  ;;  %s9813_s0 = scalar_lea.vmem %s8406_s4, %s9137_s11  ;;  %s10012_s11 = sshll.u32 %s10015_s26, 5 }
0x23c1   : > { %5452 = vrot.lane.b32.xlu0 %v9538_v24, %s9973_s22 }
0x23ce   : > { %5521 = vrot.lane.b32.xlu1 %v9538_v24, %s9996_s13  ;;  %s10009_s13 = smov 120  }
0x23ea   : > { %v5373_v32 = vpop.xlane.xlu0 %5372 }
0x23eb   : > { %7985 = vrcp.f32 %v5373_v32 }
0x23f1   : > { %v7986_v54 = vpop.eup %7985 }
0x23f2   : > { %v5379_v56 = vmul.f32 %v7986_v54, %v9575_v25 }
0x2408   : > { %v5306_v62 = vpop.xlane.xlu1 %5305 }
0x2409   : > { %7987 = vrcp.f32 %v5306_v62 }
0x240f   : > { %v7988_v55 = vpop.eup %7987 }
0x2410   : > { %v5376_v53 = vpop.xlane.xlu1 %5375  ;;  %v5312_v19 = vmul.f32 %v7988_v55, %v7972_v14 }
0x2411   : > { %7989 = vrcp.f32 %v5376_v53  ;;  %v5309_v2 = vpop.xlane.xlu2 %5308 }
0x2412   : > { %7991 = vrcp.f32 %v5309_v2  ;;  %v7805_v2 = vld [vmem:[%s9998_s16 + $0x1] ss:$0 sm:$0xff] }
0x2417   : > { %v7990_v22 = vpop.eup %7989 }
0x2418   : > { %v7992_v8 = vpop.eup %7991  ;;  %v5380_v12 = vmul.f32 %v7990_v22, %v7974_v28  ;;  %v5512_v15 = vpop.xlane.xlu0 %5511 }
0x2419   : > { %v5313_v52 = vmul.f32 %v7992_v8, %v7976_v38  ;;  %v5384_v57 = vpop.permute.xlu2 %5383 }
0x241a   : > { %v5381_v7 = vpack.c.bf16 %v5380_v12, %v5379_v56  ;;  %5396 = vmatpush.bf16.msra.mxu1 %v5384_v57 }
0x241b   : > { %v5314_v24 = vpack.c.bf16 %v5313_v52, %v5312_v19 }
0x241d   : > { %7237 = vmatmul.msk.bf16.vlgmr.msra.gmra.mxu3 %vm1902_vm8, %v5314_v24  ;;  %7239 = vmatmul.msk.bf16.vlgmr.msra.gmra.mxu1 %vm1902_vm8, %v5381_v7 }
0x2420   : > { %v5515_v11 = vpop.xlane.xlu1 %5514  ;;  %v5443_v9 = vpop.xlane.xlu0 %5442 }
0x2421   : > { %7993 = vrcp.f32 %v5443_v9 }
0x2427   : > { %v7994_v43 = vpop.eup %7993 }
0x2428   : > { %v5446_v40 = vpop.xlane.xlu1 %5445  ;;  %v5449_v25 = vmul.f32 %v7994_v43, %v7980_v47 }
0x2429   : > { %7995 = vrcp.f32 %v5446_v40 }
0x242a   : > { %7997 = vrcp.f32 %v5515_v11 }
0x242b   : > { %7999 = vrcp.f32 %v5512_v15 }
0x242f   : > { %v7996_v50 = vpop.eup %7995 }
0x2430   : > { %v5450_v6 = vmul.f32 %v7996_v50, %v7984_v13  ;;  %v7998_v31 = vpop.eup %7997  ;;  %v7307_v50 = vld [vmem:[%s9999_s17 + $0x70] sm:$0xf] }
0x2431   : > { %v8000_v60 = vpop.eup %7999  ;;  %v5519_v16 = vmul.f32 %v7998_v31, %v7982_v41 }
0x2432   : > { %v5451_v5 = vpack.c.bf16 %v5450_v6, %v5449_v25  ;;  %v5518_v33 = vmul.f32 %v8000_v60, %v7978_v3  ;;  %v7609_v6 = vld [vmem:[%s9999_s17 + $0x74] sm:$0xf0]  ;;  %v7608_v25 = vld [vmem:[%s9999_s17 + $0x74] sm:$0xf]  ;;  %v7299_v60 = vld [vmem:[%s9999_s17 + $0x60] sm:$0xf] }
0x2433   : > { %v5453_v1 = vpop.permute.xlu0 %5452 }
0x2434   : > { %5465 = vmatpush.bf16.msrb.mxu3 %v5453_v1  ;;  %v5520_v48 = vpack.c.bf16 %v5519_v16, %v5518_v33  ;;  %v7308_v1 = vor.u32 %v7609_v6, %v7307_v50  ;;  %v7607_v16 = vld [vmem:[%s9999_s17 + $0x64] sm:$0xf0]  ;;  %v7606_v33 = vld [vmem:[%s9999_s17 + $0x64] sm:$0xf] }
0x2437   : > { %7241 = vmatmul.msk.bf16.vlgmr.msrb.gmra.mxu3 %vm1902_vm8, %v5451_v5  ;;  %v7309_v5 = vld [vmem:[%s9999_s17 + $0x78] sm:$0xf0] }
0x2438   : > { %v7312_v31 = vor.u32 %v7608_v25, %v7309_v5  ;;  %5753 = vmatpush.bf16.msra.mxu3 %v7308_v1  ;;  %v7625_v5 = vld [vmem:[%s10003_s21 + $0xf8] sm:$0xff] }
0x2439   : > { %6098 = vmatpush.bf16.msra.mxu2 %v7625_v5 }
0x243a   : > { %5767 = vmatpush.bf16.msra.mxu0 %v7312_v31 }
0x2440   : > { %v5522_v39 = vpop.permute.xlu1 %5521 }
0x2441   : > { %5534 = vmatpush.bf16.msrb.mxu1 %v5522_v39  ;;  %v7300_v39 = vor.u32 %v7607_v16, %v7299_v60 }
0x2443   : > { %5754 = vmatpush.bf16.msra.mxu3 %v7300_v39 }
0x2444   : > { %7243 = vmatmul.msk.bf16.vlgmr.msrb.gmra.mxu1 %vm1902_vm8, %v5520_v48  ;;  %v7301_v48 = vld [vmem:[%s9999_s17 + $0x68] sm:$0xf0] }
0x249a   : > { %v5398_v14 = vpop.f32.mrf.mxu1 }
0x24a0   : > { %v5327_v20 = vpop.f32.mrf.mxu3 }
0x24a2   : > { %v5400_v4 = vpop.f32.mrf.mxu1 }
0x24a3   : > { %v7765_v44 = vpack.i.bf16 %v5400_v4, %v5398_v14  ;;  %v7304_v14 = vor.u32 %v7606_v33, %v7301_v48  ;;  %v7291_v4 = vld [vmem:[%s9999_s17 + $0x50] sm:$0xf] }
0x24a5   : > { %7766 = vrot.lane.b32.xlu2 %v7765_v44, %s9974_s1  ;;  %5768 = vmatpush.bf16.msra.mxu0 %v7304_v14  ;;  %v7605_v44 = vld [vmem:[%s9999_s17 + $0x54] sm:$0xf0]  ;;  %v7624_v14 = vld [vmem:[%s10003_s21 + $0xf0] sm:$0xff]  ;;  %s10011_s1 = sld [smem:[#allocation48_spill]] }
0x24a6   : > { %6099 = vmatpush.bf16.msra.mxu2 %v7624_v14 }
0x24a8   : > { %v5329_v0 = vpop.f32.mrf.mxu3 }
0x24ba   : > { %v5467_v45 = vpop.f32.mrf.mxu3 }
0x24c1   : > { %v5536_v36 = vpop.f32.mrf.mxu1 }
0x24c2   : > { %v5469_v28 = vpop.f32.mrf.mxu3 }
0x24c3   : > { %v7770_v46 = vpack.i.bf16 %v5469_v28, %v5467_v45  ;;  %v7293_v45 = vld [vmem:[%s9999_s17 + $0x58] sm:$0xf0] }
0x24c5   : > { %7771 = vrot.lane.b32.xlu2 %v7770_v46, %s9995_s12  ;;  %s10010_s12 = sld [smem:[#allocation47_spill]] }
0x24c9   : > { %v5538_v37 = vpop.f32.mrf.mxu1 }
0x24ca   : > { %v7775_v38 = vpack.i.bf16 %v5538_v37, %v5536_v36  ;;  %v7283_v37 = vld [vmem:[%s9999_s17 + $0x40] sm:$0xf] }
0x24cd   : > { %7776 = vrot.lane.b32.xlu2 %v7775_v38, %s9994_s10  ;;  %v7603_v38 = vld [vmem:[%s9999_s17 + $0x44] sm:$0xf0]  ;;  %s1478_s10 = scalar_lea.vmem %s8396_s27, %s10012_s11 }
0x24ce   : > { %v7284_v23 = vor.u32 %v7603_v38, %v7283_v37 }
0x24ff   : > { %v7767_v34 = vpop.permute.xlu2 %7766 }
0x2500   : > { %v7769_v3 = vunpack.i.h.bf16 %v7767_v34  ;;  %v7768_v18 = vunpack.i.l.bf16 %v7767_v34  ;;  %v7288_v34 = vor.u32 %v7602_v30, %v7285_v17  ;;  %v7623_v30 = vld [vmem:[%s10003_s21 + $0xe8] sm:$0xff] }
0x2501   : > { %6100 = vmatpush.bf16.msra.mxu2 %v7623_v30 }
0x2502   : > { %v5566_v47 = vsel %vm1902_vm8, %v5329_v0, %v7769_v3  ;;  %v5565_v41 = vsel %vm1902_vm8, %v5327_v20, %v7768_v18  ;;  %v7604_v20 = vld [vmem:[%s9999_s17 + $0x54] sm:$0xf]  ;;  %v7292_v0 = vor.u32 %v7605_v44, %v7291_v4 }
0x2503   : > { %v7296_v28 = vor.u32 %v7604_v20, %v7293_v45  ;;  %v7617_v45 = vld [vmem:[%s10003_s21 + $0xb8] sm:$0xff] }
0x2504   : > { %5755 = vmatpush.bf16.msra.mxu3 %v7292_v0  ;;  %6084 = vmatpush.bf16.msra.mxu1 %v7617_v45 }
0x2505   : > { %5769 = vmatpush.bf16.msra.mxu0 %v7296_v28 }
0x2508   : > { %5756 = vmatpush.bf16.msra.mxu3 %v7284_v23 }
0x2509   : > { %5770 = vmatpush.bf16.msra.mxu0 %v7288_v34 }
0x251f   : > { %v7772_v59 = vpop.permute.xlu2 %7771 }
0x2520   : > { %v7774_v10 = vunpack.i.h.bf16 %v7772_v59  ;;  %v7773_v21 = vunpack.i.l.bf16 %v7772_v59 }
0x2522   : > { %v5568_v13 = vsel %vm2200_vm9, %v5566_v47, %v7774_v10  ;;  %v5567_v26 = vsel %vm2200_vm9, %v5565_v41, %v7773_v21 }
0x2527   : > { %v7777_v61 = vpop.permute.xlu2 %7776 }
0x2528   : > { %v7779_v29 = vunpack.i.h.bf16 %v7777_v61  ;;  %v7778_v27 = vunpack.i.l.bf16 %v7777_v61 }
0x252a   : > { %v5569_v62 = vsel %vm2203_vm10, %v5567_v26, %v7778_v27  ;;  %v5570_v32 = vsel %vm2203_vm10, %v5568_v13, %v7779_v29 }
0x252b   : > { %v5580_v53 = vpack.c.bf16 %v5570_v32, %v5569_v62 }
0x252d   : > { %7268 = vmatmul.msk.bf16.vlgmr.msrb.gmra.mxu2 %vm1625_vm0, %v5580_v53 }
0x25b0   : > { %v5617_v54 = vpop.f32.mrf.mxu2 }
0x25b1   : > { %v5622_v55 = vadd.f32 %v5617_v54, %v9486_v51 }
0x25b3   : > { %v9613_v22 = vadd.f32 %v7805_v2, %v5622_v55 }
0x25b5   : > { %v5635_v8 = vsel %vm1625_vm0, %v9613_v22, 0.0 }
0x25b6   : > { %5636 = vadd.xlane.f32.xlu0 %v5635_v8 }
0x25b8   : > { %v5619_v56 = vpop.f32.mrf.mxu2 }
0x25b9   : > { %v5623_v12 = vadd.f32 %v5619_v56, %v9491_v42  ;;  %v7807_v56 = vld [vmem:[%s10001_s19 + $0x1] ss:$0 sm:$0xff] }
0x25bb   : > { %v9618_v19 = vadd.f32 %v7805_v2, %v5623_v12  ;;  %v7806_v2 = vld [vmem:[%s10000_s18 + $0x1] ss:$0 sm:$0xff] }
0x25bd   : > { %v5638_v52 = vsel %vm1625_vm0, %v9618_v19, 0.0 }
0x25be   : > { %5639 = vadd.xlane.f32.xlu2 %v5638_v52 }
0x2629   : > { %v5637_v57 = vpop.xlane.xlu0 %5636 }
0x262a   : > { %v5641_v51 = vmul.f32 %v5637_v57, %v8497_v35 }
0x262c   : > { %v9624_v7 = vsub.f32 %v9613_v22, %v5641_v51 }
0x262e   : > { %v5645_v24 = vmul.f32 %v9624_v7, %v9624_v7 }
0x2630   : > { %v5647_v42 = vsel %vm1625_vm0, %v5645_v24, 0.0 }
0x2631   : > { %5648 = vadd.xlane.f32.xlu1 %v5647_v42  ;;  %v5640_v15 = vpop.xlane.xlu2 %5639 }
0x2632   : > { %v5642_v11 = vmul.f32 %v5640_v15, %v8497_v35  ;;  %v7280_v15 = vld [vmem:[%s10002_s20 + $0x2] sm:$0x3] }
0x2633   : > { %v5702_v50 = vperm.slane %v7280_v15, 0 }
0x2634   : > { %v9631_v9 = vsub.f32 %v9618_v19, %v5642_v11  ;;  %v5703_v11 = vperm.slane %v7280_v15, 1 }
0x2636   : > { %v5646_v40 = vmul.f32 %v9631_v9, %v9631_v9 }
0x2638   : > { %v5650_v43 = vsel %vm1625_vm0, %v5646_v40, 0.0 }
0x2639   : > { %5651 = vadd.xlane.f32.xlu0 %v5650_v43 }
0x26a4   : > { %v5649_v36 = vpop.xlane.xlu1 %5648 }
0x26a5   : > { %v5653_v46 = vmul.f32 %v5649_v36, %v8497_v35 }
0x26a7   : > { %v5655_v49 = vadd.f32 1e-06, %v5653_v46 }
0x26a9   : > { %8001 = vrsqrt.f32 %v5655_v49  ;;  %vm5663_vm9 = vweird.f32 %v5655_v49 }
0x26ac   : > { %v5652_v59 = vpop.xlane.xlu0 %5651 }
0x26ad   : > { %v5654_v3 = vmul.f32 %v5652_v59, %v8497_v35 }
0x26af   : > { %v8002_v18 = vpop.eup %8001  ;;  %v5656_v10 = vadd.f32 1e-06, %v5654_v3  ;;  %v7616_v3 = vld [vmem:[%s10003_s21 + $0xb0] sm:$0xff] }
0x26b0   : > { %v5658_v21 = vmul.f32 %v8002_v18, %v5655_v49  ;;  %vm5664_vm8 = vweird.f32 %v8002_v18  ;;  %6085 = vmatpush.bf16.msra.mxu1 %v7616_v3 }
0x26b1   : > { %8003 = vrsqrt.f32 %v5656_v10  ;;  %vm5665_vm10 = vmor %vm5663_vm9, %vm5664_vm8  ;;  %vm5673_vm11 = vweird.f32 %v5656_v10 }
0x26b2   : > { %v5659_v61 = vmul.f32 %v8002_v18, %v5658_v21 }
0x26b4   : > { %v5660_v47 = vmul.f32 0.5, %v5659_v61 }
0x26b6   : > { %v5661_v41 = vsub.f32 1.5, %v5660_v47 }
0x26b7   : > { %v8004_v29 = vpop.eup %8003 }
0x26b8   : > { %v5662_v27 = vmul.f32 %v8002_v18, %v5661_v41  ;;  %v5668_v13 = vmul.f32 %v8004_v29, %v5656_v10  ;;  %vm5674_vm7 = vweird.f32 %v8004_v29 }
0x26b9   : > { %vm5675_vm12 = vmor %vm5673_vm11, %vm5674_vm7 }
0x26ba   : > { %v5669_v26 = vmul.f32 %v8004_v29, %v5668_v13  ;;  %v5666_v62 = vsel %vm5665_vm10, %v8002_v18, %v5662_v27  ;;  %v7622_v13 = vld [vmem:[%s10003_s21 + $0xe0] sm:$0xff] }
0x26bb   : > { %v5677_v54 = vmul.f32 %v5666_v62, %v9624_v7  ;;  %6101 = vmatpush.bf16.msra.mxu2 %v7622_v13 }
0x26bc   : > { %v5670_v32 = vmul.f32 0.5, %v5669_v26 }
0x26bd   : > { %v5682_v12 = vmul.f32 %v7806_v2, %v5677_v54 }
0x26be   : > { %v5671_v53 = vsub.f32 1.5, %v5670_v32 }
0x26bf   : > { %v5687_v51 = vadd.f32 %v7807_v56, %v5682_v12 }
0x26c0   : > { %v5672_v55 = vmul.f32 %v8004_v29, %v5671_v53 }
0x26c2   : > { %v5676_v8 = vsel %vm5675_vm12, %v8004_v29, %v5672_v55 }
0x26c3   : > { %v5678_v52 = vmul.f32 %v5676_v8, %v9631_v9 }
0x26c5   : > { %v5683_v57 = vmul.f32 %v7806_v2, %v5678_v52  ;;  %v7615_v2 = vld [vmem:[%s10003_s21 + $0xa8] sm:$0xff] }
0x26c6   : > { %6086 = vmatpush.bf16.msra.mxu1 %v7615_v2  ;;  %v7611_v2 = vld [vmem:[%s10003_s21 + $0x88] sm:$0xff] }
0x26c7   : > { %v5688_v24 = vadd.f32 %v7807_v56, %v5683_v57 }
0x26c9   : > { %v5698_v42 = vpack.c.bf16 %v5688_v24, %v5687_v51  ;;  %v7621_v51 = vld [vmem:[%s10003_s21 + $0xd8] sm:$0xff] }
0x26ca   : > { %6102 = vmatpush.bf16.msra.mxu2 %v7621_v51 }
0x26cb   : > { %7313 = vmatmul.msk.bf16.vlgmr.msra.gmra.mxu3 %vm1625_vm0, %v5698_v42  ;;  %7314 = vmatmul.msk.bf16.vlgmr.msra.gmra.mxu0 %vm1625_vm0, %v5698_v42 }
0x2748   : > { %v5772_v7 = vpop.f32.mrf.mxu0 }
0x2749   : > { %v9661_v40 = vadd.f32 %v5772_v7, %v5703_v11  ;;  %v7614_v7 = vld [vmem:[%s10003_s21 + $0xa0] sm:$0xff] }
0x274a   : > { %6087 = vmatpush.bf16.msra.mxu1 %v7614_v7 }
0x274b   : > { %v9664_v43 = vmul.f32 0.70710677, %v9661_v40 }
0x274d   : > { %v5825_v9 = vmul.f32 %v9664_v43, %v9664_v43 }
0x274e   : > { %v5758_v6 = vpop.f32.mrf.mxu3 }
0x274f   : > { %v9668_v25 = vmin.f32 %v5825_v9, 16.0  ;;  %v9670_v1 = vadd.f32 %v5758_v6, %v5702_v50 }
0x2750   : > { %v5774_v31 = vpop.f32.mrf.mxu0 }
0x2751   : > { %v5827_v60 = vmul.f32 2.1237322e-06, %v9668_v25  ;;  %v5838_v16 = vmul.f32 3.8918573e-05, %v9668_v25  ;;  %v9675_v33 = vadd.f32 %v5774_v31, %v5703_v11  ;;  %v9678_v39 = vmul.f32 0.70710677, %v9670_v1 }
0x2753   : > { %v5839_v48 = vadd.f32 0.001143296, %v5838_v16  ;;  %v5828_v4 = vadd.f32 0.00028619796, %v5827_v60  ;;  %v5785_v44 = vmul.f32 %v9678_v39, %v9678_v39  ;;  %v9684_v20 = vmul.f32 0.70710677, %v9675_v33 }
0x2754   : > { %v7620_v60 = vld [vmem:[%s10003_s21 + $0xd0] sm:$0xff] }
0x2755   : > { %v5840_v0 = vmul.f32 %v5839_v48, %v9668_v25  ;;  %v9688_v36 = vmin.f32 %v5785_v44, 16.0  ;;  %v5905_v28 = vmul.f32 %v9684_v20, %v9684_v20  ;;  %v5829_v49 = vmul.f32 %v5828_v4, %v9668_v25  ;;  %6103 = vmatpush.bf16.msra.mxu2 %v7620_v60 }
0x2756   : > { %v5760_v46 = vpop.f32.mrf.mxu3 }
0x2757   : > { %v5841_v37 = vadd.f32 0.014752088, %v5840_v0  ;;  %v9692_v38 = vadd.f32 %v5760_v46, %v5702_v50  ;;  %v5798_v23 = vmul.f32 3.8918573e-05, %v9688_v36  ;;  %v9697_v17 = vmin.f32 %v5905_v28, 16.0  ;;  %v7613_v0 = vld [vmem:[%s10003_s21 + $0x98] sm:$0xff] }
0x2758   : > { %v5787_v18 = vmul.f32 2.1237322e-06, %v9688_v36  ;;  %v5830_v29 = vadd.f32 0.0036580483, %v5829_v49  ;;  %6088 = vmatpush.bf16.msra.mxu1 %v7613_v0 }
0x2759   : > { %v5842_v34 = vmul.f32 %v5841_v37, %v9668_v25  ;;  %v9701_v59 = vmul.f32 0.70710677, %v9692_v38  ;;  %v5799_v10 = vadd.f32 0.001143296, %v5798_v23  ;;  %v5907_v21 = vmul.f32 2.1237322e-06, %v9697_v17 }
0x275a   : > { %v5918_v47 = vmul.f32 3.8918573e-05, %v9697_v17  ;;  %v5788_v54 = vadd.f32 0.00028619796, %v5787_v18  ;;  %v5831_v24 = vmul.f32 %v5830_v29, %v9668_v25  ;;  %v7619_v37 = vld [vmem:[%s10003_s21 + $0xc8] sm:$0xff] }
0x275b   : > { %v5843_v61 = vadd.f32 0.112945676, %v5842_v34  ;;  %v5865_v41 = vmul.f32 %v9701_v59, %v9701_v59  ;;  %v5800_v27 = vmul.f32 %v5799_v10, %v9688_v36  ;;  %v5908_v62 = vadd.f32 0.00028619796, %v5907_v21  ;;  %v7612_v10 = vld [vmem:[%s10003_s21 + $0x90] sm:$0xff]  ;;  %6104 = vmatpush.bf16.msra.mxu2 %v7619_v37 }
0x275c   : > { %v5919_v32 = vadd.f32 0.001143296, %v5918_v47  ;;  %v5789_v50 = vmul.f32 %v5788_v54, %v9688_v36  ;;  %v5832_v14 = vadd.f32 0.05243302, %v5831_v24  ;;  %6089 = vmatpush.bf16.msra.mxu1 %v7612_v10 }
0x275d   : > { %v5844_v26 = vmul.f32 %v5843_v61, %v9668_v25  ;;  %v9712_v53 = vmin.f32 %v5865_v41, 16.0  ;;  %v5801_v55 = vadd.f32 0.014752088, %v5800_v27  ;;  %v5909_v15 = vmul.f32 %v5908_v62, %v9697_v17  ;;  %v7618_v27 = vld [vmem:[%s10003_s21 + $0xc0] sm:$0xff] }
0x275e   : > { %v5920_v56 = vmul.f32 %v5919_v32, %v9697_v17  ;;  %v5790_v45 = vadd.f32 0.0036580483, %v5789_v50  ;;  %v5833_v23 = vmul.f32 %v5832_v14, %v9668_v25 }
0x275f   : > { %v5845_v8 = vadd.f32 0.4994258, %v5844_v26  ;;  %v5802_v12 = vmul.f32 %v5801_v55, %v9688_v36  ;;  %v5867_v52 = vmul.f32 2.1237322e-06, %v9712_v53  ;;  %v5878_v57 = vmul.f32 3.8918573e-05, %v9712_v53  ;;  %6105 = vmatpush.bf16.msra.mxu2 %v7618_v27 }
0x2760   : > { %v5921_v11 = vadd.f32 0.014752088, %v5920_v56  ;;  %v5910_v4 = vadd.f32 0.0036580483, %v5909_v15  ;;  %v5791_v21 = vmul.f32 %v5790_v45, %v9688_v36  ;;  %v5834_v62 = vadd.f32 0.18741608, %v5833_v23  ;;  %6090 = vmatpush.bf16.msra.mxu1 %v7611_v2 }
0x2761   : > { %v5846_v42 = vmul.f32 %v5845_v8, %v9668_v25  ;;  %v5803_v9 = vadd.f32 0.112945676, %v5802_v12  ;;  %v5879_v6 = vadd.f32 0.001143296, %v5878_v57  ;;  %v5868_v48 = vadd.f32 0.00028619796, %v5867_v52 }
0x2762   : > { %v5922_v31 = vmul.f32 %v5921_v11, %v9697_v17  ;;  %v5911_v34 = vmul.f32 %v5910_v4, %v9697_v17  ;;  %v5792_v55 = vadd.f32 0.05243302, %v5791_v21  ;;  %v5835_v24 = vmul.f32 %v5834_v62, %v9668_v25  ;;  %v7610_v15 = vld [vmem:[%s10003_s21 + $0x80] sm:$0xff] }
0x2763   : > { %v9725_v5 = vadd.f32 1.0, %v5846_v42  ;;  %v5804_v16 = vmul.f32 %v5803_v9, %v9688_v36  ;;  %v5880_v44 = vmul.f32 %v5879_v6, %v9712_v53  ;;  %v5869_v49 = vmul.f32 %v5868_v48, %v9712_v53 }
0x2764   : > { %v5923_v46 = vadd.f32 0.112945676, %v5922_v31  ;;  %v5912_v32 = vadd.f32 0.05243302, %v5911_v34  ;;  %v5793_v50 = vmul.f32 %v5792_v55, %v9688_v36  ;;  %6091 = vmatpush.bf16.msra.mxu1 %v7610_v15  ;;  %v5836_v14 = vadd.f32 1.1283791, %v5835_v24 }
0x2765   : > { %8005 = vrcp.f32 %v9725_v5  ;;  %v5805_v28 = vadd.f32 0.4994258, %v5804_v16  ;;  %v5881_v18 = vadd.f32 0.014752088, %v5880_v44  ;;  %v5870_v26 = vadd.f32 0.0036580483, %v5869_v49 }
0x2766   : > { %v5924_v3 = vmul.f32 %v5923_v46, %v9697_v17  ;;  %v5913_v42 = vmul.f32 %v5912_v32, %v9697_v17  ;;  %v5859_v9 = vand.u32 2147483648, %v9725_v5  ;;  %vm5853_vm14 = vweird.f32 %v9725_v5 }
0x2767   : > { %v5806_v30 = vmul.f32 %v5805_v28, %v9688_v36  ;;  %v5882_v29 = vmul.f32 %v5881_v18, %v9712_v53  ;;  %v5871_v57 = vmul.f32 %v5870_v26, %v9712_v53  ;;  %v5857_v31 = vand.u32 2147483647, %v9725_v5 }
0x2768   : > { %v5925_v41 = vadd.f32 0.4994258, %v5924_v3  ;;  %v5914_v48 = vadd.f32 0.18741608, %v5913_v42  ;;  %v5794_v44 = vadd.f32 0.18741608, %v5793_v50  ;;  %v5837_v34 = vmul.f32 %v5836_v14, %v9664_v43 }
0x2769   : > { %v9741_v61 = vadd.f32 1.0, %v5806_v30  ;;  %v5883_v56 = vadd.f32 0.112945676, %v5882_v29  ;;  %v5872_v25 = vadd.f32 0.05243302, %v5871_v57  ;;  %v5860_v45 = vor.u32 1.1754944e-38, %v5859_v9 }
0x276a   : > { %v5926_v8 = vmul.f32 %v5925_v41, %v9697_v17  ;;  %vm5858_vm1 = vcmp.eq.f32.partialorder %v5857_v31, 8.507059e+37  ;;  %v5795_v3 = vmul.f32 %v5794_v44, %v9688_v36 }
0x276b   : > { %v8006_v47 = vpop.eup %8005  ;;  %8007 = vrcp.f32 %v9741_v61  ;;  %v5884_v51 = vmul.f32 %v5883_v56, %v9712_v53  ;;  %v5873_v37 = vmul.f32 %v5872_v25, %v9712_v53  ;;  %vm5813_vm2 = vweird.f32 %v9741_v61 }
0x276c   : > { %v5849_v13 = vmul.f32 %v8006_v47, %v9725_v5  ;;  %v9749_v52 = vadd.f32 1.0, %v5926_v8  ;;  %vm5854_vm13 = vweird.f32 %v8006_v47  ;;  %v5915_v5 = vmul.f32 %v5914_v48, %v9697_v17 }
0x276d   : > { %v5885_v60 = vadd.f32 0.4994258, %v5884_v51  ;;  %vm5855_vm15 = vmor %vm5853_vm14, %vm5854_vm13  ;;  %v5817_v10 = vand.u32 2147483647, %v9741_v61  ;;  %v5819_v41 = vand.u32 2147483648, %v9741_v61 }
0x276e   : > { %v5850_v54 = vsub.f32 1.0, %v5849_v13  ;;  %8009 = vrcp.f32 %v9749_v52  ;;  %v5939_v29 = vand.u32 2147483648, %v9749_v52  ;;  %v5874_v17 = vadd.f32 0.18741608, %v5873_v37 }
0x276f   : > { %v5886_v0 = vmul.f32 %v5885_v60, %v9712_v53  ;;  %v5916_v27 = vadd.f32 1.1283791, %v5915_v5  ;;  %v5937_v43 = vand.u32 2147483647, %v9749_v52  ;;  %v5796_v36 = vadd.f32 1.1283791, %v5795_v3 }
0x2770   : > { %v5851_v12 = vmul.f32 %v8006_v47, %v5850_v54  ;;  %vm5818_vm8 = vcmp.eq.f32.partialorder %v5817_v10, 8.507059e+37  ;;  %vm5933_vm9 = vweird.f32 %v9749_v52  ;;  %v5820_v55 = vor.u32 1.1754944e-38, %v5819_v41  ;;  %v7808_v10 = vld [vmem:[%s10006_s23 + $0x1] ss:$0 sm:$0xff] }
0x2771   : > { %v8008_v11 = vpop.eup %8007  ;;  %v5887_v30 = vadd.f32 1.0, %v5886_v0  ;;  %v5940_v8 = vor.u32 1.1754944e-38, %v5939_v29  ;;  %v5875_v56 = vmul.f32 %v5874_v17, %v9712_v53  ;;  %vm5938_vm7 = vcmp.eq.f32.partialorder %v5937_v43, 8.507059e+37 }
0x2772   : > { %v5852_v7 = vadd.f32 %v8006_v47, %v5851_v12  ;;  %v5809_v6 = vmul.f32 %v8008_v11, %v9741_v61  ;;  %vm5814_vm3 = vweird.f32 %v8008_v11  ;;  %v5917_v61 = vmul.f32 %v5916_v27, %v9684_v20 }
0x2773   : > { %8011 = vrcp.f32 %v5887_v30  ;;  %vm9775_vm6 = vmor %vm5813_vm2, %vm5814_vm3  ;;  %v5797_v42 = vmul.f32 %v5796_v36, %v9678_v39  ;;  %v5897_v50 = vand.u32 2147483647, %v5887_v30  ;;  %v5899_v9 = vand.u32 2147483648, %v5887_v30 }
0x2774   : > { %v5810_v16 = vsub.f32 1.0, %v5809_v6  ;;  %v5856_v4 = vsel %vm5855_vm15, %v8006_v47, %v5852_v7  ;;  %v8010_v46 = vpop.eup %8009  ;;  %v5778_v53 = vmul.f32 0.5, %v9661_v40  ;;  %v5780_v20 = vmul.f32 0.5, %v9675_v33 }
0x2775   : > { %v5861_v49 = vsel %vm5858_vm1, %v5860_v45, %v5856_v4  ;;  %v5929_v23 = vmul.f32 %v8010_v46, %v9749_v52  ;;  %vm5934_vm5 = vweird.f32 %v8010_v46  ;;  %v5876_v52 = vadd.f32 1.1283791, %v5875_v56  ;;  %v7633_v56 = vld [vmem:[%s10010_s12 + $0x34] sm:$0xf0] }
0x2776   : > { %v5811_v28 = vmul.f32 %v8008_v11, %v5810_v16  ;;  %v5862_v47 = vmul.f32 %v5861_v49, %v5837_v34  ;;  %vm5935_vm10 = vmor %vm5933_vm9, %vm5934_vm5  ;;  %vm5893_vm12 = vweird.f32 %v5887_v30  ;;  %v5900_v14 = vor.u32 1.1754944e-38, %v5899_v9  ;;  %v7628_v9 = vld [vmem:[%s10010_s12 + $0x14] sm:$0xf] }
0x2777   : > { %v5930_v21 = vsub.f32 1.0, %v5929_v23  ;;  %v5877_v39 = vmul.f32 %v5876_v52, %v9701_v59  ;;  %vm5898_vm14 = vcmp.eq.f32.partialorder %v5897_v50, 8.507059e+37  ;;  %v5777_v33 = vmul.f32 0.5, %v9670_v1  ;;  %v7426_v52 = vld [vmem:[%s10010_s12 + $0x10] sm:$0xf] }
0x2778   : > { %v5812_v18 = vadd.f32 %v8008_v11, %v5811_v28  ;;  %v7316_v54 = vclamps-f32 %v5862_v47, 1.0  ;;  %v7629_v50 = vld [vmem:[%s10010_s12 + $0x14] sm:$0xf0] }
0x2779   : > { %v5931_v13 = vmul.f32 %v8010_v46, %v5930_v21  ;;  %v8012_v2 = vpop.eup %8011 }
0x277a   : > { %v5816_v62 = vsel %vm9775_vm6, %v8008_v11, %v5812_v18  ;;  %v5889_v57 = vmul.f32 %v8012_v2, %v5887_v30  ;;  %v5946_v7 = vadd.f32 1.0, %v7316_v54  ;;  %vm5894_vm11 = vweird.f32 %v8012_v2 }
0x277b   : > { %v5932_v32 = vadd.f32 %v8010_v46, %v5931_v13  ;;  %v5821_v51 = vsel %vm5818_vm8, %v5820_v55, %v5816_v62  ;;  %vm5895_vm13 = vmor %vm5893_vm12, %vm5894_vm11  ;;  %v5779_v30 = vmul.f32 0.5, %v9692_v38 }
0x277c   : > { %v5890_v11 = vsub.f32 1.0, %v5889_v57  ;;  %v5822_v6 = vmul.f32 %v5821_v51, %v5797_v42  ;;  %v5950_v48 = vmul.f32 %v5946_v7, %v5778_v53  ;;  %v7444_v57 = vld [vmem:[%s10010_s12 + $0x38] sm:$0xf0]  ;;  %v7630_v42 = vld [vmem:[%s10010_s12 + $0x24] sm:$0xf] }
0x277d   : > { %v5936_v12 = vsel %vm5935_vm10, %v8010_v46, %v5932_v32 }
0x277e   : > { %v5941_v24 = vsel %vm5938_vm7, %v5940_v8, %v5936_v12  ;;  %v5891_v25 = vmul.f32 %v8012_v2, %v5890_v11  ;;  %v7315_v4 = vclamps-f32 %v5822_v6, 1.0  ;;  %v7442_v8 = vld [vmem:[%s10010_s12 + $0x30] sm:$0xf]  ;;  %v7436_v11 = vld [vmem:[%s10010_s12 + $0x28] sm:$0xf0]  ;;  %v7427_v6 = vor.u32 %v7629_v50, %v7426_v52 }
0x277f   : > { %v5942_v15 = vmul.f32 %v5941_v24, %v5917_v61  ;;  %v7632_v61 = vld [vmem:[%s10010_s12 + $0x34] sm:$0xf]  ;;  %v7443_v12 = vor.u32 %v7633_v56, %v7442_v8  ;;  %v7631_v24 = vld [vmem:[%s10010_s12 + $0x24] sm:$0xf0]  ;;  %v7439_v7 = vor.u32 %v7630_v42, %v7436_v11 }
0x2780   : > { %v5892_v16 = vadd.f32 %v8012_v2, %v5891_v25  ;;  %v5945_v37 = vadd.f32 1.0, %v7315_v4  ;;  %v7447_v51 = vor.u32 %v7632_v61, %v7444_v57  ;;  %v7420_v4 = vld [vmem:[%s10010_s12 + $0x8] sm:$0xf0] }
0x2781   : > { %v7318_v31 = vclamps-f32 %v5942_v15, 1.0  ;;  %6239 = vmatpush.bf16.msrb.mxu3 %v7443_v12 }
0x2782   : > { %v5896_v0 = vsel %vm5895_vm13, %v8012_v2, %v5892_v16  ;;  %v5949_v5 = vmul.f32 %v5945_v37, %v5777_v33  ;;  %6253 = vmatpush.bf16.msrb.mxu0 %v7447_v51  ;;  %v7627_v16 = vld [vmem:[%s10010_s12 + $0x4] sm:$0xf0] }
0x2783   : > { %v5948_v60 = vadd.f32 1.0, %v7318_v31  ;;  %v5901_v45 = vsel %vm5898_vm14, %v5900_v14, %v5896_v0  ;;  %v7428_v31 = vld [vmem:[%s10010_s12 + $0x18] sm:$0xf0] }
0x2784   : > { %v5902_v46 = vmul.f32 %v5901_v45, %v5877_v39  ;;  %v7431_v53 = vor.u32 %v7628_v9, %v7428_v31 }
0x2785   : > { %v5952_v44 = vmul.f32 %v5948_v60, %v5780_v20  ;;  %v7418_v60 = vld [vmem:[%s10010_s12] sm:$0xf] }
0x2786   : > { %v7317_v40 = vclamps-f32 %v5902_v46, 1.0  ;;  %6254 = vmatpush.bf16.msrb.mxu0 %v7439_v7  ;;  %v7419_v14 = vor.u32 %v7627_v16, %v7418_v60 }
0x2787   : > { %v5987_v28 = vpack.c.bf16 %v5952_v44, %v5950_v48  ;;  %v7626_v48 = vld [vmem:[%s10010_s12 + $0x4] sm:$0xf] }
0x2788   : > { %v5947_v49 = vadd.f32 1.0, %v7317_v40  ;;  %v7423_v44 = vor.u32 %v7626_v48, %v7420_v4 }
0x2789   : > { %6106 = vmatmul.bf16.vlgmr.msra.gmra.mxu2 %v5987_v28 }
0x278a   : > { %v5951_v59 = vmul.f32 %v5947_v49, %v5779_v30  ;;  %6255 = vmatpush.bf16.msrb.mxu0 %v7431_v53 }
0x278c   : > { %v5986_v23 = vpack.c.bf16 %v5951_v59, %v5949_v5 }
0x278e   : > { %6092 = vmatmul.bf16.vlgmr.msra.gmra.mxu1 %v5986_v23  ;;  %6256 = vmatpush.bf16.msrb.mxu0 %v7423_v44 }
0x280b   : > { %v6093_v3 = vpop.f32.mrf.mxu1 }
0x280c   : > { %v6107_v34 = vpop.f32.mrf.mxu2 }
0x280d   : > { %v6108_v18 = vadd.f32 %v6107_v34, %v6093_v3 }
0x280f   : > { %v6112_v21 = vadd.f32 %v6108_v18, %v9613_v22 }
0x2811   : > { %v6119_v47 = vadd.f32 %v7808_v10, %v6112_v21 }
0x2813   : > { %v6123_v29 = vsel %vm1625_vm0, %v6119_v47, 0.0  ;;  %v6095_v17 = vpop.f32.mrf.mxu1 }
0x2814   : > { %v6109_v41 = vpop.f32.mrf.mxu2  ;;  %6124 = vadd.xlane.f32.xlu2 %v6123_v29  ;;  %v7810_v29 = vld [vmem:[#allocation4] ss:$0 sm:$0xff] }
0x2815   : > { %v6110_v1 = vadd.f32 %v6109_v41, %v6095_v17 }
0x2817   : > { %v6113_v38 = vadd.f32 %v6110_v1, %v9618_v19 }
0x2819   : > { %v6120_v27 = vadd.f32 %v7808_v10, %v6113_v38  ;;  %v7809_v10 = vld [vmem:[#allocation2] ss:$0 sm:$0xff] }
0x281b   : > { %v6126_v13 = vsel %vm1625_vm0, %v6120_v27, 0.0 }
0x281c   : > { %6127 = vadd.xlane.f32.xlu1 %v6126_v13 }
0x2835   : > { %6271 = vrot.lane.b32.xlu1 %v9150_v63, %s10009_s13 }
0x2887   : > { %v6125_v43 = vpop.xlane.xlu2 %6124 }
0x2888   : > { %v6129_v22 = vmul.f32 %v6125_v43, %v8497_v35 }
0x288a   : > { %v9798_v36 = vsub.f32 %v6119_v47, %v6129_v22  ;;  %v6186_v22 = vld [vmem:[%s10011_s1] sm:$0x3] }
0x288c   : > { %v6133_v19 = vmul.f32 %v9798_v36, %v9798_v36 }
0x288e   : > { %v6135_v26 = vsel %vm1625_vm0, %v6133_v19, 0.0 }
0x288f   : > { %6136 = vadd.xlane.f32.xlu0 %v6135_v26  ;;  %v6128_v62 = vpop.xlane.xlu1 %6127 }
0x2890   : > { %v6130_v32 = vmul.f32 %v6128_v62, %v8497_v35  ;;  %v6188_v62 = vperm.slane %v6186_v22, 0 }
0x2892   : > { %v9804_v2 = vsub.f32 %v6120_v27, %v6130_v32 }
0x2894   : > { %v6134_v63 = vmul.f32 %v9804_v2, %v9804_v2 }
0x2896   : > { %v6138_v54 = vsel %vm1625_vm0, %v6134_v63, 0.0 }
0x2897   : > { %6139 = vadd.xlane.f32.xlu2 %v6138_v54 }
0x28a3   : > { %6273 = vrot.lane.b32.xlu0 %v9154_v58, %s10009_s13  ;;  %v7434_v58 = vld [vmem:[%s10010_s12 + $0x20] sm:$0xf] }
0x28a4   : > { %v7435_v15 = vor.u32 %v7631_v24, %v7434_v58 }
0x28a6   : > { %6240 = vmatpush.bf16.msrb.mxu3 %v7435_v15 }
0x28a7   : > { %v6272_v55 = vpop.permute.xlu1 %6271 }
0x28a8   : > { %6277 = vst.msk [vmem:[%s9813_s0] sm:$0xff] %vm3957_vm4, %v6272_v55 }
0x28aa   : > { %6241 = vmatpush.bf16.msrb.mxu3 %v7427_v6 }
0x28ae   : > { %6242 = vmatpush.bf16.msrb.mxu3 %v7419_v14 }
0x2902   : > { %v6137_v25 = vpop.xlane.xlu0 %6136 }
0x2903   : > { %v6141_v20 = vmul.f32 %v6137_v25, %v8497_v35 }
0x2905   : > { %v6143_v39 = vadd.f32 1e-06, %v6141_v20 }
0x2907   : > { %8013 = vrsqrt.f32 %v6143_v39  ;;  %vm6151_vm1 = vweird.f32 %v6143_v39 }
0x290a   : > { %v6140_v0 = vpop.xlane.xlu2 %6139 }
0x290b   : > { %v6142_v45 = vmul.f32 %v6140_v0, %v8497_v35 }
0x290d   : > { %v8014_v28 = vpop.eup %8013  ;;  %v6144_v46 = vadd.f32 1e-06, %v6142_v45 }
0x290e   : > { %v6146_v37 = vmul.f32 %v8014_v28, %v6143_v39  ;;  %vm6152_vm15 = vweird.f32 %v8014_v28 }
0x290f   : > { %8015 = vrsqrt.f32 %v6144_v46  ;;  %vm6153_vm2 = vmor %vm6151_vm1, %vm6152_vm15  ;;  %vm6161_vm5 = vweird.f32 %v6144_v46 }
0x2910   : > { %v6147_v40 = vmul.f32 %v8014_v28, %v6146_v37 }
0x2912   : > { %v6148_v33 = vmul.f32 0.5, %v6147_v40 }
0x2914   : > { %v6149_v30 = vsub.f32 1.5, %v6148_v33 }
0x2915   : > { %v8016_v49 = vpop.eup %8015  ;;  %v6274_v5 = vpop.permute.xlu0 %6273 }
0x2916   : > { %v6150_v59 = vmul.f32 %v8014_v28, %v6149_v30  ;;  %v6156_v23 = vmul.f32 %v8016_v49, %v6144_v46  ;;  %6278 = vst.msk [vmem:[%s9813_s0 + $0x8] sm:$0xff] %vm3957_vm4, %v6274_v5  ;;  %vm6162_vm3 = vweird.f32 %v8016_v49 }
0x2917   : > { %vm6163_vm6 = vmor %vm6161_vm5, %vm6162_vm3 }
0x2918   : > { %v6157_v34 = vmul.f32 %v8016_v49, %v6156_v23  ;;  %v6154_v3 = vsel %vm6153_vm2, %v8014_v28, %v6150_v59 }
0x2919   : > { %v6165_v21 = vmul.f32 %v6154_v3, %v9798_v36  ;;  %v6189_v36 = vperm.slane %v6186_v22, 1 }
0x291a   : > { %v6158_v18 = vmul.f32 0.5, %v6157_v34 }
0x291b   : > { %v6170_v17 = vmul.f32 %v7809_v10, %v6165_v21 }
0x291c   : > { %v6159_v35 = vsub.f32 1.5, %v6158_v18 }
0x291d   : > { %v6175_v27 = vadd.f32 %v7810_v29, %v6170_v17 }
0x291e   : > { %v6160_v47 = vmul.f32 %v8016_v49, %v6159_v35 }
0x2920   : > { %v6164_v41 = vsel %vm6163_vm6, %v8016_v49, %v6160_v47 }
0x2921   : > { %v6166_v1 = vmul.f32 %v6164_v41, %v9804_v2 }
0x2923   : > { %v6171_v38 = vmul.f32 %v7809_v10, %v6166_v1 }
0x2925   : > { %v6176_v13 = vadd.f32 %v7810_v29, %v6171_v38 }
0x2927   : > { %v6185_v43 = vpack.c.bf16 %v6176_v13, %v6175_v27 }
0x2929   : > { %7448 = vmatmul.msk.bf16.vlgmr.msrb.gmra.mxu3 %vm1625_vm0, %v6185_v43  ;;  %7449 = vmatmul.msk.bf16.vlgmr.msrb.gmra.mxu0 %vm1625_vm0, %v6185_v43 }
0x29a6   : > { %v6258_v19 = vpop.f32.mrf.mxu0 }
0x29a7   : > { %v6259_v26 = vadd.f32 %v6258_v19, %v6189_v36 }
0x29a9   : > { %6264 = vst.msk [vmem:[%s1478_s10 + $0x8] sm:$0xff] %vm1625_vm0, %v6259_v26 }
0x29ac   : > { %v6244_v32 = vpop.f32.mrf.mxu3 }
0x29ad   : > { %v6245_v63 = vadd.f32 %v6244_v32, %v6188_v62 }
0x29ae   : > { %v6260_v2 = vpop.f32.mrf.mxu0 }
0x29af   : > { %6263 = vst [vmem:[%s1478_s10] sm:$0xff] %v6245_v63  ;;  %v6261_v54 = vadd.f32 %v6260_v2, %v6189_v36 }
0x29b1   : > { %6266 = vst.msk [vmem:[%s1478_s10 + $0x18] sm:$0xff] %vm1625_vm0, %v6261_v54 }
0x29b4   : > { %v6246_v55 = vpop.f32.mrf.mxu3 }
0x29b5   : > { %v6247_v8 = vadd.f32 %v6246_v55, %v6188_v62 }
0x29b7   : > { %6265 = vst [vmem:[%s1478_s10 + $0x10] sm:$0xff] %v6247_v8 }
0x29b8 PF: > { %s10013_s22 = sld [smem:[#allocation50_spill]] }
0x29be   : > { %s108_s22 = sadd.s32 1, %s10013_s22  }
0x29bf   : > { %p105_p2 = scmp.ge.s32.totalorder %s108_s22, 4  }
0x29c1   :  { %107 = sbr.rel (!%p105_p2) target bundleno = 110 (0x6e), region = 345 }
0x29c6   :  { %6350 = vsyncpa [#allocation3], 1 }
0x29c7   :  { %6352 = vsyncpa [#allocation3 + $0x1], 1 }
0x29c8   :  { %6353 = vsyncpa [#allocation5], 1 }

</bundles_post_ra>
